<compile_context>
chip_gen: v7x
topology: tpu7x:2x2x1
jax: 0.10.0
libtpu: 0.0.40
codegen_flags: <defaults>
</compile_context>

<pallas_src>
import jax
import jax.numpy as jnp
from jax import lax
from jax.experimental import pallas as pl
from jax.experimental.pallas import tpu as pltpu

N_INPUTS = 11
N_NEURONS = 256
N_OUTPUTS = 3
I_PAD = 16  # n_inputs padded to a sublane-aligned contraction size (zero-padded, exact)


def lstm_fused_kernel(x_ref, wih_ref, b_ref, whh_ref, wfc_ref, bfc_ref,
                      out_ref, xw_ref, h_ref, c_ref):
    """Fused input projection + LSTM recurrence + final Linear for one batch block.

    x_ref   : (T, Bb, I_PAD)  time-major input, K zero-padded to 16 (f32)
    wih_ref : (I_PAD, 4H)     W_ih^T, gate-permuted [g,i,f,o], zero-padded rows (f32)
    b_ref   : (1, 4H)         b_ih + b_hh, gate-permuted (f32)
    whh_ref : (H, 4H)         W_hh^T, gate-permuted (bf16 or f32)
    wfc_ref : (H, O)          W_fc^T (f32)
    bfc_ref : (1, O)          b_fc (f32)
    out_ref : (Bb, O)         logits for this batch block
    xw_ref  : (T, Bb, 4H)     f32 VMEM scratch, precomputed input projections
    h_ref, c_ref : (Bb, H)    f32 VMEM scratch, recurrent state
    """
    T, Bb, IP = x_ref.shape
    H = N_NEURONS

    # --- Input projection for all T steps at once (single MXU matmul, off the
    # serial h-recurrence; fused in-kernel, no HBM round trip for xw). ---
    x_flat = x_ref[...].reshape(T * Bb, IP)
    xw = jnp.dot(x_flat, wih_ref[...], preferred_element_type=jnp.float32)
    xw_ref[...] = xw.reshape(T, Bb, 4 * H) + b_ref[...]

    h_ref[...] = jnp.zeros_like(h_ref)
    c_ref[...] = jnp.zeros_like(c_ref)

    # TODO(synk): replace jnp.dot below with explicit MXU weight residency
    # (pltpu.matmul_push_rhs once before the loop, matmul_acc_lhs/matmul_pop per step)
    # once per-chip staging-register tiling is in place.
    def step(t, carry):
        # Only the recurrent matmul sits on the serial dependency chain.
        gates = xw_ref[t] + jnp.dot(
            h_ref[...].astype(whh_ref.dtype), whh_ref[...],
            preferred_element_type=jnp.float32)                 # (Bb, 4H) f32
        # Gate blocks were permuted wrapper-side to [g, i, f, o]; each slice is
        # 256-wide (lane aligned).  g first -> tanh(g) EUP push starts on the first
        # MRF pop; o last -> its sigmoid hides under the c_new chain.
        g_g = jnp.tanh(gates[:, 0 * H:1 * H])
        i_g = jax.nn.sigmoid(gates[:, 1 * H:2 * H])
        f_g = jax.nn.sigmoid(gates[:, 2 * H:3 * H])
        o_g = jax.nn.sigmoid(gates[:, 3 * H:4 * H])
        c_new = f_g * c_ref[...] + i_g * g_g
        c_ref[...] = c_new
        h_ref[...] = o_g * jnp.tanh(c_new)
        return carry

    # T is static and small: full unroll for cross-iteration LLO scheduling.
    # (Switch to partial unroll of 2-4 if T grows beyond ~32-64.)
    lax.fori_loop(0, T, step, 0, unroll=True)

    # FC epilogue on the last hidden state (runs once; O=3 masked store is negligible).
    out_ref[...] = (jnp.dot(h_ref[...], wfc_ref[...],
                            preferred_element_type=jnp.float32)
                    + bfc_ref[...])


def _permute_gates(w):
    """Reorder PyTorch's [i, f, g, o] gate blocks (axis 0) to [g, i, f, o]."""
    H = N_NEURONS
    return jnp.concatenate(
        [w[2 * H:3 * H], w[0 * H:1 * H], w[1 * H:2 * H], w[3 * H:4 * H]], axis=0)


def prepare_params(params, *, use_bf16_weights=True):
    """One-time weight prep: gate permutation, K padding, transpose, dtype cast."""
    H, O = N_NEURONS, N_OUTPUTS
    wih = _permute_gates(params["w_ih"])                       # (4H, I)
    whh = _permute_gates(params["w_hh"])                       # (4H, H)
    b = _permute_gates(params["b_ih"] + params["b_hh"])        # (4H,)
    wih_t = jnp.pad(wih.T, ((0, I_PAD - N_INPUTS), (0, 0)))    # (I_PAD, 4H), exact zeros
    whh_t = whh.T                                              # (H, 4H)
    if use_bf16_weights:
        # bf16 only for the MXU operand; accumulation and gate math stay f32.
        whh_t = whh_t.astype(jnp.bfloat16)
    return {
        "wih_t": wih_t,
        "b": b.reshape(1, 4 * H),
        "whh_t": whh_t,
        "wfc_t": params["w_fc"].T,                             # (H, O)
        "bfc": params["b_fc"].reshape(1, O),                   # (1, O)
    }


def lstm_model_forward(x, prepped):
    """x: (B, T, n_inputs) float32 -> (B, n_outputs) float32."""
    B, T, I = x.shape
    assert I == N_INPUTS
    H, O = N_NEURONS, N_OUTPUTS

    # Batch block: shards across TensorCores (v7x) via the "parallel" grid axis.
    B_BLK = B if B <= 128 else 128
    assert B % B_BLK == 0
    n_blk = B // B_BLK

    # Tiny per-call prep: time-major + zero-pad K 11 -> 16 (exact; padded rows of
    # W_ih^T are zero so the padded matmul equals the unpadded one bit-wise).
    x_tm = jnp.pad(jnp.transpose(x.astype(jnp.float32), (1, 0, 2)),
                   ((0, 0), (0, 0), (0, I_PAD - I)))            # (T, B, I_PAD)

    out = pl.pallas_call(
        lstm_fused_kernel,
        out_shape=jax.ShapeDtypeStruct((B, O), jnp.float32),
        grid=(n_blk,),
        in_specs=[
            pl.BlockSpec((T, B_BLK, I_PAD), lambda i: (0, i, 0)),
            pl.BlockSpec((I_PAD, 4 * H), lambda i: (0, 0)),
            pl.BlockSpec((1, 4 * H), lambda i: (0, 0)),
            pl.BlockSpec((H, 4 * H), lambda i: (0, 0)),
            pl.BlockSpec((H, O), lambda i: (0, 0)),
            pl.BlockSpec((1, O), lambda i: (0, 0)),
        ],
        out_specs=pl.BlockSpec((B_BLK, O), lambda i: (i, 0)),
        scratch_shapes=[
            pltpu.VMEM((T, B_BLK, 4 * H), jnp.float32),   # xw (input projections)
            pltpu.VMEM((B_BLK, H), jnp.float32),          # h
            pltpu.VMEM((B_BLK, H), jnp.float32),          # c
        ],
        compiler_params=pltpu.CompilerParams(
            dimension_semantics=("parallel",)),
    )(x_tm, prepped["wih_t"], prepped["b"], prepped["whh_t"],
      prepped["wfc_t"], prepped["bfc"])
    return out


def lstm_model_reference(x, params):
    """Pure-JAX reference matching PyTorch nn.LSTM + nn.Linear semantics (f32)."""
    B, T, I = x.shape
    H = N_NEURONS
    wih, whh = params["w_ih"], params["w_hh"]          # (4H, I), (4H, H)
    b = params["b_ih"] + params["b_hh"]                # (4H,)

    def step(carry, x_t):
        h, c = carry
        gates = x_t @ wih.T + h @ whh.T + b
        i_g = jax.nn.sigmoid(gates[:, 0 * H:1 * H])
        f_g = jax.nn.sigmoid(gates[:, 1 * H:2 * H])
        g_g = jnp.tanh(gates[:, 2 * H:3 * H])
        o_g = jax.nn.sigmoid(gates[:, 3 * H:4 * H])
        c = f_g * c + i_g * g_g
        h = o_g * jnp.tanh(c)
        return (h, c), None

    h0 = jnp.zeros((B, H), jnp.float32)
    c0 = jnp.zeros((B, H), jnp.float32)
    (h_last, _), _ = lax.scan(step, (h0, c0), jnp.transpose(x, (1, 0, 2)))
    return h_last @ params["w_fc"].T + params["b_fc"]


def init_params(key):
    """Deterministic init mimicking PyTorch's U(-1/sqrt(H), 1/sqrt(H))."""
    H, I, O = N_NEURONS, N_INPUTS, N_OUTPUTS
    k = 1.0 / jnp.sqrt(jnp.float32(H))
    keys = jax.random.split(key, 6)
    u = lambda kk, shape: jax.random.uniform(kk, shape, jnp.float32, -k, k)
    return {
        "w_ih": u(keys[0], (4 * H, I)),
        "w_hh": u(keys[1], (4 * H, H)),
        "b_ih": u(keys[2], (4 * H,)),
        "b_hh": u(keys[3], (4 * H,)),
        "w_fc": u(keys[4], (O, H)),
        "b_fc": u(keys[5], (O,)),
    }


if __name__ == "__main__":
    key = jax.random.PRNGKey(0)
    k_param, k_x = jax.random.split(key)

    params = init_params(k_param)

    # B raised to the 8-sublane width per perf review (kernel is latency-bound;
    # throughput scales almost linearly with B).
    B, T = 8, 8
    x = jax.random.normal(k_x, (B, T, N_INPUTS), jnp.float32)

    ref = jax.block_until_ready(lstm_model_reference(x, params))

    fwd = jax.jit(lstm_model_forward)

    # f32 recurrent-weights path: tight check of kernel semantics
    # (gate permutation + K padding are numerically exact transformations).
    prepped_f32 = prepare_params(params, use_bf16_weights=False)
    out_f32 = jax.block_until_ready(fwd(x, prepped_f32))
    assert out_f32.shape == (B, N_OUTPUTS)
    assert jnp.allclose(out_f32, ref, atol=5e-4, rtol=5e-4), (
        f"f32 mismatch: max abs diff {jnp.max(jnp.abs(out_f32 - ref))}")

    # bf16 recurrent-weights path (the fast path on v6e/v7x): relaxed tolerance.
    prepped_bf16 = prepare_params(params, use_bf16_weights=True)
    out_bf16 = jax.block_until_ready(fwd(x, prepped_bf16))
    assert out_bf16.shape == (B, N_OUTPUTS)
    assert jnp.allclose(out_bf16, ref, atol=2e-2, rtol=2e-2), (
        f"bf16 mismatch: max abs diff {jnp.max(jnp.abs(out_bf16 - ref))}")

    print("KERNEL_OK")
</pallas_src>

<mosaic_0001>
module attributes {stable_mosaic.version = 11 : i64} {
  func.func @lstm_fused_kernel(%arg0: i32, %arg1: memref<8x8x16xf32, #tpu.memory_space<vmem>>, %arg2: memref<16x1024xf32, #tpu.memory_space<vmem>>, %arg3: memref<1x1024xf32, #tpu.memory_space<vmem>>, %arg4: memref<256x1024xf32, #tpu.memory_space<vmem>>, %arg5: memref<256x3xf32, #tpu.memory_space<vmem>>, %arg6: memref<1x3xf32, #tpu.memory_space<vmem>>, %arg7: memref<8x3xf32, #tpu.memory_space<vmem>>, %arg8: memref<8x8x1024xf32, #tpu.memory_space<vmem>>, %arg9: memref<8x256xf32, #tpu.memory_space<vmem>>, %arg10: memref<8x256xf32, #tpu.memory_space<vmem>>) attributes {dimension_semantics = [#tpu.dimension_semantics<parallel>], iteration_bounds = array<i64: 1>, scalar_prefetch = 0 : i64, scratch_operands = 3 : i64, tpu.core_type = #tpu.core_type<tc>, window_params = [{transform_indices = @transform_0, window_bounds = array<i64: 8, 8, 16>}, {pipeline_mode = #tpu.pipeline_mode<synchronous>, transform_indices = @transform_1, window_bounds = array<i64: 16, 1024>}, {pipeline_mode = #tpu.pipeline_mode<synchronous>, transform_indices = @transform_2, window_bounds = array<i64: 1, 1024>}, {pipeline_mode = #tpu.pipeline_mode<synchronous>, transform_indices = @transform_3, window_bounds = array<i64: 256, 1024>}, {pipeline_mode = #tpu.pipeline_mode<synchronous>, transform_indices = @transform_4, window_bounds = array<i64: 256, 3>}, {pipeline_mode = #tpu.pipeline_mode<synchronous>, transform_indices = @transform_5, window_bounds = array<i64: 1, 3>}, {transform_indices = @transform_6, window_bounds = array<i64: 8, 3>}]} {
    %c0 = arith.constant 0 : index
    %c0_0 = arith.constant 0 : index
    %c0_1 = arith.constant 0 : index
    %0 = vector.load %arg1[%c0, %c0_0, %c0_1] : memref<8x8x16xf32, #tpu.memory_space<vmem>>, vector<8x8x16xf32>
    %1 = vector.shape_cast %0 : vector<8x8x16xf32> to vector<64x16xf32>
    %c0_2 = arith.constant 0 : index
    %c0_3 = arith.constant 0 : index
    %2 = vector.load %arg2[%c0_2, %c0_3] : memref<16x1024xf32, #tpu.memory_space<vmem>>, vector<16x1024xf32>
    %cst = arith.constant dense<0.000000e+00> : vector<64x1024xf32>
    %3 = tpu.matmul %1, %2, %cst {dimension_numbers = #tpu.dot_dimension_numbers<[1], [0], [0], [1], [0, 0, 1, 1], [], []>} : vector<64x16xf32>, vector<16x1024xf32>, vector<64x1024xf32> -> vector<64x1024xf32>
    %4 = vector.shape_cast %3 : vector<64x1024xf32> to vector<8x8x1024xf32>
    %c0_4 = arith.constant 0 : index
    %c0_5 = arith.constant 0 : index
    %5 = vector.load %arg3[%c0_4, %c0_5] : memref<1x1024xf32, #tpu.memory_space<vmem>>, vector<1x1024xf32>
    %6 = vector.shape_cast %5 : vector<1x1024xf32> to vector<1x1x1024xf32>
    %7 = vector.broadcast %6 : vector<1x1x1024xf32> to vector<8x8x1024xf32>
    %8 = arith.addf %4, %7 : vector<8x8x1024xf32>
    %c0_6 = arith.constant 0 : index
    %c0_7 = arith.constant 0 : index
    %c0_8 = arith.constant 0 : index
    %9 = vector.load %arg8[%c0_6, %c0_7, %c0_8] : memref<8x8x1024xf32, #tpu.memory_space<vmem>>, vector<8x8x1024xf32>
    tpu.vector_store %arg8[%c0_6, %c0_7, %c0_8], %8 {strides = array<i32>} : memref<8x8x1024xf32, #tpu.memory_space<vmem>>, vector<8x8x1024xf32>,
    %cst_9 = arith.constant 0.000000e+00 : f32
    %10 = vector.broadcast %cst_9 : f32 to vector<8x256xf32>
    %c0_10 = arith.constant 0 : index
    %c0_11 = arith.constant 0 : index
    %11 = vector.load %arg9[%c0_10, %c0_11] : memref<8x256xf32, #tpu.memory_space<vmem>>, vector<8x256xf32>
    tpu.vector_store %arg9[%c0_10, %c0_11], %10 {strides = array<i32>} : memref<8x256xf32, #tpu.memory_space<vmem>>, vector<8x256xf32>,
    %cst_12 = arith.constant 0.000000e+00 : f32
    %12 = vector.broadcast %cst_12 : f32 to vector<8x256xf32>
    %c0_13 = arith.constant 0 : index
    %c0_14 = arith.constant 0 : index
    %13 = vector.load %arg10[%c0_13, %c0_14] : memref<8x256xf32, #tpu.memory_space<vmem>>, vector<8x256xf32>
    tpu.vector_store %arg10[%c0_13, %c0_14], %12 {strides = array<i32>} : memref<8x256xf32, #tpu.memory_space<vmem>>, vector<8x256xf32>,
    %c0_i32 = arith.constant 0 : i32
    %14 = arith.index_cast %c0_i32 : i32 to index
    %c0_15 = arith.constant 0 : index
    %c0_16 = arith.constant 0 : index
    %15 = vector.load %arg8[%14, %c0_15, %c0_16] : memref<8x8x1024xf32, #tpu.memory_space<vmem>>, vector<1x8x1024xf32>
    %16 = vector.shape_cast %15 : vector<1x8x1024xf32> to vector<8x1024xf32>
    %c0_17 = arith.constant 0 : index
    %c0_18 = arith.constant 0 : index
    %17 = vector.load %arg9[%c0_17, %c0_18] : memref<8x256xf32, #tpu.memory_space<vmem>>, vector<8x256xf32>
    %c0_19 = arith.constant 0 : index
    %c0_20 = arith.constant 0 : index
    %18 = vector.load %arg4[%c0_19, %c0_20] : memref<256x1024xf32, #tpu.memory_space<vmem>>, vector<256x1024xf32>
    %cst_21 = arith.constant dense<0.000000e+00> : vector<8x1024xf32>
    %19 = tpu.matmul %17, %18, %cst_21 {dimension_numbers = #tpu.dot_dimension_numbers<[1], [0], [0], [1], [0, 0, 1, 1], [], []>} : vector<8x256xf32>, vector<256x1024xf32>, vector<8x1024xf32> -> vector<8x1024xf32>
    %20 = arith.addf %16, %19 : vector<8x1024xf32>
    %21 = vector.extract_strided_slice %20 {offsets = [0, 0], sizes = [8, 256], strides = [1, 1]} : vector<8x1024xf32> to vector<8x256xf32>
    %22 = math.tanh %21 : vector<8x256xf32>
    %23 = vector.extract_strided_slice %20 {offsets = [0, 256], sizes = [8, 256], strides = [1, 1]} : vector<8x1024xf32> to vector<8x256xf32>
    %24 = arith.negf %23 : vector<8x256xf32>
    %25 = math.exp %24 : vector<8x256xf32>
    %cst_22 = arith.constant 1.000000e+00 : f32
    %26 = vector.broadcast %cst_22 : f32 to vector<8x256xf32>
    %27 = arith.addf %26, %25 : vector<8x256xf32>
    %28 = arith.divf %26, %27 : vector<8x256xf32>
    %29 = vector.extract_strided_slice %20 {offsets = [0, 512], sizes = [8, 256], strides = [1, 1]} : vector<8x1024xf32> to vector<8x256xf32>
    %30 = arith.negf %29 : vector<8x256xf32>
    %31 = math.exp %30 : vector<8x256xf32>
    %cst_23 = arith.constant 1.000000e+00 : f32
    %32 = vector.broadcast %cst_23 : f32 to vector<8x256xf32>
    %33 = arith.addf %32, %31 : vector<8x256xf32>
    %34 = arith.divf %32, %33 : vector<8x256xf32>
    %35 = vector.extract_strided_slice %20 {offsets = [0, 768], sizes = [8, 256], strides = [1, 1]} : vector<8x1024xf32> to vector<8x256xf32>
    %36 = arith.negf %35 : vector<8x256xf32>
    %37 = math.exp %36 : vector<8x256xf32>
    %cst_24 = arith.constant 1.000000e+00 : f32
    %38 = vector.broadcast %cst_24 : f32 to vector<8x256xf32>
    %39 = arith.addf %38, %37 : vector<8x256xf32>
    %40 = arith.divf %38, %39 : vector<8x256xf32>
    %c0_25 = arith.constant 0 : index
    %c0_26 = arith.constant 0 : index
    %41 = vector.load %arg10[%c0_25, %c0_26] : memref<8x256xf32, #tpu.memory_space<vmem>>, vector<8x256xf32>
    %42 = arith.mulf %34, %41 : vector<8x256xf32>
    %43 = arith.mulf %28, %22 : vector<8x256xf32>
    %44 = arith.addf %42, %43 : vector<8x256xf32>
    %c0_27 = arith.constant 0 : index
    %c0_28 = arith.constant 0 : index
    %45 = vector.load %arg10[%c0_27, %c0_28] : memref<8x256xf32, #tpu.memory_space<vmem>>, vector<8x256xf32>
    tpu.vector_store %arg10[%c0_27, %c0_28], %44 {strides = array<i32>} : memref<8x256xf32, #tpu.memory_space<vmem>>, vector<8x256xf32>,
    %46 = math.tanh %44 : vector<8x256xf32>
    %47 = arith.mulf %40, %46 : vector<8x256xf32>
    %c0_29 = arith.constant 0 : index
    %c0_30 = arith.constant 0 : index
    %48 = vector.load %arg9[%c0_29, %c0_30] : memref<8x256xf32, #tpu.memory_space<vmem>>, vector<8x256xf32>
    tpu.vector_store %arg9[%c0_29, %c0_30], %47 {strides = array<i32>} : memref<8x256xf32, #tpu.memory_space<vmem>>, vector<8x256xf32>,
    %c1_i32 = arith.constant 1 : i32
    %49 = arith.index_cast %c1_i32 : i32 to index
    %c0_31 = arith.constant 0 : index
    %c0_32 = arith.constant 0 : index
    %50 = vector.load %arg8[%49, %c0_31, %c0_32] : memref<8x8x1024xf32, #tpu.memory_space<vmem>>, vector<1x8x1024xf32>
    %51 = vector.shape_cast %50 : vector<1x8x1024xf32> to vector<8x1024xf32>
    %c0_33 = arith.constant 0 : index
    %c0_34 = arith.constant 0 : index
    %52 = vector.load %arg9[%c0_33, %c0_34] : memref<8x256xf32, #tpu.memory_space<vmem>>, vector<8x256xf32>
    %c0_35 = arith.constant 0 : index
    %c0_36 = arith.constant 0 : index
    %53 = vector.load %arg4[%c0_35, %c0_36] : memref<256x1024xf32, #tpu.memory_space<vmem>>, vector<256x1024xf32>
    %cst_37 = arith.constant dense<0.000000e+00> : vector<8x1024xf32>
    %54 = tpu.matmul %52, %53, %cst_37 {dimension_numbers = #tpu.dot_dimension_numbers<[1], [0], [0], [1], [0, 0, 1, 1], [], []>} : vector<8x256xf32>, vector<256x1024xf32>, vector<8x1024xf32> -> vector<8x1024xf32>
    %55 = arith.addf %51, %54 : vector<8x1024xf32>
    %56 = vector.extract_strided_slice %55 {offsets = [0, 0], sizes = [8, 256], strides = [1, 1]} : vector<8x1024xf32> to vector<8x256xf32>
    %57 = math.tanh %56 : vector<8x256xf32>
    %58 = vector.extract_strided_slice %55 {offsets = [0, 256], sizes = [8, 256], strides = [1, 1]} : vector<8x1024xf32> to vector<8x256xf32>
    %59 = arith.negf %58 : vector<8x256xf32>
    %60 = math.exp %59 : vector<8x256xf32>
    %cst_38 = arith.constant 1.000000e+00 : f32
    %61 = vector.broadcast %cst_38 : f32 to vector<8x256xf32>
    %62 = arith.addf %61, %60 : vector<8x256xf32>
    %63 = arith.divf %61, %62 : vector<8x256xf32>
    %64 = vector.extract_strided_slice %55 {offsets = [0, 512], sizes = [8, 256], strides = [1, 1]} : vector<8x1024xf32> to vector<8x256xf32>
    %65 = arith.negf %64 : vector<8x256xf32>
    %66 = math.exp %65 : vector<8x256xf32>
    %cst_39 = arith.constant 1.000000e+00 : f32
    %67 = vector.broadcast %cst_39 : f32 to vector<8x256xf32>
    %68 = arith.addf %67, %66 : vector<8x256xf32>
    %69 = arith.divf %67, %68 : vector<8x256xf32>
    %70 = vector.extract_strided_slice %55 {offsets = [0, 768], sizes = [8, 256], strides = [1, 1]} : vector<8x1024xf32> to vector<8x256xf32>
    %71 = arith.negf %70 : vector<8x256xf32>
    %72 = math.exp %71 : vector<8x256xf32>
    %cst_40 = arith.constant 1.000000e+00 : f32
    %73 = vector.broadcast %cst_40 : f32 to vector<8x256xf32>
    %74 = arith.addf %73, %72 : vector<8x256xf32>
    %75 = arith.divf %73, %74 : vector<8x256xf32>
    %c0_41 = arith.constant 0 : index
    %c0_42 = arith.constant 0 : index
    %76 = vector.load %arg10[%c0_41, %c0_42] : memref<8x256xf32, #tpu.memory_space<vmem>>, vector<8x256xf32>
    %77 = arith.mulf %69, %76 : vector<8x256xf32>
    %78 = arith.mulf %63, %57 : vector<8x256xf32>
    %79 = arith.addf %77, %78 : vector<8x256xf32>
    %c0_43 = arith.constant 0 : index
    %c0_44 = arith.constant 0 : index
    %80 = vector.load %arg10[%c0_43, %c0_44] : memref<8x256xf32, #tpu.memory_space<vmem>>, vector<8x256xf32>
    tpu.vector_store %arg10[%c0_43, %c0_44], %79 {strides = array<i32>} : memref<8x256xf32, #tpu.memory_space<vmem>>, vector<8x256xf32>,
    %81 = math.tanh %79 : vector<8x256xf32>
    %82 = arith.mulf %75, %81 : vector<8x256xf32>
    %c0_45 = arith.constant 0 : index
    %c0_46 = arith.constant 0 : index
    %83 = vector.load %arg9[%c0_45, %c0_46] : memref<8x256xf32, #tpu.memory_space<vmem>>, vector<8x256xf32>
    tpu.vector_store %arg9[%c0_45, %c0_46], %82 {strides = array<i32>} : memref<8x256xf32, #tpu.memory_space<vmem>>, vector<8x256xf32>,
    %c2_i32 = arith.constant 2 : i32
    %84 = arith.index_cast %c2_i32 : i32 to index
    %c0_47 = arith.constant 0 : index
    %c0_48 = arith.constant 0 : index
    %85 = vector.load %arg8[%84, %c0_47, %c0_48] : memref<8x8x1024xf32, #tpu.memory_space<vmem>>, vector<1x8x1024xf32>
    %86 = vector.shape_cast %85 : vector<1x8x1024xf32> to vector<8x1024xf32>
    %c0_49 = arith.constant 0 : index
    %c0_50 = arith.constant 0 : index
    %87 = vector.load %arg9[%c0_49, %c0_50] : memref<8x256xf32, #tpu.memory_space<vmem>>, vector<8x256xf32>
    %c0_51 = arith.constant 0 : index
    %c0_52 = arith.constant 0 : index
    %88 = vector.load %arg4[%c0_51, %c0_52] : memref<256x1024xf32, #tpu.memory_space<vmem>>, vector<256x1024xf32>
    %cst_53 = arith.constant dense<0.000000e+00> : vector<8x1024xf32>
    %89 = tpu.matmul %87, %88, %cst_53 {dimension_numbers = #tpu.dot_dimension_numbers<[1], [0], [0], [1], [0, 0, 1, 1], [], []>} : vector<8x256xf32>, vector<256x1024xf32>, vector<8x1024xf32> -> vector<8x1024xf32>
    %90 = arith.addf %86, %89 : vector<8x1024xf32>
    %91 = vector.extract_strided_slice %90 {offsets = [0, 0], sizes = [8, 256], strides = [1, 1]} : vector<8x1024xf32> to vector<8x256xf32>
    %92 = math.tanh %91 : vector<8x256xf32>
    %93 = vector.extract_strided_slice %90 {offsets = [0, 256], sizes = [8, 256], strides = [1, 1]} : vector<8x1024xf32> to vector<8x256xf32>
    %94 = arith.negf %93 : vector<8x256xf32>
    %95 = math.exp %94 : vector<8x256xf32>
    %cst_54 = arith.constant 1.000000e+00 : f32
    %96 = vector.broadcast %cst_54 : f32 to vector<8x256xf32>
    %97 = arith.addf %96, %95 : vector<8x256xf32>
    %98 = arith.divf %96, %97 : vector<8x256xf32>
    %99 = vector.extract_strided_slice %90 {offsets = [0, 512], sizes = [8, 256], strides = [1, 1]} : vector<8x1024xf32> to vector<8x256xf32>
    %100 = arith.negf %99 : vector<8x256xf32>
    %101 = math.exp %100 : vector<8x256xf32>
    %cst_55 = arith.constant 1.000000e+00 : f32
    %102 = vector.broadcast %cst_55 : f32 to vector<8x256xf32>
    %103 = arith.addf %102, %101 : vector<8x256xf32>
    %104 = arith.divf %102, %103 : vector<8x256xf32>
    %105 = vector.extract_strided_slice %90 {offsets = [0, 768], sizes = [8, 256], strides = [1, 1]} : vector<8x1024xf32> to vector<8x256xf32>
    %106 = arith.negf %105 : vector<8x256xf32>
    %107 = math.exp %106 : vector<8x256xf32>
    %cst_56 = arith.constant 1.000000e+00 : f32
    %108 = vector.broadcast %cst_56 : f32 to vector<8x256xf32>
    %109 = arith.addf %108, %107 : vector<8x256xf32>
    %110 = arith.divf %108, %109 : vector<8x256xf32>
    %c0_57 = arith.constant 0 : index
    %c0_58 = arith.constant 0 : index
    %111 = vector.load %arg10[%c0_57, %c0_58] : memref<8x256xf32, #tpu.memory_space<vmem>>, vector<8x256xf32>
    %112 = arith.mulf %104, %111 : vector<8x256xf32>
    %113 = arith.mulf %98, %92 : vector<8x256xf32>
    %114 = arith.addf %112, %113 : vector<8x256xf32>
    %c0_59 = arith.constant 0 : index
    %c0_60 = arith.constant 0 : index
    %115 = vector.load %arg10[%c0_59, %c0_60] : memref<8x256xf32, #tpu.memory_space<vmem>>, vector<8x256xf32>
    tpu.vector_store %arg10[%c0_59, %c0_60], %114 {strides = array<i32>} : memref<8x256xf32, #tpu.memory_space<vmem>>, vector<8x256xf32>,
    %116 = math.tanh %114 : vector<8x256xf32>
    %117 = arith.mulf %110, %116 : vector<8x256xf32>
    %c0_61 = arith.constant 0 : index
    %c0_62 = arith.constant 0 : index
    %118 = vector.load %arg9[%c0_61, %c0_62] : memref<8x256xf32, #tpu.memory_space<vmem>>, vector<8x256xf32>
    tpu.vector_store %arg9[%c0_61, %c0_62], %117 {strides = array<i32>} : memref<8x256xf32, #tpu.memory_space<vmem>>, vector<8x256xf32>,
    %c3_i32 = arith.constant 3 : i32
    %119 = arith.index_cast %c3_i32 : i32 to index
    %c0_63 = arith.constant 0 : index
    %c0_64 = arith.constant 0 : index
    %120 = vector.load %arg8[%119, %c0_63, %c0_64] : memref<8x8x1024xf32, #tpu.memory_space<vmem>>, vector<1x8x1024xf32>
    %121 = vector.shape_cast %120 : vector<1x8x1024xf32> to vector<8x1024xf32>
    %c0_65 = arith.constant 0 : index
    %c0_66 = arith.constant 0 : index
    %122 = vector.load %arg9[%c0_65, %c0_66] : memref<8x256xf32, #tpu.memory_space<vmem>>, vector<8x256xf32>
    %c0_67 = arith.constant 0 : index
    %c0_68 = arith.constant 0 : index
    %123 = vector.load %arg4[%c0_67, %c0_68] : memref<256x1024xf32, #tpu.memory_space<vmem>>, vector<256x1024xf32>
    %cst_69 = arith.constant dense<0.000000e+00> : vector<8x1024xf32>
    %124 = tpu.matmul %122, %123, %cst_69 {dimension_numbers = #tpu.dot_dimension_numbers<[1], [0], [0], [1], [0, 0, 1, 1], [], []>} : vector<8x256xf32>, vector<256x1024xf32>, vector<8x1024xf32> -> vector<8x1024xf32>
    %125 = arith.addf %121, %124 : vector<8x1024xf32>
    %126 = vector.extract_strided_slice %125 {offsets = [0, 0], sizes = [8, 256], strides = [1, 1]} : vector<8x1024xf32> to vector<8x256xf32>
    %127 = math.tanh %126 : vector<8x256xf32>
    %128 = vector.extract_strided_slice %125 {offsets = [0, 256], sizes = [8, 256], strides = [1, 1]} : vector<8x1024xf32> to vector<8x256xf32>
    %129 = arith.negf %128 : vector<8x256xf32>
    %130 = math.exp %129 : vector<8x256xf32>
    %cst_70 = arith.constant 1.000000e+00 : f32
    %131 = vector.broadcast %cst_70 : f32 to vector<8x256xf32>
    %132 = arith.addf %131, %130 : vector<8x256xf32>
    %133 = arith.divf %131, %132 : vector<8x256xf32>
    %134 = vector.extract_strided_slice %125 {offsets = [0, 512], sizes = [8, 256], strides = [1, 1]} : vector<8x1024xf32> to vector<8x256xf32>
    %135 = arith.negf %134 : vector<8x256xf32>
    %136 = math.exp %135 : vector<8x256xf32>
    %cst_71 = arith.constant 1.000000e+00 : f32
    %137 = vector.broadcast %cst_71 : f32 to vector<8x256xf32>
    %138 = arith.addf %137, %136 : vector<8x256xf32>
    %139 = arith.divf %137, %138 : vector<8x256xf32>
    %140 = vector.extract_strided_slice %125 {offsets = [0, 768], sizes = [8, 256], strides = [1, 1]} : vector<8x1024xf32> to vector<8x256xf32>
    %141 = arith.negf %140 : vector<8x256xf32>
    %142 = math.exp %141 : vector<8x256xf32>
    %cst_72 = arith.constant 1.000000e+00 : f32
    %143 = vector.broadcast %cst_72 : f32 to vector<8x256xf32>
    %144 = arith.addf %143, %142 : vector<8x256xf32>
    %145 = arith.divf %143, %144 : vector<8x256xf32>
    %c0_73 = arith.constant 0 : index
    %c0_74 = arith.constant 0 : index
    %146 = vector.load %arg10[%c0_73, %c0_74] : memref<8x256xf32, #tpu.memory_space<vmem>>, vector<8x256xf32>
    %147 = arith.mulf %139, %146 : vector<8x256xf32>
    %148 = arith.mulf %133, %127 : vector<8x256xf32>
    %149 = arith.addf %147, %148 : vector<8x256xf32>
    %c0_75 = arith.constant 0 : index
    %c0_76 = arith.constant 0 : index
    %150 = vector.load %arg10[%c0_75, %c0_76] : memref<8x256xf32, #tpu.memory_space<vmem>>, vector<8x256xf32>
    tpu.vector_store %arg10[%c0_75, %c0_76], %149 {strides = array<i32>} : memref<8x256xf32, #tpu.memory_space<vmem>>, vector<8x256xf32>,
    %151 = math.tanh %149 : vector<8x256xf32>
    %152 = arith.mulf %145, %151 : vector<8x256xf32>
    %c0_77 = arith.constant 0 : index
    %c0_78 = arith.constant 0 : index
    %153 = vector.load %arg9[%c0_77, %c0_78] : memref<8x256xf32, #tpu.memory_space<vmem>>, vector<8x256xf32>
    tpu.vector_store %arg9[%c0_77, %c0_78], %152 {strides = array<i32>} : memref<8x256xf32, #tpu.memory_space<vmem>>, vector<8x256xf32>,
    %c4_i32 = arith.constant 4 : i32
    %154 = arith.index_cast %c4_i32 : i32 to index
    %c0_79 = arith.constant 0 : index
    %c0_80 = arith.constant 0 : index
    %155 = vector.load %arg8[%154, %c0_79, %c0_80] : memref<8x8x1024xf32, #tpu.memory_space<vmem>>, vector<1x8x1024xf32>
    %156 = vector.shape_cast %155 : vector<1x8x1024xf32> to vector<8x1024xf32>
    %c0_81 = arith.constant 0 : index
    %c0_82 = arith.constant 0 : index
    %157 = vector.load %arg9[%c0_81, %c0_82] : memref<8x256xf32, #tpu.memory_space<vmem>>, vector<8x256xf32>
    %c0_83 = arith.constant 0 : index
    %c0_84 = arith.constant 0 : index
    %158 = vector.load %arg4[%c0_83, %c0_84] : memref<256x1024xf32, #tpu.memory_space<vmem>>, vector<256x1024xf32>
    %cst_85 = arith.constant dense<0.000000e+00> : vector<8x1024xf32>
    %159 = tpu.matmul %157, %158, %cst_85 {dimension_numbers = #tpu.dot_dimension_numbers<[1], [0], [0], [1], [0, 0, 1, 1], [], []>} : vector<8x256xf32>, vector<256x1024xf32>, vector<8x1024xf32> -> vector<8x1024xf32>
    %160 = arith.addf %156, %159 : vector<8x1024xf32>
    %161 = vector.extract_strided_slice %160 {offsets = [0, 0], sizes = [8, 256], strides = [1, 1]} : vector<8x1024xf32> to vector<8x256xf32>
    %162 = math.tanh %161 : vector<8x256xf32>
    %163 = vector.extract_strided_slice %160 {offsets = [0, 256], sizes = [8, 256], strides = [1, 1]} : vector<8x1024xf32> to vector<8x256xf32>
    %164 = arith.negf %163 : vector<8x256xf32>
    %165 = math.exp %164 : vector<8x256xf32>
    %cst_86 = arith.constant 1.000000e+00 : f32
    %166 = vector.broadcast %cst_86 : f32 to vector<8x256xf32>
    %167 = arith.addf %166, %165 : vector<8x256xf32>
    %168 = arith.divf %166, %167 : vector<8x256xf32>
    %169 = vector.extract_strided_slice %160 {offsets = [0, 512], sizes = [8, 256], strides = [1, 1]} : vector<8x1024xf32> to vector<8x256xf32>
    %170 = arith.negf %169 : vector<8x256xf32>
    %171 = math.exp %170 : vector<8x256xf32>
    %cst_87 = arith.constant 1.000000e+00 : f32
    %172 = vector.broadcast %cst_87 : f32 to vector<8x256xf32>
    %173 = arith.addf %172, %171 : vector<8x256xf32>
    %174 = arith.divf %172, %173 : vector<8x256xf32>
    %175 = vector.extract_strided_slice %160 {offsets = [0, 768], sizes = [8, 256], strides = [1, 1]} : vector<8x1024xf32> to vector<8x256xf32>
    %176 = arith.negf %175 : vector<8x256xf32>
    %177 = math.exp %176 : vector<8x256xf32>
    %cst_88 = arith.constant 1.000000e+00 : f32
    %178 = vector.broadcast %cst_88 : f32 to vector<8x256xf32>
    %179 = arith.addf %178, %177 : vector<8x256xf32>
    %180 = arith.divf %178, %179 : vector<8x256xf32>
    %c0_89 = arith.constant 0 : index
    %c0_90 = arith.constant 0 : index
    %181 = vector.load %arg10[%c0_89, %c0_90] : memref<8x256xf32, #tpu.memory_space<vmem>>, vector<8x256xf32>
    %182 = arith.mulf %174, %181 : vector<8x256xf32>
    %183 = arith.mulf %168, %162 : vector<8x256xf32>
    %184 = arith.addf %182, %183 : vector<8x256xf32>
    %c0_91 = arith.constant 0 : index
    %c0_92 = arith.constant 0 : index
    %185 = vector.load %arg10[%c0_91, %c0_92] : memref<8x256xf32, #tpu.memory_space<vmem>>, vector<8x256xf32>
    tpu.vector_store %arg10[%c0_91, %c0_92], %184 {strides = array<i32>} : memref<8x256xf32, #tpu.memory_space<vmem>>, vector<8x256xf32>,
    %186 = math.tanh %184 : vector<8x256xf32>
    %187 = arith.mulf %180, %186 : vector<8x256xf32>
    %c0_93 = arith.constant 0 : index
    %c0_94 = arith.constant 0 : index
    %188 = vector.load %arg9[%c0_93, %c0_94] : memref<8x256xf32, #tpu.memory_space<vmem>>, vector<8x256xf32>
    tpu.vector_store %arg9[%c0_93, %c0_94], %187 {strides = array<i32>} : memref<8x256xf32, #tpu.memory_space<vmem>>, vector<8x256xf32>,
    %c5_i32 = arith.constant 5 : i32
    %189 = arith.index_cast %c5_i32 : i32 to index
    %c0_95 = arith.constant 0 : index
    %c0_96 = arith.constant 0 : index
    %190 = vector.load %arg8[%189, %c0_95, %c0_96] : memref<8x8x1024xf32, #tpu.memory_space<vmem>>, vector<1x8x1024xf32>
    %191 = vector.shape_cast %190 : vector<1x8x1024xf32> to vector<8x1024xf32>
    %c0_97 = arith.constant 0 : index
    %c0_98 = arith.constant 0 : index
    %192 = vector.load %arg9[%c0_97, %c0_98] : memref<8x256xf32, #tpu.memory_space<vmem>>, vector<8x256xf32>
    %c0_99 = arith.constant 0 : index
    %c0_100 = arith.constant 0 : index
    %193 = vector.load %arg4[%c0_99, %c0_100] : memref<256x1024xf32, #tpu.memory_space<vmem>>, vector<256x1024xf32>
    %cst_101 = arith.constant dense<0.000000e+00> : vector<8x1024xf32>
    %194 = tpu.matmul %192, %193, %cst_101 {dimension_numbers = #tpu.dot_dimension_numbers<[1], [0], [0], [1], [0, 0, 1, 1], [], []>} : vector<8x256xf32>, vector<256x1024xf32>, vector<8x1024xf32> -> vector<8x1024xf32>
    %195 = arith.addf %191, %194 : vector<8x1024xf32>
    %196 = vector.extract_strided_slice %195 {offsets = [0, 0], sizes = [8, 256], strides = [1, 1]} : vector<8x1024xf32> to vector<8x256xf32>
    %197 = math.tanh %196 : vector<8x256xf32>
    %198 = vector.extract_strided_slice %195 {offsets = [0, 256], sizes = [8, 256], strides = [1, 1]} : vector<8x1024xf32> to vector<8x256xf32>
    %199 = arith.negf %198 : vector<8x256xf32>
    %200 = math.exp %199 : vector<8x256xf32>
    %cst_102 = arith.constant 1.000000e+00 : f32
    %201 = vector.broadcast %cst_102 : f32 to vector<8x256xf32>
    %202 = arith.addf %201, %200 : vector<8x256xf32>
    %203 = arith.divf %201, %202 : vector<8x256xf32>
    %204 = vector.extract_strided_slice %195 {offsets = [0, 512], sizes = [8, 256], strides = [1, 1]} : vector<8x1024xf32> to vector<8x256xf32>
    %205 = arith.negf %204 : vector<8x256xf32>
    %206 = math.exp %205 : vector<8x256xf32>
    %cst_103 = arith.constant 1.000000e+00 : f32
    %207 = vector.broadcast %cst_103 : f32 to vector<8x256xf32>
    %208 = arith.addf %207, %206 : vector<8x256xf32>
    %209 = arith.divf %207, %208 : vector<8x256xf32>
    %210 = vector.extract_strided_slice %195 {offsets = [0, 768], sizes = [8, 256], strides = [1, 1]} : vector<8x1024xf32> to vector<8x256xf32>
    %211 = arith.negf %210 : vector<8x256xf32>
    %212 = math.exp %211 : vector<8x256xf32>
    %cst_104 = arith.constant 1.000000e+00 : f32
    %213 = vector.broadcast %cst_104 : f32 to vector<8x256xf32>
    %214 = arith.addf %213, %212 : vector<8x256xf32>
    %215 = arith.divf %213, %214 : vector<8x256xf32>
    %c0_105 = arith.constant 0 : index
    %c0_106 = arith.constant 0 : index
    %216 = vector.load %arg10[%c0_105, %c0_106] : memref<8x256xf32, #tpu.memory_space<vmem>>, vector<8x256xf32>
    %217 = arith.mulf %209, %216 : vector<8x256xf32>
    %218 = arith.mulf %203, %197 : vector<8x256xf32>
    %219 = arith.addf %217, %218 : vector<8x256xf32>
    %c0_107 = arith.constant 0 : index
    %c0_108 = arith.constant 0 : index
    %220 = vector.load %arg10[%c0_107, %c0_108] : memref<8x256xf32, #tpu.memory_space<vmem>>, vector<8x256xf32>
    tpu.vector_store %arg10[%c0_107, %c0_108], %219 {strides = array<i32>} : memref<8x256xf32, #tpu.memory_space<vmem>>, vector<8x256xf32>,
    %221 = math.tanh %219 : vector<8x256xf32>
    %222 = arith.mulf %215, %221 : vector<8x256xf32>
    %c0_109 = arith.constant 0 : index
    %c0_110 = arith.constant 0 : index
    %223 = vector.load %arg9[%c0_109, %c0_110] : memref<8x256xf32, #tpu.memory_space<vmem>>, vector<8x256xf32>
    tpu.vector_store %arg9[%c0_109, %c0_110], %222 {strides = array<i32>} : memref<8x256xf32, #tpu.memory_space<vmem>>, vector<8x256xf32>,
    %c6_i32 = arith.constant 6 : i32
    %224 = arith.index_cast %c6_i32 : i32 to index
    %c0_111 = arith.constant 0 : index
    %c0_112 = arith.constant 0 : index
    %225 = vector.load %arg8[%224, %c0_111, %c0_112] : memref<8x8x1024xf32, #tpu.memory_space<vmem>>, vector<1x8x1024xf32>
    %226 = vector.shape_cast %225 : vector<1x8x1024xf32> to vector<8x1024xf32>
    %c0_113 = arith.constant 0 : index
    %c0_114 = arith.constant 0 : index
    %227 = vector.load %arg9[%c0_113, %c0_114] : memref<8x256xf32, #tpu.memory_space<vmem>>, vector<8x256xf32>
    %c0_115 = arith.constant 0 : index
    %c0_116 = arith.constant 0 : index
    %228 = vector.load %arg4[%c0_115, %c0_116] : memref<256x1024xf32, #tpu.memory_space<vmem>>, vector<256x1024xf32>
    %cst_117 = arith.constant dense<0.000000e+00> : vector<8x1024xf32>
    %229 = tpu.matmul %227, %228, %cst_117 {dimension_numbers = #tpu.dot_dimension_numbers<[1], [0], [0], [1], [0, 0, 1, 1], [], []>} : vector<8x256xf32>, vector<256x1024xf32>, vector<8x1024xf32> -> vector<8x1024xf32>
    %230 = arith.addf %226, %229 : vector<8x1024xf32>
    %231 = vector.extract_strided_slice %230 {offsets = [0, 0], sizes = [8, 256], strides = [1, 1]} : vector<8x1024xf32> to vector<8x256xf32>
    %232 = math.tanh %231 : vector<8x256xf32>
    %233 = vector.extract_strided_slice %230 {offsets = [0, 256], sizes = [8, 256], strides = [1, 1]} : vector<8x1024xf32> to vector<8x256xf32>
    %234 = arith.negf %233 : vector<8x256xf32>
    %235 = math.exp %234 : vector<8x256xf32>
    %cst_118 = arith.constant 1.000000e+00 : f32
    %236 = vector.broadcast %cst_118 : f32 to vector<8x256xf32>
    %237 = arith.addf %236, %235 : vector<8x256xf32>
    %238 = arith.divf %236, %237 : vector<8x256xf32>
    %239 = vector.extract_strided_slice %230 {offsets = [0, 512], sizes = [8, 256], strides = [1, 1]} : vector<8x1024xf32> to vector<8x256xf32>
    %240 = arith.negf %239 : vector<8x256xf32>
    %241 = math.exp %240 : vector<8x256xf32>
    %cst_119 = arith.constant 1.000000e+00 : f32
    %242 = vector.broadcast %cst_119 : f32 to vector<8x256xf32>
    %243 = arith.addf %242, %241 : vector<8x256xf32>
    %244 = arith.divf %242, %243 : vector<8x256xf32>
    %245 = vector.extract_strided_slice %230 {offsets = [0, 768], sizes = [8, 256], strides = [1, 1]} : vector<8x1024xf32> to vector<8x256xf32>
    %246 = arith.negf %245 : vector<8x256xf32>
    %247 = math.exp %246 : vector<8x256xf32>
    %cst_120 = arith.constant 1.000000e+00 : f32
    %248 = vector.broadcast %cst_120 : f32 to vector<8x256xf32>
    %249 = arith.addf %248, %247 : vector<8x256xf32>
    %250 = arith.divf %248, %249 : vector<8x256xf32>
    %c0_121 = arith.constant 0 : index
    %c0_122 = arith.constant 0 : index
    %251 = vector.load %arg10[%c0_121, %c0_122] : memref<8x256xf32, #tpu.memory_space<vmem>>, vector<8x256xf32>
    %252 = arith.mulf %244, %251 : vector<8x256xf32>
    %253 = arith.mulf %238, %232 : vector<8x256xf32>
    %254 = arith.addf %252, %253 : vector<8x256xf32>
    %c0_123 = arith.constant 0 : index
    %c0_124 = arith.constant 0 : index
    %255 = vector.load %arg10[%c0_123, %c0_124] : memref<8x256xf32, #tpu.memory_space<vmem>>, vector<8x256xf32>
    tpu.vector_store %arg10[%c0_123, %c0_124], %254 {strides = array<i32>} : memref<8x256xf32, #tpu.memory_space<vmem>>, vector<8x256xf32>,
    %256 = math.tanh %254 : vector<8x256xf32>
    %257 = arith.mulf %250, %256 : vector<8x256xf32>
    %c0_125 = arith.constant 0 : index
    %c0_126 = arith.constant 0 : index
    %258 = vector.load %arg9[%c0_125, %c0_126] : memref<8x256xf32, #tpu.memory_space<vmem>>, vector<8x256xf32>
    tpu.vector_store %arg9[%c0_125, %c0_126], %257 {strides = array<i32>} : memref<8x256xf32, #tpu.memory_space<vmem>>, vector<8x256xf32>,
    %c7_i32 = arith.constant 7 : i32
    %259 = arith.index_cast %c7_i32 : i32 to index
    %c0_127 = arith.constant 0 : index
    %c0_128 = arith.constant 0 : index
    %260 = vector.load %arg8[%259, %c0_127, %c0_128] : memref<8x8x1024xf32, #tpu.memory_space<vmem>>, vector<1x8x1024xf32>
    %261 = vector.shape_cast %260 : vector<1x8x1024xf32> to vector<8x1024xf32>
    %c0_129 = arith.constant 0 : index
    %c0_130 = arith.constant 0 : index
    %262 = vector.load %arg9[%c0_129, %c0_130] : memref<8x256xf32, #tpu.memory_space<vmem>>, vector<8x256xf32>
    %c0_131 = arith.constant 0 : index
    %c0_132 = arith.constant 0 : index
    %263 = vector.load %arg4[%c0_131, %c0_132] : memref<256x1024xf32, #tpu.memory_space<vmem>>, vector<256x1024xf32>
    %cst_133 = arith.constant dense<0.000000e+00> : vector<8x1024xf32>
    %264 = tpu.matmul %262, %263, %cst_133 {dimension_numbers = #tpu.dot_dimension_numbers<[1], [0], [0], [1], [0, 0, 1, 1], [], []>} : vector<8x256xf32>, vector<256x1024xf32>, vector<8x1024xf32> -> vector<8x1024xf32>
    %265 = arith.addf %261, %264 : vector<8x1024xf32>
    %266 = vector.extract_strided_slice %265 {offsets = [0, 0], sizes = [8, 256], strides = [1, 1]} : vector<8x1024xf32> to vector<8x256xf32>
    %267 = math.tanh %266 : vector<8x256xf32>
    %268 = vector.extract_strided_slice %265 {offsets = [0, 256], sizes = [8, 256], strides = [1, 1]} : vector<8x1024xf32> to vector<8x256xf32>
    %269 = arith.negf %268 : vector<8x256xf32>
    %270 = math.exp %269 : vector<8x256xf32>
    %cst_134 = arith.constant 1.000000e+00 : f32
    %271 = vector.broadcast %cst_134 : f32 to vector<8x256xf32>
    %272 = arith.addf %271, %270 : vector<8x256xf32>
    %273 = arith.divf %271, %272 : vector<8x256xf32>
    %274 = vector.extract_strided_slice %265 {offsets = [0, 512], sizes = [8, 256], strides = [1, 1]} : vector<8x1024xf32> to vector<8x256xf32>
    %275 = arith.negf %274 : vector<8x256xf32>
    %276 = math.exp %275 : vector<8x256xf32>
    %cst_135 = arith.constant 1.000000e+00 : f32
    %277 = vector.broadcast %cst_135 : f32 to vector<8x256xf32>
    %278 = arith.addf %277, %276 : vector<8x256xf32>
    %279 = arith.divf %277, %278 : vector<8x256xf32>
    %280 = vector.extract_strided_slice %265 {offsets = [0, 768], sizes = [8, 256], strides = [1, 1]} : vector<8x1024xf32> to vector<8x256xf32>
    %281 = arith.negf %280 : vector<8x256xf32>
    %282 = math.exp %281 : vector<8x256xf32>
    %cst_136 = arith.constant 1.000000e+00 : f32
    %283 = vector.broadcast %cst_136 : f32 to vector<8x256xf32>
    %284 = arith.addf %283, %282 : vector<8x256xf32>
    %285 = arith.divf %283, %284 : vector<8x256xf32>
    %c0_137 = arith.constant 0 : index
    %c0_138 = arith.constant 0 : index
    %286 = vector.load %arg10[%c0_137, %c0_138] : memref<8x256xf32, #tpu.memory_space<vmem>>, vector<8x256xf32>
    %287 = arith.mulf %279, %286 : vector<8x256xf32>
    %288 = arith.mulf %273, %267 : vector<8x256xf32>
    %289 = arith.addf %287, %288 : vector<8x256xf32>
    %c0_139 = arith.constant 0 : index
    %c0_140 = arith.constant 0 : index
    %290 = vector.load %arg10[%c0_139, %c0_140] : memref<8x256xf32, #tpu.memory_space<vmem>>, vector<8x256xf32>
    tpu.vector_store %arg10[%c0_139, %c0_140], %289 {strides = array<i32>} : memref<8x256xf32, #tpu.memory_space<vmem>>, vector<8x256xf32>,
    %291 = math.tanh %289 : vector<8x256xf32>
    %292 = arith.mulf %285, %291 : vector<8x256xf32>
    %c0_141 = arith.constant 0 : index
    %c0_142 = arith.constant 0 : index
    %293 = vector.load %arg9[%c0_141, %c0_142] : memref<8x256xf32, #tpu.memory_space<vmem>>, vector<8x256xf32>
    tpu.vector_store %arg9[%c0_141, %c0_142], %292 {strides = array<i32>} : memref<8x256xf32, #tpu.memory_space<vmem>>, vector<8x256xf32>,
    %c8_i32 = arith.constant 8 : i32
    %c0_143 = arith.constant 0 : index
    %c0_144 = arith.constant 0 : index
    %294 = vector.load %arg9[%c0_143, %c0_144] : memref<8x256xf32, #tpu.memory_space<vmem>>, vector<8x256xf32>
    %c0_145 = arith.constant 0 : index
    %c0_146 = arith.constant 0 : index
    %295 = vector.load %arg5[%c0_145, %c0_146] : memref<256x3xf32, #tpu.memory_space<vmem>>, vector<256x3xf32>
    %cst_147 = arith.constant dense<0.000000e+00> : vector<8x3xf32>
    %296 = tpu.matmul %294, %295, %cst_147 {dimension_numbers = #tpu.dot_dimension_numbers<[1], [0], [0], [1], [0, 0, 1, 1], [], []>} : vector<8x256xf32>, vector<256x3xf32>, vector<8x3xf32> -> vector<8x3xf32>
    %c0_148 = arith.constant 0 : index
    %c0_149 = arith.constant 0 : index
    %297 = vector.load %arg6[%c0_148, %c0_149] : memref<1x3xf32, #tpu.memory_space<vmem>>, vector<1x3xf32>
    %298 = vector.broadcast %297 : vector<1x3xf32> to vector<8x3xf32>
    %299 = arith.addf %296, %298 : vector<8x3xf32>
    %c0_150 = arith.constant 0 : index
    %c0_151 = arith.constant 0 : index
    %300 = vector.load %arg7[%c0_150, %c0_151] : memref<8x3xf32, #tpu.memory_space<vmem>>, vector<8x3xf32>
    tpu.vector_store %arg7[%c0_150, %c0_151], %299 {strides = array<i32>} : memref<8x3xf32, #tpu.memory_space<vmem>>, vector<8x3xf32>,
    return
  }
  func.func @transform_0(%arg0: i32) -> (i32, i32, i32) {
    %c0_i32 = arith.constant 0 : i32
    %c0_i32_0 = arith.constant 0 : i32
    %c0_i32_1 = arith.constant 0 : i32
    return %c0_i32, %arg0, %c0_i32_0 : i32, i32, i32
  }
  func.func @transform_1(%arg0: i32) -> (i32, i32) {
    %c0_i32 = arith.constant 0 : i32
    %c0_i32_0 = arith.constant 0 : i32
    %c0_i32_1 = arith.constant 0 : i32
    return %c0_i32, %c0_i32_0 : i32, i32
  }
  func.func @transform_2(%arg0: i32) -> (i32, i32) {
    %c0_i32 = arith.constant 0 : i32
    %c0_i32_0 = arith.constant 0 : i32
    %c0_i32_1 = arith.constant 0 : i32
    return %c0_i32, %c0_i32_0 : i32, i32
  }
  func.func @transform_3(%arg0: i32) -> (i32, i32) {
    %c0_i32 = arith.constant 0 : i32
    %c0_i32_0 = arith.constant 0 : i32
    %c0_i32_1 = arith.constant 0 : i32
    return %c0_i32, %c0_i32_0 : i32, i32
  }
  func.func @transform_4(%arg0: i32) -> (i32, i32) {
    %c0_i32 = arith.constant 0 : i32
    %c0_i32_0 = arith.constant 0 : i32
    %c0_i32_1 = arith.constant 0 : i32
    return %c0_i32, %c0_i32_0 : i32, i32
  }
  func.func @transform_5(%arg0: i32) -> (i32, i32) {
    %c0_i32 = arith.constant 0 : i32
    %c0_i32_0 = arith.constant 0 : i32
    %c0_i32_1 = arith.constant 0 : i32
    return %c0_i32, %c0_i32_0 : i32, i32
  }
  func.func @transform_6(%arg0: i32) -> (i32, i32) {
    %c0_i32 = arith.constant 0 : i32
    %c0_i32_0 = arith.constant 0 : i32
    return %arg0, %c0_i32 : i32, i32
  }
}

</mosaic_0001>

<bundles_post_ra>
// kernel: lstm_model_forward.1
= control target key start
LH: loop header
LB: loop body
LE: loop exit
PB: predicated region body
PF: predicated region fallthrough
CT: control target
= control target key end

     0   :  { %11 = vsyncpa [#allocation6], 0  ;;  %s8359_s21 = smov [#allocation5]   ;;  %s8909_s0 = inlined_call_operand.vmem [shape: f32[8,8,16], index: 0, kind: input, shape index: {}]   ;;  %s8910_s1 = inlined_call_operand.vmem [shape: f32[16,1024], index: 1, kind: input, shape index: {}]   ;;  %s8911_s2 = inlined_call_operand.vmem [shape: f32[1,1024], index: 2, kind: input, shape index: {}]   ;;  %s8912_s3 = inlined_call_operand.hbm [shape: f32[256,1024], index: 3, kind: input, shape index: {}]   ;;  %s8913_s4 = inlined_call_operand.vmem [shape: f32[256,3], index: 4, kind: input, shape index: {}]   ;;  %s8914_s5 = inlined_call_operand.vmem [shape: f32[1,3], index: 5, kind: input, shape index: {}]   ;;  %s8915_s6 = inlined_call_operand.vmem [shape: f32[8,3], index: 6, kind: output, shape index: {}]  }
   0x1   :  { %s23_s22 = sshll.u32 %s8359_s21, 4  ;;  %s8335_s25 = scalar_lea.hbm %s8912_s3, 32768  ;;  %s24_s22 = int_to_ptr.vmem [resolvable:$true] %s23_s22 }
   0x2   :  { %p8336_p0 = scmp.ne.s32.totalorder %s8912_s3, %s8335_s25  ;;  %p8339_p1 = scmp.lt.u32.totalorder %s8335_s25, %s8912_s3 }
   0x4   :  { %p8341_p2 = pnand %p8339_p1, %p8336_p0 }
   0x6   :  { %8344 = shalt.err (!%p8341_p2)
}
   0x7   :  { %s8345_s30 = scalar_lea.vmem %s24_s22, 32768  ;;  %p8350_p4 = scmp.lt.s32.totalorder %s24_s22, %s24_s22 }
   0x8   :  { %p8346_p3 = scmp.ne.s32.totalorder %s24_s22, %s8345_s30  ;;  %p8351_p5 = scmp.lt.s32.totalorder %s8345_s30, %s8345_s30 }
   0xa   :  { %p8352_p6 = por %p8351_p5, %p8350_p4 }
   0xc   :  { %p8353_p7 = pnand %p8352_p6, %p8346_p3 }
   0xe   :  { %8356 = shalt.err (!%p8353_p7)
}
   0xf   :  { %s8360_s7 = smov 1024   ;;  %s8361_s8 = smov 64  }
  0x10   :  { %29 = dma.hbm_to_vmem [thread:$0]  %s8912_s3, 32768, %s24_s22, [#allocation6], %s8360_s7, %s8360_s7, %s8361_s8  }
  0x11   :  { %8357 = dma.done.wait [#allocation6], 32768  }
  0x12   :  { %8358 = vsyncadd [#allocation6], 4294934528  ;;  %v8362_v0 = vmov 0.0   ;;  %v46_v1 = vld [vmem:[%s8910_s1 + $0x8] sm:$0xff]  ;;  %v45_v3 = vld [vmem:[%s8910_s1] sm:$0xff]  ;;  %vm61_vm0 = vcmask 130048  }
  0x13   :  { %150 = vmatprep.mubr.f32.mxu0 %v8362_v0  ;;  %174 = vmatprep.mubr.f32.mxu1 %v8362_v0  ;;  %v54_v2 = vld [vmem:[%s8910_s1 + $0x48] sm:$0xff]  ;;  %v53_v5 = vld [vmem:[%s8910_s1 + $0x40] sm:$0xff]  ;;  %v48_v7 = vld [vmem:[%s8910_s1 + $0x18] sm:$0xff]  ;;  %vm5726_vm1 = vcmask 23552  }
  0x14   :  { %v5849_v4 = vpack.c.bf16 %v54_v2, %v46_v1  ;;  %v5851_v6 = vpack.c.bf16 %v53_v5, %v45_v3  ;;  %v56_v8 = vld [vmem:[%s8910_s1 + $0x58] sm:$0xff]  ;;  %v47_v9 = vld [vmem:[%s8910_s1 + $0x10] sm:$0xff]  ;;  %v8439_v12 = vld [vmem:[%s8909_s0] sm:$0xff] }
  0x15   :  { %v5853_v10 = vpack.c.bf16 %v56_v8, %v48_v7  ;;  %v55_v11 = vld [vmem:[%s8910_s1 + $0x50] sm:$0xff]  ;;  %v8444_v13 = vld [vmem:[%s8909_s0 + $0x20] sm:$0xff]  ;;  %v50_v15 = vld [vmem:[%s8910_s1 + $0x28] sm:$0xff] }
  0x16   :  { %5850 = vmatprep.subr.bf16.mxu0 %v5849_v4  ;;  %7945 = vmatprep.subr.bf16.mxu1 %v5849_v4  ;;  %v5855_v14 = vpack.c.bf16 %v55_v11, %v47_v9  ;;  %v58_v16 = vld [vmem:[%s8910_s1 + $0x68] sm:$0xff]  ;;  %v49_v18 = vld [vmem:[%s8910_s1 + $0x20] sm:$0xff]  ;;  %v52_v23 = vld [vmem:[%s8910_s1 + $0x38] sm:$0xff] }
  0x17   :  { %5852 = vmatpush1.bf16.msra.mxu0 %v5851_v6  ;;  %7946 = vmatpush1.bf16.msra.mxu1 %v5851_v6  ;;  %v5857_v17 = vpack.c.bf16 %v58_v16, %v50_v15  ;;  %v57_v19 = vld [vmem:[%s8910_s1 + $0x60] sm:$0xff]  ;;  %v723_v20 = vld [vmem:[#allocation5 + $0x8] sm:$0xff]  ;;  %v60_v24 = vld [vmem:[%s8910_s1 + $0x78] sm:$0xff] }
  0x18   :  { %5854 = vmatprep.subr.bf16.mxu1 %v5853_v10  ;;  %v5859_v21 = vpack.c.bf16 %v57_v19, %v49_v18  ;;  %v731_v22 = vld [vmem:[#allocation5 + $0x48] sm:$0xff]  ;;  %v5861_v27 = vpack.c.bf16 %v60_v24, %v52_v23  ;;  %v8489_v29 = vld [vmem:[%s8909_s0 + $0x10] sm:$0xff]  ;;  %v8505_v31 = vld [vmem:[%s8909_s0 + $0x18] sm:$0xff] }
  0x19   :  { %v8472_v25 = vld [vmem:[%s8909_s0 + $0x8] sm:$0xff]  ;;  %5858 = vmatprep.subr.bf16.mxu0 %v5857_v17  ;;  %v5865_v28 = vpack.c.bf16 %v731_v22, %v723_v20  ;;  %v8494_v30 = vld [vmem:[%s8909_s0 + $0x30] sm:$0xff]  ;;  %v8510_v32 = vld [vmem:[%s8909_s0 + $0x38] sm:$0xff] }
  0x1a   :  { %5733 = vmatmul.mubr.msk.f32.vlgmr.msra.gmra.mrb[0].mxu0 %vm61_vm0, %v8439_v12  ;;  %5737 = vmatmul.mubr.msk.f32.vlgmr.msra.gmra.mrb[0].mxu1 %vm61_vm0, %v8444_v13  ;;  %v8477_v26 = vld [vmem:[%s8909_s0 + $0x28] sm:$0xff]  ;;  %v722_v33 = vld [vmem:[#allocation5] sm:$0xff]  ;;  %v51_v35 = vld [vmem:[%s8910_s1 + $0x30] sm:$0xff] }
  0x1b   :  { %5856 = vmatpush1.bf16.msra.mxu1 %v5855_v14  ;;  %156 = vmatprep.mubr.f32.mxu0 %v8362_v0  ;;  %v730_v34 = vld [vmem:[#allocation5 + $0x40] sm:$0xff]  ;;  %v59_v36 = vld [vmem:[%s8910_s1 + $0x70] sm:$0xff]  ;;  %v739_v37 = vld [vmem:[#allocation5 + $0x88] sm:$0xff] }
  0x1c   :  { %180 = vmatprep.mubr.f32.mxu1 %v8362_v0  ;;  %5860 = vmatpush1.bf16.msra.mxu0 %v5859_v21  ;;  %v747_v38 = vld [vmem:[#allocation5 + $0xc8] sm:$0xff]  ;;  %v725_v39 = vld [vmem:[#allocation5 + $0x18] sm:$0xff]  ;;  %v5867_v41 = vpack.c.bf16 %v730_v34, %v722_v33  ;;  %v5863_v42 = vpack.c.bf16 %v59_v36, %v51_v35  ;;  %v738_v44 = vld [vmem:[#allocation5 + $0x80] sm:$0xff] }
  0x1d   :  { %5862 = vmatprep.subr.bf16.mxu1 %v5861_v27  ;;  %5866 = vmatprep.subr.bf16.mxu0 %v5865_v28  ;;  %v733_v40 = vld [vmem:[#allocation5 + $0x58] sm:$0xff]  ;;  %v5869_v43 = vpack.c.bf16 %v747_v38, %v739_v37  ;;  %v746_v45 = vld [vmem:[#allocation5 + $0xc0] sm:$0xff]  ;;  %v755_v46 = vld [vmem:[#allocation5 + $0x108] sm:$0xff] }
  0x1e   :  { %5734 = vmatmul.mubr.msk.f32.gmra.mrb[2].mxu0 %vm61_vm0, %v8472_v25  ;;  %5738 = vmatmul.mubr.msk.f32.gmra.mrb[2].mxu1 %vm61_vm0, %v8477_v26  ;;  %v763_v47 = vld [vmem:[#allocation5 + $0x148] sm:$0xff]  ;;  %v5929_v48 = vpack.c.bf16 %v733_v40, %v725_v39  ;;  %v5871_v49 = vpack.c.bf16 %v746_v45, %v738_v44  ;;  %v754_v51 = vld [vmem:[#allocation5 + $0x100] sm:$0xff]  ;;  %v724_v34 = vld [vmem:[#allocation5 + $0x10] sm:$0xff] }
  0x1f   :  { %162 = vmatprep.mubr.f32.mxu0 %v8362_v0  ;;  %186 = vmatprep.mubr.f32.mxu1 %v8362_v0  ;;  %v5873_v50 = vpack.c.bf16 %v763_v47, %v755_v46  ;;  %v762_v52 = vld [vmem:[#allocation5 + $0x140] sm:$0xff]  ;;  %v771_v53 = vld [vmem:[#allocation5 + $0x188] sm:$0xff]  ;;  %v732_v35 = vld [vmem:[#allocation5 + $0x50] sm:$0xff] }
  0x20   :  { %v779_v54 = vld [vmem:[#allocation5 + $0x1c8] sm:$0xff]  ;;  %v5875_v55 = vpack.c.bf16 %v762_v52, %v754_v51  ;;  %v770_v57 = vld [vmem:[#allocation5 + $0x180] sm:$0xff]  ;;  %v741_v38 = vld [vmem:[#allocation5 + $0x98] sm:$0xff] }
  0x21   :  { %v5877_v56 = vpack.c.bf16 %v779_v54, %v771_v53  ;;  %v778_v58 = vld [vmem:[#allocation5 + $0x1c0] sm:$0xff]  ;;  %v787_v59 = vld [vmem:[#allocation5 + $0x208] sm:$0xff]  ;;  %v749_v39 = vld [vmem:[#allocation5 + $0xd8] sm:$0xff] }
  0x22   :  { %5735 = vmatmul.mubr.msk.f32.gmra.mrb[4].mxu0 %vm61_vm0, %v8489_v29  ;;  %5739 = vmatmul.mubr.msk.f32.gmra.mrb[4].mxu1 %vm61_vm0, %v8494_v30  ;;  %v795_v60 = vld [vmem:[#allocation5 + $0x248] sm:$0xff]  ;;  %v5879_v61 = vpack.c.bf16 %v778_v58, %v770_v57  ;;  %v786_v63 = vld [vmem:[#allocation5 + $0x200] sm:$0xff]  ;;  %v5933_v45 = vpack.c.bf16 %v749_v39, %v741_v38  ;;  %v740_v46 = vld [vmem:[#allocation5 + $0x90] sm:$0xff] }
  0x23   :  { %168 = vmatprep.mubr.f32.mxu0 %v8362_v0  ;;  %192 = vmatprep.mubr.f32.mxu1 %v8362_v0  ;;  %v5881_v62 = vpack.c.bf16 %v795_v60, %v787_v59  ;;  %v794_v1 = vld [vmem:[#allocation5 + $0x240] sm:$0xff]  ;;  %v803_v2 = vld [vmem:[#allocation5 + $0x288] sm:$0xff]  ;;  %v748_v47 = vld [vmem:[#allocation5 + $0xd0] sm:$0xff] }
  0x24   :  { %v811_v3 = vld [vmem:[#allocation5 + $0x2c8] sm:$0xff]  ;;  %v5883_v4 = vpack.c.bf16 %v794_v1, %v786_v63  ;;  %v802_v6 = vld [vmem:[#allocation5 + $0x280] sm:$0xff]  ;;  %v765_v51 = vld [vmem:[#allocation5 + $0x158] sm:$0xff]  ;;  %v5935_v53 = vpack.c.bf16 %v748_v47, %v740_v46 }
  0x25   :  { %v5885_v5 = vpack.c.bf16 %v811_v3, %v803_v2  ;;  %v810_v7 = vld [vmem:[#allocation5 + $0x2c0] sm:$0xff]  ;;  %v819_v8 = vld [vmem:[#allocation5 + $0x308] sm:$0xff]  ;;  %v756_v58 = vld [vmem:[#allocation5 + $0x110] sm:$0xff] }
  0x26   :  { %5736 = vmatmul.mubr.msk.f32.gmra.mrb[6].mxu0 %vm61_vm0, %v8505_v31  ;;  %5740 = vmatmul.mubr.msk.f32.gmra.mrb[6].mxu1 %vm61_vm0, %v8510_v32  ;;  %v827_v9 = vld [vmem:[#allocation5 + $0x348] sm:$0xff]  ;;  %v5887_v10 = vpack.c.bf16 %v810_v7, %v802_v6  ;;  %v818_v14 = vld [vmem:[#allocation5 + $0x300] sm:$0xff]  ;;  %v764_v59 = vld [vmem:[#allocation5 + $0x150] sm:$0xff] }
  0x27   :  { %263 = vmatprep.mubr.f32.mxu1 %v8362_v0  ;;  %376 = vmatprep.mubr.f32.mxu0 %v8362_v0  ;;  %v5889_v11 = vpack.c.bf16 %v827_v9, %v819_v8  ;;  %v826_v15 = vld [vmem:[#allocation5 + $0x340] sm:$0xff]  ;;  %v835_v16 = vld [vmem:[#allocation5 + $0x388] sm:$0xff]  ;;  %v781_v63 = vld [vmem:[#allocation5 + $0x1d8] sm:$0xff]  ;;  %v5939_v1 = vpack.c.bf16 %v764_v59, %v756_v58 }
  0x28   :  { %v843_v17 = vld [vmem:[#allocation5 + $0x3c8] sm:$0xff]  ;;  %v5891_v18 = vpack.c.bf16 %v826_v15, %v818_v14  ;;  %v834_v20 = vld [vmem:[#allocation5 + $0x380] sm:$0xff]  ;;  %v772_v6 = vld [vmem:[#allocation5 + $0x190] sm:$0xff] }
  0x29   :  { %v5893_v19 = vpack.c.bf16 %v843_v17, %v835_v16  ;;  %v842_v21 = vld [vmem:[#allocation5 + $0x3c0] sm:$0xff]  ;;  %v851_v22 = vld [vmem:[#allocation5 + $0x408] sm:$0xff]  ;;  %v780_v7 = vld [vmem:[#allocation5 + $0x1d0] sm:$0xff] }
  0x2a   :  { %5741 = vmatmul.mubr.msk.f32.vlgmr.msra.gmra.mrb[8].mxu1 %vm61_vm0, %v8439_v12  ;;  %5749 = vmatmul.mubr.msk.f32.vlgmr.msra.gmra.mrb[8].mxu0 %vm61_vm0, %v8439_v12  ;;  %v859_v23 = vld [vmem:[#allocation5 + $0x448] sm:$0xff]  ;;  %v5895_v24 = vpack.c.bf16 %v842_v21, %v834_v20  ;;  %v850_v27 = vld [vmem:[#allocation5 + $0x400] sm:$0xff]  ;;  %v5943_v14 = vpack.c.bf16 %v780_v7, %v772_v6  ;;  %v796_v20 = vld [vmem:[#allocation5 + $0x250] sm:$0xff] }
  0x2b   :  { %5868 = vmatpush1.bf16.msra.mxu0 %v5867_v41  ;;  %5864 = vmatpush1.bf16.msra.mxu1 %v5863_v42  ;;  %v858_v28 = vld [vmem:[#allocation5 + $0x440] sm:$0xff]  ;;  %v5897_v33 = vpack.c.bf16 %v859_v23, %v851_v22  ;;  %v867_v36 = vld [vmem:[#allocation5 + $0x488] sm:$0xff]  ;;  %v5931_v41 = vpack.c.bf16 %v732_v35, %v724_v34  ;;  %v805_v23 = vld [vmem:[#allocation5 + $0x298] sm:$0xff] }
  0x2c   :  { %269 = vmatprep.mubr.f32.mxu1 %v8362_v0  ;;  %5870 = vmatprep.subr.bf16.mxu0 %v5869_v43  ;;  %v875_v37 = vld [vmem:[#allocation5 + $0x4c8] sm:$0xff]  ;;  %v5899_v40 = vpack.c.bf16 %v858_v28, %v850_v27  ;;  %v866_v42 = vld [vmem:[#allocation5 + $0x480] sm:$0xff]  ;;  %v820_v47 = vld [vmem:[#allocation5 + $0x310] sm:$0xff] }
  0x2d   :  { %5930 = vmatprep.subr.bf16.mxu1 %v5929_v48  ;;  %382 = vmatprep.mubr.f32.mxu0 %v8362_v0  ;;  %v874_v43 = vld [vmem:[#allocation5 + $0x4c0] sm:$0xff]  ;;  %v5901_v44 = vpack.c.bf16 %v875_v37, %v867_v36  ;;  %v883_v48 = vld [vmem:[#allocation5 + $0x508] sm:$0xff]  ;;  %v804_v36 = vld [vmem:[#allocation5 + $0x290] sm:$0xff] }
  0x2e   :  { %5742 = vmatmul.mubr.msk.f32.gmra.mrb[10].mxu1 %vm61_vm0, %v8472_v25  ;;  %5750 = vmatmul.mubr.msk.f32.gmra.mrb[10].mxu0 %vm61_vm0, %v8472_v25  ;;  %v5903_v52 = vpack.c.bf16 %v874_v43, %v866_v42  ;;  %v882_v54 = vld [vmem:[#allocation5 + $0x500] sm:$0xff]  ;;  %v899_v60 = vld [vmem:[#allocation5 + $0x588] sm:$0xff]  ;;  %v812_v37 = vld [vmem:[#allocation5 + $0x2d0] sm:$0xff] }
  0x2f   :  { %5872 = vmatpush1.bf16.msra.mxu0 %v5871_v49  ;;  %275 = vmatprep.mubr.f32.mxu1 %v8362_v0  ;;  %v891_v49 = vld [vmem:[#allocation5 + $0x548] sm:$0xff]  ;;  %v898_v2 = vld [vmem:[#allocation5 + $0x580] sm:$0xff]  ;;  %v5951_v42 = vpack.c.bf16 %v812_v37, %v804_v36  ;;  %v836_v58 = vld [vmem:[#allocation5 + $0x390] sm:$0xff] }
  0x30   :  { %5874 = vmatprep.subr.bf16.mxu0 %v5873_v50  ;;  %388 = vmatprep.mubr.f32.mxu0 %v8362_v0  ;;  %v757_v50 = vld [vmem:[#allocation5 + $0x118] sm:$0xff]  ;;  %v906_v3 = vld [vmem:[#allocation5 + $0x5c0] sm:$0xff]  ;;  %v915_v8 = vld [vmem:[#allocation5 + $0x608] sm:$0xff] }
  0x31   :  { %v5937_v57 = vpack.c.bf16 %v765_v51, %v757_v50  ;;  %v923_v9 = vld [vmem:[#allocation5 + $0x648] sm:$0xff]  ;;  %v914_v15 = vld [vmem:[#allocation5 + $0x600] sm:$0xff]  ;;  %v837_v51 = vld [vmem:[#allocation5 + $0x398] sm:$0xff] }
  0x32   :  { %5743 = vmatmul.mubr.msk.f32.gmra.mrb[12].mxu1 %vm61_vm0, %v8489_v29  ;;  %5751 = vmatmul.mubr.msk.f32.gmra.mrb[12].mxu0 %vm61_vm0, %v8489_v29  ;;  %v922_v16 = vld [vmem:[#allocation5 + $0x640] sm:$0xff]  ;;  %v5913_v17 = vpack.c.bf16 %v923_v9, %v915_v8  ;;  %v931_v21 = vld [vmem:[#allocation5 + $0x688] sm:$0xff]  ;;  %v844_v59 = vld [vmem:[#allocation5 + $0x3d0] sm:$0xff] }
  0x33   :  { %5876 = vmatpush1.bf16.msra.mxu0 %v5875_v55  ;;  %281 = vmatprep.mubr.f32.mxu1 %v8362_v0  ;;  %v890_v55 = vld [vmem:[#allocation5 + $0x540] sm:$0xff]  ;;  %v939_v22 = vld [vmem:[#allocation5 + $0x6c8] sm:$0xff]  ;;  %v869_v7 = vld [vmem:[#allocation5 + $0x498] sm:$0xff] }
  0x34   :  { %5878 = vmatprep.subr.bf16.mxu0 %v5877_v56  ;;  %394 = vmatprep.mubr.f32.mxu0 %v8362_v0  ;;  %v5905_v56 = vpack.c.bf16 %v891_v49, %v883_v48  ;;  %v930_v28 = vld [vmem:[#allocation5 + $0x680] sm:$0xff]  ;;  %v5917_v34 = vpack.c.bf16 %v939_v22, %v931_v21  ;;  %v947_v38 = vld [vmem:[#allocation5 + $0x708] sm:$0xff]  ;;  %v828_v48 = vld [vmem:[#allocation5 + $0x350] sm:$0xff] }
  0x35   :  { %v955_v39 = vld [vmem:[#allocation5 + $0x748] sm:$0xff]  ;;  %v946_v43 = vld [vmem:[#allocation5 + $0x700] sm:$0xff]  ;;  %v877_v8 = vld [vmem:[#allocation5 + $0x4d8] sm:$0xff] }
  0x36   :  { %5744 = vmatmul.mubr.msk.f32.gmra.mrb[14].mxu1 %vm61_vm0, %v8505_v31  ;;  %5752 = vmatmul.mubr.msk.f32.gmra.mrb[14].mxu0 %vm61_vm0, %v8505_v31  ;;  %v963_v49 = vld [vmem:[#allocation5 + $0x788] sm:$0xff]  ;;  %v734_v6 = vld [vmem:[#allocation5 + $0x60] sm:$0xff]  ;;  %v909_v36 = vld [vmem:[#allocation5 + $0x5d8] sm:$0xff] }
  0x37   :  { %5880 = vmatpush1.bf16.msra.mxu0 %v5879_v61  ;;  %287 = vmatprep.mubr.f32.mxu1 %v8362_v0  ;;  %v907_v61 = vld [vmem:[#allocation5 + $0x5c8] sm:$0xff] }
  0x38   :  { %5882 = vmatprep.subr.bf16.mxu0 %v5881_v62  ;;  %400 = vmatprep.mubr.f32.mxu0 %v8362_v0  ;;  %v773_v62 = vld [vmem:[#allocation5 + $0x198] sm:$0xff]  ;;  %v971_v50 = vld [vmem:[#allocation5 + $0x7c8] sm:$0xff] }
  0x39   :  { %v743_v9 = vld [vmem:[#allocation5 + $0xa8] sm:$0xff] }
  0x3a   :  { %5745 = vmatmul.mubr.msk.f32.gmra.mrb[16].mxu1 %vm61_vm0, %v8444_v13  ;;  %5753 = vmatmul.mubr.msk.f32.gmra.mrb[16].mxu0 %vm61_vm0, %v8444_v13  ;;  %v759_v21 = vld [vmem:[#allocation5 + $0x128] sm:$0xff] }
  0x3b   :  { %5884 = vmatpush1.bf16.msra.mxu0 %v5883_v4  ;;  %293 = vmatprep.mubr.f32.mxu1 %v8362_v0  ;;  %v5909_v4 = vpack.c.bf16 %v907_v61, %v899_v60  ;;  %v853_v60 = vld [vmem:[#allocation5 + $0x418] sm:$0xff]  ;;  %v767_v22 = vld [vmem:[#allocation5 + $0x168] sm:$0xff] }
  0x3c   :  { %5886 = vmatprep.subr.bf16.mxu0 %v5885_v5  ;;  %406 = vmatprep.mubr.f32.mxu0 %v8362_v0  ;;  %v5941_v5 = vpack.c.bf16 %v781_v63, %v773_v62  ;;  %v861_v61 = vld [vmem:[#allocation5 + $0x458] sm:$0xff]  ;;  %v727_v62 = vld [vmem:[#allocation5 + $0x28] sm:$0xff] }
  0x3d   :  { %v735_v63 = vld [vmem:[#allocation5 + $0x68] sm:$0xff] }
  0x3e   :  { %5746 = vmatmul.mubr.msk.f32.gmra.mrb[18].mxu1 %vm61_vm0, %v8477_v26  ;;  %5754 = vmatmul.mubr.msk.f32.gmra.mrb[18].mxu0 %vm61_vm0, %v8477_v26  ;;  %v775_v37 = vld [vmem:[#allocation5 + $0x1a8] sm:$0xff] }
  0x3f   :  { %5888 = vmatpush1.bf16.msra.mxu0 %v5887_v10  ;;  %299 = vmatprep.mubr.f32.mxu1 %v8362_v0  ;;  %v789_v10 = vld [vmem:[#allocation5 + $0x218] sm:$0xff] }
  0x40   :  { %5890 = vmatprep.subr.bf16.mxu0 %v5889_v11  ;;  %412 = vmatprep.mubr.f32.mxu0 %v8362_v0  ;;  %v797_v11 = vld [vmem:[#allocation5 + $0x258] sm:$0xff] }
  0x42   :  { %5747 = vmatmul.mubr.msk.f32.gmra.mrb[20].mxu1 %vm61_vm0, %v8494_v30  ;;  %5755 = vmatmul.mubr.msk.f32.gmra.mrb[20].mxu0 %vm61_vm0, %v8494_v30 }
  0x43   :  { %5892 = vmatpush1.bf16.msra.mxu0 %v5891_v18  ;;  %305 = vmatprep.mubr.f32.mxu1 %v8362_v0  ;;  %v5945_v18 = vpack.c.bf16 %v797_v11, %v789_v10  ;;  %v751_v10 = vld [vmem:[#allocation5 + $0xe8] sm:$0xff] }
  0x44   :  { %5894 = vmatprep.subr.bf16.mxu0 %v5893_v19  ;;  %418 = vmatprep.mubr.f32.mxu0 %v8362_v0  ;;  %v788_v19 = vld [vmem:[#allocation5 + $0x210] sm:$0xff] }
  0x45   :  { %v5947_v27 = vpack.c.bf16 %v796_v20, %v788_v19  ;;  %v885_v19 = vld [vmem:[#allocation5 + $0x518] sm:$0xff] }
  0x46   :  { %5748 = vmatmul.mubr.msk.f32.gmra.mrb[22].mxu1 %vm61_vm0, %v8510_v32  ;;  %5756 = vmatmul.mubr.msk.f32.gmra.mrb[22].mxu0 %vm61_vm0, %v8510_v32  ;;  %v893_v20 = vld [vmem:[#allocation5 + $0x558] sm:$0xff] }
  0x47   :  { %5896 = vmatpush1.bf16.msra.mxu0 %v5895_v24  ;;  %489 = vmatprep.mubr.f32.mxu1 %v8362_v0  ;;  %v813_v24 = vld [vmem:[#allocation5 + $0x2d8] sm:$0xff] }
  0x48   :  { %5898 = vmatprep.subr.bf16.mxu0 %v5897_v33  ;;  %1042 = vmatprep.mubr.f32.mxu0 %v8362_v0  ;;  %v938_v33 = vld [vmem:[#allocation5 + $0x6c0] sm:$0xff]  ;;  %v5949_v35 = vpack.c.bf16 %v813_v24, %v805_v23  ;;  %v884_v24 = vld [vmem:[#allocation5 + $0x510] sm:$0xff] }
  0x4a   :  { %5757 = vmatmul.mubr.msk.f32.vlgmr.msra.gmra.mrb[24].mxu1 %vm61_vm0, %v8439_v12  ;;  %v5907_v12 = vpack.c.bf16 %v890_v55, %v882_v54  ;;  %v962_v54 = vld [vmem:[#allocation5 + $0x780] sm:$0xff] }
  0x4b   :  { %5900 = vmatpush1.bf16.msra.mxu0 %v5899_v40  ;;  %5932 = vmatpush1.bf16.msra.mxu1 %v5931_v41  ;;  %v821_v40 = vld [vmem:[#allocation5 + $0x318] sm:$0xff]  ;;  %v970_v55 = vld [vmem:[#allocation5 + $0x7c0] sm:$0xff] }
  0x4c   :  { %5902 = vmatprep.subr.bf16.mxu0 %v5901_v44  ;;  %5934 = vmatprep.subr.bf16.mxu1 %v5933_v45  ;;  %v829_v41 = vld [vmem:[#allocation5 + $0x358] sm:$0xff]  ;;  %v954_v44 = vld [vmem:[#allocation5 + $0x740] sm:$0xff]  ;;  %v5921_v45 = vpack.c.bf16 %v955_v39, %v947_v38  ;;  %v783_v38 = vld [vmem:[#allocation5 + $0x1e8] sm:$0xff] }
  0x4d   :  { %495 = vmatprep.mubr.f32.mxu1 %v8362_v0  ;;  %v5953_v46 = vpack.c.bf16 %v829_v41, %v821_v40  ;;  %v900_v41 = vld [vmem:[#allocation5 + $0x590] sm:$0xff] }
  0x4e   :  { %5758 = vmatmul.mubr.msk.f32.gmra.mrb[26].mxu1 %vm61_vm0, %v8472_v25  ;;  %v5911_v25 = vpack.c.bf16 %v906_v3, %v898_v2  ;;  %v860_v2 = vld [vmem:[#allocation5 + $0x450] sm:$0xff]  ;;  %v5961_v3 = vpack.c.bf16 %v861_v61, %v853_v60  ;;  %v815_v60 = vld [vmem:[#allocation5 + $0x2e8] sm:$0xff] }
  0x4f   :  { %5904 = vmatpush1.bf16.msra.mxu0 %v5903_v52  ;;  %5936 = vmatpush1.bf16.msra.mxu1 %v5935_v53  ;;  %v845_v52 = vld [vmem:[#allocation5 + $0x3d8] sm:$0xff]  ;;  %v5955_v53 = vpack.c.bf16 %v828_v48, %v820_v47  ;;  %v791_v48 = vld [vmem:[#allocation5 + $0x228] sm:$0xff] }
  0x50   :  { %5906 = vmatprep.subr.bf16.mxu0 %v5905_v56  ;;  %5938 = vmatprep.subr.bf16.mxu1 %v5937_v57  ;;  %v5925_v56 = vpack.c.bf16 %v971_v50, %v963_v49  ;;  %v5957_v57 = vpack.c.bf16 %v845_v52, %v837_v51  ;;  %v925_v47 = vld [vmem:[#allocation5 + $0x658] sm:$0xff]  ;;  %v799_v49 = vld [vmem:[#allocation5 + $0x268] sm:$0xff]  ;;  %v916_v52 = vld [vmem:[#allocation5 + $0x610] sm:$0xff] }
  0x51   :  { %501 = vmatprep.mubr.f32.mxu1 %v8362_v0 }
  0x52   :  { %5759 = vmatmul.mubr.msk.f32.gmra.mrb[28].mxu1 %vm61_vm0, %v8489_v29  ;;  %v5915_v29 = vpack.c.bf16 %v922_v16, %v914_v15  ;;  %v5965_v15 = vpack.c.bf16 %v877_v8, %v869_v7  ;;  %v5997_v16 = vpack.c.bf16 %v751_v10, %v743_v9  ;;  %v831_v7 = vld [vmem:[#allocation5 + $0x368] sm:$0xff]  ;;  %v948_v10 = vld [vmem:[#allocation5 + $0x710] sm:$0xff] }
  0x53   :  { %5908 = vmatpush1.bf16.msra.mxu0 %v5907_v12  ;;  %5940 = vmatpush1.bf16.msra.mxu1 %v5939_v1  ;;  %v5959_v12 = vpack.c.bf16 %v844_v59, %v836_v58  ;;  %v852_v1 = vld [vmem:[#allocation5 + $0x410] sm:$0xff]  ;;  %v941_v58 = vld [vmem:[#allocation5 + $0x6d8] sm:$0xff]  ;;  %v807_v59 = vld [vmem:[#allocation5 + $0x2a8] sm:$0xff] }
  0x54   :  { %5910 = vmatprep.subr.bf16.mxu0 %v5909_v4  ;;  %5942 = vmatprep.subr.bf16.mxu1 %v5941_v5  ;;  %v5993_v4 = vpack.c.bf16 %v735_v63, %v727_v62  ;;  %v726_v5 = vld [vmem:[#allocation5 + $0x20] sm:$0xff]  ;;  %v932_v63 = vld [vmem:[#allocation5 + $0x690] sm:$0xff] }
  0x55   :  { %507 = vmatprep.mubr.f32.mxu1 %v8362_v0  ;;  %v5995_v11 = vpack.c.bf16 %v734_v6, %v726_v5  ;;  %v957_v5 = vld [vmem:[#allocation5 + $0x758] sm:$0xff]  ;;  %v823_v6 = vld [vmem:[#allocation5 + $0x328] sm:$0xff] }
  0x56   :  { %5760 = vmatmul.mubr.msk.f32.gmra.mrb[30].mxu1 %vm61_vm0, %v8505_v31  ;;  %v5919_v31 = vpack.c.bf16 %v938_v33, %v930_v28  ;;  %v6001_v28 = vpack.c.bf16 %v767_v22, %v759_v21  ;;  %v758_v33 = vld [vmem:[#allocation5 + $0x120] sm:$0xff]  ;;  %v964_v22 = vld [vmem:[#allocation5 + $0x790] sm:$0xff] }
  0x57   :  { %5912 = vmatpush1.bf16.msra.mxu0 %v5911_v25  ;;  %5944 = vmatpush1.bf16.msra.mxu1 %v5943_v14  ;;  %v868_v25 = vld [vmem:[#allocation5 + $0x490] sm:$0xff] }
  0x58   :  { %5914 = vmatprep.subr.bf16.mxu0 %v5913_v17  ;;  %5946 = vmatprep.subr.bf16.mxu1 %v5945_v18  ;;  %v876_v14 = vld [vmem:[#allocation5 + $0x4d0] sm:$0xff]  ;;  %v742_v17 = vld [vmem:[#allocation5 + $0xa0] sm:$0xff] }
  0x59   :  { %513 = vmatprep.mubr.f32.mxu1 %v8362_v0  ;;  %v750_v18 = vld [vmem:[#allocation5 + $0xe0] sm:$0xff] }
  0x5a   :  { %5761 = vmatmul.mubr.msk.f32.gmra.mrb[32].mxu1 %vm61_vm0, %v8444_v13  ;;  %v5923_v13 = vpack.c.bf16 %v954_v44, %v946_v43  ;;  %v5999_v23 = vpack.c.bf16 %v750_v18, %v742_v17  ;;  %v6005_v43 = vpack.c.bf16 %v783_v38, %v775_v37  ;;  %v774_v44 = vld [vmem:[#allocation5 + $0x1a0] sm:$0xff]  ;;  %v973_v17 = vld [vmem:[#allocation5 + $0x7d8] sm:$0xff]  ;;  %v839_v18 = vld [vmem:[#allocation5 + $0x3a8] sm:$0xff] }
  0x5b   :  { %5916 = vmatpush1.bf16.msra.mxu0 %v5915_v29  ;;  %5948 = vmatpush1.bf16.msra.mxu1 %v5947_v27  ;;  %v892_v29 = vld [vmem:[#allocation5 + $0x550] sm:$0xff]  ;;  %v5969_v27 = vpack.c.bf16 %v893_v20, %v885_v19  ;;  %v847_v19 = vld [vmem:[#allocation5 + $0x3e8] sm:$0xff]  ;;  %v854_v38 = vld [vmem:[#allocation5 + $0x420] sm:$0xff] }
  0x5c   :  { %5918 = vmatprep.subr.bf16.mxu0 %v5917_v34  ;;  %5950 = vmatprep.subr.bf16.mxu1 %v5949_v35  ;;  %v766_v34 = vld [vmem:[#allocation5 + $0x160] sm:$0xff]  ;;  %v901_v35 = vld [vmem:[#allocation5 + $0x598] sm:$0xff]  ;;  %v5971_v39 = vpack.c.bf16 %v892_v29, %v884_v24  ;;  %v6021_v24 = vpack.c.bf16 %v847_v19, %v839_v18 }
  0x5d   :  { %519 = vmatprep.mubr.f32.mxu1 %v8362_v0  ;;  %v6003_v40 = vpack.c.bf16 %v766_v34, %v758_v33  ;;  %v838_v29 = vld [vmem:[#allocation5 + $0x3a0] sm:$0xff]  ;;  %v863_v33 = vld [vmem:[#allocation5 + $0x468] sm:$0xff]  ;;  %v729_v34 = vld [vmem:[#allocation5 + $0x38] sm:$0xff] }
  0x5e   :  { %5762 = vmatmul.mubr.msk.f32.gmra.mrb[34].mxu1 %vm61_vm0, %v8477_v26  ;;  %v5927_v26 = vpack.c.bf16 %v970_v55, %v962_v54  ;;  %v6009_v54 = vpack.c.bf16 %v799_v49, %v791_v48  ;;  %v790_v55 = vld [vmem:[#allocation5 + $0x220] sm:$0xff] }
  0x5f   :  { %5920 = vmatpush1.bf16.msra.mxu0 %v5919_v31  ;;  %5952 = vmatpush1.bf16.msra.mxu1 %v5951_v42  ;;  %v908_v31 = vld [vmem:[#allocation5 + $0x5d0] sm:$0xff]  ;;  %v5973_v42 = vpack.c.bf16 %v909_v36, %v901_v35  ;;  %v737_v35 = vld [vmem:[#allocation5 + $0x78] sm:$0xff]  ;;  %v870_v49 = vld [vmem:[#allocation5 + $0x4a0] sm:$0xff] }
  0x60   :  { %5922 = vmatprep.subr.bf16.mxu0 %v5921_v45  ;;  %5954 = vmatprep.subr.bf16.mxu1 %v5953_v46  ;;  %v782_v45 = vld [vmem:[#allocation5 + $0x1e0] sm:$0xff]  ;;  %v917_v46 = vld [vmem:[#allocation5 + $0x618] sm:$0xff]  ;;  %v5975_v50 = vpack.c.bf16 %v908_v31, %v900_v41  ;;  %v6057_v41 = vpack.c.bf16 %v737_v35, %v729_v34  ;;  %v728_v31 = vld [vmem:[#allocation5 + $0x30] sm:$0xff] }
  0x61   :  { %525 = vmatprep.mubr.f32.mxu1 %v8362_v0  ;;  %v6007_v51 = vpack.c.bf16 %v782_v45, %v774_v44  ;;  %v879_v44 = vld [vmem:[#allocation5 + $0x4e8] sm:$0xff]  ;;  %v745_v45 = vld [vmem:[#allocation5 + $0xb8] sm:$0xff]  ;;  %v918_v19 = vld [vmem:[#allocation5 + $0x620] sm:$0xff] }
  0x62   :  { %5763 = vmatmul.mubr.msk.f32.gmra.mrb[36].mxu1 %vm61_vm0, %v8494_v30  ;;  %v5963_v30 = vpack.c.bf16 %v860_v2, %v852_v1  ;;  %v6013_v1 = vpack.c.bf16 %v815_v60, %v807_v59  ;;  %v806_v2 = vld [vmem:[#allocation5 + $0x2a0] sm:$0xff] }
  0x63   :  { %5924 = vmatpush1.bf16.msra.mxu0 %v5923_v13  ;;  %5956 = vmatpush1.bf16.msra.mxu1 %v5955_v53  ;;  %v924_v13 = vld [vmem:[#allocation5 + $0x650] sm:$0xff]  ;;  %v5977_v53 = vpack.c.bf16 %v925_v47, %v917_v46  ;;  %v753_v46 = vld [vmem:[#allocation5 + $0xf8] sm:$0xff]  ;;  %v886_v60 = vld [vmem:[#allocation5 + $0x520] sm:$0xff] }
  0x64   :  { %5926 = vmatprep.subr.bf16.mxu0 %v5925_v56  ;;  %5958 = vmatprep.subr.bf16.mxu1 %v5957_v57  ;;  %v798_v56 = vld [vmem:[#allocation5 + $0x260] sm:$0xff]  ;;  %v933_v57 = vld [vmem:[#allocation5 + $0x698] sm:$0xff]  ;;  %v5979_v61 = vpack.c.bf16 %v924_v13, %v916_v52  ;;  %v6061_v52 = vpack.c.bf16 %v753_v46, %v745_v45  ;;  %v744_v13 = vld [vmem:[#allocation5 + $0xb0] sm:$0xff] }
  0x65   :  { %531 = vmatprep.mubr.f32.mxu1 %v8362_v0  ;;  %v6011_v62 = vpack.c.bf16 %v798_v56, %v790_v55  ;;  %v895_v55 = vld [vmem:[#allocation5 + $0x568] sm:$0xff]  ;;  %v761_v56 = vld [vmem:[#allocation5 + $0x138] sm:$0xff]  ;;  %v934_v35 = vld [vmem:[#allocation5 + $0x6a0] sm:$0xff] }
  0x66   :  { %5764 = vmatmul.mubr.msk.f32.gmra.mrb[38].mxu1 %vm61_vm0, %v8510_v32  ;;  %v5967_v32 = vpack.c.bf16 %v876_v14, %v868_v25  ;;  %v6017_v25 = vpack.c.bf16 %v831_v7, %v823_v6  ;;  %v822_v14 = vld [vmem:[#allocation5 + $0x320] sm:$0xff] }
  0x67   :  { %5928 = vmatpush1.bf16.msra.mxu0 %v5927_v26  ;;  %5960 = vmatpush1.bf16.msra.mxu1 %v5959_v12  ;;  %v940_v26 = vld [vmem:[#allocation5 + $0x6d0] sm:$0xff]  ;;  %v5981_v12 = vpack.c.bf16 %v941_v58, %v933_v57  ;;  %v769_v57 = vld [vmem:[#allocation5 + $0x178] sm:$0xff]  ;;  %v902_v7 = vld [vmem:[#allocation5 + $0x5a0] sm:$0xff] }
  0x68   :  { %5962 = vmatprep.subr.bf16.mxu1 %v5961_v3  ;;  %5994 = vmatprep.subr.bf16.mxu0 %v5993_v4  ;;  %v814_v3 = vld [vmem:[#allocation5 + $0x2e0] sm:$0xff]  ;;  %v949_v4 = vld [vmem:[#allocation5 + $0x718] sm:$0xff]  ;;  %v5983_v8 = vpack.c.bf16 %v940_v26, %v932_v63  ;;  %v6065_v63 = vpack.c.bf16 %v769_v57, %v761_v56  ;;  %v760_v26 = vld [vmem:[#allocation5 + $0x130] sm:$0xff] }
  0x69   :  { %1113 = vmatprep.mubr.f32.mxu1 %v8362_v0  ;;  %v6015_v9 = vpack.c.bf16 %v814_v3, %v806_v2  ;;  %v911_v2 = vld [vmem:[#allocation5 + $0x5e8] sm:$0xff]  ;;  %v777_v3 = vld [vmem:[#allocation5 + $0x1b8] sm:$0xff]  ;;  %v950_v46 = vld [vmem:[#allocation5 + $0x720] sm:$0xff] }
  0x6a   :  { %1043 = vmatmul.mubr.f32.vlgmr.msra.gmra.mrb[0].mxu0 %v8362_v0  ;;  %v966_v57 = vld [vmem:[#allocation5 + $0x7a0] sm:$0xff] }
  0x6b   :  { %5964 = vmatpush1.bf16.msra.mxu1 %v5963_v30  ;;  %5996 = vmatpush1.bf16.msra.mxu0 %v5995_v11  ;;  %v956_v30 = vld [vmem:[#allocation5 + $0x750] sm:$0xff]  ;;  %v5985_v11 = vpack.c.bf16 %v957_v5, %v949_v4  ;;  %v785_v4 = vld [vmem:[#allocation5 + $0x1f8] sm:$0xff] }
  0x6c   :  { %5966 = vmatprep.subr.bf16.mxu1 %v5965_v15  ;;  %5998 = vmatprep.subr.bf16.mxu0 %v5997_v16  ;;  %v830_v15 = vld [vmem:[#allocation5 + $0x360] sm:$0xff]  ;;  %v965_v16 = vld [vmem:[#allocation5 + $0x798] sm:$0xff]  ;;  %v5987_v20 = vpack.c.bf16 %v956_v30, %v948_v10  ;;  %v6069_v10 = vpack.c.bf16 %v785_v4, %v777_v3  ;;  %v776_v30 = vld [vmem:[#allocation5 + $0x1b0] sm:$0xff] }
  0x6d   :  { %1184 = vmatprep.mubr.f32.mxu0 %v8362_v0  ;;  %v6019_v21 = vpack.c.bf16 %v830_v15, %v822_v14  ;;  %v927_v14 = vld [vmem:[#allocation5 + $0x668] sm:$0xff]  ;;  %v793_v15 = vld [vmem:[#allocation5 + $0x238] sm:$0xff]  ;;  %v856_v3 = vld [vmem:[#allocation5 + $0x430] sm:$0xff] }
  0x6e   :  { %v864_v4 = vld [vmem:[#allocation5 + $0x470] sm:$0xff] }
  0x6f   :  { %5968 = vmatpush1.bf16.msra.mxu1 %v5967_v32  ;;  %6000 = vmatpush1.bf16.msra.mxu0 %v5999_v23  ;;  %v972_v32 = vld [vmem:[#allocation5 + $0x7d0] sm:$0xff]  ;;  %v5989_v23 = vpack.c.bf16 %v973_v17, %v965_v16  ;;  %v801_v16 = vld [vmem:[#allocation5 + $0x278] sm:$0xff] }
  0x70   :  { %5970 = vmatprep.subr.bf16.mxu1 %v5969_v27  ;;  %6002 = vmatprep.subr.bf16.mxu0 %v6001_v28  ;;  %v846_v27 = vld [vmem:[#allocation5 + $0x3e0] sm:$0xff]  ;;  %v855_v28 = vld [vmem:[#allocation5 + $0x428] sm:$0xff]  ;;  %v5991_v36 = vpack.c.bf16 %v972_v32, %v964_v22  ;;  %v6073_v22 = vpack.c.bf16 %v801_v16, %v793_v15  ;;  %v792_v32 = vld [vmem:[#allocation5 + $0x230] sm:$0xff] }
  0x71   :  { %v6023_v37 = vpack.c.bf16 %v846_v27, %v838_v29  ;;  %v943_v29 = vld [vmem:[#allocation5 + $0x6e8] sm:$0xff]  ;;  %v809_v27 = vld [vmem:[#allocation5 + $0x2b8] sm:$0xff]  ;;  %v888_v15 = vld [vmem:[#allocation5 + $0x530] sm:$0xff] }
  0x72   :  { %v896_v16 = vld [vmem:[#allocation5 + $0x570] sm:$0xff] }
  0x73   :  { %5972 = vmatpush1.bf16.msra.mxu1 %v5971_v39  ;;  %6004 = vmatpush1.bf16.msra.mxu0 %v6003_v40  ;;  %v862_v39 = vld [vmem:[#allocation5 + $0x460] sm:$0xff]  ;;  %v6025_v40 = vpack.c.bf16 %v863_v33, %v855_v28  ;;  %v817_v28 = vld [vmem:[#allocation5 + $0x2f8] sm:$0xff] }
  0x74   :  { %5974 = vmatprep.subr.bf16.mxu1 %v5973_v42  ;;  %6006 = vmatprep.subr.bf16.mxu0 %v6005_v43  ;;  %v736_v42 = vld [vmem:[#allocation5 + $0x70] sm:$0xff]  ;;  %v871_v43 = vld [vmem:[#allocation5 + $0x4a8] sm:$0xff]  ;;  %v6027_v47 = vpack.c.bf16 %v862_v39, %v854_v38  ;;  %v6077_v38 = vpack.c.bf16 %v817_v28, %v809_v27 }
  0x75   :  { %v6059_v48 = vpack.c.bf16 %v736_v42, %v728_v31  ;;  %v808_v39 = vld [vmem:[#allocation5 + $0x2b0] sm:$0xff]  ;;  %v959_v31 = vld [vmem:[#allocation5 + $0x768] sm:$0xff]  ;;  %v825_v42 = vld [vmem:[#allocation5 + $0x338] sm:$0xff] }
  0x76   :  { %v920_v27 = vld [vmem:[#allocation5 + $0x630] sm:$0xff] }
  0x77   :  { %5976 = vmatpush1.bf16.msra.mxu1 %v5975_v50  ;;  %6008 = vmatpush1.bf16.msra.mxu0 %v6007_v51  ;;  %v878_v50 = vld [vmem:[#allocation5 + $0x4e0] sm:$0xff]  ;;  %v6029_v51 = vpack.c.bf16 %v879_v44, %v871_v43  ;;  %v833_v43 = vld [vmem:[#allocation5 + $0x378] sm:$0xff]  ;;  %v928_v28 = vld [vmem:[#allocation5 + $0x670] sm:$0xff] }
  0x78   :  { %5978 = vmatprep.subr.bf16.mxu1 %v5977_v53  ;;  %6010 = vmatprep.subr.bf16.mxu0 %v6009_v54  ;;  %v752_v53 = vld [vmem:[#allocation5 + $0xf0] sm:$0xff]  ;;  %v887_v54 = vld [vmem:[#allocation5 + $0x528] sm:$0xff]  ;;  %v6031_v58 = vpack.c.bf16 %v878_v50, %v870_v49  ;;  %v6081_v49 = vpack.c.bf16 %v833_v43, %v825_v42 }
  0x79   :  { %v6063_v59 = vpack.c.bf16 %v752_v53, %v744_v13  ;;  %v824_v50 = vld [vmem:[#allocation5 + $0x330] sm:$0xff]  ;;  %v975_v13 = vld [vmem:[#allocation5 + $0x7e8] sm:$0xff]  ;;  %v841_v53 = vld [vmem:[#allocation5 + $0x3b8] sm:$0xff] }
  0x7a   :  { %v952_v42 = vld [vmem:[#allocation5 + $0x730] sm:$0xff] }
  0x7b   :  { %5980 = vmatpush1.bf16.msra.mxu1 %v5979_v61  ;;  %6012 = vmatpush1.bf16.msra.mxu0 %v6011_v62  ;;  %v894_v61 = vld [vmem:[#allocation5 + $0x560] sm:$0xff]  ;;  %v6033_v62 = vpack.c.bf16 %v895_v55, %v887_v54  ;;  %v849_v54 = vld [vmem:[#allocation5 + $0x3f8] sm:$0xff]  ;;  %v960_v43 = vld [vmem:[#allocation5 + $0x770] sm:$0xff] }
  0x7c   :  { %5982 = vmatprep.subr.bf16.mxu1 %v5981_v12  ;;  %6014 = vmatprep.subr.bf16.mxu0 %v6013_v1  ;;  %v768_v12 = vld [vmem:[#allocation5 + $0x170] sm:$0xff]  ;;  %v903_v1 = vld [vmem:[#allocation5 + $0x5a8] sm:$0xff]  ;;  %v6035_v5 = vpack.c.bf16 %v894_v61, %v886_v60  ;;  %v974_v60 = vld [vmem:[#allocation5 + $0x7e0] sm:$0xff] }
  0x7d   :  { %v6067_v6 = vpack.c.bf16 %v768_v12, %v760_v26  ;;  %v840_v61 = vld [vmem:[#allocation5 + $0x3b0] sm:$0xff]  ;;  %v865_v26 = vld [vmem:[#allocation5 + $0x478] sm:$0xff]  ;;  %v6055_v12 = vpack.c.bf16 %v974_v60, %v966_v57 }
  0x7e   :  { %v1338_v60 = vld [vmem:[#allocation5 + $0x18] sm:$0xff] }
  0x7f   :  { %5984 = vmatpush1.bf16.msra.mxu1 %v5983_v8  ;;  %6016 = vmatpush1.bf16.msra.mxu0 %v6015_v9  ;;  %v910_v8 = vld [vmem:[#allocation5 + $0x5e0] sm:$0xff]  ;;  %v6037_v9 = vpack.c.bf16 %v911_v2, %v903_v1 }
  0x80   :  { %5986 = vmatprep.subr.bf16.mxu1 %v5985_v11  ;;  %6018 = vmatprep.subr.bf16.mxu0 %v6017_v25  ;;  %v784_v11 = vld [vmem:[#allocation5 + $0x1f0] sm:$0xff]  ;;  %v919_v25 = vld [vmem:[#allocation5 + $0x628] sm:$0xff]  ;;  %v6039_v17 = vpack.c.bf16 %v910_v8, %v902_v7  ;;  %v6091_v7 = vpack.c.bf16 %v864_v4, %v856_v3 }
  0x81   :  { %v6071_v18 = vpack.c.bf16 %v784_v11, %v776_v30  ;;  %v889_v30 = vld [vmem:[#allocation5 + $0x538] sm:$0xff]  ;;  %v1352_v4 = vld [vmem:[#allocation5 + $0x88] sm:$0xff] }
  0x82   :  { %v897_v11 = vld [vmem:[#allocation5 + $0x578] sm:$0xff] }
  0x83   :  { %5988 = vmatpush1.bf16.msra.mxu1 %v5987_v20  ;;  %6020 = vmatpush1.bf16.msra.mxu0 %v6019_v21  ;;  %v926_v20 = vld [vmem:[#allocation5 + $0x660] sm:$0xff]  ;;  %v6041_v21 = vpack.c.bf16 %v927_v14, %v919_v25  ;;  %v6097_v14 = vpack.c.bf16 %v897_v11, %v889_v30 }
  0x84   :  { %5990 = vmatprep.subr.bf16.mxu1 %v5989_v23  ;;  %6022 = vmatprep.subr.bf16.mxu0 %v6021_v24  ;;  %v800_v23 = vld [vmem:[#allocation5 + $0x270] sm:$0xff]  ;;  %v935_v24 = vld [vmem:[#allocation5 + $0x6a8] sm:$0xff]  ;;  %v6043_v33 = vpack.c.bf16 %v926_v20, %v918_v19  ;;  %v6099_v19 = vpack.c.bf16 %v896_v16, %v888_v15 }
  0x85   :  { %v6075_v34 = vpack.c.bf16 %v800_v23, %v792_v32  ;;  %v921_v32 = vld [vmem:[#allocation5 + $0x638] sm:$0xff]  ;;  %v1368_v16 = vld [vmem:[#allocation5 + $0x108] sm:$0xff] }
  0x86   :  { %v929_v23 = vld [vmem:[#allocation5 + $0x678] sm:$0xff] }
  0x87   :  { %5992 = vmatpush1.bf16.msra.mxu1 %v5991_v36  ;;  %6024 = vmatpush1.bf16.msra.mxu0 %v6023_v37  ;;  %v942_v36 = vld [vmem:[#allocation5 + $0x6e0] sm:$0xff]  ;;  %v6045_v37 = vpack.c.bf16 %v943_v29, %v935_v24  ;;  %v6105_v29 = vpack.c.bf16 %v929_v23, %v921_v32 }
  0x88   :  { %6026 = vmatprep.subr.bf16.mxu0 %v6025_v40  ;;  %6058 = vmatprep.subr.bf16.mxu1 %v6057_v41  ;;  %v816_v40 = vld [vmem:[#allocation5 + $0x2f0] sm:$0xff]  ;;  %v951_v41 = vld [vmem:[#allocation5 + $0x728] sm:$0xff]  ;;  %v6047_v44 = vpack.c.bf16 %v942_v36, %v934_v35  ;;  %v6107_v35 = vpack.c.bf16 %v928_v28, %v920_v27 }
  0x89   :  { %v6079_v45 = vpack.c.bf16 %v816_v40, %v808_v39  ;;  %v953_v39 = vld [vmem:[#allocation5 + $0x738] sm:$0xff]  ;;  %v1384_v28 = vld [vmem:[#allocation5 + $0x188] sm:$0xff] }
  0x8a   :  { %1114 = vmatmul.mubr.f32.vlgmr.msra.gmra.mrb[8].mxu1 %v8362_v0  ;;  %v961_v40 = vld [vmem:[#allocation5 + $0x778] sm:$0xff] }
  0x8b   :  { %6028 = vmatpush1.bf16.msra.mxu0 %v6027_v47  ;;  %6060 = vmatpush1.bf16.msra.mxu1 %v6059_v48  ;;  %v958_v47 = vld [vmem:[#allocation5 + $0x760] sm:$0xff]  ;;  %v6049_v48 = vpack.c.bf16 %v959_v31, %v951_v41  ;;  %v6113_v31 = vpack.c.bf16 %v961_v40, %v953_v39 }
  0x8c   :  { %6030 = vmatprep.subr.bf16.mxu0 %v6029_v51  ;;  %6062 = vmatprep.subr.bf16.mxu1 %v6061_v52  ;;  %v832_v51 = vld [vmem:[#allocation5 + $0x370] sm:$0xff]  ;;  %v967_v52 = vld [vmem:[#allocation5 + $0x7a8] sm:$0xff]  ;;  %v6051_v55 = vpack.c.bf16 %v958_v47, %v950_v46  ;;  %v6115_v46 = vpack.c.bf16 %v960_v43, %v952_v42 }
  0x8d   :  { %1255 = vmatprep.mubr.f32.mxu1 %v8362_v0  ;;  %v6083_v56 = vpack.c.bf16 %v832_v51, %v824_v50  ;;  %v1400_v43 = vld [vmem:[#allocation5 + $0x208] sm:$0xff] }
  0x8f   :  { %6032 = vmatpush1.bf16.msra.mxu0 %v6031_v58  ;;  %6064 = vmatpush1.bf16.msra.mxu1 %v6063_v59  ;;  %v6053_v58 = vpack.c.bf16 %v975_v13, %v967_v52  ;;  %v6085_v59 = vpack.c.bf16 %v849_v54, %v841_v53 }
  0x90   :  { %6034 = vmatprep.subr.bf16.mxu0 %v6033_v62  ;;  %6066 = vmatprep.subr.bf16.mxu1 %v6065_v63  ;;  %v848_v62 = vld [vmem:[#allocation5 + $0x3f0] sm:$0xff]  ;;  %v857_v63 = vld [vmem:[#allocation5 + $0x438] sm:$0xff] }
  0x91   :  { %v6087_v1 = vpack.c.bf16 %v848_v62, %v840_v61  ;;  %v6089_v2 = vpack.c.bf16 %v865_v26, %v857_v63  ;;  %v1346_v61 = vld [vmem:[#allocation5 + $0x58] sm:$0xff]  ;;  %v1335_v62 = vld [vmem:[#allocation5] sm:$0xff] }
  0x92   :  { %v1343_v63 = vld [vmem:[#allocation5 + $0x40] sm:$0xff]  ;;  %v6185_v26 = vpack.c.bf16 %v1346_v61, %v1338_v60  ;;  %v1409_v60 = vld [vmem:[#allocation5 + $0x250] sm:$0xff]  ;;  %v1416_v61 = vld [vmem:[#allocation5 + $0x288] sm:$0xff] }
  0x93   :  { %6036 = vmatpush1.bf16.msra.mxu0 %v6035_v5  ;;  %6068 = vmatpush1.bf16.msra.mxu1 %v6067_v6  ;;  %v873_v5 = vld [vmem:[#allocation5 + $0x4b8] sm:$0xff] }
  0x94   :  { %6038 = vmatprep.subr.bf16.mxu0 %v6037_v9  ;;  %6070 = vmatprep.subr.bf16.mxu1 %v6069_v10  ;;  %v881_v6 = vld [vmem:[#allocation5 + $0x4f8] sm:$0xff]  ;;  %v872_v9 = vld [vmem:[#allocation5 + $0x4b0] sm:$0xff] }
  0x95   :  { %v6093_v8 = vpack.c.bf16 %v881_v6, %v873_v5  ;;  %v880_v10 = vld [vmem:[#allocation5 + $0x4f0] sm:$0xff]  ;;  %v1360_v5 = vld [vmem:[#allocation5 + $0xc8] sm:$0xff]  ;;  %v1354_v6 = vld [vmem:[#allocation5 + $0x98] sm:$0xff] }
  0x96   :  { %v6095_v25 = vpack.c.bf16 %v880_v10, %v872_v9  ;;  %v1351_v9 = vld [vmem:[#allocation5 + $0x80] sm:$0xff] }
  0x97   :  { %6040 = vmatpush1.bf16.msra.mxu0 %v6039_v17  ;;  %6072 = vmatpush1.bf16.msra.mxu1 %v6071_v18  ;;  %v905_v17 = vld [vmem:[#allocation5 + $0x5b8] sm:$0xff]  ;;  %v1359_v10 = vld [vmem:[#allocation5 + $0xc0] sm:$0xff] }
  0x98   :  { %6042 = vmatprep.subr.bf16.mxu0 %v6041_v21  ;;  %6074 = vmatprep.subr.bf16.mxu1 %v6073_v22  ;;  %v913_v18 = vld [vmem:[#allocation5 + $0x5f8] sm:$0xff]  ;;  %v904_v21 = vld [vmem:[#allocation5 + $0x5b0] sm:$0xff]  ;;  %v6127_v11 = vpack.c.bf16 %v1359_v10, %v1351_v9  ;;  %v1440_v9 = vld [vmem:[#allocation5 + $0x348] sm:$0xff] }
  0x99   :  { %v6101_v20 = vpack.c.bf16 %v913_v18, %v905_v17  ;;  %v912_v22 = vld [vmem:[#allocation5 + $0x5f0] sm:$0xff]  ;;  %v1376_v17 = vld [vmem:[#allocation5 + $0x148] sm:$0xff]  ;;  %v1370_v18 = vld [vmem:[#allocation5 + $0x118] sm:$0xff] }
  0x9a   :  { %v6103_v24 = vpack.c.bf16 %v912_v22, %v904_v21  ;;  %v1367_v21 = vld [vmem:[#allocation5 + $0x100] sm:$0xff]  ;;  %v1434_v10 = vld [vmem:[#allocation5 + $0x318] sm:$0xff] }
  0x9b   :  { %6044 = vmatpush1.bf16.msra.mxu0 %v6043_v33  ;;  %6076 = vmatpush1.bf16.msra.mxu1 %v6075_v34  ;;  %v937_v33 = vld [vmem:[#allocation5 + $0x6b8] sm:$0xff]  ;;  %v1375_v22 = vld [vmem:[#allocation5 + $0x140] sm:$0xff] }
  0x9c   :  { %6046 = vmatprep.subr.bf16.mxu0 %v6045_v37  ;;  %6078 = vmatprep.subr.bf16.mxu1 %v6077_v38  ;;  %v945_v34 = vld [vmem:[#allocation5 + $0x6f8] sm:$0xff]  ;;  %v936_v37 = vld [vmem:[#allocation5 + $0x6b0] sm:$0xff]  ;;  %v6131_v23 = vpack.c.bf16 %v1375_v22, %v1367_v21  ;;  %v1456_v21 = vld [vmem:[#allocation5 + $0x3c8] sm:$0xff] }
  0x9d   :  { %v6109_v36 = vpack.c.bf16 %v945_v34, %v937_v33  ;;  %v944_v38 = vld [vmem:[#allocation5 + $0x6f0] sm:$0xff]  ;;  %v1392_v33 = vld [vmem:[#allocation5 + $0x1c8] sm:$0xff]  ;;  %v1386_v34 = vld [vmem:[#allocation5 + $0x198] sm:$0xff] }
  0x9e   :  { %v6111_v41 = vpack.c.bf16 %v944_v38, %v936_v37  ;;  %v1383_v37 = vld [vmem:[#allocation5 + $0x180] sm:$0xff]  ;;  %v1450_v22 = vld [vmem:[#allocation5 + $0x398] sm:$0xff] }
  0x9f   :  { %6048 = vmatpush1.bf16.msra.mxu0 %v6047_v44  ;;  %6080 = vmatpush1.bf16.msra.mxu1 %v6079_v45  ;;  %v969_v44 = vld [vmem:[#allocation5 + $0x7b8] sm:$0xff]  ;;  %v1391_v38 = vld [vmem:[#allocation5 + $0x1c0] sm:$0xff] }
  0xa0   :  { %6050 = vmatprep.subr.bf16.mxu0 %v6049_v48  ;;  %6082 = vmatprep.subr.bf16.mxu1 %v6081_v49  ;;  %v977_v45 = vld [vmem:[#allocation5 + $0x7f8] sm:$0xff]  ;;  %v968_v48 = vld [vmem:[#allocation5 + $0x7b0] sm:$0xff]  ;;  %v6135_v40 = vpack.c.bf16 %v1391_v38, %v1383_v37  ;;  %v1472_v37 = vld [vmem:[#allocation5 + $0x448] sm:$0xff] }
  0xa1   :  { %v6117_v47 = vpack.c.bf16 %v977_v45, %v969_v44  ;;  %v976_v49 = vld [vmem:[#allocation5 + $0x7f0] sm:$0xff]  ;;  %v1408_v44 = vld [vmem:[#allocation5 + $0x248] sm:$0xff]  ;;  %v1402_v45 = vld [vmem:[#allocation5 + $0x218] sm:$0xff] }
  0xa2   :  { %v6119_v50 = vpack.c.bf16 %v976_v49, %v968_v48  ;;  %v1399_v48 = vld [vmem:[#allocation5 + $0x200] sm:$0xff]  ;;  %v1466_v38 = vld [vmem:[#allocation5 + $0x418] sm:$0xff] }
  0xa3   :  { %6052 = vmatpush1.bf16.msra.mxu0 %v6051_v55  ;;  %6084 = vmatpush1.bf16.msra.mxu1 %v6083_v56  ;;  %v1407_v49 = vld [vmem:[#allocation5 + $0x240] sm:$0xff] }
  0xa4   :  { %6054 = vmatprep.subr.bf16.mxu0 %v6053_v58  ;;  %6086 = vmatprep.subr.bf16.mxu1 %v6085_v59  ;;  %v1336_v58 = vld [vmem:[#allocation5 + $0x8] sm:$0xff] }
  0xa5   :  { %v1344_v59 = vld [vmem:[#allocation5 + $0x48] sm:$0xff] }
  0xa7   :  { %6056 = vmatpush1.bf16.msra.mxu0 %v6055_v12  ;;  %6088 = vmatpush1.bf16.msra.mxu1 %v6087_v1  ;;  %v6123_v12 = vpack.c.bf16 %v1343_v63, %v1335_v62  ;;  %v1337_v1 = vld [vmem:[#allocation5 + $0x10] sm:$0xff]  ;;  %v1424_v62 = vld [vmem:[#allocation5 + $0x2c8] sm:$0xff]  ;;  %v1418_v63 = vld [vmem:[#allocation5 + $0x298] sm:$0xff] }
  0xa8   :  { %6090 = vmatprep.subr.bf16.mxu1 %v6089_v2  ;;  %v1345_v2 = vld [vmem:[#allocation5 + $0x50] sm:$0xff] }
  0xa9   :  { %v6187_v3 = vpack.c.bf16 %v1345_v2, %v1337_v1  ;;  %v1415_v1 = vld [vmem:[#allocation5 + $0x280] sm:$0xff] }
  0xaa   :  { %1185 = vmatmul.mubr.f32.vlgmr.msra.gmra.mrb[8].mxu0 %v8362_v0  ;;  %v1423_v2 = vld [vmem:[#allocation5 + $0x2c0] sm:$0xff] }
  0xab   :  { %6092 = vmatpush1.bf16.msra.mxu1 %v6091_v7  ;;  %v6125_v7 = vpack.c.bf16 %v1360_v5, %v1352_v4  ;;  %v6143_v4 = vpack.c.bf16 %v1423_v2, %v1415_v1  ;;  %v1417_v5 = vld [vmem:[#allocation5 + $0x290] sm:$0xff]  ;;  %v1504_v1 = vld [vmem:[#allocation5 + $0x548] sm:$0xff]  ;;  %v1498_v2 = vld [vmem:[#allocation5 + $0x518] sm:$0xff] }
  0xac   :  { %6094 = vmatprep.subr.bf16.mxu1 %v6093_v8  ;;  %v1362_v8 = vld [vmem:[#allocation5 + $0xd8] sm:$0xff] }
  0xad   :  { %v6189_v30 = vpack.c.bf16 %v1362_v8, %v1354_v6  ;;  %v1425_v6 = vld [vmem:[#allocation5 + $0x2d0] sm:$0xff]  ;;  %v1432_v8 = vld [vmem:[#allocation5 + $0x308] sm:$0xff] }
  0xaf   :  { %6096 = vmatpush1.bf16.msra.mxu1 %v6095_v25  ;;  %v1353_v25 = vld [vmem:[#allocation5 + $0x90] sm:$0xff] }
  0xb0   :  { %6098 = vmatprep.subr.bf16.mxu1 %v6097_v14  ;;  %v1361_v14 = vld [vmem:[#allocation5 + $0xd0] sm:$0xff] }
  0xb1   :  { %v6191_v15 = vpack.c.bf16 %v1361_v14, %v1353_v25  ;;  %v1431_v25 = vld [vmem:[#allocation5 + $0x300] sm:$0xff] }
  0xb2   :  { %v1439_v14 = vld [vmem:[#allocation5 + $0x340] sm:$0xff] }
  0xb3   :  { %6100 = vmatpush1.bf16.msra.mxu1 %v6099_v19  ;;  %v6129_v19 = vpack.c.bf16 %v1376_v17, %v1368_v16  ;;  %v6147_v16 = vpack.c.bf16 %v1439_v14, %v1431_v25  ;;  %v1433_v17 = vld [vmem:[#allocation5 + $0x310] sm:$0xff]  ;;  %v1520_v25 = vld [vmem:[#allocation5 + $0x5c8] sm:$0xff]  ;;  %v1514_v14 = vld [vmem:[#allocation5 + $0x598] sm:$0xff] }
  0xb4   :  { %6102 = vmatprep.subr.bf16.mxu1 %v6101_v20  ;;  %v1378_v20 = vld [vmem:[#allocation5 + $0x158] sm:$0xff] }
  0xb5   :  { %v6193_v32 = vpack.c.bf16 %v1378_v20, %v1370_v18  ;;  %v1441_v18 = vld [vmem:[#allocation5 + $0x350] sm:$0xff]  ;;  %v1448_v20 = vld [vmem:[#allocation5 + $0x388] sm:$0xff] }
  0xb7   :  { %6104 = vmatpush1.bf16.msra.mxu1 %v6103_v24  ;;  %v1369_v24 = vld [vmem:[#allocation5 + $0x110] sm:$0xff] }
  0xb8   :  { %6106 = vmatprep.subr.bf16.mxu1 %v6105_v29  ;;  %v1377_v29 = vld [vmem:[#allocation5 + $0x150] sm:$0xff] }
  0xb9   :  { %v6195_v27 = vpack.c.bf16 %v1377_v29, %v1369_v24  ;;  %v1447_v24 = vld [vmem:[#allocation5 + $0x380] sm:$0xff] }
  0xba   :  { %v1455_v29 = vld [vmem:[#allocation5 + $0x3c0] sm:$0xff] }
  0xbb   :  { %6108 = vmatpush1.bf16.msra.mxu1 %v6107_v35  ;;  %v6133_v35 = vpack.c.bf16 %v1392_v33, %v1384_v28  ;;  %v6151_v28 = vpack.c.bf16 %v1455_v29, %v1447_v24  ;;  %v1449_v33 = vld [vmem:[#allocation5 + $0x390] sm:$0xff]  ;;  %v1536_v24 = vld [vmem:[#allocation5 + $0x648] sm:$0xff]  ;;  %v1530_v29 = vld [vmem:[#allocation5 + $0x618] sm:$0xff] }
  0xbc   :  { %6110 = vmatprep.subr.bf16.mxu1 %v6109_v36  ;;  %v1394_v36 = vld [vmem:[#allocation5 + $0x1d8] sm:$0xff] }
  0xbd   :  { %v6197_v39 = vpack.c.bf16 %v1394_v36, %v1386_v34  ;;  %v1457_v34 = vld [vmem:[#allocation5 + $0x3d0] sm:$0xff]  ;;  %v1464_v36 = vld [vmem:[#allocation5 + $0x408] sm:$0xff] }
  0xbf   :  { %6112 = vmatpush1.bf16.msra.mxu1 %v6111_v41  ;;  %v1385_v41 = vld [vmem:[#allocation5 + $0x190] sm:$0xff] }
  0xc0   :  { %6114 = vmatprep.subr.bf16.mxu1 %v6113_v31  ;;  %v1393_v31 = vld [vmem:[#allocation5 + $0x1d0] sm:$0xff] }
  0xc1   :  { %v6199_v42 = vpack.c.bf16 %v1393_v31, %v1385_v41  ;;  %v1463_v41 = vld [vmem:[#allocation5 + $0x400] sm:$0xff] }
  0xc2   :  { %v1471_v31 = vld [vmem:[#allocation5 + $0x440] sm:$0xff] }
  0xc3   :  { %6116 = vmatpush1.bf16.msra.mxu1 %v6115_v46  ;;  %v6137_v46 = vpack.c.bf16 %v1408_v44, %v1400_v43  ;;  %v6155_v43 = vpack.c.bf16 %v1471_v31, %v1463_v41  ;;  %v1465_v44 = vld [vmem:[#allocation5 + $0x410] sm:$0xff]  ;;  %v1552_v41 = vld [vmem:[#allocation5 + $0x6c8] sm:$0xff]  ;;  %v1546_v31 = vld [vmem:[#allocation5 + $0x698] sm:$0xff] }
  0xc4   :  { %6118 = vmatprep.subr.bf16.mxu1 %v6117_v47  ;;  %v1410_v47 = vld [vmem:[#allocation5 + $0x258] sm:$0xff] }
  0xc7   :  { %6120 = vmatpush1.bf16.msra.mxu1 %v6119_v50  ;;  %v6201_v50 = vpack.c.bf16 %v1410_v47, %v1402_v45  ;;  %v1473_v45 = vld [vmem:[#allocation5 + $0x450] sm:$0xff]  ;;  %v1480_v47 = vld [vmem:[#allocation5 + $0x488] sm:$0xff] }
  0xc8   :  { %6186 = vmatprep.subr.bf16.mxu1 %v6185_v26  ;;  %v6141_v26 = vpack.c.bf16 %v1424_v62, %v1416_v61  ;;  %v1481_v62 = vld [vmem:[#allocation5 + $0x490] sm:$0xff] }
  0xca   :  { %1256 = vmatmul.mubr.f32.vlgmr.msra.gmra.mrb[24].mxu1 %v8362_v0  ;;  %v6121_v0 = vpack.c.bf16 %v1344_v59, %v1336_v58  ;;  %v6139_v58 = vpack.c.bf16 %v1407_v49, %v1399_v48  ;;  %v1401_v59 = vld [vmem:[#allocation5 + $0x210] sm:$0xff]  ;;  %v1488_v48 = vld [vmem:[#allocation5 + $0x4c8] sm:$0xff]  ;;  %v1482_v49 = vld [vmem:[#allocation5 + $0x498] sm:$0xff] }
  0xcb   :  { %6188 = vmatpush1.bf16.msra.mxu1 %v6187_v3 }
  0xcc   :  { %6122 = vmatprep.subr.bf16.mxu0 %v6121_v0  ;;  %6190 = vmatprep.subr.bf16.mxu1 %v6189_v30  ;;  %v6203_v0 = vpack.c.bf16 %v1409_v60, %v1401_v59  ;;  %v6145_v30 = vpack.c.bf16 %v1440_v9, %v1432_v8  ;;  %v1479_v59 = vld [vmem:[#allocation5 + $0x480] sm:$0xff]  ;;  %v1497_v9 = vld [vmem:[#allocation5 + $0x510] sm:$0xff] }
  0xcd   :  { %6124 = vmatpush1.bf16.msra.mxu0 %v6123_v12  ;;  %v1426_v12 = vld [vmem:[#allocation5 + $0x2d8] sm:$0xff]  ;;  %v1487_v60 = vld [vmem:[#allocation5 + $0x4c0] sm:$0xff] }
  0xce   :  { %6126 = vmatprep.subr.bf16.mxu0 %v6125_v7  ;;  %v6205_v3 = vpack.c.bf16 %v1426_v12, %v1418_v63  ;;  %v6207_v7 = vpack.c.bf16 %v1425_v6, %v1417_v5  ;;  %v6159_v61 = vpack.c.bf16 %v1487_v60, %v1479_v59  ;;  %v1489_v63 = vld [vmem:[#allocation5 + $0x4d0] sm:$0xff]  ;;  %v1496_v12 = vld [vmem:[#allocation5 + $0x508] sm:$0xff]  ;;  %v1495_v5 = vld [vmem:[#allocation5 + $0x500] sm:$0xff] }
  0xcf   :  { %6192 = vmatpush1.bf16.msra.mxu1 %v6191_v15  ;;  %v1503_v6 = vld [vmem:[#allocation5 + $0x540] sm:$0xff]  ;;  %v1568_v59 = vld [vmem:[#allocation5 + $0x748] sm:$0xff]  ;;  %v1562_v60 = vld [vmem:[#allocation5 + $0x718] sm:$0xff] }
  0xd0   :  { %6194 = vmatprep.subr.bf16.mxu1 %v6193_v32  ;;  %v6149_v32 = vpack.c.bf16 %v1456_v21, %v1448_v20  ;;  %v6163_v8 = vpack.c.bf16 %v1503_v6, %v1495_v5  ;;  %v1513_v21 = vld [vmem:[#allocation5 + $0x590] sm:$0xff] }
  0xd1   :  { %6128 = vmatpush1.bf16.msra.mxu0 %v6127_v11  ;;  %v1442_v11 = vld [vmem:[#allocation5 + $0x358] sm:$0xff] }
  0xd2   :  { %6130 = vmatprep.subr.bf16.mxu0 %v6129_v19  ;;  %v6209_v15 = vpack.c.bf16 %v1442_v11, %v1434_v10  ;;  %v6211_v19 = vpack.c.bf16 %v1441_v18, %v1433_v17  ;;  %v1505_v10 = vld [vmem:[#allocation5 + $0x550] sm:$0xff]  ;;  %v1512_v11 = vld [vmem:[#allocation5 + $0x588] sm:$0xff]  ;;  %v1511_v17 = vld [vmem:[#allocation5 + $0x580] sm:$0xff] }
  0xd3   :  { %6196 = vmatpush1.bf16.msra.mxu1 %v6195_v27  ;;  %v1519_v18 = vld [vmem:[#allocation5 + $0x5c0] sm:$0xff] }
  0xd4   :  { %6198 = vmatprep.subr.bf16.mxu1 %v6197_v39  ;;  %v6153_v39 = vpack.c.bf16 %v1472_v37, %v1464_v36  ;;  %v6167_v20 = vpack.c.bf16 %v1519_v18, %v1511_v17  ;;  %v1529_v37 = vld [vmem:[#allocation5 + $0x610] sm:$0xff]  ;;  %v1348_v17 = vld [vmem:[#allocation5 + $0x68] sm:$0xff]  ;;  %v1342_v18 = vld [vmem:[#allocation5 + $0x38] sm:$0xff] }
  0xd5   :  { %6132 = vmatpush1.bf16.msra.mxu0 %v6131_v23  ;;  %v1458_v23 = vld [vmem:[#allocation5 + $0x3d8] sm:$0xff] }
  0xd6   :  { %6134 = vmatprep.subr.bf16.mxu0 %v6133_v35  ;;  %v6213_v27 = vpack.c.bf16 %v1458_v23, %v1450_v22  ;;  %v6215_v35 = vpack.c.bf16 %v1457_v34, %v1449_v33  ;;  %v1521_v22 = vld [vmem:[#allocation5 + $0x5d0] sm:$0xff]  ;;  %v1528_v23 = vld [vmem:[#allocation5 + $0x608] sm:$0xff]  ;;  %v1527_v33 = vld [vmem:[#allocation5 + $0x600] sm:$0xff] }
  0xd7   :  { %6200 = vmatpush1.bf16.msra.mxu1 %v6199_v42  ;;  %v1535_v34 = vld [vmem:[#allocation5 + $0x640] sm:$0xff] }
  0xd8   :  { %6202 = vmatprep.subr.bf16.mxu1 %v6201_v50  ;;  %v6157_v50 = vpack.c.bf16 %v1488_v48, %v1480_v47  ;;  %v6171_v36 = vpack.c.bf16 %v1535_v34, %v1527_v33  ;;  %v1545_v48 = vld [vmem:[#allocation5 + $0x690] sm:$0xff] }
  0xd9   :  { %6136 = vmatpush1.bf16.msra.mxu0 %v6135_v40  ;;  %v1474_v40 = vld [vmem:[#allocation5 + $0x458] sm:$0xff] }
  0xda   :  { %6138 = vmatprep.subr.bf16.mxu0 %v6137_v46  ;;  %v6217_v42 = vpack.c.bf16 %v1474_v40, %v1466_v38  ;;  %v6219_v46 = vpack.c.bf16 %v1473_v45, %v1465_v44  ;;  %v1537_v38 = vld [vmem:[#allocation5 + $0x650] sm:$0xff]  ;;  %v1544_v40 = vld [vmem:[#allocation5 + $0x688] sm:$0xff]  ;;  %v1543_v44 = vld [vmem:[#allocation5 + $0x680] sm:$0xff] }
  0xdb   :  { %6204 = vmatpush1.bf16.msra.mxu1 %v6203_v0  ;;  %v1551_v45 = vld [vmem:[#allocation5 + $0x6c0] sm:$0xff] }
  0xdc   :  { %6206 = vmatprep.subr.bf16.mxu1 %v6205_v3  ;;  %v6161_v3 = vpack.c.bf16 %v1504_v1, %v1496_v12  ;;  %v6175_v47 = vpack.c.bf16 %v1551_v45, %v1543_v44  ;;  %v1561_v12 = vld [vmem:[#allocation5 + $0x710] sm:$0xff] }
  0xdd   :  { %6140 = vmatpush1.bf16.msra.mxu0 %v6139_v58  ;;  %v1490_v58 = vld [vmem:[#allocation5 + $0x4d8] sm:$0xff] }
  0xde   :  { %6142 = vmatprep.subr.bf16.mxu0 %v6141_v26  ;;  %v6221_v0 = vpack.c.bf16 %v1490_v58, %v1482_v49  ;;  %v6223_v26 = vpack.c.bf16 %v1489_v63, %v1481_v62  ;;  %v1553_v49 = vld [vmem:[#allocation5 + $0x6d0] sm:$0xff]  ;;  %v1559_v63 = vld [vmem:[#allocation5 + $0x700] sm:$0xff] }
  0xdf   :  { %6208 = vmatpush1.bf16.msra.mxu1 %v6207_v7  ;;  %v6239_v58 = vpack.c.bf16 %v1553_v49, %v1545_v48 }
  0xe0   :  { %6210 = vmatprep.subr.bf16.mxu1 %v6209_v15  ;;  %v6165_v15 = vpack.c.bf16 %v1520_v25, %v1512_v11  ;;  %v1577_v11 = vld [vmem:[#allocation5 + $0x790] sm:$0xff] }
  0xe1   :  { %6144 = vmatpush1.bf16.msra.mxu0 %v6143_v4  ;;  %v1506_v4 = vld [vmem:[#allocation5 + $0x558] sm:$0xff]  ;;  %v1585_v25 = vld [vmem:[#allocation5 + $0x7d0] sm:$0xff] }
  0xe2   :  { %6146 = vmatprep.subr.bf16.mxu0 %v6145_v30  ;;  %v6225_v7 = vpack.c.bf16 %v1506_v4, %v1498_v2  ;;  %v6227_v30 = vpack.c.bf16 %v1505_v10, %v1497_v9  ;;  %v1569_v2 = vld [vmem:[#allocation5 + $0x750] sm:$0xff]  ;;  %v1584_v4 = vld [vmem:[#allocation5 + $0x7c8] sm:$0xff]  ;;  %v1575_v9 = vld [vmem:[#allocation5 + $0x780] sm:$0xff] }
  0xe3   :  { %6212 = vmatpush1.bf16.msra.mxu1 %v6211_v19  ;;  %v6243_v5 = vpack.c.bf16 %v1569_v2, %v1561_v12 }
  0xe4   :  { %6214 = vmatprep.subr.bf16.mxu1 %v6213_v27  ;;  %v6169_v27 = vpack.c.bf16 %v1536_v24, %v1528_v23  ;;  %v540_v23 = vlaneseq }
  0xe5   :  { %6148 = vmatpush1.bf16.msra.mxu0 %v6147_v16  ;;  %v1522_v16 = vld [vmem:[#allocation5 + $0x5d8] sm:$0xff] }
  0xe6   :  { %6150 = vmatprep.subr.bf16.mxu0 %v6149_v32  ;;  %v6229_v19 = vpack.c.bf16 %v1522_v16, %v1514_v14  ;;  %v6231_v32 = vpack.c.bf16 %v1521_v22, %v1513_v21  ;;  %v1340_v16 = vld [vmem:[#allocation5 + $0x28] sm:$0xff]  ;;  %v541_v24 = vshrl.u32 %v540_v23, 7 }
  0xe7   :  { %6216 = vmatpush1.bf16.msra.mxu1 %v6215_v35 }
  0xe8   :  { %6218 = vmatprep.subr.bf16.mxu1 %v6217_v42  ;;  %v6173_v42 = vpack.c.bf16 %v1552_v41, %v1544_v40  ;;  %v542_v41 = vsub.s32 0, %v541_v24 }
  0xe9   :  { %6152 = vmatpush1.bf16.msra.mxu0 %v6151_v28  ;;  %v1538_v28 = vld [vmem:[#allocation5 + $0x658] sm:$0xff] }
  0xea   :  { %6154 = vmatprep.subr.bf16.mxu0 %v6153_v39  ;;  %v6233_v35 = vpack.c.bf16 %v1538_v28, %v1530_v29  ;;  %v6235_v39 = vpack.c.bf16 %v1537_v38, %v1529_v37  ;;  %v550_v29 = vsub.s32 2, %v541_v24  ;;  %v538_v28 = vld [vmem:[%s8911_s2] sm:$0xff] }
  0xeb   :  { %6220 = vmatpush1.bf16.msra.mxu1 %v6219_v46 }
  0xec   :  { %6222 = vmatprep.subr.bf16.mxu1 %v6221_v0  ;;  %v1570_v0 = vld [vmem:[#allocation5 + $0x758] sm:$0xff]  ;;  %v8621_v33 = vrot.slane %v538_v28, %v550_v29 }
  0xed   :  { %v8602_v51 = vpop.f32.mrb[0].mxu1  ;;  %6156 = vmatpush1.bf16.msra.mxu0 %v6155_v43  ;;  %v1554_v43 = vld [vmem:[#allocation5 + $0x6d8] sm:$0xff]  ;;  %v6241_v62 = vpack.c.bf16 %v1570_v0, %v1562_v60 }
  0xee   :  { %v8604_v52 = vpop.f32.mrb[1].mxu1  ;;  %6158 = vmatprep.subr.bf16.mxu0 %v6157_v50  ;;  %v6237_v46 = vpack.c.bf16 %v1554_v43, %v1546_v31  ;;  %v1560_v50 = vld [vmem:[#allocation5 + $0x708] sm:$0xff]  ;;  %v546_v31 = vsub.s32 1, %v541_v24 }
  0xef   :  { %6224 = vmatpush1.bf16.msra.mxu1 %v6223_v26  ;;  %v1567_v26 = vld [vmem:[#allocation5 + $0x740] sm:$0xff] }
  0xf0   :  { %6226 = vmatprep.subr.bf16.mxu1 %v6225_v7  ;;  %v6179_v1 = vpack.c.bf16 %v1567_v26, %v1559_v63  ;;  %v1578_v7 = vld [vmem:[#allocation5 + $0x798] sm:$0xff]  ;;  %v8629_v43 = vrot.slane %v538_v28, %v546_v31 }
  0xf1   :  { %v8606_v13 = vpop.f32.mrb[2].mxu1  ;;  %6160 = vmatpush1.bf16.msra.mxu0 %v6159_v61  ;;  %v6177_v61 = vpack.c.bf16 %v1568_v59, %v1560_v50  ;;  %v558_v50 = vsub.s32 4, %v541_v24  ;;  %v562_v59 = vsub.s32 5, %v541_v24 }
  0xf2   :  { %v8608_v53 = vpop.f32.mrb[3].mxu1  ;;  %6162 = vmatprep.subr.bf16.mxu0 %v6161_v3  ;;  %v1576_v3 = vld [vmem:[#allocation5 + $0x788] sm:$0xff] }
  0xf3   :  { %6228 = vmatpush1.bf16.msra.mxu1 %v6227_v30  ;;  %v6181_v6 = vpack.c.bf16 %v1584_v4, %v1576_v3  ;;  %v1583_v30 = vld [vmem:[#allocation5 + $0x7c0] sm:$0xff]  ;;  %v8635_v26 = vrot.slane %v538_v28, %v562_v59 }
  0xf4   :  { %6230 = vmatprep.subr.bf16.mxu1 %v6229_v19  ;;  %v6183_v14 = vpack.c.bf16 %v1583_v30, %v1575_v9  ;;  %v6249_v19 = vpack.c.bf16 %v1348_v17, %v1340_v16  ;;  %v566_v30 = vsub.s32 6, %v541_v24 }
  0xf5   :  { %v8610_v54 = vpop.f32.mrb[4].mxu1  ;;  %6164 = vmatpush1.bf16.msra.mxu0 %v6163_v8  ;;  %v1586_v8 = vld [vmem:[#allocation5 + $0x7d8] sm:$0xff] }
  0xf6   :  { %v8612_v55 = vpop.f32.mrb[5].mxu1  ;;  %6166 = vmatprep.subr.bf16.mxu0 %v6165_v15  ;;  %v6245_v10 = vpack.c.bf16 %v1586_v8, %v1578_v7  ;;  %v6247_v15 = vpack.c.bf16 %v1585_v25, %v1577_v11  ;;  %v570_v11 = vsub.s32 7, %v541_v24  ;;  %v8639_v16 = vrot.slane %v538_v28, %v566_v30 }
  0xf7   :  { %6232 = vmatpush1.bf16.msra.mxu1 %v6231_v32 }
  0xf8   :  { %6234 = vmatprep.subr.bf16.mxu1 %v6233_v35 }
  0xf9   :  { %v8614_v56 = vpop.f32.mrb[6].mxu1  ;;  %6168 = vmatpush1.bf16.msra.mxu0 %v6167_v20  ;;  %v1350_v20 = vld [vmem:[#allocation5 + $0x78] sm:$0xff] }
  0xfa   :  { %v8616_v57 = vpop.f32.mrb[7].mxu1  ;;  %6170 = vmatprep.subr.bf16.mxu0 %v6169_v27  ;;  %v6313_v21 = vpack.c.bf16 %v1350_v20, %v1342_v18  ;;  %v554_v27 = vsub.s32 3, %v541_v24  ;;  %v8641_v18 = vrot.slane %v538_v28, %v570_v11 }
  0xfb   :  { %6236 = vmatpush1.bf16.msra.mxu1 %v6235_v39 }
  0xfc   :  { %6238 = vmatprep.subr.bf16.mxu1 %v6237_v46  ;;  %v8623_v34 = vrot.slane %v538_v28, %v554_v27 }
  0xfd   :  { %6172 = vmatpush1.bf16.msra.mxu0 %v6171_v36 }
  0xfe   :  { %6174 = vmatprep.subr.bf16.mxu0 %v6173_v42  ;;  %v8627_v42 = vrot.slane %v538_v28, %v542_v41  ;;  %v1349_v41 = vld [vmem:[#allocation5 + $0x70] sm:$0xff] }
  0xff   :  { %6240 = vmatpush1.bf16.msra.mxu1 %v6239_v58 }
 0x100   :  { %6242 = vmatprep.subr.bf16.mxu1 %v6241_v62  ;;  %v8633_v62 = vrot.slane %v538_v28, %v558_v50 }
 0x101   :  { %6176 = vmatpush1.bf16.msra.mxu0 %v6175_v47 }
 0x102   :  { %6178 = vmatprep.subr.bf16.mxu0 %v6177_v61 }
 0x103   :  { %6244 = vmatpush1.bf16.msra.mxu1 %v6243_v5 }
 0x104   :  { %6246 = vmatprep.subr.bf16.mxu1 %v6245_v10 }
 0x105   :  { %6180 = vmatpush1.bf16.msra.mxu0 %v6179_v1 }
 0x106   :  { %6182 = vmatprep.subr.bf16.mxu0 %v6181_v6 }
 0x107   :  { %6248 = vmatpush1.bf16.msra.mxu1 %v6247_v15 }
 0x108   :  { %6314 = vmatprep.subr.bf16.mxu1 %v6313_v21 }
 0x109   :  { %6184 = vmatpush1.bf16.msra.mxu0 %v6183_v14 }
 0x10a   :  { %6250 = vmatprep.subr.bf16.mxu0 %v6249_v19 }
 0x13d   :  { %v1044_v22 = vpop.f32.mrb[0].mxu0 }
 0x13e   :  { %v1046_v32 = vpop.f32.mrb[1].mxu0  ;;  %v7947_v44 = vadd.f32 %v1044_v22, %v8627_v42 }
 0x13f   :  { %v7948_v45 = vadd.f32 %v1046_v32, %v8629_v43 }
 0x15d   :  { %v1115_v35 = vpop.f32.mrb[8].mxu1 }
 0x15e   :  { %v7971_v36 = vadd.f32 %v1115_v35, %v8621_v33  ;;  %v1117_v37 = vpop.f32.mrb[9].mxu1 }
 0x15f   :  { %v7972_v38 = vadd.f32 %v1117_v37, %v8623_v34  ;;  %v1339_v37 = vld [vmem:[#allocation5 + $0x20] sm:$0xff] }
 0x160   :  { %v5765_v39 = vmul.f32 -1.442695, %v7971_v36 }
 0x161   :  { %v5766_v40 = vmul.f32 -1.442695, %v7972_v38 }
 0x162   :  { %8079 = vpow2.f32 %v5765_v39  ;;  %v1347_v39 = vld [vmem:[#allocation5 + $0x60] sm:$0xff] }
 0x163   :  { %8081 = vpow2.f32 %v5766_v40  ;;  %v1341_v40 = vld [vmem:[#allocation5 + $0x30] sm:$0xff] }
 0x164   :  { %8083 = vtanh.f32 %v7947_v44  ;;  %v1356_v44 = vld [vmem:[#allocation5 + $0xa8] sm:$0xff]  ;;  %v6315_v59 = vpack.c.bf16 %v1349_v41, %v1341_v40  ;;  %v1414_v40 = vld [vmem:[#allocation5 + $0x278] sm:$0xff] }
 0x165   :  { %8085 = vtanh.f32 %v7948_v45 }
 0x16c   :  { %v8080_v46 = vpop.eup %8079 }
 0x16d   :  { %v8082_v47 = vpop.eup %8081  ;;  %v1278_v48 = vadd.f32 1.0, %v8080_v46  ;;  %v1364_v46 = vld [vmem:[#allocation5 + $0xe8] sm:$0xff] }
 0x16e   :  { %v1279_v49 = vadd.f32 1.0, %v8082_v47  ;;  %v8084_v58 = vpop.eup %8083  ;;  %v1358_v47 = vld [vmem:[#allocation5 + $0xb8] sm:$0xff] }
 0x16f   :  { %8087 = vrcp.f32 %v1278_v48  ;;  %v8086_v60 = vpop.eup %8085  ;;  %v1366_v48 = vld [vmem:[#allocation5 + $0xf8] sm:$0xff] }
 0x170   :  { %8089 = vrcp.f32 %v1279_v49 }
 0x179   :  { %v8088_v0 = vpop.eup %8087 }
 0x17a   :  { %v8090_v61 = vpop.eup %8089  ;;  %v1312_v63 = vmul.f32 %v8088_v0, %v8084_v58  ;;  %v6251_v58 = vpack.c.bf16 %v1347_v39, %v1339_v37  ;;  %v1363_v0 = vld [vmem:[#allocation5 + $0xe0] sm:$0xff]  ;;  %v1404_v37 = vld [vmem:[#allocation5 + $0x228] sm:$0xff]  ;;  %v1406_v39 = vld [vmem:[#allocation5 + $0x238] sm:$0xff] }
 0x17b   :  { %v1313_v12 = vmul.f32 %v8090_v61, %v8086_v60  ;;  %v1355_v60 = vld [vmem:[#allocation5 + $0xa0] sm:$0xff] }
 0x17d   :  { %v1186_v1 = vpop.f32.mrb[8].mxu0 }
 0x17e   :  { %v7987_v2 = vadd.f32 %v1186_v1, %v8633_v62  ;;  %v1188_v3 = vpop.f32.mrb[9].mxu0  ;;  %v1372_v1 = vld [vmem:[#allocation5 + $0x128] sm:$0xff] }
 0x17f   :  { %v7988_v4 = vadd.f32 %v1188_v3, %v8635_v26  ;;  %v6317_v3 = vpack.c.bf16 %v1366_v48, %v1358_v47  ;;  %v6329_v47 = vpack.c.bf16 %v1414_v40, %v1406_v39  ;;  %v1405_v48 = vld [vmem:[#allocation5 + $0x230] sm:$0xff]  ;;  %v1468_v40 = vld [vmem:[#allocation5 + $0x428] sm:$0xff] }
 0x180   :  { %v5767_v5 = vmul.f32 -1.442695, %v7987_v2  ;;  %v6253_v2 = vpack.c.bf16 %v1364_v46, %v1356_v44  ;;  %v1403_v44 = vld [vmem:[#allocation5 + $0x220] sm:$0xff]  ;;  %v1461_v39 = vld [vmem:[#allocation5 + $0x3f0] sm:$0xff] }
 0x181   :  { %v5768_v6 = vmul.f32 -1.442695, %v7988_v4  ;;  %v1380_v4 = vld [vmem:[#allocation5 + $0x168] sm:$0xff] }
 0x182   :  { %8091 = vpow2.f32 %v5767_v5  ;;  %v1374_v5 = vld [vmem:[#allocation5 + $0x138] sm:$0xff]  ;;  %v6257_v30 = vpack.c.bf16 %v1380_v4, %v1372_v1  ;;  %v1427_v1 = vld [vmem:[#allocation5 + $0x2e0] sm:$0xff]  ;;  %v1421_v4 = vld [vmem:[#allocation5 + $0x2b0] sm:$0xff] }
 0x183   :  { %8093 = vpow2.f32 %v5768_v6  ;;  %v1382_v6 = vld [vmem:[#allocation5 + $0x178] sm:$0xff] }
 0x184   :  { %v6321_v11 = vpack.c.bf16 %v1382_v6, %v1374_v5  ;;  %v1429_v5 = vld [vmem:[#allocation5 + $0x2f0] sm:$0xff]  ;;  %v1436_v6 = vld [vmem:[#allocation5 + $0x328] sm:$0xff] }
 0x18c   :  { %v8092_v7 = vpop.eup %8091 }
 0x18d   :  { %v8094_v8 = vpop.eup %8093  ;;  %v1290_v9 = vadd.f32 1.0, %v8092_v7  ;;  %v6255_v7 = vpack.c.bf16 %v1363_v0, %v1355_v60  ;;  %v1430_v60 = vld [vmem:[#allocation5 + $0x2f8] sm:$0xff] }
 0x18e   :  { %v1291_v10 = vadd.f32 1.0, %v8094_v8 }
 0x18f   :  { %8095 = vrcp.f32 %v1290_v9  ;;  %v1371_v9 = vld [vmem:[#allocation5 + $0x120] sm:$0xff] }
 0x190   :  { %8097 = vrcp.f32 %v1291_v10  ;;  %v1379_v10 = vld [vmem:[#allocation5 + $0x160] sm:$0xff] }
 0x199   :  { %v8096_v25 = vpop.eup %8095 }
 0x19a   :  { %v8098_v14 = vpop.eup %8097  ;;  %v1310_v15 = vmul.f32 0.0, %v8096_v25  ;;  %v1373_v25 = vld [vmem:[#allocation5 + $0x130] sm:$0xff] }
 0x19b   :  { %v1311_v17 = vmul.f32 0.0, %v8098_v14  ;;  %v1381_v14 = vld [vmem:[#allocation5 + $0x170] sm:$0xff] }
 0x19c   :  { %v8643_v19 = vadd.f32 %v1312_v63, %v1310_v15  ;;  %v1357_v63 = vld [vmem:[#allocation5 + $0xb0] sm:$0xff]  ;;  %v1388_v15 = vld [vmem:[#allocation5 + $0x1a8] sm:$0xff] }
 0x19d   :  { %v8645_v20 = vadd.f32 %v1313_v12, %v1311_v17  ;;  %v1257_v21 = vpop.f32.mrb[24].mxu1  ;;  %v1365_v12 = vld [vmem:[#allocation5 + $0xf0] sm:$0xff]  ;;  %v1396_v17 = vld [vmem:[#allocation5 + $0x1e8] sm:$0xff] }
 0x19e   :  { %v8003_v22 = vadd.f32 %v1257_v21, %v8639_v16  ;;  %v1259_v32 = vpop.f32.mrb[25].mxu1  ;;  %v6319_v8 = vpack.c.bf16 %v1365_v12, %v1357_v63  ;;  %v1390_v21 = vld [vmem:[#allocation5 + $0x1b8] sm:$0xff]  ;;  %v1419_v12 = vld [vmem:[#allocation5 + $0x2a0] sm:$0xff] }
 0x19f   :  { %v8004_v23 = vadd.f32 %v1259_v32, %v8641_v18  ;;  %v6259_v32 = vpack.c.bf16 %v1379_v10, %v1371_v9  ;;  %v1446_v9 = vld [vmem:[#allocation5 + $0x378] sm:$0xff]  ;;  %v6271_v10 = vpack.c.bf16 %v1427_v1, %v1419_v12 }
 0x1a0   :  { %v5769_v29 = vmul.f32 -1.442695, %v8003_v22  ;;  %v1398_v22 = vld [vmem:[#allocation5 + $0x1f8] sm:$0xff] }
 0x1a1   :  { %v5770_v24 = vmul.f32 -1.442695, %v8004_v23  ;;  %v6323_v23 = vpack.c.bf16 %v1381_v14, %v1373_v25  ;;  %v1443_v25 = vld [vmem:[#allocation5 + $0x360] sm:$0xff]  ;;  %v1494_v12 = vld [vmem:[#allocation5 + $0x4f8] sm:$0xff] }
 0x1a2   :  { %8099 = vpow2.f32 %v5769_v29  ;;  %v1387_v29 = vld [vmem:[#allocation5 + $0x1a0] sm:$0xff] }
 0x1a3   :  { %8101 = vpow2.f32 %v5770_v24  ;;  %v1395_v24 = vld [vmem:[#allocation5 + $0x1e0] sm:$0xff] }
 0x1a4   :  { %8103 = vtanh.f32 %v8645_v20  ;;  %v6263_v41 = vpack.c.bf16 %v1395_v24, %v1387_v29  ;;  %v1462_v29 = vld [vmem:[#allocation5 + $0x3f8] sm:$0xff] }
 0x1ac   :  { %v8100_v27 = vpop.eup %8099 }
 0x1ad   :  { %v8102_v35 = vpop.eup %8101  ;;  %v1302_v36 = vadd.f32 1.0, %v8100_v27  ;;  %v6261_v27 = vpack.c.bf16 %v1396_v17, %v1388_v15  ;;  %v1437_v17 = vld [vmem:[#allocation5 + $0x330] sm:$0xff] }
 0x1ae   :  { %v1303_v28 = vadd.f32 1.0, %v8102_v35  ;;  %v8104_v38 = vpop.eup %8103  ;;  %v6325_v35 = vpack.c.bf16 %v1398_v22, %v1390_v21  ;;  %v1445_v21 = vld [vmem:[#allocation5 + $0x370] sm:$0xff]  ;;  %v1452_v22 = vld [vmem:[#allocation5 + $0x3a8] sm:$0xff] }
 0x1af   :  { %8105 = vrcp.f32 %v1302_v36  ;;  %v1389_v36 = vld [vmem:[#allocation5 + $0x1b0] sm:$0xff] }
 0x1b0   :  { %8107 = vrcp.f32 %v1303_v28  ;;  %v1397_v28 = vld [vmem:[#allocation5 + $0x1f0] sm:$0xff] }
 0x1b1   :  { %8109 = vtanh.f32 %v8643_v19 }
 0x1b9   :  { %v8106_v31 = vpop.eup %8105 }
 0x1ba   :  { %v8108_v45 = vpop.eup %8107 }
 0x1bb   :  { %v8110_v49 = vpop.eup %8109  ;;  %v1321_v50 = vmul.f32 %v8108_v45, %v8104_v38  ;;  %v1412_v38 = vld [vmem:[#allocation5 + $0x268] sm:$0xff]  ;;  %v1411_v45 = vld [vmem:[#allocation5 + $0x260] sm:$0xff] }
 0x1bc   :  { %v8651_v61 = vmul.f32 %v8110_v49, %v8106_v31  ;;  %v6327_v31 = vpack.c.bf16 %v1397_v28, %v1389_v36  ;;  %v6265_v46 = vpack.c.bf16 %v1412_v38, %v1404_v37  ;;  %v1413_v49 = vld [vmem:[#allocation5 + $0x270] sm:$0xff]  ;;  %v6267_v0 = vpack.c.bf16 %v1411_v45, %v1403_v44  ;;  %v1459_v36 = vld [vmem:[#allocation5 + $0x3e0] sm:$0xff]  ;;  %v1478_v44 = vld [vmem:[#allocation5 + $0x478] sm:$0xff] }
 0x1bd   :  { %1655 = vmatprep.mubr.f32.mxu0 %v1321_v50  ;;  %1726 = vmatprep.mubr.f32.mxu1 %v1321_v50  ;;  %v6331_v63 = vpack.c.bf16 %v1413_v49, %v1405_v48  ;;  %v1453_v38 = vld [vmem:[#allocation5 + $0x3b0] sm:$0xff]  ;;  %v1475_v48 = vld [vmem:[#allocation5 + $0x460] sm:$0xff] }
 0x1be   :  { %1656 = vmatmul.mubr.f32.vlgmr.msra.gmra.mrb[2].mxu0 %v8651_v61  ;;  %1727 = vmatmul.mubr.f32.vlgmr.msra.gmra.mrb[10].mxu1 %v8651_v61 }
 0x1bf   :  { %6252 = vmatpush1.bf16.msra.mxu0 %v6251_v58  ;;  %6316 = vmatpush1.bf16.msra.mxu1 %v6315_v59  ;;  %v1428_v58 = vld [vmem:[#allocation5 + $0x2e8] sm:$0xff]  ;;  %v1422_v59 = vld [vmem:[#allocation5 + $0x2b8] sm:$0xff] }
 0x1c0   :  { %1797 = vmatprep.mubr.f32.mxu0 %v1321_v50  ;;  %1868 = vmatprep.mubr.f32.mxu1 %v1321_v50  ;;  %v1420_v50 = vld [vmem:[#allocation5 + $0x2a8] sm:$0xff] }
 0x1c1   :  { %6254 = vmatprep.subr.bf16.mxu0 %v6253_v2  ;;  %6318 = vmatprep.subr.bf16.mxu1 %v6317_v3  ;;  %v6269_v2 = vpack.c.bf16 %v1428_v58, %v1420_v50  ;;  %v6333_v3 = vpack.c.bf16 %v1430_v60, %v1422_v59  ;;  %v1469_v58 = vld [vmem:[#allocation5 + $0x430] sm:$0xff]  ;;  %v1484_v60 = vld [vmem:[#allocation5 + $0x4a8] sm:$0xff] }
 0x1c2   :  { %v1477_v59 = vld [vmem:[#allocation5 + $0x470] sm:$0xff] }
 0x1c3   :  { %6256 = vmatpush1.bf16.msra.mxu0 %v6255_v7  ;;  %6320 = vmatpush1.bf16.msra.mxu1 %v6319_v8  ;;  %v1444_v7 = vld [vmem:[#allocation5 + $0x368] sm:$0xff]  ;;  %v1438_v8 = vld [vmem:[#allocation5 + $0x338] sm:$0xff] }
 0x1c4   :  { %6258 = vmatprep.subr.bf16.mxu0 %v6257_v30  ;;  %6322 = vmatprep.subr.bf16.mxu1 %v6321_v11  ;;  %v6335_v30 = vpack.c.bf16 %v1429_v5, %v1421_v4  ;;  %v1435_v11 = vld [vmem:[#allocation5 + $0x320] sm:$0xff]  ;;  %v6273_v14 = vpack.c.bf16 %v1444_v7, %v1436_v6  ;;  %v6337_v15 = vpack.c.bf16 %v1446_v9, %v1438_v8  ;;  %v1485_v7 = vld [vmem:[#allocation5 + $0x4b0] sm:$0xff]  ;;  %v1500_v9 = vld [vmem:[#allocation5 + $0x528] sm:$0xff] }
 0x1c5   :  { %v6275_v24 = vpack.c.bf16 %v1443_v25, %v1435_v11  ;;  %v1491_v4 = vld [vmem:[#allocation5 + $0x4e0] sm:$0xff]  ;;  %v1493_v8 = vld [vmem:[#allocation5 + $0x4f0] sm:$0xff]  ;;  %v1510_v11 = vld [vmem:[#allocation5 + $0x578] sm:$0xff] }
 0x1c7   :  { %6260 = vmatpush1.bf16.msra.mxu0 %v6259_v32  ;;  %6324 = vmatpush1.bf16.msra.mxu1 %v6323_v23  ;;  %v1460_v32 = vld [vmem:[#allocation5 + $0x3e8] sm:$0xff]  ;;  %v1454_v23 = vld [vmem:[#allocation5 + $0x3b8] sm:$0xff] }
 0x1c8   :  { %6262 = vmatprep.subr.bf16.mxu0 %v6261_v27  ;;  %6326 = vmatprep.subr.bf16.mxu1 %v6325_v35  ;;  %v6339_v27 = vpack.c.bf16 %v1445_v21, %v1437_v17  ;;  %v1451_v35 = vld [vmem:[#allocation5 + $0x3a0] sm:$0xff]  ;;  %v6277_v28 = vpack.c.bf16 %v1460_v32, %v1452_v22  ;;  %v6341_v37 = vpack.c.bf16 %v1462_v29, %v1454_v23  ;;  %v1501_v32 = vld [vmem:[#allocation5 + $0x530] sm:$0xff]  ;;  %v1516_v29 = vld [vmem:[#allocation5 + $0x5a8] sm:$0xff] }
 0x1c9   :  { %v6279_v45 = vpack.c.bf16 %v1459_v36, %v1451_v35  ;;  %v1507_v17 = vld [vmem:[#allocation5 + $0x560] sm:$0xff]  ;;  %v1509_v23 = vld [vmem:[#allocation5 + $0x570] sm:$0xff]  ;;  %v1526_v35 = vld [vmem:[#allocation5 + $0x5f8] sm:$0xff] }
 0x1cb   :  { %6264 = vmatpush1.bf16.msra.mxu0 %v6263_v41  ;;  %6328 = vmatpush1.bf16.msra.mxu1 %v6327_v31  ;;  %v1476_v41 = vld [vmem:[#allocation5 + $0x468] sm:$0xff]  ;;  %v1470_v31 = vld [vmem:[#allocation5 + $0x438] sm:$0xff] }
 0x1cc   :  { %6266 = vmatprep.subr.bf16.mxu0 %v6265_v46  ;;  %6330 = vmatprep.subr.bf16.mxu1 %v6329_v47  ;;  %v6343_v46 = vpack.c.bf16 %v1461_v39, %v1453_v38  ;;  %v1467_v47 = vld [vmem:[#allocation5 + $0x420] sm:$0xff]  ;;  %v6281_v49 = vpack.c.bf16 %v1476_v41, %v1468_v40  ;;  %v6345_v50 = vpack.c.bf16 %v1478_v44, %v1470_v31  ;;  %v1517_v41 = vld [vmem:[#allocation5 + $0x5b0] sm:$0xff]  ;;  %v1532_v44 = vld [vmem:[#allocation5 + $0x628] sm:$0xff] }
 0x1cd   :  { %v6283_v1 = vpack.c.bf16 %v1475_v48, %v1467_v47  ;;  %v1523_v38 = vld [vmem:[#allocation5 + $0x5e0] sm:$0xff]  ;;  %v1525_v31 = vld [vmem:[#allocation5 + $0x5f0] sm:$0xff]  ;;  %v1542_v47 = vld [vmem:[#allocation5 + $0x678] sm:$0xff] }
 0x1cf   :  { %6268 = vmatpush1.bf16.msra.mxu0 %v6267_v0  ;;  %6332 = vmatpush1.bf16.msra.mxu1 %v6331_v63  ;;  %v1492_v0 = vld [vmem:[#allocation5 + $0x4e8] sm:$0xff]  ;;  %v1486_v63 = vld [vmem:[#allocation5 + $0x4b8] sm:$0xff] }
 0x1d0   :  { %6270 = vmatprep.subr.bf16.mxu0 %v6269_v2  ;;  %6334 = vmatprep.subr.bf16.mxu1 %v6333_v3  ;;  %v6347_v2 = vpack.c.bf16 %v1477_v59, %v1469_v58  ;;  %v1483_v3 = vld [vmem:[#allocation5 + $0x4a0] sm:$0xff]  ;;  %v6285_v5 = vpack.c.bf16 %v1492_v0, %v1484_v60  ;;  %v6349_v6 = vpack.c.bf16 %v1494_v12, %v1486_v63  ;;  %v1533_v0 = vld [vmem:[#allocation5 + $0x630] sm:$0xff]  ;;  %v1548_v12 = vld [vmem:[#allocation5 + $0x6a8] sm:$0xff] }
 0x1d1   :  { %v6287_v25 = vpack.c.bf16 %v1491_v4, %v1483_v3  ;;  %v1539_v58 = vld [vmem:[#allocation5 + $0x660] sm:$0xff]  ;;  %v1541_v63 = vld [vmem:[#allocation5 + $0x670] sm:$0xff]  ;;  %v1558_v3 = vld [vmem:[#allocation5 + $0x6f8] sm:$0xff] }
 0x1d3   :  { %6272 = vmatpush1.bf16.msra.mxu0 %v6271_v10  ;;  %6336 = vmatpush1.bf16.msra.mxu1 %v6335_v30  ;;  %v1508_v10 = vld [vmem:[#allocation5 + $0x568] sm:$0xff]  ;;  %v1502_v30 = vld [vmem:[#allocation5 + $0x538] sm:$0xff] }
 0x1d4   :  { %6274 = vmatprep.subr.bf16.mxu0 %v6273_v14  ;;  %6338 = vmatprep.subr.bf16.mxu1 %v6337_v15  ;;  %v6351_v14 = vpack.c.bf16 %v1493_v8, %v1485_v7  ;;  %v1499_v15 = vld [vmem:[#allocation5 + $0x520] sm:$0xff]  ;;  %v6289_v21 = vpack.c.bf16 %v1508_v10, %v1500_v9  ;;  %v6353_v22 = vpack.c.bf16 %v1510_v11, %v1502_v30  ;;  %v1549_v10 = vld [vmem:[#allocation5 + $0x6b0] sm:$0xff]  ;;  %v1564_v11 = vld [vmem:[#allocation5 + $0x728] sm:$0xff] }
 0x1d5   :  { %v6291_v36 = vpack.c.bf16 %v1507_v17, %v1499_v15  ;;  %v1555_v7 = vld [vmem:[#allocation5 + $0x6e0] sm:$0xff]  ;;  %v1557_v30 = vld [vmem:[#allocation5 + $0x6f0] sm:$0xff]  ;;  %v1574_v15 = vld [vmem:[#allocation5 + $0x778] sm:$0xff] }
 0x1d7   :  { %6276 = vmatpush1.bf16.msra.mxu0 %v6275_v24  ;;  %6340 = vmatpush1.bf16.msra.mxu1 %v6339_v27  ;;  %v1524_v24 = vld [vmem:[#allocation5 + $0x5e8] sm:$0xff]  ;;  %v1518_v27 = vld [vmem:[#allocation5 + $0x5b8] sm:$0xff] }
 0x1d8   :  { %6278 = vmatprep.subr.bf16.mxu0 %v6277_v28  ;;  %6342 = vmatprep.subr.bf16.mxu1 %v6341_v37  ;;  %v6355_v28 = vpack.c.bf16 %v1509_v23, %v1501_v32  ;;  %v1515_v37 = vld [vmem:[#allocation5 + $0x5a0] sm:$0xff]  ;;  %v6293_v39 = vpack.c.bf16 %v1524_v24, %v1516_v29  ;;  %v6357_v40 = vpack.c.bf16 %v1526_v35, %v1518_v27  ;;  %v1565_v24 = vld [vmem:[#allocation5 + $0x730] sm:$0xff]  ;;  %v1580_v35 = vld [vmem:[#allocation5 + $0x7a8] sm:$0xff] }
 0x1d9   :  { %v6295_v48 = vpack.c.bf16 %v1523_v38, %v1515_v37  ;;  %v1571_v32 = vld [vmem:[#allocation5 + $0x760] sm:$0xff]  ;;  %v1573_v27 = vld [vmem:[#allocation5 + $0x770] sm:$0xff]  ;;  %v1590_v37 = vld [vmem:[#allocation5 + $0x7f8] sm:$0xff] }
 0x1db   :  { %6280 = vmatpush1.bf16.msra.mxu0 %v6279_v45  ;;  %6344 = vmatpush1.bf16.msra.mxu1 %v6343_v46  ;;  %v1540_v45 = vld [vmem:[#allocation5 + $0x668] sm:$0xff]  ;;  %v1534_v46 = vld [vmem:[#allocation5 + $0x638] sm:$0xff] }
 0x1dc   :  { %6282 = vmatprep.subr.bf16.mxu0 %v6281_v49  ;;  %6346 = vmatprep.subr.bf16.mxu1 %v6345_v50  ;;  %v6359_v49 = vpack.c.bf16 %v1525_v31, %v1517_v41  ;;  %v1531_v50 = vld [vmem:[#allocation5 + $0x620] sm:$0xff]  ;;  %v6297_v59 = vpack.c.bf16 %v1540_v45, %v1532_v44  ;;  %v6361_v60 = vpack.c.bf16 %v1542_v47, %v1534_v46  ;;  %v1581_v45 = vld [vmem:[#allocation5 + $0x7b0] sm:$0xff] }
 0x1dd   :  { %v6299_v4 = vpack.c.bf16 %v1539_v58, %v1531_v50  ;;  %v1587_v44 = vld [vmem:[#allocation5 + $0x7e0] sm:$0xff]  ;;  %v1589_v46 = vld [vmem:[#allocation5 + $0x7f0] sm:$0xff]  ;;  %v1957_v50 = vld [vmem:[#allocation5 + $0x48] sm:$0xff] }
 0x1de   :  { %v1951_v58 = vld [vmem:[#allocation5 + $0x18] sm:$0xff] }
 0x1df   :  { %6284 = vmatpush1.bf16.msra.mxu0 %v6283_v1  ;;  %6348 = vmatpush1.bf16.msra.mxu1 %v6347_v2  ;;  %v1556_v1 = vld [vmem:[#allocation5 + $0x6e8] sm:$0xff]  ;;  %v1550_v2 = vld [vmem:[#allocation5 + $0x6b8] sm:$0xff] }
 0x1e0   :  { %6286 = vmatprep.subr.bf16.mxu0 %v6285_v5  ;;  %6350 = vmatprep.subr.bf16.mxu1 %v6349_v6  ;;  %v6363_v5 = vpack.c.bf16 %v1541_v63, %v1533_v0  ;;  %v1547_v6 = vld [vmem:[#allocation5 + $0x6a0] sm:$0xff]  ;;  %v6301_v8 = vpack.c.bf16 %v1556_v1, %v1548_v12  ;;  %v6365_v9 = vpack.c.bf16 %v1558_v3, %v1550_v2  ;;  %v1950_v2 = vld [vmem:[#allocation5 + $0x10] sm:$0xff] }
 0x1e1   :  { %v6303_v17 = vpack.c.bf16 %v1555_v7, %v1547_v6  ;;  %v1948_v0 = vld [vmem:[#allocation5] sm:$0xff]  ;;  %v1958_v3 = vld [vmem:[#allocation5 + $0x50] sm:$0xff]  ;;  %v1973_v6 = vld [vmem:[#allocation5 + $0xc8] sm:$0xff] }
 0x1e2   :  { %v1956_v63 = vld [vmem:[#allocation5 + $0x40] sm:$0xff]  ;;  %v1967_v7 = vld [vmem:[#allocation5 + $0x98] sm:$0xff] }
 0x1e3   :  { %6288 = vmatpush1.bf16.msra.mxu0 %v6287_v25  ;;  %6352 = vmatpush1.bf16.msra.mxu1 %v6351_v14  ;;  %v1572_v25 = vld [vmem:[#allocation5 + $0x768] sm:$0xff]  ;;  %v1566_v14 = vld [vmem:[#allocation5 + $0x738] sm:$0xff]  ;;  %v6379_v1 = vpack.c.bf16 %v1956_v63, %v1948_v0 }
 0x1e4   :  { %6290 = vmatprep.subr.bf16.mxu0 %v6289_v21  ;;  %6354 = vmatprep.subr.bf16.mxu1 %v6353_v22  ;;  %v6367_v21 = vpack.c.bf16 %v1557_v30, %v1549_v10  ;;  %v1563_v22 = vld [vmem:[#allocation5 + $0x720] sm:$0xff]  ;;  %v6305_v23 = vpack.c.bf16 %v1572_v25, %v1564_v11  ;;  %v6369_v29 = vpack.c.bf16 %v1574_v15, %v1566_v14  ;;  %v1966_v11 = vld [vmem:[#allocation5 + $0x90] sm:$0xff]  ;;  %v1981_v15 = vld [vmem:[#allocation5 + $0x108] sm:$0xff] }
 0x1e5   :  { %v6307_v38 = vpack.c.bf16 %v1571_v32, %v1563_v22  ;;  %v1964_v10 = vld [vmem:[#allocation5 + $0x80] sm:$0xff]  ;;  %v1974_v14 = vld [vmem:[#allocation5 + $0xd0] sm:$0xff]  ;;  %v1983_v32 = vld [vmem:[#allocation5 + $0x118] sm:$0xff] }
 0x1e6   :  { %v1972_v30 = vld [vmem:[#allocation5 + $0xc0] sm:$0xff] }
 0x1e7   :  { %6292 = vmatpush1.bf16.msra.mxu0 %v6291_v36  ;;  %6356 = vmatpush1.bf16.msra.mxu1 %v6355_v28  ;;  %v1588_v36 = vld [vmem:[#allocation5 + $0x7e8] sm:$0xff]  ;;  %v1582_v28 = vld [vmem:[#allocation5 + $0x7b8] sm:$0xff]  ;;  %v6383_v25 = vpack.c.bf16 %v1972_v30, %v1964_v10  ;;  %v2028_v30 = vld [vmem:[#allocation5 + $0x280] sm:$0xff] }
 0x1e8   :  { %6294 = vmatprep.subr.bf16.mxu0 %v6293_v39  ;;  %6358 = vmatprep.subr.bf16.mxu1 %v6357_v40  ;;  %v6371_v39 = vpack.c.bf16 %v1573_v27, %v1565_v24  ;;  %v1579_v40 = vld [vmem:[#allocation5 + $0x7a0] sm:$0xff]  ;;  %v6309_v41 = vpack.c.bf16 %v1588_v36, %v1580_v35  ;;  %v6373_v31 = vpack.c.bf16 %v1590_v37, %v1582_v28  ;;  %v1982_v35 = vld [vmem:[#allocation5 + $0x110] sm:$0xff]  ;;  %v1997_v37 = vld [vmem:[#allocation5 + $0x188] sm:$0xff] }
 0x1e9   :  { %v6311_v47 = vpack.c.bf16 %v1587_v44, %v1579_v40  ;;  %v1988_v27 = vld [vmem:[#allocation5 + $0x140] sm:$0xff]  ;;  %v1990_v36 = vld [vmem:[#allocation5 + $0x150] sm:$0xff]  ;;  %v2039_v10 = vld [vmem:[#allocation5 + $0x2d8] sm:$0xff] }
 0x1ea   :  { %v6451_v40 = vpack.c.bf16 %v1990_v36, %v1982_v35  ;;  %v1996_v44 = vld [vmem:[#allocation5 + $0x180] sm:$0xff] }
 0x1eb   :  { %6296 = vmatpush1.bf16.msra.mxu0 %v6295_v48  ;;  %6360 = vmatpush1.bf16.msra.mxu1 %v6359_v49  ;;  %v6375_v48 = vpack.c.bf16 %v1589_v46, %v1581_v45  ;;  %v1949_v49 = vld [vmem:[#allocation5 + $0x8] sm:$0xff]  ;;  %v2004_v45 = vld [vmem:[#allocation5 + $0x1c0] sm:$0xff] }
 0x1ec   :  { %6298 = vmatprep.subr.bf16.mxu0 %v6297_v59  ;;  %6362 = vmatprep.subr.bf16.mxu1 %v6361_v60  ;;  %v6377_v59 = vpack.c.bf16 %v1957_v50, %v1949_v49  ;;  %v1959_v60 = vld [vmem:[#allocation5 + $0x58] sm:$0xff]  ;;  %v2013_v49 = vld [vmem:[#allocation5 + $0x208] sm:$0xff]  ;;  %v2052_v35 = vld [vmem:[#allocation5 + $0x340] sm:$0xff] }
 0x1ed   :  { %v6441_v12 = vpack.c.bf16 %v1959_v60, %v1951_v58  ;;  %v2021_v50 = vld [vmem:[#allocation5 + $0x248] sm:$0xff]  ;;  %v2015_v58 = vld [vmem:[#allocation5 + $0x218] sm:$0xff]  ;;  %v6391_v60 = vpack.c.bf16 %v2004_v45, %v1996_v44 }
 0x1ee   :  { %v6393_v63 = vpack.c.bf16 %v2021_v50, %v2013_v49  ;;  %v2071_v45 = vld [vmem:[#allocation5 + $0x3d8] sm:$0xff]  ;;  %v2062_v50 = vld [vmem:[#allocation5 + $0x390] sm:$0xff] }
 0x1ef   :  { %6300 = vmatpush1.bf16.msra.mxu0 %v6299_v4  ;;  %6364 = vmatpush1.bf16.msra.mxu1 %v6363_v5  ;;  %v1965_v4 = vld [vmem:[#allocation5 + $0x88] sm:$0xff]  ;;  %v6443_v5 = vpack.c.bf16 %v1958_v3, %v1950_v2  ;;  %v2020_v2 = vld [vmem:[#allocation5 + $0x240] sm:$0xff]  ;;  %v2014_v3 = vld [vmem:[#allocation5 + $0x210] sm:$0xff] }
 0x1f0   :  { %6302 = vmatprep.subr.bf16.mxu0 %v6301_v8  ;;  %6366 = vmatprep.subr.bf16.mxu1 %v6365_v9  ;;  %v1975_v8 = vld [vmem:[#allocation5 + $0xd8] sm:$0xff] }
 0x1f1   :  { %v6445_v9 = vpack.c.bf16 %v1975_v8, %v1967_v7  ;;  %v2029_v7 = vld [vmem:[#allocation5 + $0x288] sm:$0xff] }
 0x1f2   :  { %v2037_v8 = vld [vmem:[#allocation5 + $0x2c8] sm:$0xff] }
 0x1f3   :  { %6304 = vmatpush1.bf16.msra.mxu0 %v6303_v17  ;;  %6368 = vmatpush1.bf16.msra.mxu1 %v6367_v21  ;;  %v1989_v17 = vld [vmem:[#allocation5 + $0x148] sm:$0xff]  ;;  %v6447_v21 = vpack.c.bf16 %v1974_v14, %v1966_v11  ;;  %v2036_v11 = vld [vmem:[#allocation5 + $0x2c0] sm:$0xff] }
 0x1f4   :  { %6306 = vmatprep.subr.bf16.mxu0 %v6305_v23  ;;  %6370 = vmatprep.subr.bf16.mxu1 %v6369_v29  ;;  %v6385_v22 = vpack.c.bf16 %v1989_v17, %v1981_v15  ;;  %v1991_v23 = vld [vmem:[#allocation5 + $0x158] sm:$0xff]  ;;  %v1980_v29 = vld [vmem:[#allocation5 + $0x100] sm:$0xff]  ;;  %v6399_v14 = vpack.c.bf16 %v2036_v11, %v2028_v30  ;;  %v2030_v15 = vld [vmem:[#allocation5 + $0x290] sm:$0xff] }
 0x1f5   :  { %v6449_v24 = vpack.c.bf16 %v1991_v23, %v1983_v32  ;;  %v6387_v28 = vpack.c.bf16 %v1988_v27, %v1980_v29  ;;  %v2038_v17 = vld [vmem:[#allocation5 + $0x2d0] sm:$0xff]  ;;  %v2053_v32 = vld [vmem:[#allocation5 + $0x348] sm:$0xff]  ;;  %v2047_v23 = vld [vmem:[#allocation5 + $0x318] sm:$0xff] }
 0x1f6   :  { %v2044_v27 = vld [vmem:[#allocation5 + $0x300] sm:$0xff]  ;;  %v2103_v11 = vld [vmem:[#allocation5 + $0x4d8] sm:$0xff] }
 0x1f7   :  { %6308 = vmatpush1.bf16.msra.mxu0 %v6307_v38  ;;  %6372 = vmatpush1.bf16.msra.mxu1 %v6371_v39  ;;  %v2005_v38 = vld [vmem:[#allocation5 + $0x1c8] sm:$0xff]  ;;  %v1999_v39 = vld [vmem:[#allocation5 + $0x198] sm:$0xff] }
 0x1f8   :  { %6310 = vmatprep.subr.bf16.mxu0 %v6309_v41  ;;  %6374 = vmatprep.subr.bf16.mxu1 %v6373_v31  ;;  %v6389_v41 = vpack.c.bf16 %v2005_v38, %v1997_v37  ;;  %v2007_v31 = vld [vmem:[#allocation5 + $0x1d8] sm:$0xff]  ;;  %v2046_v37 = vld [vmem:[#allocation5 + $0x310] sm:$0xff] }
 0x1f9   :  { %v6453_v46 = vpack.c.bf16 %v2007_v31, %v1999_v39  ;;  %v2054_v38 = vld [vmem:[#allocation5 + $0x350] sm:$0xff]  ;;  %v2063_v31 = vld [vmem:[#allocation5 + $0x398] sm:$0xff] }
 0x1fa   :  { %v6467_v39 = vpack.c.bf16 %v2054_v38, %v2046_v37 }
 0x1fb   :  { %6312 = vmatpush1.bf16.msra.mxu0 %v6311_v47  ;;  %6376 = vmatpush1.bf16.msra.mxu1 %v6375_v48  ;;  %v1998_v47 = vld [vmem:[#allocation5 + $0x190] sm:$0xff] }
 0x1fc   :  { %6378 = vmatprep.subr.bf16.mxu0 %v6377_v59  ;;  %6442 = vmatprep.subr.bf16.mxu1 %v6441_v12  ;;  %v2006_v48 = vld [vmem:[#allocation5 + $0x1d0] sm:$0xff]  ;;  %v2023_v59 = vld [vmem:[#allocation5 + $0x258] sm:$0xff] }
 0x1fd   :  { %v6455_v0 = vpack.c.bf16 %v2006_v48, %v1998_v47  ;;  %v6457_v12 = vpack.c.bf16 %v2023_v59, %v2015_v58  ;;  %v2068_v47 = vld [vmem:[#allocation5 + $0x3c0] sm:$0xff]  ;;  %v6469_v48 = vpack.c.bf16 %v2071_v45, %v2063_v31  ;;  %v2070_v58 = vld [vmem:[#allocation5 + $0x3d0] sm:$0xff]  ;;  %v2125_v31 = vld [vmem:[#allocation5 + $0x588] sm:$0xff] }
 0x1fe   :  { %1798 = vmatmul.mubr.f32.vlgmr.msra.gmra.mrb[10].mxu0 %v8651_v61  ;;  %1869 = vmatmul.mubr.f32.vlgmr.msra.gmra.mrb[26].mxu1 %v8651_v61  ;;  %v6381_v61 = vpack.c.bf16 %v1973_v6, %v1965_v4  ;;  %v6471_v59 = vpack.c.bf16 %v2070_v58, %v2062_v50  ;;  %v2127_v45 = vld [vmem:[#allocation5 + $0x598] sm:$0xff] }
 0x1ff   :  { %6380 = vmatpush1.bf16.msra.mxu0 %v6379_v1  ;;  %6444 = vmatpush1.bf16.msra.mxu1 %v6443_v5  ;;  %v2012_v1 = vld [vmem:[#allocation5 + $0x200] sm:$0xff]  ;;  %v2022_v5 = vld [vmem:[#allocation5 + $0x250] sm:$0xff] }
 0x200   :  { %6382 = vmatprep.subr.bf16.mxu0 %v6381_v61  ;;  %6446 = vmatprep.subr.bf16.mxu1 %v6445_v9  ;;  %v6395_v4 = vpack.c.bf16 %v2020_v2, %v2012_v1  ;;  %v6459_v6 = vpack.c.bf16 %v2022_v5, %v2014_v3  ;;  %v2031_v61 = vld [vmem:[#allocation5 + $0x298] sm:$0xff]  ;;  %v6397_v9 = vpack.c.bf16 %v2037_v8, %v2029_v7  ;;  %v2076_v2 = vld [vmem:[#allocation5 + $0x400] sm:$0xff]  ;;  %v2086_v7 = vld [vmem:[#allocation5 + $0x450] sm:$0xff] }
 0x201   :  { %v2087_v1 = vld [vmem:[#allocation5 + $0x458] sm:$0xff]  ;;  %v2084_v3 = vld [vmem:[#allocation5 + $0x440] sm:$0xff] }
 0x202   :  { %v6411_v5 = vpack.c.bf16 %v2084_v3, %v2076_v2  ;;  %v2151_v3 = vld [vmem:[#allocation5 + $0x658] sm:$0xff] }
 0x203   :  { %6384 = vmatpush1.bf16.msra.mxu0 %v6383_v25  ;;  %6448 = vmatpush1.bf16.msra.mxu1 %v6447_v21  ;;  %v6461_v25 = vpack.c.bf16 %v2039_v10, %v2031_v61  ;;  %v6463_v21 = vpack.c.bf16 %v2038_v17, %v2030_v15  ;;  %v2093_v61 = vld [vmem:[#allocation5 + $0x488] sm:$0xff]  ;;  %v2095_v10 = vld [vmem:[#allocation5 + $0x498] sm:$0xff] }
 0x204   :  { %6386 = vmatprep.subr.bf16.mxu0 %v6385_v22  ;;  %6450 = vmatprep.subr.bf16.mxu1 %v6449_v24  ;;  %v2045_v22 = vld [vmem:[#allocation5 + $0x308] sm:$0xff]  ;;  %v2055_v24 = vld [vmem:[#allocation5 + $0x358] sm:$0xff]  ;;  %v6477_v15 = vpack.c.bf16 %v2103_v11, %v2095_v10 }
 0x205   :  { %v6401_v29 = vpack.c.bf16 %v2053_v32, %v2045_v22  ;;  %v6465_v36 = vpack.c.bf16 %v2055_v24, %v2047_v23  ;;  %v2102_v22 = vld [vmem:[#allocation5 + $0x4d0] sm:$0xff]  ;;  %v2109_v23 = vld [vmem:[#allocation5 + $0x508] sm:$0xff]  ;;  %v2111_v24 = vld [vmem:[#allocation5 + $0x518] sm:$0xff] }
 0x206   :  { %v2157_v10 = vld [vmem:[#allocation5 + $0x688] sm:$0xff]  ;;  %v2159_v11 = vld [vmem:[#allocation5 + $0x698] sm:$0xff] }
 0x207   :  { %6388 = vmatpush1.bf16.msra.mxu0 %v6387_v28  ;;  %6452 = vmatpush1.bf16.msra.mxu1 %v6451_v40  ;;  %v6403_v28 = vpack.c.bf16 %v2052_v35, %v2044_v27  ;;  %v2061_v40 = vld [vmem:[#allocation5 + $0x388] sm:$0xff]  ;;  %v2119_v35 = vld [vmem:[#allocation5 + $0x558] sm:$0xff] }
 0x208   :  { %6390 = vmatprep.subr.bf16.mxu0 %v6389_v41  ;;  %6454 = vmatprep.subr.bf16.mxu1 %v6453_v46  ;;  %v2069_v41 = vld [vmem:[#allocation5 + $0x3c8] sm:$0xff]  ;;  %v2060_v46 = vld [vmem:[#allocation5 + $0x380] sm:$0xff]  ;;  %v6481_v37 = vpack.c.bf16 %v2119_v35, %v2111_v24  ;;  %v2175_v35 = vld [vmem:[#allocation5 + $0x718] sm:$0xff] }
 0x209   :  { %v6405_v44 = vpack.c.bf16 %v2069_v41, %v2061_v40  ;;  %v6407_v49 = vpack.c.bf16 %v2068_v47, %v2060_v46  ;;  %v2118_v40 = vld [vmem:[#allocation5 + $0x550] sm:$0xff]  ;;  %v2135_v47 = vld [vmem:[#allocation5 + $0x5d8] sm:$0xff] }
 0x20a   :  { %v6485_v50 = vpack.c.bf16 %v2135_v47, %v2127_v45  ;;  %v2197_v45 = vld [vmem:[#allocation5 + $0x7c8] sm:$0xff] }
 0x20b   :  { %6392 = vmatpush1.bf16.msra.mxu0 %v6391_v60  ;;  %6456 = vmatpush1.bf16.msra.mxu1 %v6455_v0  ;;  %v2077_v60 = vld [vmem:[#allocation5 + $0x408] sm:$0xff] }
 0x20c   :  { %6394 = vmatprep.subr.bf16.mxu0 %v6393_v63  ;;  %6458 = vmatprep.subr.bf16.mxu1 %v6457_v12  ;;  %v2085_v0 = vld [vmem:[#allocation5 + $0x448] sm:$0xff]  ;;  %v2079_v63 = vld [vmem:[#allocation5 + $0x418] sm:$0xff] }
 0x20d   :  { %v6409_v12 = vpack.c.bf16 %v2085_v0, %v2077_v60  ;;  %v2134_v60 = vld [vmem:[#allocation5 + $0x5d0] sm:$0xff] }
 0x20f   :  { %6396 = vmatpush1.bf16.msra.mxu0 %v6395_v4  ;;  %6460 = vmatpush1.bf16.msra.mxu1 %v6459_v6  ;;  %v6473_v4 = vpack.c.bf16 %v2087_v1, %v2079_v63  ;;  %v2078_v6 = vld [vmem:[#allocation5 + $0x410] sm:$0xff]  ;;  %v2141_v63 = vld [vmem:[#allocation5 + $0x608] sm:$0xff]  ;;  %v2143_v1 = vld [vmem:[#allocation5 + $0x618] sm:$0xff] }
 0x210   :  { %6398 = vmatprep.subr.bf16.mxu0 %v6397_v9  ;;  %6462 = vmatprep.subr.bf16.mxu1 %v6461_v25  ;;  %v6475_v8 = vpack.c.bf16 %v2086_v7, %v2078_v6  ;;  %v2101_v9 = vld [vmem:[#allocation5 + $0x4c8] sm:$0xff]  ;;  %v2092_v25 = vld [vmem:[#allocation5 + $0x480] sm:$0xff]  ;;  %v6489_v6 = vpack.c.bf16 %v2151_v3, %v2143_v1  ;;  %v1955_v3 = vld [vmem:[#allocation5 + $0x38] sm:$0xff] }
 0x211   :  { %v6413_v30 = vpack.c.bf16 %v2101_v9, %v2093_v61  ;;  %v2150_v61 = vld [vmem:[#allocation5 + $0x650] sm:$0xff]  ;;  %v1953_v1 = vld [vmem:[#allocation5 + $0x28] sm:$0xff] }
 0x213   :  { %6400 = vmatpush1.bf16.msra.mxu0 %v6399_v14  ;;  %6464 = vmatpush1.bf16.msra.mxu1 %v6463_v21  ;;  %v2100_v14 = vld [vmem:[#allocation5 + $0x4c0] sm:$0xff]  ;;  %v2094_v21 = vld [vmem:[#allocation5 + $0x490] sm:$0xff] }
 0x214   :  { %6402 = vmatprep.subr.bf16.mxu0 %v6401_v29  ;;  %6466 = vmatprep.subr.bf16.mxu1 %v6465_v36  ;;  %v6415_v17 = vpack.c.bf16 %v2100_v14, %v2092_v25  ;;  %v6479_v32 = vpack.c.bf16 %v2102_v22, %v2094_v21  ;;  %v2117_v29 = vld [vmem:[#allocation5 + $0x548] sm:$0xff]  ;;  %v2108_v36 = vld [vmem:[#allocation5 + $0x500] sm:$0xff]  ;;  %v2167_v14 = vld [vmem:[#allocation5 + $0x6d8] sm:$0xff] }
 0x215   :  { %v6417_v27 = vpack.c.bf16 %v2117_v29, %v2109_v23  ;;  %v6493_v21 = vpack.c.bf16 %v2167_v14, %v2159_v11  ;;  %v2166_v23 = vld [vmem:[#allocation5 + $0x6d0] sm:$0xff]  ;;  %v2173_v29 = vld [vmem:[#allocation5 + $0x708] sm:$0xff] }
 0x217   :  { %6404 = vmatpush1.bf16.msra.mxu0 %v6403_v28  ;;  %6468 = vmatpush1.bf16.msra.mxu1 %v6467_v39  ;;  %v2116_v28 = vld [vmem:[#allocation5 + $0x540] sm:$0xff]  ;;  %v2110_v39 = vld [vmem:[#allocation5 + $0x510] sm:$0xff] }
 0x218   :  { %6406 = vmatprep.subr.bf16.mxu0 %v6405_v44  ;;  %6470 = vmatprep.subr.bf16.mxu1 %v6469_v48  ;;  %v6419_v38 = vpack.c.bf16 %v2116_v28, %v2108_v36  ;;  %v6483_v41 = vpack.c.bf16 %v2118_v40, %v2110_v39  ;;  %v2133_v44 = vld [vmem:[#allocation5 + $0x5c8] sm:$0xff]  ;;  %v2124_v48 = vld [vmem:[#allocation5 + $0x580] sm:$0xff]  ;;  %v2183_v36 = vld [vmem:[#allocation5 + $0x758] sm:$0xff] }
 0x219   :  { %v6421_v46 = vpack.c.bf16 %v2133_v44, %v2125_v31  ;;  %v2180_v39 = vld [vmem:[#allocation5 + $0x740] sm:$0xff]  ;;  %v2174_v40 = vld [vmem:[#allocation5 + $0x710] sm:$0xff]  ;;  %v2189_v44 = vld [vmem:[#allocation5 + $0x788] sm:$0xff] }
 0x21a   :  { %v2182_v31 = vld [vmem:[#allocation5 + $0x750] sm:$0xff]  ;;  %v6437_v47 = vpack.c.bf16 %v2197_v45, %v2189_v44 }
 0x21b   :  { %6408 = vmatpush1.bf16.msra.mxu0 %v6407_v49  ;;  %6472 = vmatpush1.bf16.msra.mxu1 %v6471_v59  ;;  %v2132_v49 = vld [vmem:[#allocation5 + $0x5c0] sm:$0xff]  ;;  %v2126_v59 = vld [vmem:[#allocation5 + $0x590] sm:$0xff] }
 0x21c   :  { %6410 = vmatprep.subr.bf16.mxu0 %v6409_v12  ;;  %6474 = vmatprep.subr.bf16.mxu1 %v6473_v4  ;;  %v6423_v58 = vpack.c.bf16 %v2132_v49, %v2124_v48  ;;  %v6487_v0 = vpack.c.bf16 %v2134_v60, %v2126_v59  ;;  %v2149_v12 = vld [vmem:[#allocation5 + $0x648] sm:$0xff]  ;;  %v2140_v4 = vld [vmem:[#allocation5 + $0x600] sm:$0xff]  ;;  %v2191_v48 = vld [vmem:[#allocation5 + $0x798] sm:$0xff] }
 0x21d   :  { %v6425_v2 = vpack.c.bf16 %v2149_v12, %v2141_v63  ;;  %v2199_v49 = vld [vmem:[#allocation5 + $0x7d8] sm:$0xff]  ;;  %v2196_v59 = vld [vmem:[#allocation5 + $0x7c0] sm:$0xff]  ;;  %v2190_v60 = vld [vmem:[#allocation5 + $0x790] sm:$0xff] }
 0x21f   :  { %6412 = vmatpush1.bf16.msra.mxu0 %v6411_v5  ;;  %6476 = vmatpush1.bf16.msra.mxu1 %v6475_v8  ;;  %v2148_v5 = vld [vmem:[#allocation5 + $0x640] sm:$0xff]  ;;  %v2142_v8 = vld [vmem:[#allocation5 + $0x610] sm:$0xff] }
 0x220   :  { %6414 = vmatprep.subr.bf16.mxu0 %v6413_v30  ;;  %6478 = vmatprep.subr.bf16.mxu1 %v6477_v15  ;;  %v6427_v7 = vpack.c.bf16 %v2148_v5, %v2140_v4  ;;  %v6491_v9 = vpack.c.bf16 %v2150_v61, %v2142_v8  ;;  %v2165_v30 = vld [vmem:[#allocation5 + $0x6c8] sm:$0xff]  ;;  %v2156_v15 = vld [vmem:[#allocation5 + $0x680] sm:$0xff]  ;;  %v1963_v5 = vld [vmem:[#allocation5 + $0x78] sm:$0xff] }
 0x221   :  { %v6429_v25 = vpack.c.bf16 %v2165_v30, %v2157_v10 }
 0x223   :  { %6416 = vmatpush1.bf16.msra.mxu0 %v6415_v17  ;;  %6480 = vmatpush1.bf16.msra.mxu1 %v6479_v32  ;;  %v2164_v17 = vld [vmem:[#allocation5 + $0x6c0] sm:$0xff]  ;;  %v2158_v32 = vld [vmem:[#allocation5 + $0x690] sm:$0xff] }
 0x224   :  { %6418 = vmatprep.subr.bf16.mxu0 %v6417_v27  ;;  %6482 = vmatprep.subr.bf16.mxu1 %v6481_v37  ;;  %v6431_v22 = vpack.c.bf16 %v2164_v17, %v2156_v15  ;;  %v6495_v24 = vpack.c.bf16 %v2166_v23, %v2158_v32  ;;  %v2181_v27 = vld [vmem:[#allocation5 + $0x748] sm:$0xff]  ;;  %v6497_v37 = vpack.c.bf16 %v2183_v36, %v2175_v35 }
 0x225   :  { %v6433_v28 = vpack.c.bf16 %v2181_v27, %v2173_v29 }
 0x227   :  { %6420 = vmatpush1.bf16.msra.mxu0 %v6419_v38  ;;  %6484 = vmatpush1.bf16.msra.mxu1 %v6483_v41  ;;  %v2172_v38 = vld [vmem:[#allocation5 + $0x700] sm:$0xff] }
 0x228   :  { %6422 = vmatprep.subr.bf16.mxu0 %v6421_v46  ;;  %6486 = vmatprep.subr.bf16.mxu1 %v6485_v50  ;;  %v6435_v41 = vpack.c.bf16 %v2180_v39, %v2172_v38  ;;  %v6499_v46 = vpack.c.bf16 %v2182_v31, %v2174_v40  ;;  %v2188_v50 = vld [vmem:[#allocation5 + $0x780] sm:$0xff] }
 0x229   :  { %v6439_v63 = vpack.c.bf16 %v2196_v59, %v2188_v50 }
 0x22b   :  { %6424 = vmatpush1.bf16.msra.mxu0 %v6423_v58  ;;  %6488 = vmatpush1.bf16.msra.mxu1 %v6487_v0  ;;  %v6501_v58 = vpack.c.bf16 %v2199_v49, %v2191_v48  ;;  %v2198_v0 = vld [vmem:[#allocation5 + $0x7d0] sm:$0xff] }
 0x22c   :  { %6426 = vmatprep.subr.bf16.mxu0 %v6425_v2  ;;  %6490 = vmatprep.subr.bf16.mxu1 %v6489_v6  ;;  %v6503_v12 = vpack.c.bf16 %v2198_v0, %v2190_v60  ;;  %v1961_v2 = vld [vmem:[#allocation5 + $0x68] sm:$0xff]  ;;  %v6569_v6 = vpack.c.bf16 %v1963_v5, %v1955_v3 }
 0x22d   :  { %v6505_v4 = vpack.c.bf16 %v1961_v2, %v1953_v1 }
 0x22f   :  { %6428 = vmatpush1.bf16.msra.mxu0 %v6427_v7  ;;  %6492 = vmatpush1.bf16.msra.mxu1 %v6491_v9 }
 0x230   :  { %6430 = vmatprep.subr.bf16.mxu0 %v6429_v25  ;;  %6494 = vmatprep.subr.bf16.mxu1 %v6493_v21 }
 0x233   :  { %6432 = vmatpush1.bf16.msra.mxu0 %v6431_v22  ;;  %6496 = vmatpush1.bf16.msra.mxu1 %v6495_v24 }
 0x234   :  { %6434 = vmatprep.subr.bf16.mxu0 %v6433_v28  ;;  %6498 = vmatprep.subr.bf16.mxu1 %v6497_v37 }
 0x237   :  { %6436 = vmatpush1.bf16.msra.mxu0 %v6435_v41  ;;  %6500 = vmatpush1.bf16.msra.mxu1 %v6499_v46 }
 0x238   :  { %6438 = vmatprep.subr.bf16.mxu0 %v6437_v47  ;;  %6502 = vmatprep.subr.bf16.mxu1 %v6501_v58 }
 0x23b   :  { %6440 = vmatpush1.bf16.msra.mxu0 %v6439_v63  ;;  %6504 = vmatpush1.bf16.msra.mxu1 %v6503_v12 }
 0x23c   :  { %6506 = vmatprep.subr.bf16.mxu0 %v6505_v4  ;;  %6570 = vmatprep.subr.bf16.mxu1 %v6569_v6 }
 0x291   :  { %v1657_v7 = vpop.f32.mrb[2].mxu0  ;;  %v1728_v8 = vpop.f32.mrb[10].mxu1 }
 0x292   :  { %v7973_v61 = vadd.f32 %v1728_v8, %v8621_v33  ;;  %v1659_v9 = vpop.f32.mrb[3].mxu0  ;;  %v1730_v10 = vpop.f32.mrb[11].mxu1  ;;  %v7949_v14 = vadd.f32 %v1657_v7, %v8627_v42  ;;  %v1952_v7 = vld [vmem:[#allocation5 + $0x20] sm:$0xff] }
 0x293   :  { %v7974_v30 = vadd.f32 %v1730_v10, %v8623_v34  ;;  %v7950_v15 = vadd.f32 %v1659_v9, %v8629_v43  ;;  %v1954_v9 = vld [vmem:[#allocation5 + $0x30] sm:$0xff] }
 0x294   :  { %v5771_v11 = vmul.f32 -1.442695, %v7973_v61  ;;  %v1960_v61 = vld [vmem:[#allocation5 + $0x60] sm:$0xff] }
 0x295   :  { %v5772_v25 = vmul.f32 -1.442695, %v7974_v30  ;;  %v1969_v30 = vld [vmem:[#allocation5 + $0xa8] sm:$0xff] }
 0x296   :  { %8111 = vpow2.f32 %v5771_v11 }
 0x297   :  { %8113 = vpow2.f32 %v5772_v25  ;;  %v1977_v25 = vld [vmem:[#allocation5 + $0xe8] sm:$0xff] }
 0x298   :  { %8115 = vtanh.f32 %v7949_v14  ;;  %v1971_v14 = vld [vmem:[#allocation5 + $0xb8] sm:$0xff] }
 0x299   :  { %8117 = vtanh.f32 %v7950_v15 }
 0x2a0   :  { %v8112_v17 = vpop.eup %8111 }
 0x2a1   :  { %v8114_v21 = vpop.eup %8113  ;;  %v1891_v22 = vadd.f32 1.0, %v8112_v17 }
 0x2a2   :  { %v1892_v32 = vadd.f32 1.0, %v8114_v21  ;;  %v8116_v23 = vpop.eup %8115  ;;  %v6507_v21 = vpack.c.bf16 %v1960_v61, %v1952_v7  ;;  %v2017_v7 = vld [vmem:[#allocation5 + $0x228] sm:$0xff]  ;;  %v2019_v61 = vld [vmem:[#allocation5 + $0x238] sm:$0xff] }
 0x2a3   :  { %8119 = vrcp.f32 %v1891_v22  ;;  %v8118_v29 = vpop.eup %8117 }
 0x2a4   :  { %8121 = vrcp.f32 %v1892_v32  ;;  %v1968_v32 = vld [vmem:[#allocation5 + $0xa0] sm:$0xff] }
 0x2ad   :  { %v8120_v24 = vpop.eup %8119 }
 0x2ae   :  { %v8122_v27 = vpop.eup %8121  ;;  %v1925_v35 = vmul.f32 %v8120_v24, %v8116_v23  ;;  %v1976_v23 = vld [vmem:[#allocation5 + $0xe0] sm:$0xff]  ;;  %v1970_v24 = vld [vmem:[#allocation5 + $0xb0] sm:$0xff] }
 0x2af   :  { %v1926_v36 = vmul.f32 %v8122_v27, %v8118_v29  ;;  %v1978_v27 = vld [vmem:[#allocation5 + $0xf0] sm:$0xff] }
 0x2d1   :  { %v1799_v28 = vpop.f32.mrb[10].mxu0  ;;  %v1870_v37 = vpop.f32.mrb[26].mxu1 }
 0x2d2   :  { %v7989_v38 = vadd.f32 %v1799_v28, %v8633_v62  ;;  %v1801_v39 = vpop.f32.mrb[11].mxu0  ;;  %v1872_v40 = vpop.f32.mrb[27].mxu1  ;;  %v8005_v46 = vadd.f32 %v1870_v37, %v8639_v16  ;;  %v1993_v37 = vld [vmem:[#allocation5 + $0x168] sm:$0xff] }
 0x2d3   :  { %v7990_v41 = vadd.f32 %v1801_v39, %v8635_v26  ;;  %v8006_v45 = vadd.f32 %v1872_v40, %v8641_v18  ;;  %v1995_v39 = vld [vmem:[#allocation5 + $0x178] sm:$0xff]  ;;  %v6511_v40 = vpack.c.bf16 %v1976_v23, %v1968_v32 }
 0x2d4   :  { %v5773_v31 = vmul.f32 -1.442695, %v7989_v38  ;;  %v5775_v49 = vmul.f32 -1.442695, %v8005_v46  ;;  %v1987_v38 = vld [vmem:[#allocation5 + $0x138] sm:$0xff] }
 0x2d5   :  { %v5774_v44 = vmul.f32 -1.442695, %v7990_v41  ;;  %v5776_v47 = vmul.f32 -1.442695, %v8006_v45  ;;  %v6575_v41 = vpack.c.bf16 %v1978_v27, %v1970_v24  ;;  %v6577_v46 = vpack.c.bf16 %v1995_v39, %v1987_v38  ;;  %v2043_v32 = vld [vmem:[#allocation5 + $0x2f8] sm:$0xff]  ;;  %v2032_v27 = vld [vmem:[#allocation5 + $0x2a0] sm:$0xff] }
 0x2d6   :  { %8123 = vpow2.f32 %v5773_v31  ;;  %v1984_v31 = vld [vmem:[#allocation5 + $0x120] sm:$0xff]  ;;  %v2042_v38 = vld [vmem:[#allocation5 + $0x2f0] sm:$0xff]  ;;  %v2049_v39 = vld [vmem:[#allocation5 + $0x328] sm:$0xff] }
 0x2d7   :  { %8125 = vpow2.f32 %v5774_v44  ;;  %v1992_v44 = vld [vmem:[#allocation5 + $0x160] sm:$0xff] }
 0x2d8   :  { %8127 = vpow2.f32 %v5776_v47  ;;  %v1986_v47 = vld [vmem:[#allocation5 + $0x130] sm:$0xff] }
 0x2e0   :  { %v8124_v48 = vpop.eup %8123 }
 0x2e1   :  { %v1903_v50 = vadd.f32 1.0, %v8124_v48  ;;  %v8126_v58 = vpop.eup %8125  ;;  %v1994_v48 = vld [vmem:[#allocation5 + $0x170] sm:$0xff] }
 0x2e2   :  { %v1904_v59 = vadd.f32 1.0, %v8126_v58  ;;  %v8128_v60 = vpop.eup %8127  ;;  %v2003_v58 = vld [vmem:[#allocation5 + $0x1b8] sm:$0xff] }
 0x2e3   :  { %8129 = vrcp.f32 %v1903_v50  ;;  %v1916_v1 = vadd.f32 1.0, %v8128_v60  ;;  %v2009_v50 = vld [vmem:[#allocation5 + $0x1e8] sm:$0xff]  ;;  %v6515_v60 = vpack.c.bf16 %v1992_v44, %v1984_v31  ;;  %v2059_v31 = vld [vmem:[#allocation5 + $0x378] sm:$0xff] }
 0x2e4   :  { %8131 = vpow2.f32 %v5775_v49  ;;  %v2001_v49 = vld [vmem:[#allocation5 + $0x1a8] sm:$0xff] }
 0x2e5   :  { %8133 = vrcp.f32 %v1904_v59  ;;  %v2011_v59 = vld [vmem:[#allocation5 + $0x1f8] sm:$0xff] }
 0x2e6   :  { %8135 = vrcp.f32 %v1916_v1  ;;  %v6517_v1 = vpack.c.bf16 %v2009_v50, %v2001_v49  ;;  %v2050_v50 = vld [vmem:[#allocation5 + $0x330] sm:$0xff] }
 0x2ed   :  { %v8130_v0 = vpop.eup %8129 }
 0x2ee   :  { %v8132_v63 = vpop.eup %8131  ;;  %v1923_v12 = vmul.f32 %v8130_v0, %v8643_v19  ;;  %v1962_v19 = vld [vmem:[#allocation5 + $0x70] sm:$0xff]  ;;  %v6579_v0 = vpack.c.bf16 %v1994_v48, %v1986_v47  ;;  %v2056_v47 = vld [vmem:[#allocation5 + $0x360] sm:$0xff] }
 0x2ef   :  { %v8134_v2 = vpop.eup %8133  ;;  %v1915_v5 = vadd.f32 1.0, %v8132_v63  ;;  %v6571_v22 = vpack.c.bf16 %v1962_v19, %v1954_v9  ;;  %v2000_v63 = vld [vmem:[#allocation5 + $0x1a0] sm:$0xff]  ;;  %v2027_v9 = vld [vmem:[#allocation5 + $0x278] sm:$0xff] }
 0x2f0   :  { %v8666_v3 = vadd.f32 %v1925_v35, %v1923_v12  ;;  %v1924_v4 = vmul.f32 %v8134_v2, %v8645_v20  ;;  %v8136_v8 = vpop.eup %8135  ;;  %v1979_v20 = vld [vmem:[#allocation5 + $0xf8] sm:$0xff]  ;;  %v1985_v35 = vld [vmem:[#allocation5 + $0x128] sm:$0xff]  ;;  %v2008_v12 = vld [vmem:[#allocation5 + $0x1e0] sm:$0xff]  ;;  %v6581_v2 = vpack.c.bf16 %v2011_v59, %v2003_v58 }
 0x2f1   :  { %v6573_v28 = vpack.c.bf16 %v1979_v20, %v1971_v14  ;;  %v6513_v45 = vpack.c.bf16 %v1993_v37, %v1985_v35  ;;  %v6519_v19 = vpack.c.bf16 %v2008_v12, %v2000_v63  ;;  %v6585_v14 = vpack.c.bf16 %v2027_v9, %v2019_v61  ;;  %v2018_v20 = vld [vmem:[#allocation5 + $0x230] sm:$0xff]  ;;  %v2040_v35 = vld [vmem:[#allocation5 + $0x2e0] sm:$0xff]  ;;  %v2065_v59 = vld [vmem:[#allocation5 + $0x3a8] sm:$0xff] }
 0x2f2   :  { %v8669_v6 = vadd.f32 %v1926_v36, %v1924_v4  ;;  %8137 = vtanh.f32 %v8666_v3  ;;  %v6509_v36 = vpack.c.bf16 %v1977_v25, %v1969_v30  ;;  %v2002_v4 = vld [vmem:[#allocation5 + $0x1b0] sm:$0xff]  ;;  %v2016_v30 = vld [vmem:[#allocation5 + $0x220] sm:$0xff]  ;;  %v6527_v44 = vpack.c.bf16 %v2040_v35, %v2032_v27  ;;  %v2075_v63 = vld [vmem:[#allocation5 + $0x3f8] sm:$0xff] }
 0x2f3   :  { %v2034_v37 = vld [vmem:[#allocation5 + $0x2b0] sm:$0xff]  ;;  %v2081_v9 = vld [vmem:[#allocation5 + $0x428] sm:$0xff]  ;;  %v2107_v27 = vld [vmem:[#allocation5 + $0x4f8] sm:$0xff] }
 0x2f4   :  { %8139 = vtanh.f32 %v8669_v6  ;;  %v2058_v58 = vld [vmem:[#allocation5 + $0x370] sm:$0xff] }
 0x2f5   :  { %8141 = vrcp.f32 %v1915_v5  ;;  %v2010_v5 = vld [vmem:[#allocation5 + $0x1f0] sm:$0xff] }
 0x2f6   :  { %v2074_v61 = vld [vmem:[#allocation5 + $0x3f0] sm:$0xff] }
 0x2fc   :  { %v8138_v10 = vpop.eup %8137 }
 0x2fe   :  { %v8140_v11 = vpop.eup %8139 }
 0x2ff   :  { %v8142_v15 = vpop.eup %8141  ;;  %v1934_v17 = vmul.f32 %v8140_v11, %v8136_v8  ;;  %v2025_v8 = vld [vmem:[#allocation5 + $0x268] sm:$0xff]  ;;  %v2024_v11 = vld [vmem:[#allocation5 + $0x260] sm:$0xff] }
 0x300   :  { %v8673_v29 = vmul.f32 %v8142_v15, %v8138_v10  ;;  %v6583_v10 = vpack.c.bf16 %v2010_v5, %v2002_v4  ;;  %v6521_v25 = vpack.c.bf16 %v2025_v8, %v2017_v7  ;;  %v2026_v15 = vld [vmem:[#allocation5 + $0x270] sm:$0xff]  ;;  %v6523_v23 = vpack.c.bf16 %v2024_v11, %v2016_v30  ;;  %v2072_v4 = vld [vmem:[#allocation5 + $0x3e0] sm:$0xff]  ;;  %v2091_v30 = vld [vmem:[#allocation5 + $0x478] sm:$0xff] }
 0x301   :  { %2268 = vmatprep.mubr.f32.mxu0 %v1934_v17  ;;  %2339 = vmatprep.mubr.f32.mxu1 %v1934_v17  ;;  %v6587_v24 = vpack.c.bf16 %v2026_v15, %v2018_v20  ;;  %v2066_v8 = vld [vmem:[#allocation5 + $0x3b0] sm:$0xff]  ;;  %v2088_v20 = vld [vmem:[#allocation5 + $0x460] sm:$0xff] }
 0x302   :  { %2269 = vmatmul.mubr.f32.vlgmr.msra.gmra.mrb[4].mxu0 %v8673_v29  ;;  %2340 = vmatmul.mubr.f32.vlgmr.msra.gmra.mrb[12].mxu1 %v8673_v29 }
 0x303   :  { %6508 = vmatpush1.bf16.msra.mxu0 %v6507_v21  ;;  %6572 = vmatpush1.bf16.msra.mxu1 %v6571_v22  ;;  %v2041_v21 = vld [vmem:[#allocation5 + $0x2e8] sm:$0xff]  ;;  %v2035_v22 = vld [vmem:[#allocation5 + $0x2b8] sm:$0xff] }
 0x304   :  { %2410 = vmatprep.mubr.f32.mxu0 %v1934_v17  ;;  %2481 = vmatprep.mubr.f32.mxu1 %v1934_v17  ;;  %v2033_v17 = vld [vmem:[#allocation5 + $0x2a8] sm:$0xff] }
 0x305   :  { %6510 = vmatprep.subr.bf16.mxu0 %v6509_v36  ;;  %6574 = vmatprep.subr.bf16.mxu1 %v6573_v28  ;;  %v6525_v36 = vpack.c.bf16 %v2041_v21, %v2033_v17  ;;  %v6589_v28 = vpack.c.bf16 %v2043_v32, %v2035_v22  ;;  %v2082_v21 = vld [vmem:[#allocation5 + $0x430] sm:$0xff]  ;;  %v2097_v32 = vld [vmem:[#allocation5 + $0x4a8] sm:$0xff] }
 0x306   :  { %v2090_v22 = vld [vmem:[#allocation5 + $0x470] sm:$0xff] }
 0x307   :  { %6512 = vmatpush1.bf16.msra.mxu0 %v6511_v40  ;;  %6576 = vmatpush1.bf16.msra.mxu1 %v6575_v41  ;;  %v2057_v40 = vld [vmem:[#allocation5 + $0x368] sm:$0xff]  ;;  %v2051_v41 = vld [vmem:[#allocation5 + $0x338] sm:$0xff] }
 0x308   :  { %6514 = vmatprep.subr.bf16.mxu0 %v6513_v45  ;;  %6578 = vmatprep.subr.bf16.mxu1 %v6577_v46  ;;  %v6591_v45 = vpack.c.bf16 %v2042_v38, %v2034_v37  ;;  %v2048_v46 = vld [vmem:[#allocation5 + $0x320] sm:$0xff]  ;;  %v6529_v48 = vpack.c.bf16 %v2057_v40, %v2049_v39  ;;  %v6593_v49 = vpack.c.bf16 %v2059_v31, %v2051_v41  ;;  %v2098_v40 = vld [vmem:[#allocation5 + $0x4b0] sm:$0xff]  ;;  %v2113_v31 = vld [vmem:[#allocation5 + $0x528] sm:$0xff] }
 0x309   :  { %v6531_v12 = vpack.c.bf16 %v2056_v47, %v2048_v46  ;;  %v2104_v37 = vld [vmem:[#allocation5 + $0x4e0] sm:$0xff]  ;;  %v2106_v41 = vld [vmem:[#allocation5 + $0x4f0] sm:$0xff]  ;;  %v2123_v46 = vld [vmem:[#allocation5 + $0x578] sm:$0xff] }
 0x30b   :  { %6516 = vmatpush1.bf16.msra.mxu0 %v6515_v60  ;;  %6580 = vmatpush1.bf16.msra.mxu1 %v6579_v0  ;;  %v2073_v60 = vld [vmem:[#allocation5 + $0x3e8] sm:$0xff]  ;;  %v2067_v0 = vld [vmem:[#allocation5 + $0x3b8] sm:$0xff] }
 0x30c   :  { %6518 = vmatprep.subr.bf16.mxu0 %v6517_v1  ;;  %6582 = vmatprep.subr.bf16.mxu1 %v6581_v2  ;;  %v6595_v1 = vpack.c.bf16 %v2058_v58, %v2050_v50  ;;  %v2064_v2 = vld [vmem:[#allocation5 + $0x3a0] sm:$0xff]  ;;  %v6533_v5 = vpack.c.bf16 %v2073_v60, %v2065_v59  ;;  %v6597_v7 = vpack.c.bf16 %v2075_v63, %v2067_v0  ;;  %v2114_v60 = vld [vmem:[#allocation5 + $0x530] sm:$0xff]  ;;  %v2129_v63 = vld [vmem:[#allocation5 + $0x5a8] sm:$0xff] }
 0x30d   :  { %v6535_v11 = vpack.c.bf16 %v2072_v4, %v2064_v2  ;;  %v2120_v50 = vld [vmem:[#allocation5 + $0x560] sm:$0xff]  ;;  %v2122_v0 = vld [vmem:[#allocation5 + $0x570] sm:$0xff]  ;;  %v2139_v2 = vld [vmem:[#allocation5 + $0x5f8] sm:$0xff] }
 0x30f   :  { %6520 = vmatpush1.bf16.msra.mxu0 %v6519_v19  ;;  %6584 = vmatpush1.bf16.msra.mxu1 %v6583_v10  ;;  %v2089_v19 = vld [vmem:[#allocation5 + $0x468] sm:$0xff]  ;;  %v2083_v10 = vld [vmem:[#allocation5 + $0x438] sm:$0xff] }
 0x310   :  { %6522 = vmatprep.subr.bf16.mxu0 %v6521_v25  ;;  %6586 = vmatprep.subr.bf16.mxu1 %v6585_v14  ;;  %v6599_v25 = vpack.c.bf16 %v2074_v61, %v2066_v8  ;;  %v2080_v14 = vld [vmem:[#allocation5 + $0x420] sm:$0xff]  ;;  %v6537_v15 = vpack.c.bf16 %v2089_v19, %v2081_v9  ;;  %v6601_v17 = vpack.c.bf16 %v2091_v30, %v2083_v10  ;;  %v2130_v19 = vld [vmem:[#allocation5 + $0x5b0] sm:$0xff]  ;;  %v2145_v30 = vld [vmem:[#allocation5 + $0x628] sm:$0xff] }
 0x311   :  { %v6539_v35 = vpack.c.bf16 %v2088_v20, %v2080_v14  ;;  %v2136_v8 = vld [vmem:[#allocation5 + $0x5e0] sm:$0xff]  ;;  %v2138_v10 = vld [vmem:[#allocation5 + $0x5f0] sm:$0xff]  ;;  %v2155_v14 = vld [vmem:[#allocation5 + $0x678] sm:$0xff] }
 0x313   :  { %6524 = vmatpush1.bf16.msra.mxu0 %v6523_v23  ;;  %6588 = vmatpush1.bf16.msra.mxu1 %v6587_v24  ;;  %v2105_v23 = vld [vmem:[#allocation5 + $0x4e8] sm:$0xff]  ;;  %v2099_v24 = vld [vmem:[#allocation5 + $0x4b8] sm:$0xff] }
 0x314   :  { %6526 = vmatprep.subr.bf16.mxu0 %v6525_v36  ;;  %6590 = vmatprep.subr.bf16.mxu1 %v6589_v28  ;;  %v6603_v36 = vpack.c.bf16 %v2090_v22, %v2082_v21  ;;  %v2096_v28 = vld [vmem:[#allocation5 + $0x4a0] sm:$0xff]  ;;  %v6541_v38 = vpack.c.bf16 %v2105_v23, %v2097_v32  ;;  %v6605_v39 = vpack.c.bf16 %v2107_v27, %v2099_v24  ;;  %v2146_v23 = vld [vmem:[#allocation5 + $0x630] sm:$0xff]  ;;  %v2161_v27 = vld [vmem:[#allocation5 + $0x6a8] sm:$0xff] }
 0x315   :  { %v6543_v47 = vpack.c.bf16 %v2104_v37, %v2096_v28  ;;  %v2152_v21 = vld [vmem:[#allocation5 + $0x660] sm:$0xff]  ;;  %v2154_v24 = vld [vmem:[#allocation5 + $0x670] sm:$0xff]  ;;  %v2171_v28 = vld [vmem:[#allocation5 + $0x6f8] sm:$0xff] }
 0x317   :  { %6528 = vmatpush1.bf16.msra.mxu0 %v6527_v44  ;;  %6592 = vmatpush1.bf16.msra.mxu1 %v6591_v45  ;;  %v2121_v44 = vld [vmem:[#allocation5 + $0x568] sm:$0xff]  ;;  %v2115_v45 = vld [vmem:[#allocation5 + $0x538] sm:$0xff] }
 0x318   :  { %6530 = vmatprep.subr.bf16.mxu0 %v6529_v48  ;;  %6594 = vmatprep.subr.bf16.mxu1 %v6593_v49  ;;  %v6607_v48 = vpack.c.bf16 %v2106_v41, %v2098_v40  ;;  %v2112_v49 = vld [vmem:[#allocation5 + $0x520] sm:$0xff]  ;;  %v6545_v58 = vpack.c.bf16 %v2121_v44, %v2113_v31  ;;  %v6609_v59 = vpack.c.bf16 %v2123_v46, %v2115_v45  ;;  %v2162_v44 = vld [vmem:[#allocation5 + $0x6b0] sm:$0xff]  ;;  %v2177_v46 = vld [vmem:[#allocation5 + $0x728] sm:$0xff] }
 0x319   :  { %v6547_v4 = vpack.c.bf16 %v2120_v50, %v2112_v49  ;;  %v2168_v40 = vld [vmem:[#allocation5 + $0x6e0] sm:$0xff]  ;;  %v2170_v45 = vld [vmem:[#allocation5 + $0x6f0] sm:$0xff]  ;;  %v2187_v49 = vld [vmem:[#allocation5 + $0x778] sm:$0xff] }
 0x31b   :  { %6532 = vmatpush1.bf16.msra.mxu0 %v6531_v12  ;;  %6596 = vmatpush1.bf16.msra.mxu1 %v6595_v1  ;;  %v2137_v12 = vld [vmem:[#allocation5 + $0x5e8] sm:$0xff]  ;;  %v2131_v1 = vld [vmem:[#allocation5 + $0x5b8] sm:$0xff] }
 0x31c   :  { %6534 = vmatprep.subr.bf16.mxu0 %v6533_v5  ;;  %6598 = vmatprep.subr.bf16.mxu1 %v6597_v7  ;;  %v6611_v5 = vpack.c.bf16 %v2122_v0, %v2114_v60  ;;  %v2128_v7 = vld [vmem:[#allocation5 + $0x5a0] sm:$0xff]  ;;  %v6549_v61 = vpack.c.bf16 %v2137_v12, %v2129_v63  ;;  %v6613_v9 = vpack.c.bf16 %v2139_v2, %v2131_v1  ;;  %v2178_v12 = vld [vmem:[#allocation5 + $0x730] sm:$0xff]  ;;  %v2193_v2 = vld [vmem:[#allocation5 + $0x7a8] sm:$0xff] }
 0x31d   :  { %v6551_v20 = vpack.c.bf16 %v2136_v8, %v2128_v7  ;;  %v2184_v60 = vld [vmem:[#allocation5 + $0x760] sm:$0xff]  ;;  %v2186_v1 = vld [vmem:[#allocation5 + $0x770] sm:$0xff]  ;;  %v2203_v7 = vld [vmem:[#allocation5 + $0x7f8] sm:$0xff] }
 0x31f   :  { %6536 = vmatpush1.bf16.msra.mxu0 %v6535_v11  ;;  %6600 = vmatpush1.bf16.msra.mxu1 %v6599_v25  ;;  %v2153_v11 = vld [vmem:[#allocation5 + $0x668] sm:$0xff]  ;;  %v2147_v25 = vld [vmem:[#allocation5 + $0x638] sm:$0xff] }
 0x320   :  { %6538 = vmatprep.subr.bf16.mxu0 %v6537_v15  ;;  %6602 = vmatprep.subr.bf16.mxu1 %v6601_v17  ;;  %v6615_v15 = vpack.c.bf16 %v2138_v10, %v2130_v19  ;;  %v2144_v17 = vld [vmem:[#allocation5 + $0x620] sm:$0xff]  ;;  %v6553_v22 = vpack.c.bf16 %v2153_v11, %v2145_v30  ;;  %v6617_v32 = vpack.c.bf16 %v2155_v14, %v2147_v25  ;;  %v2194_v11 = vld [vmem:[#allocation5 + $0x7b0] sm:$0xff] }
 0x321   :  { %v6555_v37 = vpack.c.bf16 %v2152_v21, %v2144_v17  ;;  %v2200_v30 = vld [vmem:[#allocation5 + $0x7e0] sm:$0xff]  ;;  %v2202_v25 = vld [vmem:[#allocation5 + $0x7f0] sm:$0xff]  ;;  %v2570_v17 = vld [vmem:[#allocation5 + $0x48] sm:$0xff] }
 0x322   :  { %v2564_v21 = vld [vmem:[#allocation5 + $0x18] sm:$0xff] }
 0x323   :  { %6540 = vmatpush1.bf16.msra.mxu0 %v6539_v35  ;;  %6604 = vmatpush1.bf16.msra.mxu1 %v6603_v36  ;;  %v2169_v35 = vld [vmem:[#allocation5 + $0x6e8] sm:$0xff]  ;;  %v2163_v36 = vld [vmem:[#allocation5 + $0x6b8] sm:$0xff] }
 0x324   :  { %6542 = vmatprep.subr.bf16.mxu0 %v6541_v38  ;;  %6606 = vmatprep.subr.bf16.mxu1 %v6605_v39  ;;  %v6619_v38 = vpack.c.bf16 %v2154_v24, %v2146_v23  ;;  %v2160_v39 = vld [vmem:[#allocation5 + $0x6a0] sm:$0xff]  ;;  %v6557_v41 = vpack.c.bf16 %v2169_v35, %v2161_v27  ;;  %v6621_v31 = vpack.c.bf16 %v2171_v28, %v2163_v36  ;;  %v2563_v36 = vld [vmem:[#allocation5 + $0x10] sm:$0xff] }
 0x325   :  { %v6559_v50 = vpack.c.bf16 %v2168_v40, %v2160_v39  ;;  %v2561_v23 = vld [vmem:[#allocation5] sm:$0xff]  ;;  %v2571_v28 = vld [vmem:[#allocation5 + $0x50] sm:$0xff]  ;;  %v2586_v39 = vld [vmem:[#allocation5 + $0xc8] sm:$0xff] }
 0x326   :  { %v2569_v24 = vld [vmem:[#allocation5 + $0x40] sm:$0xff]  ;;  %v2580_v40 = vld [vmem:[#allocation5 + $0x98] sm:$0xff] }
 0x327   :  { %6544 = vmatpush1.bf16.msra.mxu0 %v6543_v47  ;;  %6608 = vmatpush1.bf16.msra.mxu1 %v6607_v48  ;;  %v2185_v47 = vld [vmem:[#allocation5 + $0x768] sm:$0xff]  ;;  %v2179_v48 = vld [vmem:[#allocation5 + $0x738] sm:$0xff]  ;;  %v6635_v35 = vpack.c.bf16 %v2569_v24, %v2561_v23 }
 0x328   :  { %6546 = vmatprep.subr.bf16.mxu0 %v6545_v58  ;;  %6610 = vmatprep.subr.bf16.mxu1 %v6609_v59  ;;  %v6623_v58 = vpack.c.bf16 %v2170_v45, %v2162_v44  ;;  %v2176_v59 = vld [vmem:[#allocation5 + $0x720] sm:$0xff]  ;;  %v6561_v0 = vpack.c.bf16 %v2185_v47, %v2177_v46  ;;  %v6625_v63 = vpack.c.bf16 %v2187_v49, %v2179_v48  ;;  %v2579_v46 = vld [vmem:[#allocation5 + $0x90] sm:$0xff]  ;;  %v2594_v49 = vld [vmem:[#allocation5 + $0x108] sm:$0xff] }
 0x329   :  { %v6563_v8 = vpack.c.bf16 %v2184_v60, %v2176_v59  ;;  %v2577_v44 = vld [vmem:[#allocation5 + $0x80] sm:$0xff]  ;;  %v2587_v48 = vld [vmem:[#allocation5 + $0xd0] sm:$0xff]  ;;  %v2596_v60 = vld [vmem:[#allocation5 + $0x118] sm:$0xff] }
 0x32a   :  { %v2585_v45 = vld [vmem:[#allocation5 + $0xc0] sm:$0xff] }
 0x32b   :  { %6548 = vmatpush1.bf16.msra.mxu0 %v6547_v4  ;;  %6612 = vmatpush1.bf16.msra.mxu1 %v6611_v5  ;;  %v2201_v4 = vld [vmem:[#allocation5 + $0x7e8] sm:$0xff]  ;;  %v2195_v5 = vld [vmem:[#allocation5 + $0x7b8] sm:$0xff]  ;;  %v6639_v47 = vpack.c.bf16 %v2585_v45, %v2577_v44  ;;  %v2641_v45 = vld [vmem:[#allocation5 + $0x280] sm:$0xff] }
 0x32c   :  { %6550 = vmatprep.subr.bf16.mxu0 %v6549_v61  ;;  %6614 = vmatprep.subr.bf16.mxu1 %v6613_v9  ;;  %v6627_v61 = vpack.c.bf16 %v2186_v1, %v2178_v12  ;;  %v2192_v9 = vld [vmem:[#allocation5 + $0x7a0] sm:$0xff]  ;;  %v6565_v19 = vpack.c.bf16 %v2201_v4, %v2193_v2  ;;  %v6629_v10 = vpack.c.bf16 %v2203_v7, %v2195_v5  ;;  %v2595_v2 = vld [vmem:[#allocation5 + $0x110] sm:$0xff]  ;;  %v2610_v7 = vld [vmem:[#allocation5 + $0x188] sm:$0xff] }
 0x32d   :  { %v6567_v14 = vpack.c.bf16 %v2200_v30, %v2192_v9  ;;  %v2601_v1 = vld [vmem:[#allocation5 + $0x140] sm:$0xff]  ;;  %v2603_v4 = vld [vmem:[#allocation5 + $0x150] sm:$0xff]  ;;  %v2652_v44 = vld [vmem:[#allocation5 + $0x2d8] sm:$0xff] }
 0x32e   :  { %v6707_v9 = vpack.c.bf16 %v2603_v4, %v2595_v2  ;;  %v2609_v30 = vld [vmem:[#allocation5 + $0x180] sm:$0xff] }
 0x32f   :  { %6552 = vmatpush1.bf16.msra.mxu0 %v6551_v20  ;;  %6616 = vmatpush1.bf16.msra.mxu1 %v6615_v15  ;;  %v6631_v20 = vpack.c.bf16 %v2202_v25, %v2194_v11  ;;  %v2562_v15 = vld [vmem:[#allocation5 + $0x8] sm:$0xff]  ;;  %v2617_v11 = vld [vmem:[#allocation5 + $0x1c0] sm:$0xff] }
 0x330   :  { %6554 = vmatprep.subr.bf16.mxu0 %v6553_v22  ;;  %6618 = vmatprep.subr.bf16.mxu1 %v6617_v32  ;;  %v6633_v22 = vpack.c.bf16 %v2570_v17, %v2562_v15  ;;  %v2572_v32 = vld [vmem:[#allocation5 + $0x58] sm:$0xff]  ;;  %v2626_v15 = vld [vmem:[#allocation5 + $0x208] sm:$0xff]  ;;  %v2665_v2 = vld [vmem:[#allocation5 + $0x340] sm:$0xff] }
 0x331   :  { %v6697_v27 = vpack.c.bf16 %v2572_v32, %v2564_v21  ;;  %v2634_v17 = vld [vmem:[#allocation5 + $0x248] sm:$0xff]  ;;  %v2628_v21 = vld [vmem:[#allocation5 + $0x218] sm:$0xff]  ;;  %v6647_v32 = vpack.c.bf16 %v2617_v11, %v2609_v30 }
 0x332   :  { %v6649_v24 = vpack.c.bf16 %v2634_v17, %v2626_v15  ;;  %v2684_v11 = vld [vmem:[#allocation5 + $0x3d8] sm:$0xff]  ;;  %v2675_v17 = vld [vmem:[#allocation5 + $0x390] sm:$0xff] }
 0x333   :  { %6556 = vmatpush1.bf16.msra.mxu0 %v6555_v37  ;;  %6620 = vmatpush1.bf16.msra.mxu1 %v6619_v38  ;;  %v2578_v37 = vld [vmem:[#allocation5 + $0x88] sm:$0xff]  ;;  %v6699_v38 = vpack.c.bf16 %v2571_v28, %v2563_v36  ;;  %v2633_v36 = vld [vmem:[#allocation5 + $0x240] sm:$0xff]  ;;  %v2627_v28 = vld [vmem:[#allocation5 + $0x210] sm:$0xff] }
 0x334   :  { %6558 = vmatprep.subr.bf16.mxu0 %v6557_v41  ;;  %6622 = vmatprep.subr.bf16.mxu1 %v6621_v31  ;;  %v2588_v41 = vld [vmem:[#allocation5 + $0xd8] sm:$0xff] }
 0x335   :  { %v6701_v31 = vpack.c.bf16 %v2588_v41, %v2580_v40  ;;  %v2642_v40 = vld [vmem:[#allocation5 + $0x288] sm:$0xff] }
 0x336   :  { %v2650_v41 = vld [vmem:[#allocation5 + $0x2c8] sm:$0xff] }
 0x337   :  { %6560 = vmatpush1.bf16.msra.mxu0 %v6559_v50  ;;  %6624 = vmatpush1.bf16.msra.mxu1 %v6623_v58  ;;  %v2602_v50 = vld [vmem:[#allocation5 + $0x148] sm:$0xff]  ;;  %v6703_v58 = vpack.c.bf16 %v2587_v48, %v2579_v46  ;;  %v2649_v46 = vld [vmem:[#allocation5 + $0x2c0] sm:$0xff] }
 0x338   :  { %6562 = vmatprep.subr.bf16.mxu0 %v6561_v0  ;;  %6626 = vmatprep.subr.bf16.mxu1 %v6625_v63  ;;  %v6641_v59 = vpack.c.bf16 %v2602_v50, %v2594_v49  ;;  %v2604_v0 = vld [vmem:[#allocation5 + $0x158] sm:$0xff]  ;;  %v2593_v63 = vld [vmem:[#allocation5 + $0x100] sm:$0xff]  ;;  %v6655_v48 = vpack.c.bf16 %v2649_v46, %v2641_v45  ;;  %v2643_v49 = vld [vmem:[#allocation5 + $0x290] sm:$0xff] }
 0x339   :  { %v6705_v12 = vpack.c.bf16 %v2604_v0, %v2596_v60  ;;  %v6643_v5 = vpack.c.bf16 %v2601_v1, %v2593_v63  ;;  %v2651_v50 = vld [vmem:[#allocation5 + $0x2d0] sm:$0xff]  ;;  %v2666_v60 = vld [vmem:[#allocation5 + $0x348] sm:$0xff]  ;;  %v2660_v0 = vld [vmem:[#allocation5 + $0x318] sm:$0xff] }
 0x33a   :  { %v2657_v1 = vld [vmem:[#allocation5 + $0x300] sm:$0xff]  ;;  %v2716_v46 = vld [vmem:[#allocation5 + $0x4d8] sm:$0xff] }
 0x33b   :  { %6564 = vmatpush1.bf16.msra.mxu0 %v6563_v8  ;;  %6628 = vmatpush1.bf16.msra.mxu1 %v6627_v61  ;;  %v2618_v8 = vld [vmem:[#allocation5 + $0x1c8] sm:$0xff]  ;;  %v2612_v61 = vld [vmem:[#allocation5 + $0x198] sm:$0xff] }
 0x33c   :  { %6566 = vmatprep.subr.bf16.mxu0 %v6565_v19  ;;  %6630 = vmatprep.subr.bf16.mxu1 %v6629_v10  ;;  %v6645_v19 = vpack.c.bf16 %v2618_v8, %v2610_v7  ;;  %v2620_v10 = vld [vmem:[#allocation5 + $0x1d8] sm:$0xff]  ;;  %v2659_v7 = vld [vmem:[#allocation5 + $0x310] sm:$0xff] }
 0x33d   :  { %v6709_v25 = vpack.c.bf16 %v2620_v10, %v2612_v61  ;;  %v2667_v8 = vld [vmem:[#allocation5 + $0x350] sm:$0xff]  ;;  %v2676_v10 = vld [vmem:[#allocation5 + $0x398] sm:$0xff] }
 0x33e   :  { %v6723_v61 = vpack.c.bf16 %v2667_v8, %v2659_v7 }
 0x33f   :  { %6568 = vmatpush1.bf16.msra.mxu0 %v6567_v14  ;;  %6632 = vmatpush1.bf16.msra.mxu1 %v6631_v20  ;;  %v2611_v14 = vld [vmem:[#allocation5 + $0x190] sm:$0xff] }
 0x340   :  { %6634 = vmatprep.subr.bf16.mxu0 %v6633_v22  ;;  %6698 = vmatprep.subr.bf16.mxu1 %v6697_v27  ;;  %v2619_v20 = vld [vmem:[#allocation5 + $0x1d0] sm:$0xff]  ;;  %v2636_v22 = vld [vmem:[#allocation5 + $0x258] sm:$0xff] }
 0x341   :  { %v6711_v23 = vpack.c.bf16 %v2619_v20, %v2611_v14  ;;  %v6713_v27 = vpack.c.bf16 %v2636_v22, %v2628_v21  ;;  %v2681_v14 = vld [vmem:[#allocation5 + $0x3c0] sm:$0xff]  ;;  %v6725_v20 = vpack.c.bf16 %v2684_v11, %v2676_v10  ;;  %v2683_v21 = vld [vmem:[#allocation5 + $0x3d0] sm:$0xff]  ;;  %v2738_v10 = vld [vmem:[#allocation5 + $0x588] sm:$0xff] }
 0x342   :  { %2411 = vmatmul.mubr.f32.vlgmr.msra.gmra.mrb[12].mxu0 %v8673_v29  ;;  %2482 = vmatmul.mubr.f32.vlgmr.msra.gmra.mrb[28].mxu1 %v8673_v29  ;;  %v6637_v29 = vpack.c.bf16 %v2586_v39, %v2578_v37  ;;  %v6727_v22 = vpack.c.bf16 %v2683_v21, %v2675_v17  ;;  %v2740_v11 = vld [vmem:[#allocation5 + $0x598] sm:$0xff] }
 0x343   :  { %6636 = vmatpush1.bf16.msra.mxu0 %v6635_v35  ;;  %6700 = vmatpush1.bf16.msra.mxu1 %v6699_v38  ;;  %v2625_v35 = vld [vmem:[#allocation5 + $0x200] sm:$0xff]  ;;  %v2635_v38 = vld [vmem:[#allocation5 + $0x250] sm:$0xff] }
 0x344   :  { %6638 = vmatprep.subr.bf16.mxu0 %v6637_v29  ;;  %6702 = vmatprep.subr.bf16.mxu1 %v6701_v31  ;;  %v6651_v37 = vpack.c.bf16 %v2633_v36, %v2625_v35  ;;  %v6715_v39 = vpack.c.bf16 %v2635_v38, %v2627_v28  ;;  %v2644_v29 = vld [vmem:[#allocation5 + $0x298] sm:$0xff]  ;;  %v6653_v31 = vpack.c.bf16 %v2650_v41, %v2642_v40  ;;  %v2689_v36 = vld [vmem:[#allocation5 + $0x400] sm:$0xff]  ;;  %v2699_v40 = vld [vmem:[#allocation5 + $0x450] sm:$0xff] }
 0x345   :  { %v2700_v35 = vld [vmem:[#allocation5 + $0x458] sm:$0xff]  ;;  %v2697_v28 = vld [vmem:[#allocation5 + $0x440] sm:$0xff] }
 0x346   :  { %v6667_v38 = vpack.c.bf16 %v2697_v28, %v2689_v36  ;;  %v2764_v28 = vld [vmem:[#allocation5 + $0x658] sm:$0xff] }
 0x347   :  { %6640 = vmatpush1.bf16.msra.mxu0 %v6639_v47  ;;  %6704 = vmatpush1.bf16.msra.mxu1 %v6703_v58  ;;  %v6717_v47 = vpack.c.bf16 %v2652_v44, %v2644_v29  ;;  %v6719_v58 = vpack.c.bf16 %v2651_v50, %v2643_v49  ;;  %v2706_v29 = vld [vmem:[#allocation5 + $0x488] sm:$0xff]  ;;  %v2708_v44 = vld [vmem:[#allocation5 + $0x498] sm:$0xff] }
 0x348   :  { %6642 = vmatprep.subr.bf16.mxu0 %v6641_v59  ;;  %6706 = vmatprep.subr.bf16.mxu1 %v6705_v12  ;;  %v2658_v59 = vld [vmem:[#allocation5 + $0x308] sm:$0xff]  ;;  %v2668_v12 = vld [vmem:[#allocation5 + $0x358] sm:$0xff]  ;;  %v6733_v49 = vpack.c.bf16 %v2716_v46, %v2708_v44 }
 0x349   :  { %v6657_v63 = vpack.c.bf16 %v2666_v60, %v2658_v59  ;;  %v6721_v4 = vpack.c.bf16 %v2668_v12, %v2660_v0  ;;  %v2715_v59 = vld [vmem:[#allocation5 + $0x4d0] sm:$0xff]  ;;  %v2722_v0 = vld [vmem:[#allocation5 + $0x508] sm:$0xff]  ;;  %v2724_v12 = vld [vmem:[#allocation5 + $0x518] sm:$0xff] }
 0x34a   :  { %v2770_v44 = vld [vmem:[#allocation5 + $0x688] sm:$0xff]  ;;  %v2772_v46 = vld [vmem:[#allocation5 + $0x698] sm:$0xff] }
 0x34b   :  { %6644 = vmatpush1.bf16.msra.mxu0 %v6643_v5  ;;  %6708 = vmatpush1.bf16.msra.mxu1 %v6707_v9  ;;  %v6659_v5 = vpack.c.bf16 %v2665_v2, %v2657_v1  ;;  %v2674_v9 = vld [vmem:[#allocation5 + $0x388] sm:$0xff]  ;;  %v2732_v2 = vld [vmem:[#allocation5 + $0x558] sm:$0xff] }
 0x34c   :  { %6646 = vmatprep.subr.bf16.mxu0 %v6645_v19  ;;  %6710 = vmatprep.subr.bf16.mxu1 %v6709_v25  ;;  %v2682_v19 = vld [vmem:[#allocation5 + $0x3c8] sm:$0xff]  ;;  %v2673_v25 = vld [vmem:[#allocation5 + $0x380] sm:$0xff]  ;;  %v6737_v7 = vpack.c.bf16 %v2732_v2, %v2724_v12  ;;  %v2788_v2 = vld [vmem:[#allocation5 + $0x718] sm:$0xff] }
 0x34d   :  { %v6661_v30 = vpack.c.bf16 %v2682_v19, %v2674_v9  ;;  %v6663_v15 = vpack.c.bf16 %v2681_v14, %v2673_v25  ;;  %v2731_v9 = vld [vmem:[#allocation5 + $0x550] sm:$0xff]  ;;  %v2748_v14 = vld [vmem:[#allocation5 + $0x5d8] sm:$0xff] }
 0x34e   :  { %v6741_v17 = vpack.c.bf16 %v2748_v14, %v2740_v11  ;;  %v2810_v11 = vld [vmem:[#allocation5 + $0x7c8] sm:$0xff] }
 0x34f   :  { %6648 = vmatpush1.bf16.msra.mxu0 %v6647_v32  ;;  %6712 = vmatpush1.bf16.msra.mxu1 %v6711_v23  ;;  %v2690_v32 = vld [vmem:[#allocation5 + $0x408] sm:$0xff] }
 0x350   :  { %6650 = vmatprep.subr.bf16.mxu0 %v6649_v24  ;;  %6714 = vmatprep.subr.bf16.mxu1 %v6713_v27  ;;  %v2698_v23 = vld [vmem:[#allocation5 + $0x448] sm:$0xff]  ;;  %v2692_v24 = vld [vmem:[#allocation5 + $0x418] sm:$0xff] }
 0x351   :  { %v6665_v27 = vpack.c.bf16 %v2698_v23, %v2690_v32  ;;  %v2747_v32 = vld [vmem:[#allocation5 + $0x5d0] sm:$0xff] }
 0x353   :  { %6652 = vmatpush1.bf16.msra.mxu0 %v6651_v37  ;;  %6716 = vmatpush1.bf16.msra.mxu1 %v6715_v39  ;;  %v6729_v37 = vpack.c.bf16 %v2700_v35, %v2692_v24  ;;  %v2691_v39 = vld [vmem:[#allocation5 + $0x410] sm:$0xff]  ;;  %v2754_v24 = vld [vmem:[#allocation5 + $0x608] sm:$0xff]  ;;  %v2756_v35 = vld [vmem:[#allocation5 + $0x618] sm:$0xff] }
 0x354   :  { %6654 = vmatprep.subr.bf16.mxu0 %v6653_v31  ;;  %6718 = vmatprep.subr.bf16.mxu1 %v6717_v47  ;;  %v6731_v41 = vpack.c.bf16 %v2699_v40, %v2691_v39  ;;  %v2714_v31 = vld [vmem:[#allocation5 + $0x4c8] sm:$0xff]  ;;  %v2705_v47 = vld [vmem:[#allocation5 + $0x480] sm:$0xff]  ;;  %v6745_v39 = vpack.c.bf16 %v2764_v28, %v2756_v35  ;;  %v2568_v28 = vld [vmem:[#allocation5 + $0x38] sm:$0xff] }
 0x355   :  { %v6669_v45 = vpack.c.bf16 %v2714_v31, %v2706_v29  ;;  %v2763_v29 = vld [vmem:[#allocation5 + $0x650] sm:$0xff]  ;;  %v2566_v35 = vld [vmem:[#allocation5 + $0x28] sm:$0xff] }
 0x357   :  { %6656 = vmatpush1.bf16.msra.mxu0 %v6655_v48  ;;  %6720 = vmatpush1.bf16.msra.mxu1 %v6719_v58  ;;  %v2713_v48 = vld [vmem:[#allocation5 + $0x4c0] sm:$0xff]  ;;  %v2707_v58 = vld [vmem:[#allocation5 + $0x490] sm:$0xff] }
 0x358   :  { %6658 = vmatprep.subr.bf16.mxu0 %v6657_v63  ;;  %6722 = vmatprep.subr.bf16.mxu1 %v6721_v4  ;;  %v6671_v50 = vpack.c.bf16 %v2713_v48, %v2705_v47  ;;  %v6735_v60 = vpack.c.bf16 %v2715_v59, %v2707_v58  ;;  %v2730_v63 = vld [vmem:[#allocation5 + $0x548] sm:$0xff]  ;;  %v2721_v4 = vld [vmem:[#allocation5 + $0x500] sm:$0xff]  ;;  %v2780_v48 = vld [vmem:[#allocation5 + $0x6d8] sm:$0xff] }
 0x359   :  { %v6673_v1 = vpack.c.bf16 %v2730_v63, %v2722_v0  ;;  %v6749_v58 = vpack.c.bf16 %v2780_v48, %v2772_v46  ;;  %v2779_v0 = vld [vmem:[#allocation5 + $0x6d0] sm:$0xff]  ;;  %v2786_v63 = vld [vmem:[#allocation5 + $0x708] sm:$0xff] }
 0x35b   :  { %6660 = vmatpush1.bf16.msra.mxu0 %v6659_v5  ;;  %6724 = vmatpush1.bf16.msra.mxu1 %v6723_v61  ;;  %v2729_v5 = vld [vmem:[#allocation5 + $0x540] sm:$0xff]  ;;  %v2723_v61 = vld [vmem:[#allocation5 + $0x510] sm:$0xff] }
 0x35c   :  { %6662 = vmatprep.subr.bf16.mxu0 %v6661_v30  ;;  %6726 = vmatprep.subr.bf16.mxu1 %v6725_v20  ;;  %v6675_v8 = vpack.c.bf16 %v2729_v5, %v2721_v4  ;;  %v6739_v19 = vpack.c.bf16 %v2731_v9, %v2723_v61  ;;  %v2746_v30 = vld [vmem:[#allocation5 + $0x5c8] sm:$0xff]  ;;  %v2737_v20 = vld [vmem:[#allocation5 + $0x580] sm:$0xff]  ;;  %v2796_v4 = vld [vmem:[#allocation5 + $0x758] sm:$0xff] }
 0x35d   :  { %v6677_v25 = vpack.c.bf16 %v2746_v30, %v2738_v10  ;;  %v2793_v61 = vld [vmem:[#allocation5 + $0x740] sm:$0xff]  ;;  %v2787_v9 = vld [vmem:[#allocation5 + $0x710] sm:$0xff]  ;;  %v2802_v30 = vld [vmem:[#allocation5 + $0x788] sm:$0xff] }
 0x35e   :  { %v2795_v10 = vld [vmem:[#allocation5 + $0x750] sm:$0xff]  ;;  %v6693_v14 = vpack.c.bf16 %v2810_v11, %v2802_v30 }
 0x35f   :  { %6664 = vmatpush1.bf16.msra.mxu0 %v6663_v15  ;;  %6728 = vmatpush1.bf16.msra.mxu1 %v6727_v22  ;;  %v2745_v15 = vld [vmem:[#allocation5 + $0x5c0] sm:$0xff]  ;;  %v2739_v22 = vld [vmem:[#allocation5 + $0x590] sm:$0xff] }
 0x360   :  { %6666 = vmatprep.subr.bf16.mxu0 %v6665_v27  ;;  %6730 = vmatprep.subr.bf16.mxu1 %v6729_v37  ;;  %v6679_v21 = vpack.c.bf16 %v2745_v15, %v2737_v20  ;;  %v6743_v23 = vpack.c.bf16 %v2747_v32, %v2739_v22  ;;  %v2762_v27 = vld [vmem:[#allocation5 + $0x648] sm:$0xff]  ;;  %v2753_v37 = vld [vmem:[#allocation5 + $0x600] sm:$0xff]  ;;  %v2804_v20 = vld [vmem:[#allocation5 + $0x798] sm:$0xff] }
 0x361   :  { %v6681_v36 = vpack.c.bf16 %v2762_v27, %v2754_v24  ;;  %v2812_v15 = vld [vmem:[#allocation5 + $0x7d8] sm:$0xff]  ;;  %v2809_v22 = vld [vmem:[#allocation5 + $0x7c0] sm:$0xff]  ;;  %v2803_v32 = vld [vmem:[#allocation5 + $0x790] sm:$0xff] }
 0x363   :  { %6668 = vmatpush1.bf16.msra.mxu0 %v6667_v38  ;;  %6732 = vmatpush1.bf16.msra.mxu1 %v6731_v41  ;;  %v2761_v38 = vld [vmem:[#allocation5 + $0x640] sm:$0xff]  ;;  %v2755_v41 = vld [vmem:[#allocation5 + $0x610] sm:$0xff] }
 0x364   :  { %6670 = vmatprep.subr.bf16.mxu0 %v6669_v45  ;;  %6734 = vmatprep.subr.bf16.mxu1 %v6733_v49  ;;  %v6683_v40 = vpack.c.bf16 %v2761_v38, %v2753_v37  ;;  %v6747_v31 = vpack.c.bf16 %v2763_v29, %v2755_v41  ;;  %v2778_v45 = vld [vmem:[#allocation5 + $0x6c8] sm:$0xff]  ;;  %v2769_v49 = vld [vmem:[#allocation5 + $0x680] sm:$0xff]  ;;  %v2576_v38 = vld [vmem:[#allocation5 + $0x78] sm:$0xff] }
 0x365   :  { %v6685_v47 = vpack.c.bf16 %v2778_v45, %v2770_v44 }
 0x367   :  { %6672 = vmatpush1.bf16.msra.mxu0 %v6671_v50  ;;  %6736 = vmatpush1.bf16.msra.mxu1 %v6735_v60  ;;  %v2777_v50 = vld [vmem:[#allocation5 + $0x6c0] sm:$0xff]  ;;  %v2771_v60 = vld [vmem:[#allocation5 + $0x690] sm:$0xff] }
 0x368   :  { %6674 = vmatprep.subr.bf16.mxu0 %v6673_v1  ;;  %6738 = vmatprep.subr.bf16.mxu1 %v6737_v7  ;;  %v6687_v59 = vpack.c.bf16 %v2777_v50, %v2769_v49  ;;  %v6751_v12 = vpack.c.bf16 %v2779_v0, %v2771_v60  ;;  %v2794_v1 = vld [vmem:[#allocation5 + $0x748] sm:$0xff]  ;;  %v6753_v7 = vpack.c.bf16 %v2796_v4, %v2788_v2 }
 0x369   :  { %v6689_v5 = vpack.c.bf16 %v2794_v1, %v2786_v63 }
 0x36b   :  { %6676 = vmatpush1.bf16.msra.mxu0 %v6675_v8  ;;  %6740 = vmatpush1.bf16.msra.mxu1 %v6739_v19  ;;  %v2785_v8 = vld [vmem:[#allocation5 + $0x700] sm:$0xff] }
 0x36c   :  { %6678 = vmatprep.subr.bf16.mxu0 %v6677_v25  ;;  %6742 = vmatprep.subr.bf16.mxu1 %v6741_v17  ;;  %v6691_v19 = vpack.c.bf16 %v2793_v61, %v2785_v8  ;;  %v6755_v25 = vpack.c.bf16 %v2795_v10, %v2787_v9  ;;  %v2801_v17 = vld [vmem:[#allocation5 + $0x780] sm:$0xff] }
 0x36d   :  { %v6695_v24 = vpack.c.bf16 %v2809_v22, %v2801_v17 }
 0x36f   :  { %6680 = vmatpush1.bf16.msra.mxu0 %v6679_v21  ;;  %6744 = vmatpush1.bf16.msra.mxu1 %v6743_v23  ;;  %v6757_v21 = vpack.c.bf16 %v2812_v15, %v2804_v20  ;;  %v2811_v23 = vld [vmem:[#allocation5 + $0x7d0] sm:$0xff] }
 0x370   :  { %6682 = vmatprep.subr.bf16.mxu0 %v6681_v36  ;;  %6746 = vmatprep.subr.bf16.mxu1 %v6745_v39  ;;  %v6759_v27 = vpack.c.bf16 %v2811_v23, %v2803_v32  ;;  %v2574_v36 = vld [vmem:[#allocation5 + $0x68] sm:$0xff]  ;;  %v6825_v39 = vpack.c.bf16 %v2576_v38, %v2568_v28 }
 0x371   :  { %v6761_v37 = vpack.c.bf16 %v2574_v36, %v2566_v35 }
 0x373   :  { %6684 = vmatpush1.bf16.msra.mxu0 %v6683_v40  ;;  %6748 = vmatpush1.bf16.msra.mxu1 %v6747_v31 }
 0x374   :  { %6686 = vmatprep.subr.bf16.mxu0 %v6685_v47  ;;  %6750 = vmatprep.subr.bf16.mxu1 %v6749_v58 }
 0x377   :  { %6688 = vmatpush1.bf16.msra.mxu0 %v6687_v59  ;;  %6752 = vmatpush1.bf16.msra.mxu1 %v6751_v12 }
 0x378   :  { %6690 = vmatprep.subr.bf16.mxu0 %v6689_v5  ;;  %6754 = vmatprep.subr.bf16.mxu1 %v6753_v7 }
 0x37b   :  { %6692 = vmatpush1.bf16.msra.mxu0 %v6691_v19  ;;  %6756 = vmatpush1.bf16.msra.mxu1 %v6755_v25 }
 0x37c   :  { %6694 = vmatprep.subr.bf16.mxu0 %v6693_v14  ;;  %6758 = vmatprep.subr.bf16.mxu1 %v6757_v21 }
 0x37f   :  { %6696 = vmatpush1.bf16.msra.mxu0 %v6695_v24  ;;  %6760 = vmatpush1.bf16.msra.mxu1 %v6759_v27 }
 0x380   :  { %6762 = vmatprep.subr.bf16.mxu0 %v6761_v37  ;;  %6826 = vmatprep.subr.bf16.mxu1 %v6825_v39 }
 0x3d5   :  { %v2270_v40 = vpop.f32.mrb[4].mxu0  ;;  %v2341_v41 = vpop.f32.mrb[12].mxu1 }
 0x3d6   :  { %v7975_v29 = vadd.f32 %v2341_v41, %v8621_v33  ;;  %v2272_v31 = vpop.f32.mrb[5].mxu0  ;;  %v2343_v44 = vpop.f32.mrb[13].mxu1  ;;  %v7951_v48 = vadd.f32 %v2270_v40, %v8627_v42  ;;  %v2565_v40 = vld [vmem:[#allocation5 + $0x20] sm:$0xff] }
 0x3d7   :  { %v7976_v45 = vadd.f32 %v2343_v44, %v8623_v34  ;;  %v7952_v49 = vadd.f32 %v2272_v31, %v8629_v43  ;;  %v2567_v31 = vld [vmem:[#allocation5 + $0x30] sm:$0xff] }
 0x3d8   :  { %v5777_v46 = vmul.f32 -1.442695, %v7975_v29  ;;  %v2573_v29 = vld [vmem:[#allocation5 + $0x60] sm:$0xff] }
 0x3d9   :  { %v5778_v47 = vmul.f32 -1.442695, %v7976_v45  ;;  %v2582_v45 = vld [vmem:[#allocation5 + $0xa8] sm:$0xff] }
 0x3da   :  { %8143 = vpow2.f32 %v5777_v46 }
 0x3db   :  { %8145 = vpow2.f32 %v5778_v47  ;;  %v2590_v47 = vld [vmem:[#allocation5 + $0xe8] sm:$0xff] }
 0x3dc   :  { %8147 = vtanh.f32 %v7951_v48  ;;  %v2584_v48 = vld [vmem:[#allocation5 + $0xb8] sm:$0xff] }
 0x3dd   :  { %8149 = vtanh.f32 %v7952_v49 }
 0x3e4   :  { %v8144_v50 = vpop.eup %8143 }
 0x3e5   :  { %v8146_v58 = vpop.eup %8145  ;;  %v2504_v59 = vadd.f32 1.0, %v8144_v50 }
 0x3e6   :  { %v2505_v60 = vadd.f32 1.0, %v8146_v58  ;;  %v8148_v0 = vpop.eup %8147  ;;  %v6763_v58 = vpack.c.bf16 %v2573_v29, %v2565_v40  ;;  %v2630_v40 = vld [vmem:[#allocation5 + $0x228] sm:$0xff]  ;;  %v2632_v29 = vld [vmem:[#allocation5 + $0x238] sm:$0xff] }
 0x3e7   :  { %8151 = vrcp.f32 %v2504_v59  ;;  %v8150_v63 = vpop.eup %8149 }
 0x3e8   :  { %8153 = vrcp.f32 %v2505_v60  ;;  %v2581_v60 = vld [vmem:[#allocation5 + $0xa0] sm:$0xff] }
 0x3f1   :  { %v8152_v12 = vpop.eup %8151 }
 0x3f2   :  { %v8154_v1 = vpop.eup %8153  ;;  %v2538_v2 = vmul.f32 %v8152_v12, %v8148_v0  ;;  %v2589_v0 = vld [vmem:[#allocation5 + $0xe0] sm:$0xff]  ;;  %v2583_v12 = vld [vmem:[#allocation5 + $0xb0] sm:$0xff] }
 0x3f3   :  { %v2539_v4 = vmul.f32 %v8154_v1, %v8150_v63  ;;  %v2591_v1 = vld [vmem:[#allocation5 + $0xf0] sm:$0xff] }
 0x415   :  { %v2412_v5 = vpop.f32.mrb[12].mxu0  ;;  %v2483_v7 = vpop.f32.mrb[28].mxu1 }
 0x416   :  { %v7991_v8 = vadd.f32 %v2412_v5, %v8633_v62  ;;  %v2414_v61 = vpop.f32.mrb[13].mxu0  ;;  %v2485_v9 = vpop.f32.mrb[29].mxu1  ;;  %v8007_v25 = vadd.f32 %v2483_v7, %v8639_v16  ;;  %v2606_v7 = vld [vmem:[#allocation5 + $0x168] sm:$0xff] }
 0x417   :  { %v7992_v19 = vadd.f32 %v2414_v61, %v8635_v26  ;;  %v8008_v11 = vadd.f32 %v2485_v9, %v8641_v18  ;;  %v2608_v61 = vld [vmem:[#allocation5 + $0x178] sm:$0xff]  ;;  %v6767_v9 = vpack.c.bf16 %v2589_v0, %v2581_v60 }
 0x418   :  { %v5779_v10 = vmul.f32 -1.442695, %v7991_v8  ;;  %v5781_v15 = vmul.f32 -1.442695, %v8007_v25  ;;  %v2600_v8 = vld [vmem:[#allocation5 + $0x138] sm:$0xff] }
 0x419   :  { %v5780_v30 = vmul.f32 -1.442695, %v7992_v19  ;;  %v5782_v14 = vmul.f32 -1.442695, %v8008_v11  ;;  %v6831_v19 = vpack.c.bf16 %v2591_v1, %v2583_v12  ;;  %v6833_v25 = vpack.c.bf16 %v2608_v61, %v2600_v8  ;;  %v2656_v60 = vld [vmem:[#allocation5 + $0x2f8] sm:$0xff]  ;;  %v2645_v1 = vld [vmem:[#allocation5 + $0x2a0] sm:$0xff] }
 0x41a   :  { %8155 = vpow2.f32 %v5779_v10  ;;  %v2597_v10 = vld [vmem:[#allocation5 + $0x120] sm:$0xff]  ;;  %v2655_v8 = vld [vmem:[#allocation5 + $0x2f0] sm:$0xff]  ;;  %v2662_v61 = vld [vmem:[#allocation5 + $0x328] sm:$0xff] }
 0x41b   :  { %8157 = vpow2.f32 %v5780_v30  ;;  %v2605_v30 = vld [vmem:[#allocation5 + $0x160] sm:$0xff] }
 0x41c   :  { %8159 = vpow2.f32 %v5782_v14  ;;  %v2599_v14 = vld [vmem:[#allocation5 + $0x130] sm:$0xff] }
 0x424   :  { %v8156_v20 = vpop.eup %8155 }
 0x425   :  { %v2516_v17 = vadd.f32 1.0, %v8156_v20  ;;  %v8158_v21 = vpop.eup %8157  ;;  %v2607_v20 = vld [vmem:[#allocation5 + $0x170] sm:$0xff] }
 0x426   :  { %v2517_v22 = vadd.f32 1.0, %v8158_v21  ;;  %v8160_v32 = vpop.eup %8159  ;;  %v2616_v21 = vld [vmem:[#allocation5 + $0x1b8] sm:$0xff] }
 0x427   :  { %8161 = vrcp.f32 %v2516_v17  ;;  %v2529_v35 = vadd.f32 1.0, %v8160_v32  ;;  %v2622_v17 = vld [vmem:[#allocation5 + $0x1e8] sm:$0xff]  ;;  %v6771_v32 = vpack.c.bf16 %v2605_v30, %v2597_v10  ;;  %v2672_v10 = vld [vmem:[#allocation5 + $0x378] sm:$0xff] }
 0x428   :  { %8163 = vpow2.f32 %v5781_v15  ;;  %v2614_v15 = vld [vmem:[#allocation5 + $0x1a8] sm:$0xff] }
 0x429   :  { %8165 = vrcp.f32 %v2517_v22  ;;  %v2624_v22 = vld [vmem:[#allocation5 + $0x1f8] sm:$0xff] }
 0x42a   :  { %8167 = vrcp.f32 %v2529_v35  ;;  %v6773_v35 = vpack.c.bf16 %v2622_v17, %v2614_v15  ;;  %v2663_v17 = vld [vmem:[#allocation5 + $0x330] sm:$0xff] }
 0x431   :  { %v8162_v23 = vpop.eup %8161 }
 0x432   :  { %v8164_v24 = vpop.eup %8163  ;;  %v2536_v27 = vmul.f32 %v8162_v23, %v8666_v3  ;;  %v2575_v3 = vld [vmem:[#allocation5 + $0x70] sm:$0xff]  ;;  %v6835_v23 = vpack.c.bf16 %v2607_v20, %v2599_v14  ;;  %v2669_v14 = vld [vmem:[#allocation5 + $0x360] sm:$0xff] }
 0x433   :  { %v8166_v36 = vpop.eup %8165  ;;  %v2528_v38 = vadd.f32 1.0, %v8164_v24  ;;  %v6827_v59 = vpack.c.bf16 %v2575_v3, %v2567_v31  ;;  %v2613_v24 = vld [vmem:[#allocation5 + $0x1a0] sm:$0xff]  ;;  %v2640_v31 = vld [vmem:[#allocation5 + $0x278] sm:$0xff] }
 0x434   :  { %v8688_v28 = vadd.f32 %v2538_v2, %v2536_v27  ;;  %v2537_v37 = vmul.f32 %v8166_v36, %v8669_v6  ;;  %v8168_v41 = vpop.eup %8167  ;;  %v2592_v6 = vld [vmem:[#allocation5 + $0xf8] sm:$0xff]  ;;  %v2598_v2 = vld [vmem:[#allocation5 + $0x128] sm:$0xff]  ;;  %v2621_v27 = vld [vmem:[#allocation5 + $0x1e0] sm:$0xff]  ;;  %v6837_v36 = vpack.c.bf16 %v2624_v22, %v2616_v21 }
 0x435   :  { %v6829_v5 = vpack.c.bf16 %v2592_v6, %v2584_v48  ;;  %v6769_v11 = vpack.c.bf16 %v2606_v7, %v2598_v2  ;;  %v6775_v3 = vpack.c.bf16 %v2621_v27, %v2613_v24  ;;  %v6841_v48 = vpack.c.bf16 %v2640_v31, %v2632_v29  ;;  %v2631_v6 = vld [vmem:[#allocation5 + $0x230] sm:$0xff]  ;;  %v2653_v2 = vld [vmem:[#allocation5 + $0x2e0] sm:$0xff]  ;;  %v2678_v22 = vld [vmem:[#allocation5 + $0x3a8] sm:$0xff] }
 0x436   :  { %v8691_v39 = vadd.f32 %v2539_v4, %v2537_v37  ;;  %8169 = vtanh.f32 %v8688_v28  ;;  %v6765_v4 = vpack.c.bf16 %v2590_v47, %v2582_v45  ;;  %v2615_v37 = vld [vmem:[#allocation5 + $0x1b0] sm:$0xff]  ;;  %v2629_v45 = vld [vmem:[#allocation5 + $0x220] sm:$0xff]  ;;  %v6783_v30 = vpack.c.bf16 %v2653_v2, %v2645_v1  ;;  %v2688_v24 = vld [vmem:[#allocation5 + $0x3f8] sm:$0xff] }
 0x437   :  { %v2647_v7 = vld [vmem:[#allocation5 + $0x2b0] sm:$0xff]  ;;  %v2694_v31 = vld [vmem:[#allocation5 + $0x428] sm:$0xff]  ;;  %v2720_v1 = vld [vmem:[#allocation5 + $0x4f8] sm:$0xff] }
 0x438   :  { %8171 = vtanh.f32 %v8691_v39  ;;  %v2671_v21 = vld [vmem:[#allocation5 + $0x370] sm:$0xff] }
 0x439   :  { %8173 = vrcp.f32 %v2528_v38  ;;  %v2623_v38 = vld [vmem:[#allocation5 + $0x1f0] sm:$0xff] }
 0x43a   :  { %v2687_v29 = vld [vmem:[#allocation5 + $0x3f0] sm:$0xff] }
 0x440   :  { %v8170_v44 = vpop.eup %8169 }
 0x442   :  { %v8172_v46 = vpop.eup %8171 }
 0x443   :  { %v8174_v49 = vpop.eup %8173  ;;  %v2547_v50 = vmul.f32 %v8172_v46, %v8168_v41  ;;  %v2638_v41 = vld [vmem:[#allocation5 + $0x268] sm:$0xff]  ;;  %v2637_v46 = vld [vmem:[#allocation5 + $0x260] sm:$0xff] }
 0x444   :  { %v8695_v63 = vmul.f32 %v8174_v49, %v8170_v44  ;;  %v6839_v44 = vpack.c.bf16 %v2623_v38, %v2615_v37  ;;  %v6777_v47 = vpack.c.bf16 %v2638_v41, %v2630_v40  ;;  %v2639_v49 = vld [vmem:[#allocation5 + $0x270] sm:$0xff]  ;;  %v6779_v0 = vpack.c.bf16 %v2637_v46, %v2629_v45  ;;  %v2685_v37 = vld [vmem:[#allocation5 + $0x3e0] sm:$0xff]  ;;  %v2704_v45 = vld [vmem:[#allocation5 + $0x478] sm:$0xff] }
 0x445   :  { %2881 = vmatprep.mubr.f32.mxu0 %v2547_v50  ;;  %2952 = vmatprep.mubr.f32.mxu1 %v2547_v50  ;;  %v6843_v12 = vpack.c.bf16 %v2639_v49, %v2631_v6  ;;  %v2679_v41 = vld [vmem:[#allocation5 + $0x3b0] sm:$0xff]  ;;  %v2701_v6 = vld [vmem:[#allocation5 + $0x460] sm:$0xff] }
 0x446   :  { %2882 = vmatmul.mubr.f32.vlgmr.msra.gmra.mrb[6].mxu0 %v8695_v63  ;;  %2953 = vmatmul.mubr.f32.vlgmr.msra.gmra.mrb[14].mxu1 %v8695_v63 }
 0x447   :  { %6764 = vmatpush1.bf16.msra.mxu0 %v6763_v58  ;;  %6828 = vmatpush1.bf16.msra.mxu1 %v6827_v59  ;;  %v2654_v58 = vld [vmem:[#allocation5 + $0x2e8] sm:$0xff]  ;;  %v2648_v59 = vld [vmem:[#allocation5 + $0x2b8] sm:$0xff] }
 0x448   :  { %3023 = vmatprep.mubr.f32.mxu0 %v2547_v50  ;;  %3094 = vmatprep.mubr.f32.mxu1 %v2547_v50  ;;  %v2646_v50 = vld [vmem:[#allocation5 + $0x2a8] sm:$0xff] }
 0x449   :  { %6766 = vmatprep.subr.bf16.mxu0 %v6765_v4  ;;  %6830 = vmatprep.subr.bf16.mxu1 %v6829_v5  ;;  %v6781_v4 = vpack.c.bf16 %v2654_v58, %v2646_v50  ;;  %v6845_v5 = vpack.c.bf16 %v2656_v60, %v2648_v59  ;;  %v2695_v58 = vld [vmem:[#allocation5 + $0x430] sm:$0xff]  ;;  %v2710_v60 = vld [vmem:[#allocation5 + $0x4a8] sm:$0xff] }
 0x44a   :  { %v2703_v59 = vld [vmem:[#allocation5 + $0x470] sm:$0xff] }
 0x44b   :  { %6768 = vmatpush1.bf16.msra.mxu0 %v6767_v9  ;;  %6832 = vmatpush1.bf16.msra.mxu1 %v6831_v19  ;;  %v2670_v9 = vld [vmem:[#allocation5 + $0x368] sm:$0xff]  ;;  %v2664_v19 = vld [vmem:[#allocation5 + $0x338] sm:$0xff] }
 0x44c   :  { %6770 = vmatprep.subr.bf16.mxu0 %v6769_v11  ;;  %6834 = vmatprep.subr.bf16.mxu1 %v6833_v25  ;;  %v6847_v11 = vpack.c.bf16 %v2655_v8, %v2647_v7  ;;  %v2661_v25 = vld [vmem:[#allocation5 + $0x320] sm:$0xff]  ;;  %v6785_v20 = vpack.c.bf16 %v2670_v9, %v2662_v61  ;;  %v6849_v15 = vpack.c.bf16 %v2672_v10, %v2664_v19  ;;  %v2711_v9 = vld [vmem:[#allocation5 + $0x4b0] sm:$0xff]  ;;  %v2726_v10 = vld [vmem:[#allocation5 + $0x528] sm:$0xff] }
 0x44d   :  { %v6787_v27 = vpack.c.bf16 %v2669_v14, %v2661_v25  ;;  %v2717_v7 = vld [vmem:[#allocation5 + $0x4e0] sm:$0xff]  ;;  %v2719_v19 = vld [vmem:[#allocation5 + $0x4f0] sm:$0xff]  ;;  %v2736_v25 = vld [vmem:[#allocation5 + $0x578] sm:$0xff] }
 0x44f   :  { %6772 = vmatpush1.bf16.msra.mxu0 %v6771_v32  ;;  %6836 = vmatpush1.bf16.msra.mxu1 %v6835_v23  ;;  %v2686_v32 = vld [vmem:[#allocation5 + $0x3e8] sm:$0xff]  ;;  %v2680_v23 = vld [vmem:[#allocation5 + $0x3b8] sm:$0xff] }
 0x450   :  { %6774 = vmatprep.subr.bf16.mxu0 %v6773_v35  ;;  %6838 = vmatprep.subr.bf16.mxu1 %v6837_v36  ;;  %v6851_v35 = vpack.c.bf16 %v2671_v21, %v2663_v17  ;;  %v2677_v36 = vld [vmem:[#allocation5 + $0x3a0] sm:$0xff]  ;;  %v6789_v38 = vpack.c.bf16 %v2686_v32, %v2678_v22  ;;  %v6853_v40 = vpack.c.bf16 %v2688_v24, %v2680_v23  ;;  %v2727_v32 = vld [vmem:[#allocation5 + $0x530] sm:$0xff]  ;;  %v2742_v24 = vld [vmem:[#allocation5 + $0x5a8] sm:$0xff] }
 0x451   :  { %v6791_v46 = vpack.c.bf16 %v2685_v37, %v2677_v36  ;;  %v2733_v17 = vld [vmem:[#allocation5 + $0x560] sm:$0xff]  ;;  %v2735_v23 = vld [vmem:[#allocation5 + $0x570] sm:$0xff]  ;;  %v2752_v36 = vld [vmem:[#allocation5 + $0x5f8] sm:$0xff] }
 0x453   :  { %6776 = vmatpush1.bf16.msra.mxu0 %v6775_v3  ;;  %6840 = vmatpush1.bf16.msra.mxu1 %v6839_v44  ;;  %v2702_v3 = vld [vmem:[#allocation5 + $0x468] sm:$0xff]  ;;  %v2696_v44 = vld [vmem:[#allocation5 + $0x438] sm:$0xff] }
 0x454   :  { %6778 = vmatprep.subr.bf16.mxu0 %v6777_v47  ;;  %6842 = vmatprep.subr.bf16.mxu1 %v6841_v48  ;;  %v6855_v47 = vpack.c.bf16 %v2687_v29, %v2679_v41  ;;  %v2693_v48 = vld [vmem:[#allocation5 + $0x420] sm:$0xff]  ;;  %v6793_v49 = vpack.c.bf16 %v2702_v3, %v2694_v31  ;;  %v6857_v50 = vpack.c.bf16 %v2704_v45, %v2696_v44  ;;  %v2743_v3 = vld [vmem:[#allocation5 + $0x5b0] sm:$0xff]  ;;  %v2758_v45 = vld [vmem:[#allocation5 + $0x628] sm:$0xff] }
 0x455   :  { %v6795_v2 = vpack.c.bf16 %v2701_v6, %v2693_v48  ;;  %v2749_v41 = vld [vmem:[#allocation5 + $0x5e0] sm:$0xff]  ;;  %v2751_v44 = vld [vmem:[#allocation5 + $0x5f0] sm:$0xff]  ;;  %v2768_v48 = vld [vmem:[#allocation5 + $0x678] sm:$0xff] }
 0x457   :  { %6780 = vmatpush1.bf16.msra.mxu0 %v6779_v0  ;;  %6844 = vmatpush1.bf16.msra.mxu1 %v6843_v12  ;;  %v2718_v0 = vld [vmem:[#allocation5 + $0x4e8] sm:$0xff]  ;;  %v2712_v12 = vld [vmem:[#allocation5 + $0x4b8] sm:$0xff] }
 0x458   :  { %6782 = vmatprep.subr.bf16.mxu0 %v6781_v4  ;;  %6846 = vmatprep.subr.bf16.mxu1 %v6845_v5  ;;  %v6859_v4 = vpack.c.bf16 %v2703_v59, %v2695_v58  ;;  %v2709_v5 = vld [vmem:[#allocation5 + $0x4a0] sm:$0xff]  ;;  %v6797_v8 = vpack.c.bf16 %v2718_v0, %v2710_v60  ;;  %v6861_v61 = vpack.c.bf16 %v2720_v1, %v2712_v12  ;;  %v2759_v0 = vld [vmem:[#allocation5 + $0x630] sm:$0xff]  ;;  %v2774_v1 = vld [vmem:[#allocation5 + $0x6a8] sm:$0xff] }
 0x459   :  { %v6799_v14 = vpack.c.bf16 %v2717_v7, %v2709_v5  ;;  %v2765_v58 = vld [vmem:[#allocation5 + $0x660] sm:$0xff]  ;;  %v2767_v12 = vld [vmem:[#allocation5 + $0x670] sm:$0xff]  ;;  %v2784_v5 = vld [vmem:[#allocation5 + $0x6f8] sm:$0xff] }
 0x45b   :  { %6784 = vmatpush1.bf16.msra.mxu0 %v6783_v30  ;;  %6848 = vmatpush1.bf16.msra.mxu1 %v6847_v11  ;;  %v2734_v30 = vld [vmem:[#allocation5 + $0x568] sm:$0xff]  ;;  %v2728_v11 = vld [vmem:[#allocation5 + $0x538] sm:$0xff] }
 0x45c   :  { %6786 = vmatprep.subr.bf16.mxu0 %v6785_v20  ;;  %6850 = vmatprep.subr.bf16.mxu1 %v6849_v15  ;;  %v6863_v20 = vpack.c.bf16 %v2719_v19, %v2711_v9  ;;  %v2725_v15 = vld [vmem:[#allocation5 + $0x520] sm:$0xff]  ;;  %v6801_v21 = vpack.c.bf16 %v2734_v30, %v2726_v10  ;;  %v6865_v22 = vpack.c.bf16 %v2736_v25, %v2728_v11  ;;  %v2775_v30 = vld [vmem:[#allocation5 + $0x6b0] sm:$0xff]  ;;  %v2790_v25 = vld [vmem:[#allocation5 + $0x728] sm:$0xff] }
 0x45d   :  { %v6803_v37 = vpack.c.bf16 %v2733_v17, %v2725_v15  ;;  %v2781_v9 = vld [vmem:[#allocation5 + $0x6e0] sm:$0xff]  ;;  %v2783_v11 = vld [vmem:[#allocation5 + $0x6f0] sm:$0xff]  ;;  %v2800_v15 = vld [vmem:[#allocation5 + $0x778] sm:$0xff] }
 0x45f   :  { %6788 = vmatpush1.bf16.msra.mxu0 %v6787_v27  ;;  %6852 = vmatpush1.bf16.msra.mxu1 %v6851_v35  ;;  %v2750_v27 = vld [vmem:[#allocation5 + $0x5e8] sm:$0xff]  ;;  %v2744_v35 = vld [vmem:[#allocation5 + $0x5b8] sm:$0xff] }
 0x460   :  { %6790 = vmatprep.subr.bf16.mxu0 %v6789_v38  ;;  %6854 = vmatprep.subr.bf16.mxu1 %v6853_v40  ;;  %v6867_v38 = vpack.c.bf16 %v2735_v23, %v2727_v32  ;;  %v2741_v40 = vld [vmem:[#allocation5 + $0x5a0] sm:$0xff]  ;;  %v6805_v29 = vpack.c.bf16 %v2750_v27, %v2742_v24  ;;  %v6869_v31 = vpack.c.bf16 %v2752_v36, %v2744_v35  ;;  %v2791_v27 = vld [vmem:[#allocation5 + $0x730] sm:$0xff]  ;;  %v2806_v36 = vld [vmem:[#allocation5 + $0x7a8] sm:$0xff] }
 0x461   :  { %v6807_v6 = vpack.c.bf16 %v2749_v41, %v2741_v40  ;;  %v2797_v32 = vld [vmem:[#allocation5 + $0x760] sm:$0xff]  ;;  %v2799_v35 = vld [vmem:[#allocation5 + $0x770] sm:$0xff]  ;;  %v2816_v40 = vld [vmem:[#allocation5 + $0x7f8] sm:$0xff] }
 0x463   :  { %6792 = vmatpush1.bf16.msra.mxu0 %v6791_v46  ;;  %6856 = vmatpush1.bf16.msra.mxu1 %v6855_v47  ;;  %v2766_v46 = vld [vmem:[#allocation5 + $0x668] sm:$0xff]  ;;  %v2760_v47 = vld [vmem:[#allocation5 + $0x638] sm:$0xff] }
 0x464   :  { %6794 = vmatprep.subr.bf16.mxu0 %v6793_v49  ;;  %6858 = vmatprep.subr.bf16.mxu1 %v6857_v50  ;;  %v6871_v49 = vpack.c.bf16 %v2751_v44, %v2743_v3  ;;  %v2757_v50 = vld [vmem:[#allocation5 + $0x620] sm:$0xff]  ;;  %v6809_v59 = vpack.c.bf16 %v2766_v46, %v2758_v45  ;;  %v6873_v60 = vpack.c.bf16 %v2768_v48, %v2760_v47  ;;  %v2807_v46 = vld [vmem:[#allocation5 + $0x7b0] sm:$0xff] }
 0x465   :  { %v6811_v7 = vpack.c.bf16 %v2765_v58, %v2757_v50  ;;  %v2813_v45 = vld [vmem:[#allocation5 + $0x7e0] sm:$0xff]  ;;  %v2815_v47 = vld [vmem:[#allocation5 + $0x7f0] sm:$0xff]  ;;  %v3183_v50 = vld [vmem:[#allocation5 + $0x48] sm:$0xff] }
 0x466   :  { %v3177_v58 = vld [vmem:[#allocation5 + $0x18] sm:$0xff] }
 0x467   :  { %6796 = vmatpush1.bf16.msra.mxu0 %v6795_v2  ;;  %6860 = vmatpush1.bf16.msra.mxu1 %v6859_v4  ;;  %v2782_v2 = vld [vmem:[#allocation5 + $0x6e8] sm:$0xff]  ;;  %v2776_v4 = vld [vmem:[#allocation5 + $0x6b8] sm:$0xff] }
 0x468   :  { %6798 = vmatprep.subr.bf16.mxu0 %v6797_v8  ;;  %6862 = vmatprep.subr.bf16.mxu1 %v6861_v61  ;;  %v6875_v8 = vpack.c.bf16 %v2767_v12, %v2759_v0  ;;  %v2773_v61 = vld [vmem:[#allocation5 + $0x6a0] sm:$0xff]  ;;  %v6813_v19 = vpack.c.bf16 %v2782_v2, %v2774_v1  ;;  %v6877_v10 = vpack.c.bf16 %v2784_v5, %v2776_v4  ;;  %v3176_v4 = vld [vmem:[#allocation5 + $0x10] sm:$0xff] }
 0x469   :  { %v6815_v17 = vpack.c.bf16 %v2781_v9, %v2773_v61  ;;  %v3174_v0 = vld [vmem:[#allocation5] sm:$0xff]  ;;  %v3184_v5 = vld [vmem:[#allocation5 + $0x50] sm:$0xff]  ;;  %v3199_v61 = vld [vmem:[#allocation5 + $0xc8] sm:$0xff] }
 0x46a   :  { %v3182_v12 = vld [vmem:[#allocation5 + $0x40] sm:$0xff]  ;;  %v3193_v9 = vld [vmem:[#allocation5 + $0x98] sm:$0xff] }
 0x46b   :  { %6800 = vmatpush1.bf16.msra.mxu0 %v6799_v14  ;;  %6864 = vmatpush1.bf16.msra.mxu1 %v6863_v20  ;;  %v2798_v14 = vld [vmem:[#allocation5 + $0x768] sm:$0xff]  ;;  %v2792_v20 = vld [vmem:[#allocation5 + $0x738] sm:$0xff]  ;;  %v6891_v2 = vpack.c.bf16 %v3182_v12, %v3174_v0 }
 0x46c   :  { %6802 = vmatprep.subr.bf16.mxu0 %v6801_v21  ;;  %6866 = vmatprep.subr.bf16.mxu1 %v6865_v22  ;;  %v6879_v21 = vpack.c.bf16 %v2783_v11, %v2775_v30  ;;  %v2789_v22 = vld [vmem:[#allocation5 + $0x720] sm:$0xff]  ;;  %v6817_v23 = vpack.c.bf16 %v2798_v14, %v2790_v25  ;;  %v6881_v24 = vpack.c.bf16 %v2800_v15, %v2792_v20  ;;  %v3192_v25 = vld [vmem:[#allocation5 + $0x90] sm:$0xff]  ;;  %v3207_v15 = vld [vmem:[#allocation5 + $0x108] sm:$0xff] }
 0x46d   :  { %v6819_v41 = vpack.c.bf16 %v2797_v32, %v2789_v22  ;;  %v3190_v30 = vld [vmem:[#allocation5 + $0x80] sm:$0xff]  ;;  %v3200_v20 = vld [vmem:[#allocation5 + $0xd0] sm:$0xff]  ;;  %v3209_v32 = vld [vmem:[#allocation5 + $0x118] sm:$0xff] }
 0x46e   :  { %v3198_v11 = vld [vmem:[#allocation5 + $0xc0] sm:$0xff] }
 0x46f   :  { %6804 = vmatpush1.bf16.msra.mxu0 %v6803_v37  ;;  %6868 = vmatpush1.bf16.msra.mxu1 %v6867_v38  ;;  %v2814_v37 = vld [vmem:[#allocation5 + $0x7e8] sm:$0xff]  ;;  %v2808_v38 = vld [vmem:[#allocation5 + $0x7b8] sm:$0xff]  ;;  %v6895_v14 = vpack.c.bf16 %v3198_v11, %v3190_v30  ;;  %v3254_v11 = vld [vmem:[#allocation5 + $0x280] sm:$0xff] }
 0x470   :  { %6806 = vmatprep.subr.bf16.mxu0 %v6805_v29  ;;  %6870 = vmatprep.subr.bf16.mxu1 %v6869_v31  ;;  %v6883_v29 = vpack.c.bf16 %v2799_v35, %v2791_v27  ;;  %v2805_v31 = vld [vmem:[#allocation5 + $0x7a0] sm:$0xff]  ;;  %v6821_v3 = vpack.c.bf16 %v2814_v37, %v2806_v36  ;;  %v6885_v44 = vpack.c.bf16 %v2816_v40, %v2808_v38  ;;  %v3208_v36 = vld [vmem:[#allocation5 + $0x110] sm:$0xff]  ;;  %v3223_v40 = vld [vmem:[#allocation5 + $0x188] sm:$0xff] }
 0x471   :  { %v6823_v48 = vpack.c.bf16 %v2813_v45, %v2805_v31  ;;  %v3214_v35 = vld [vmem:[#allocation5 + $0x140] sm:$0xff]  ;;  %v3216_v37 = vld [vmem:[#allocation5 + $0x150] sm:$0xff]  ;;  %v3265_v30 = vld [vmem:[#allocation5 + $0x2d8] sm:$0xff] }
 0x472   :  { %v6963_v31 = vpack.c.bf16 %v3216_v37, %v3208_v36  ;;  %v3222_v45 = vld [vmem:[#allocation5 + $0x180] sm:$0xff] }
 0x473   :  { %6808 = vmatpush1.bf16.msra.mxu0 %v6807_v6  ;;  %6872 = vmatpush1.bf16.msra.mxu1 %v6871_v49  ;;  %v6887_v6 = vpack.c.bf16 %v2815_v47, %v2807_v46  ;;  %v3175_v49 = vld [vmem:[#allocation5 + $0x8] sm:$0xff]  ;;  %v3230_v46 = vld [vmem:[#allocation5 + $0x1c0] sm:$0xff] }
 0x474   :  { %6810 = vmatprep.subr.bf16.mxu0 %v6809_v59  ;;  %6874 = vmatprep.subr.bf16.mxu1 %v6873_v60  ;;  %v6889_v59 = vpack.c.bf16 %v3183_v50, %v3175_v49  ;;  %v3185_v60 = vld [vmem:[#allocation5 + $0x58] sm:$0xff]  ;;  %v3239_v49 = vld [vmem:[#allocation5 + $0x208] sm:$0xff]  ;;  %v3278_v36 = vld [vmem:[#allocation5 + $0x340] sm:$0xff] }
 0x475   :  { %v6953_v1 = vpack.c.bf16 %v3185_v60, %v3177_v58  ;;  %v3247_v50 = vld [vmem:[#allocation5 + $0x248] sm:$0xff]  ;;  %v3241_v58 = vld [vmem:[#allocation5 + $0x218] sm:$0xff]  ;;  %v6903_v60 = vpack.c.bf16 %v3230_v46, %v3222_v45 }
 0x476   :  { %v6905_v12 = vpack.c.bf16 %v3247_v50, %v3239_v49  ;;  %v3297_v46 = vld [vmem:[#allocation5 + $0x3d8] sm:$0xff]  ;;  %v3288_v50 = vld [vmem:[#allocation5 + $0x390] sm:$0xff] }
 0x477   :  { %6812 = vmatpush1.bf16.msra.mxu0 %v6811_v7  ;;  %6876 = vmatpush1.bf16.msra.mxu1 %v6875_v8  ;;  %v3191_v7 = vld [vmem:[#allocation5 + $0x88] sm:$0xff]  ;;  %v6955_v8 = vpack.c.bf16 %v3184_v5, %v3176_v4  ;;  %v3246_v4 = vld [vmem:[#allocation5 + $0x240] sm:$0xff]  ;;  %v3240_v5 = vld [vmem:[#allocation5 + $0x210] sm:$0xff] }
 0x478   :  { %6814 = vmatprep.subr.bf16.mxu0 %v6813_v19  ;;  %6878 = vmatprep.subr.bf16.mxu1 %v6877_v10  ;;  %v3201_v19 = vld [vmem:[#allocation5 + $0xd8] sm:$0xff] }
 0x479   :  { %v6957_v10 = vpack.c.bf16 %v3201_v19, %v3193_v9  ;;  %v3255_v9 = vld [vmem:[#allocation5 + $0x288] sm:$0xff] }
 0x47a   :  { %v3263_v19 = vld [vmem:[#allocation5 + $0x2c8] sm:$0xff] }
 0x47b   :  { %6816 = vmatpush1.bf16.msra.mxu0 %v6815_v17  ;;  %6880 = vmatpush1.bf16.msra.mxu1 %v6879_v21  ;;  %v3215_v17 = vld [vmem:[#allocation5 + $0x148] sm:$0xff]  ;;  %v6959_v21 = vpack.c.bf16 %v3200_v20, %v3192_v25  ;;  %v3262_v25 = vld [vmem:[#allocation5 + $0x2c0] sm:$0xff] }
 0x47c   :  { %6818 = vmatprep.subr.bf16.mxu0 %v6817_v23  ;;  %6882 = vmatprep.subr.bf16.mxu1 %v6881_v24  ;;  %v6897_v22 = vpack.c.bf16 %v3215_v17, %v3207_v15  ;;  %v3217_v23 = vld [vmem:[#allocation5 + $0x158] sm:$0xff]  ;;  %v3206_v24 = vld [vmem:[#allocation5 + $0x100] sm:$0xff]  ;;  %v6911_v20 = vpack.c.bf16 %v3262_v25, %v3254_v11  ;;  %v3256_v15 = vld [vmem:[#allocation5 + $0x290] sm:$0xff] }
 0x47d   :  { %v6961_v27 = vpack.c.bf16 %v3217_v23, %v3209_v32  ;;  %v6899_v38 = vpack.c.bf16 %v3214_v35, %v3206_v24  ;;  %v3264_v17 = vld [vmem:[#allocation5 + $0x2d0] sm:$0xff]  ;;  %v3279_v32 = vld [vmem:[#allocation5 + $0x348] sm:$0xff]  ;;  %v3273_v23 = vld [vmem:[#allocation5 + $0x318] sm:$0xff] }
 0x47e   :  { %v3270_v35 = vld [vmem:[#allocation5 + $0x300] sm:$0xff]  ;;  %v3329_v25 = vld [vmem:[#allocation5 + $0x4d8] sm:$0xff] }
 0x47f   :  { %6820 = vmatpush1.bf16.msra.mxu0 %v6819_v41  ;;  %6884 = vmatpush1.bf16.msra.mxu1 %v6883_v29  ;;  %v3231_v41 = vld [vmem:[#allocation5 + $0x1c8] sm:$0xff]  ;;  %v3225_v29 = vld [vmem:[#allocation5 + $0x198] sm:$0xff] }
 0x480   :  { %6822 = vmatprep.subr.bf16.mxu0 %v6821_v3  ;;  %6886 = vmatprep.subr.bf16.mxu1 %v6885_v44  ;;  %v6901_v3 = vpack.c.bf16 %v3231_v41, %v3223_v40  ;;  %v3233_v44 = vld [vmem:[#allocation5 + $0x1d8] sm:$0xff]  ;;  %v3272_v40 = vld [vmem:[#allocation5 + $0x310] sm:$0xff] }
 0x481   :  { %v6965_v47 = vpack.c.bf16 %v3233_v44, %v3225_v29  ;;  %v3280_v41 = vld [vmem:[#allocation5 + $0x350] sm:$0xff]  ;;  %v3289_v44 = vld [vmem:[#allocation5 + $0x398] sm:$0xff] }
 0x482   :  { %v6979_v29 = vpack.c.bf16 %v3280_v41, %v3272_v40 }
 0x483   :  { %6824 = vmatpush1.bf16.msra.mxu0 %v6823_v48  ;;  %6888 = vmatpush1.bf16.msra.mxu1 %v6887_v6  ;;  %v3224_v48 = vld [vmem:[#allocation5 + $0x190] sm:$0xff] }
 0x484   :  { %6890 = vmatprep.subr.bf16.mxu0 %v6889_v59  ;;  %6954 = vmatprep.subr.bf16.mxu1 %v6953_v1  ;;  %v3232_v6 = vld [vmem:[#allocation5 + $0x1d0] sm:$0xff]  ;;  %v3249_v59 = vld [vmem:[#allocation5 + $0x258] sm:$0xff] }
 0x485   :  { %v6967_v0 = vpack.c.bf16 %v3232_v6, %v3224_v48  ;;  %v6969_v1 = vpack.c.bf16 %v3249_v59, %v3241_v58  ;;  %v3294_v48 = vld [vmem:[#allocation5 + $0x3c0] sm:$0xff]  ;;  %v6981_v6 = vpack.c.bf16 %v3297_v46, %v3289_v44  ;;  %v3296_v58 = vld [vmem:[#allocation5 + $0x3d0] sm:$0xff]  ;;  %v3351_v44 = vld [vmem:[#allocation5 + $0x588] sm:$0xff] }
 0x486   :  { %3024 = vmatmul.mubr.f32.vlgmr.msra.gmra.mrb[14].mxu0 %v8695_v63  ;;  %3095 = vmatmul.mubr.f32.vlgmr.msra.gmra.mrb[30].mxu1 %v8695_v63  ;;  %v6893_v63 = vpack.c.bf16 %v3199_v61, %v3191_v7  ;;  %v6983_v59 = vpack.c.bf16 %v3296_v58, %v3288_v50  ;;  %v3353_v46 = vld [vmem:[#allocation5 + $0x598] sm:$0xff] }
 0x487   :  { %6892 = vmatpush1.bf16.msra.mxu0 %v6891_v2  ;;  %6956 = vmatpush1.bf16.msra.mxu1 %v6955_v8  ;;  %v3238_v2 = vld [vmem:[#allocation5 + $0x200] sm:$0xff]  ;;  %v3248_v8 = vld [vmem:[#allocation5 + $0x250] sm:$0xff] }
 0x488   :  { %6894 = vmatprep.subr.bf16.mxu0 %v6893_v63  ;;  %6958 = vmatprep.subr.bf16.mxu1 %v6957_v10  ;;  %v6907_v7 = vpack.c.bf16 %v3246_v4, %v3238_v2  ;;  %v6971_v61 = vpack.c.bf16 %v3248_v8, %v3240_v5  ;;  %v3257_v63 = vld [vmem:[#allocation5 + $0x298] sm:$0xff]  ;;  %v6909_v10 = vpack.c.bf16 %v3263_v19, %v3255_v9  ;;  %v3302_v4 = vld [vmem:[#allocation5 + $0x400] sm:$0xff]  ;;  %v3312_v9 = vld [vmem:[#allocation5 + $0x450] sm:$0xff] }
 0x489   :  { %v3313_v2 = vld [vmem:[#allocation5 + $0x458] sm:$0xff]  ;;  %v3310_v5 = vld [vmem:[#allocation5 + $0x440] sm:$0xff] }
 0x48a   :  { %v6923_v8 = vpack.c.bf16 %v3310_v5, %v3302_v4  ;;  %v3377_v5 = vld [vmem:[#allocation5 + $0x658] sm:$0xff] }
 0x48b   :  { %6896 = vmatpush1.bf16.msra.mxu0 %v6895_v14  ;;  %6960 = vmatpush1.bf16.msra.mxu1 %v6959_v21  ;;  %v6973_v14 = vpack.c.bf16 %v3265_v30, %v3257_v63  ;;  %v6975_v21 = vpack.c.bf16 %v3264_v17, %v3256_v15  ;;  %v3319_v63 = vld [vmem:[#allocation5 + $0x488] sm:$0xff]  ;;  %v3321_v30 = vld [vmem:[#allocation5 + $0x498] sm:$0xff] }
 0x48c   :  { %6898 = vmatprep.subr.bf16.mxu0 %v6897_v22  ;;  %6962 = vmatprep.subr.bf16.mxu1 %v6961_v27  ;;  %v3271_v22 = vld [vmem:[#allocation5 + $0x308] sm:$0xff]  ;;  %v3281_v27 = vld [vmem:[#allocation5 + $0x358] sm:$0xff]  ;;  %v6989_v15 = vpack.c.bf16 %v3329_v25, %v3321_v30 }
 0x48d   :  { %v6913_v24 = vpack.c.bf16 %v3279_v32, %v3271_v22  ;;  %v6977_v37 = vpack.c.bf16 %v3281_v27, %v3273_v23  ;;  %v3328_v22 = vld [vmem:[#allocation5 + $0x4d0] sm:$0xff]  ;;  %v3335_v23 = vld [vmem:[#allocation5 + $0x508] sm:$0xff]  ;;  %v3337_v27 = vld [vmem:[#allocation5 + $0x518] sm:$0xff] }
 0x48e   :  { %v3383_v30 = vld [vmem:[#allocation5 + $0x688] sm:$0xff]  ;;  %v3385_v25 = vld [vmem:[#allocation5 + $0x698] sm:$0xff] }
 0x48f   :  { %6900 = vmatpush1.bf16.msra.mxu0 %v6899_v38  ;;  %6964 = vmatpush1.bf16.msra.mxu1 %v6963_v31  ;;  %v6915_v38 = vpack.c.bf16 %v3278_v36, %v3270_v35  ;;  %v3287_v31 = vld [vmem:[#allocation5 + $0x388] sm:$0xff]  ;;  %v3345_v36 = vld [vmem:[#allocation5 + $0x558] sm:$0xff] }
 0x490   :  { %6902 = vmatprep.subr.bf16.mxu0 %v6901_v3  ;;  %6966 = vmatprep.subr.bf16.mxu1 %v6965_v47  ;;  %v3295_v3 = vld [vmem:[#allocation5 + $0x3c8] sm:$0xff]  ;;  %v3286_v47 = vld [vmem:[#allocation5 + $0x380] sm:$0xff]  ;;  %v6993_v40 = vpack.c.bf16 %v3345_v36, %v3337_v27  ;;  %v3401_v36 = vld [vmem:[#allocation5 + $0x718] sm:$0xff] }
 0x491   :  { %v6917_v45 = vpack.c.bf16 %v3295_v3, %v3287_v31  ;;  %v6919_v49 = vpack.c.bf16 %v3294_v48, %v3286_v47  ;;  %v3344_v31 = vld [vmem:[#allocation5 + $0x550] sm:$0xff]  ;;  %v3361_v48 = vld [vmem:[#allocation5 + $0x5d8] sm:$0xff] }
 0x492   :  { %v6997_v50 = vpack.c.bf16 %v3361_v48, %v3353_v46  ;;  %v3423_v46 = vld [vmem:[#allocation5 + $0x7c8] sm:$0xff] }
 0x493   :  { %6904 = vmatpush1.bf16.msra.mxu0 %v6903_v60  ;;  %6968 = vmatpush1.bf16.msra.mxu1 %v6967_v0  ;;  %v3303_v60 = vld [vmem:[#allocation5 + $0x408] sm:$0xff] }
 0x494   :  { %6906 = vmatprep.subr.bf16.mxu0 %v6905_v12  ;;  %6970 = vmatprep.subr.bf16.mxu1 %v6969_v1  ;;  %v3311_v0 = vld [vmem:[#allocation5 + $0x448] sm:$0xff]  ;;  %v3305_v12 = vld [vmem:[#allocation5 + $0x418] sm:$0xff] }
 0x495   :  { %v6921_v1 = vpack.c.bf16 %v3311_v0, %v3303_v60  ;;  %v3360_v60 = vld [vmem:[#allocation5 + $0x5d0] sm:$0xff] }
 0x497   :  { %6908 = vmatpush1.bf16.msra.mxu0 %v6907_v7  ;;  %6972 = vmatpush1.bf16.msra.mxu1 %v6971_v61  ;;  %v6985_v7 = vpack.c.bf16 %v3313_v2, %v3305_v12  ;;  %v3304_v61 = vld [vmem:[#allocation5 + $0x410] sm:$0xff]  ;;  %v3367_v12 = vld [vmem:[#allocation5 + $0x608] sm:$0xff]  ;;  %v3369_v2 = vld [vmem:[#allocation5 + $0x618] sm:$0xff] }
 0x498   :  { %6910 = vmatprep.subr.bf16.mxu0 %v6909_v10  ;;  %6974 = vmatprep.subr.bf16.mxu1 %v6973_v14  ;;  %v6987_v19 = vpack.c.bf16 %v3312_v9, %v3304_v61  ;;  %v3327_v10 = vld [vmem:[#allocation5 + $0x4c8] sm:$0xff]  ;;  %v3318_v14 = vld [vmem:[#allocation5 + $0x480] sm:$0xff]  ;;  %v7001_v61 = vpack.c.bf16 %v3377_v5, %v3369_v2  ;;  %v3181_v5 = vld [vmem:[#allocation5 + $0x38] sm:$0xff] }
 0x499   :  { %v6925_v11 = vpack.c.bf16 %v3327_v10, %v3319_v63  ;;  %v3376_v63 = vld [vmem:[#allocation5 + $0x650] sm:$0xff]  ;;  %v3179_v2 = vld [vmem:[#allocation5 + $0x28] sm:$0xff] }
 0x49b   :  { %6912 = vmatpush1.bf16.msra.mxu0 %v6911_v20  ;;  %6976 = vmatpush1.bf16.msra.mxu1 %v6975_v21  ;;  %v3326_v20 = vld [vmem:[#allocation5 + $0x4c0] sm:$0xff]  ;;  %v3320_v21 = vld [vmem:[#allocation5 + $0x490] sm:$0xff] }
 0x49c   :  { %6914 = vmatprep.subr.bf16.mxu0 %v6913_v24  ;;  %6978 = vmatprep.subr.bf16.mxu1 %v6977_v37  ;;  %v6927_v17 = vpack.c.bf16 %v3326_v20, %v3318_v14  ;;  %v6991_v32 = vpack.c.bf16 %v3328_v22, %v3320_v21  ;;  %v3343_v24 = vld [vmem:[#allocation5 + $0x548] sm:$0xff]  ;;  %v3334_v37 = vld [vmem:[#allocation5 + $0x500] sm:$0xff]  ;;  %v3393_v20 = vld [vmem:[#allocation5 + $0x6d8] sm:$0xff] }
 0x49d   :  { %v6929_v35 = vpack.c.bf16 %v3343_v24, %v3335_v23  ;;  %v7005_v21 = vpack.c.bf16 %v3393_v20, %v3385_v25  ;;  %v3392_v23 = vld [vmem:[#allocation5 + $0x6d0] sm:$0xff]  ;;  %v3399_v24 = vld [vmem:[#allocation5 + $0x708] sm:$0xff] }
 0x49f   :  { %6916 = vmatpush1.bf16.msra.mxu0 %v6915_v38  ;;  %6980 = vmatpush1.bf16.msra.mxu1 %v6979_v29  ;;  %v3342_v38 = vld [vmem:[#allocation5 + $0x540] sm:$0xff]  ;;  %v3336_v29 = vld [vmem:[#allocation5 + $0x510] sm:$0xff] }
 0x4a0   :  { %6918 = vmatprep.subr.bf16.mxu0 %v6917_v45  ;;  %6982 = vmatprep.subr.bf16.mxu1 %v6981_v6  ;;  %v6931_v41 = vpack.c.bf16 %v3342_v38, %v3334_v37  ;;  %v6995_v3 = vpack.c.bf16 %v3344_v31, %v3336_v29  ;;  %v3359_v45 = vld [vmem:[#allocation5 + $0x5c8] sm:$0xff]  ;;  %v3350_v6 = vld [vmem:[#allocation5 + $0x580] sm:$0xff]  ;;  %v3409_v37 = vld [vmem:[#allocation5 + $0x758] sm:$0xff] }
 0x4a1   :  { %v6933_v47 = vpack.c.bf16 %v3359_v45, %v3351_v44  ;;  %v3406_v29 = vld [vmem:[#allocation5 + $0x740] sm:$0xff]  ;;  %v3400_v31 = vld [vmem:[#allocation5 + $0x710] sm:$0xff]  ;;  %v3415_v45 = vld [vmem:[#allocation5 + $0x788] sm:$0xff] }
 0x4a2   :  { %v3408_v44 = vld [vmem:[#allocation5 + $0x750] sm:$0xff]  ;;  %v6949_v48 = vpack.c.bf16 %v3423_v46, %v3415_v45 }
 0x4a3   :  { %6920 = vmatpush1.bf16.msra.mxu0 %v6919_v49  ;;  %6984 = vmatpush1.bf16.msra.mxu1 %v6983_v59  ;;  %v3358_v49 = vld [vmem:[#allocation5 + $0x5c0] sm:$0xff]  ;;  %v3352_v59 = vld [vmem:[#allocation5 + $0x590] sm:$0xff] }
 0x4a4   :  { %6922 = vmatprep.subr.bf16.mxu0 %v6921_v1  ;;  %6986 = vmatprep.subr.bf16.mxu1 %v6985_v7  ;;  %v6935_v58 = vpack.c.bf16 %v3358_v49, %v3350_v6  ;;  %v6999_v0 = vpack.c.bf16 %v3360_v60, %v3352_v59  ;;  %v3375_v1 = vld [vmem:[#allocation5 + $0x648] sm:$0xff]  ;;  %v3366_v7 = vld [vmem:[#allocation5 + $0x600] sm:$0xff]  ;;  %v3417_v6 = vld [vmem:[#allocation5 + $0x798] sm:$0xff] }
 0x4a5   :  { %v6937_v4 = vpack.c.bf16 %v3375_v1, %v3367_v12  ;;  %v3425_v49 = vld [vmem:[#allocation5 + $0x7d8] sm:$0xff]  ;;  %v3422_v59 = vld [vmem:[#allocation5 + $0x7c0] sm:$0xff]  ;;  %v3416_v60 = vld [vmem:[#allocation5 + $0x790] sm:$0xff] }
 0x4a7   :  { %6924 = vmatpush1.bf16.msra.mxu0 %v6923_v8  ;;  %6988 = vmatpush1.bf16.msra.mxu1 %v6987_v19  ;;  %v3374_v8 = vld [vmem:[#allocation5 + $0x640] sm:$0xff]  ;;  %v3368_v19 = vld [vmem:[#allocation5 + $0x610] sm:$0xff] }
 0x4a8   :  { %6926 = vmatprep.subr.bf16.mxu0 %v6925_v11  ;;  %6990 = vmatprep.subr.bf16.mxu1 %v6989_v15  ;;  %v6939_v9 = vpack.c.bf16 %v3374_v8, %v3366_v7  ;;  %v7003_v10 = vpack.c.bf16 %v3376_v63, %v3368_v19  ;;  %v3391_v11 = vld [vmem:[#allocation5 + $0x6c8] sm:$0xff]  ;;  %v3382_v15 = vld [vmem:[#allocation5 + $0x680] sm:$0xff]  ;;  %v3189_v8 = vld [vmem:[#allocation5 + $0x78] sm:$0xff] }
 0x4a9   :  { %v6941_v14 = vpack.c.bf16 %v3391_v11, %v3383_v30 }
 0x4ab   :  { %6928 = vmatpush1.bf16.msra.mxu0 %v6927_v17  ;;  %6992 = vmatpush1.bf16.msra.mxu1 %v6991_v32  ;;  %v3390_v17 = vld [vmem:[#allocation5 + $0x6c0] sm:$0xff]  ;;  %v3384_v32 = vld [vmem:[#allocation5 + $0x690] sm:$0xff] }
 0x4ac   :  { %6930 = vmatprep.subr.bf16.mxu0 %v6929_v35  ;;  %6994 = vmatprep.subr.bf16.mxu1 %v6993_v40  ;;  %v6943_v22 = vpack.c.bf16 %v3390_v17, %v3382_v15  ;;  %v7007_v27 = vpack.c.bf16 %v3392_v23, %v3384_v32  ;;  %v3407_v35 = vld [vmem:[#allocation5 + $0x748] sm:$0xff]  ;;  %v7009_v40 = vpack.c.bf16 %v3409_v37, %v3401_v36 }
 0x4ad   :  { %v6945_v38 = vpack.c.bf16 %v3407_v35, %v3399_v24 }
 0x4af   :  { %6932 = vmatpush1.bf16.msra.mxu0 %v6931_v41  ;;  %6996 = vmatpush1.bf16.msra.mxu1 %v6995_v3  ;;  %v3398_v41 = vld [vmem:[#allocation5 + $0x700] sm:$0xff] }
 0x4b0   :  { %6934 = vmatprep.subr.bf16.mxu0 %v6933_v47  ;;  %6998 = vmatprep.subr.bf16.mxu1 %v6997_v50  ;;  %v6947_v3 = vpack.c.bf16 %v3406_v29, %v3398_v41  ;;  %v7011_v47 = vpack.c.bf16 %v3408_v44, %v3400_v31  ;;  %v3414_v50 = vld [vmem:[#allocation5 + $0x780] sm:$0xff] }
 0x4b1   :  { %v6951_v12 = vpack.c.bf16 %v3422_v59, %v3414_v50 }
 0x4b3   :  { %6936 = vmatpush1.bf16.msra.mxu0 %v6935_v58  ;;  %7000 = vmatpush1.bf16.msra.mxu1 %v6999_v0  ;;  %v7013_v58 = vpack.c.bf16 %v3425_v49, %v3417_v6  ;;  %v3424_v0 = vld [vmem:[#allocation5 + $0x7d0] sm:$0xff] }
 0x4b4   :  { %6938 = vmatprep.subr.bf16.mxu0 %v6937_v4  ;;  %7002 = vmatprep.subr.bf16.mxu1 %v7001_v61  ;;  %v7015_v1 = vpack.c.bf16 %v3424_v0, %v3416_v60  ;;  %v3187_v4 = vld [vmem:[#allocation5 + $0x68] sm:$0xff]  ;;  %v7081_v61 = vpack.c.bf16 %v3189_v8, %v3181_v5 }
 0x4b5   :  { %v7017_v7 = vpack.c.bf16 %v3187_v4, %v3179_v2 }
 0x4b7   :  { %6940 = vmatpush1.bf16.msra.mxu0 %v6939_v9  ;;  %7004 = vmatpush1.bf16.msra.mxu1 %v7003_v10 }
 0x4b8   :  { %6942 = vmatprep.subr.bf16.mxu0 %v6941_v14  ;;  %7006 = vmatprep.subr.bf16.mxu1 %v7005_v21 }
 0x4bb   :  { %6944 = vmatpush1.bf16.msra.mxu0 %v6943_v22  ;;  %7008 = vmatpush1.bf16.msra.mxu1 %v7007_v27 }
 0x4bc   :  { %6946 = vmatprep.subr.bf16.mxu0 %v6945_v38  ;;  %7010 = vmatprep.subr.bf16.mxu1 %v7009_v40 }
 0x4bf   :  { %6948 = vmatpush1.bf16.msra.mxu0 %v6947_v3  ;;  %7012 = vmatpush1.bf16.msra.mxu1 %v7011_v47 }
 0x4c0   :  { %6950 = vmatprep.subr.bf16.mxu0 %v6949_v48  ;;  %7014 = vmatprep.subr.bf16.mxu1 %v7013_v58 }
 0x4c3   :  { %6952 = vmatpush1.bf16.msra.mxu0 %v6951_v12  ;;  %7016 = vmatpush1.bf16.msra.mxu1 %v7015_v1 }
 0x4c4   :  { %7018 = vmatprep.subr.bf16.mxu0 %v7017_v7  ;;  %7082 = vmatprep.subr.bf16.mxu1 %v7081_v61 }
 0x519   :  { %v2883_v9 = vpop.f32.mrb[6].mxu0  ;;  %v2954_v19 = vpop.f32.mrb[14].mxu1 }
 0x51a   :  { %v7977_v63 = vadd.f32 %v2954_v19, %v8621_v33  ;;  %v2885_v10 = vpop.f32.mrb[7].mxu0  ;;  %v2956_v30 = vpop.f32.mrb[15].mxu1  ;;  %v7953_v20 = vadd.f32 %v2883_v9, %v8627_v42  ;;  %v3178_v9 = vld [vmem:[#allocation5 + $0x20] sm:$0xff] }
 0x51b   :  { %v7978_v11 = vadd.f32 %v2956_v30, %v8623_v34  ;;  %v7954_v15 = vadd.f32 %v2885_v10, %v8629_v43  ;;  %v3180_v10 = vld [vmem:[#allocation5 + $0x30] sm:$0xff] }
 0x51c   :  { %v5783_v25 = vmul.f32 -1.442695, %v7977_v63  ;;  %v3186_v63 = vld [vmem:[#allocation5 + $0x60] sm:$0xff] }
 0x51d   :  { %v5784_v14 = vmul.f32 -1.442695, %v7978_v11  ;;  %v3195_v11 = vld [vmem:[#allocation5 + $0xa8] sm:$0xff] }
 0x51e   :  { %8175 = vpow2.f32 %v5783_v25 }
 0x51f   :  { %8177 = vpow2.f32 %v5784_v14  ;;  %v3203_v14 = vld [vmem:[#allocation5 + $0xe8] sm:$0xff] }
 0x520   :  { %8179 = vtanh.f32 %v7953_v20  ;;  %v3197_v20 = vld [vmem:[#allocation5 + $0xb8] sm:$0xff] }
 0x521   :  { %8181 = vtanh.f32 %v7954_v15 }
 0x528   :  { %v8176_v17 = vpop.eup %8175 }
 0x529   :  { %v8178_v21 = vpop.eup %8177  ;;  %v3117_v22 = vadd.f32 1.0, %v8176_v17 }
 0x52a   :  { %v3118_v32 = vadd.f32 1.0, %v8178_v21  ;;  %v8180_v23 = vpop.eup %8179  ;;  %v7019_v21 = vpack.c.bf16 %v3186_v63, %v3178_v9  ;;  %v3243_v9 = vld [vmem:[#allocation5 + $0x228] sm:$0xff]  ;;  %v3245_v63 = vld [vmem:[#allocation5 + $0x238] sm:$0xff] }
 0x52b   :  { %8183 = vrcp.f32 %v3117_v22  ;;  %v8182_v24 = vpop.eup %8181 }
 0x52c   :  { %8185 = vrcp.f32 %v3118_v32  ;;  %v3194_v32 = vld [vmem:[#allocation5 + $0xa0] sm:$0xff] }
 0x535   :  { %v8184_v27 = vpop.eup %8183 }
 0x536   :  { %v8186_v35 = vpop.eup %8185  ;;  %v3151_v36 = vmul.f32 %v8184_v27, %v8180_v23  ;;  %v3202_v23 = vld [vmem:[#allocation5 + $0xe0] sm:$0xff]  ;;  %v3196_v27 = vld [vmem:[#allocation5 + $0xb0] sm:$0xff] }
 0x537   :  { %v3152_v37 = vmul.f32 %v8186_v35, %v8182_v24  ;;  %v3204_v35 = vld [vmem:[#allocation5 + $0xf0] sm:$0xff] }
 0x559   :  { %v3025_v38 = vpop.f32.mrb[14].mxu0  ;;  %v3096_v40 = vpop.f32.mrb[30].mxu1 }
 0x55a   :  { %v7993_v41 = vadd.f32 %v3025_v38, %v8633_v62  ;;  %v3027_v29 = vpop.f32.mrb[15].mxu0  ;;  %v3098_v31 = vpop.f32.mrb[31].mxu1  ;;  %v8009_v47 = vadd.f32 %v3096_v40, %v8639_v16  ;;  %v3219_v40 = vld [vmem:[#allocation5 + $0x168] sm:$0xff] }
 0x55b   :  { %v7994_v3 = vadd.f32 %v3027_v29, %v8635_v26  ;;  %v8010_v46 = vadd.f32 %v3098_v31, %v8641_v18  ;;  %v3221_v29 = vld [vmem:[#allocation5 + $0x178] sm:$0xff]  ;;  %v7023_v31 = vpack.c.bf16 %v3202_v23, %v3194_v32 }
 0x55c   :  { %v5785_v44 = vmul.f32 -1.442695, %v7993_v41  ;;  %v5787_v49 = vmul.f32 -1.442695, %v8009_v47  ;;  %v3213_v41 = vld [vmem:[#allocation5 + $0x138] sm:$0xff] }
 0x55d   :  { %v5786_v45 = vmul.f32 -1.442695, %v7994_v3  ;;  %v5788_v48 = vmul.f32 -1.442695, %v8010_v46  ;;  %v7087_v3 = vpack.c.bf16 %v3204_v35, %v3196_v27  ;;  %v7089_v47 = vpack.c.bf16 %v3221_v29, %v3213_v41  ;;  %v3269_v32 = vld [vmem:[#allocation5 + $0x2f8] sm:$0xff]  ;;  %v3258_v35 = vld [vmem:[#allocation5 + $0x2a0] sm:$0xff] }
 0x55e   :  { %8187 = vpow2.f32 %v5785_v44  ;;  %v3210_v44 = vld [vmem:[#allocation5 + $0x120] sm:$0xff]  ;;  %v3268_v41 = vld [vmem:[#allocation5 + $0x2f0] sm:$0xff]  ;;  %v3275_v29 = vld [vmem:[#allocation5 + $0x328] sm:$0xff] }
 0x55f   :  { %8189 = vpow2.f32 %v5786_v45  ;;  %v3218_v45 = vld [vmem:[#allocation5 + $0x160] sm:$0xff] }
 0x560   :  { %8191 = vpow2.f32 %v5788_v48  ;;  %v3212_v48 = vld [vmem:[#allocation5 + $0x130] sm:$0xff] }
 0x568   :  { %v8188_v6 = vpop.eup %8187 }
 0x569   :  { %v3129_v50 = vadd.f32 1.0, %v8188_v6  ;;  %v8190_v58 = vpop.eup %8189  ;;  %v3220_v6 = vld [vmem:[#allocation5 + $0x170] sm:$0xff] }
 0x56a   :  { %v3130_v59 = vadd.f32 1.0, %v8190_v58  ;;  %v8192_v60 = vpop.eup %8191  ;;  %v3229_v58 = vld [vmem:[#allocation5 + $0x1b8] sm:$0xff] }
 0x56b   :  { %8193 = vrcp.f32 %v3129_v50  ;;  %v3142_v2 = vadd.f32 1.0, %v8192_v60  ;;  %v3235_v50 = vld [vmem:[#allocation5 + $0x1e8] sm:$0xff]  ;;  %v7027_v60 = vpack.c.bf16 %v3218_v45, %v3210_v44  ;;  %v3285_v44 = vld [vmem:[#allocation5 + $0x378] sm:$0xff] }
 0x56c   :  { %8195 = vpow2.f32 %v5787_v49  ;;  %v3227_v49 = vld [vmem:[#allocation5 + $0x1a8] sm:$0xff] }
 0x56d   :  { %8197 = vrcp.f32 %v3130_v59  ;;  %v3237_v59 = vld [vmem:[#allocation5 + $0x1f8] sm:$0xff] }
 0x56e   :  { %8199 = vrcp.f32 %v3142_v2  ;;  %v7029_v2 = vpack.c.bf16 %v3235_v50, %v3227_v49  ;;  %v3276_v50 = vld [vmem:[#allocation5 + $0x330] sm:$0xff] }
 0x575   :  { %v8194_v0 = vpop.eup %8193 }
 0x576   :  { %v8196_v12 = vpop.eup %8195  ;;  %v3149_v1 = vmul.f32 %v8194_v0, %v8688_v28  ;;  %v3188_v28 = vld [vmem:[#allocation5 + $0x70] sm:$0xff]  ;;  %v7091_v0 = vpack.c.bf16 %v3220_v6, %v3212_v48  ;;  %v3282_v48 = vld [vmem:[#allocation5 + $0x360] sm:$0xff] }
 0x577   :  { %v8198_v4 = vpop.eup %8197  ;;  %v3141_v8 = vadd.f32 1.0, %v8196_v12  ;;  %v7083_v22 = vpack.c.bf16 %v3188_v28, %v3180_v10  ;;  %v3226_v12 = vld [vmem:[#allocation5 + $0x1a0] sm:$0xff]  ;;  %v3253_v10 = vld [vmem:[#allocation5 + $0x278] sm:$0xff] }
 0x578   :  { %v8710_v5 = vadd.f32 %v3151_v36, %v3149_v1  ;;  %v3150_v7 = vmul.f32 %v8198_v4, %v8691_v39  ;;  %v8200_v19 = vpop.eup %8199  ;;  %v3205_v39 = vld [vmem:[#allocation5 + $0xf8] sm:$0xff]  ;;  %v3211_v36 = vld [vmem:[#allocation5 + $0x128] sm:$0xff]  ;;  %v3234_v1 = vld [vmem:[#allocation5 + $0x1e0] sm:$0xff]  ;;  %v7093_v4 = vpack.c.bf16 %v3237_v59, %v3229_v58 }
 0x579   :  { %v7085_v38 = vpack.c.bf16 %v3205_v39, %v3197_v20  ;;  %v7025_v46 = vpack.c.bf16 %v3219_v40, %v3211_v36  ;;  %v7031_v28 = vpack.c.bf16 %v3234_v1, %v3226_v12  ;;  %v7097_v20 = vpack.c.bf16 %v3253_v10, %v3245_v63  ;;  %v3244_v39 = vld [vmem:[#allocation5 + $0x230] sm:$0xff]  ;;  %v3266_v36 = vld [vmem:[#allocation5 + $0x2e0] sm:$0xff]  ;;  %v3291_v59 = vld [vmem:[#allocation5 + $0x3a8] sm:$0xff] }
 0x57a   :  { %v8713_v61 = vadd.f32 %v3152_v37, %v3150_v7  ;;  %8201 = vtanh.f32 %v8710_v5  ;;  %v7021_v37 = vpack.c.bf16 %v3203_v14, %v3195_v11  ;;  %v3228_v7 = vld [vmem:[#allocation5 + $0x1b0] sm:$0xff]  ;;  %v3242_v11 = vld [vmem:[#allocation5 + $0x220] sm:$0xff]  ;;  %v7039_v45 = vpack.c.bf16 %v3266_v36, %v3258_v35  ;;  %v3301_v12 = vld [vmem:[#allocation5 + $0x3f8] sm:$0xff] }
 0x57b   :  { %v3260_v40 = vld [vmem:[#allocation5 + $0x2b0] sm:$0xff]  ;;  %v3307_v10 = vld [vmem:[#allocation5 + $0x428] sm:$0xff]  ;;  %v3333_v35 = vld [vmem:[#allocation5 + $0x4f8] sm:$0xff] }
 0x57c   :  { %8203 = vtanh.f32 %v8713_v61  ;;  %v3284_v58 = vld [vmem:[#allocation5 + $0x370] sm:$0xff] }
 0x57d   :  { %8205 = vrcp.f32 %v3141_v8  ;;  %v3236_v8 = vld [vmem:[#allocation5 + $0x1f0] sm:$0xff] }
 0x57e   :  { %v3300_v63 = vld [vmem:[#allocation5 + $0x3f0] sm:$0xff] }
 0x584   :  { %v8202_v30 = vpop.eup %8201 }
 0x586   :  { %v8204_v25 = vpop.eup %8203 }
 0x587   :  { %v8206_v15 = vpop.eup %8205  ;;  %v3160_v17 = vmul.f32 %v8204_v25, %v8200_v19  ;;  %v3251_v19 = vld [vmem:[#allocation5 + $0x268] sm:$0xff]  ;;  %v3250_v25 = vld [vmem:[#allocation5 + $0x260] sm:$0xff] }
 0x588   :  { %v8717_v24 = vmul.f32 %v8206_v15, %v8202_v30  ;;  %v7095_v30 = vpack.c.bf16 %v3236_v8, %v3228_v7  ;;  %v7033_v14 = vpack.c.bf16 %v3251_v19, %v3243_v9  ;;  %v3252_v15 = vld [vmem:[#allocation5 + $0x270] sm:$0xff]  ;;  %v7035_v23 = vpack.c.bf16 %v3250_v25, %v3242_v11  ;;  %v3298_v7 = vld [vmem:[#allocation5 + $0x3e0] sm:$0xff]  ;;  %v3317_v11 = vld [vmem:[#allocation5 + $0x478] sm:$0xff] }
 0x589   :  { %3494 = vmatprep.mubr.f32.mxu0 %v3160_v17  ;;  %3565 = vmatprep.mubr.f32.mxu1 %v3160_v17  ;;  %v7099_v27 = vpack.c.bf16 %v3252_v15, %v3244_v39  ;;  %v3292_v19 = vld [vmem:[#allocation5 + $0x3b0] sm:$0xff]  ;;  %v3314_v39 = vld [vmem:[#allocation5 + $0x460] sm:$0xff] }
 0x58a   :  { %3495 = vmatmul.mubr.f32.vlgmr.msra.gmra.mrb[24].mxu0 %v8717_v24  ;;  %3566 = vmatmul.mubr.f32.vlgmr.msra.gmra.mrb[16].mxu1 %v8717_v24 }
 0x58b   :  { %7020 = vmatpush1.bf16.msra.mxu0 %v7019_v21  ;;  %7084 = vmatpush1.bf16.msra.mxu1 %v7083_v22  ;;  %v3267_v21 = vld [vmem:[#allocation5 + $0x2e8] sm:$0xff]  ;;  %v3261_v22 = vld [vmem:[#allocation5 + $0x2b8] sm:$0xff] }
 0x58c   :  { %3636 = vmatprep.mubr.f32.mxu0 %v3160_v17  ;;  %3707 = vmatprep.mubr.f32.mxu1 %v3160_v17  ;;  %v3259_v17 = vld [vmem:[#allocation5 + $0x2a8] sm:$0xff] }
 0x58d   :  { %7022 = vmatprep.subr.bf16.mxu0 %v7021_v37  ;;  %7086 = vmatprep.subr.bf16.mxu1 %v7085_v38  ;;  %v7037_v37 = vpack.c.bf16 %v3267_v21, %v3259_v17  ;;  %v7101_v38 = vpack.c.bf16 %v3269_v32, %v3261_v22  ;;  %v3308_v21 = vld [vmem:[#allocation5 + $0x430] sm:$0xff]  ;;  %v3323_v32 = vld [vmem:[#allocation5 + $0x4a8] sm:$0xff] }
 0x58e   :  { %v3316_v22 = vld [vmem:[#allocation5 + $0x470] sm:$0xff] }
 0x58f   :  { %7024 = vmatpush1.bf16.msra.mxu0 %v7023_v31  ;;  %7088 = vmatpush1.bf16.msra.mxu1 %v7087_v3  ;;  %v3283_v31 = vld [vmem:[#allocation5 + $0x368] sm:$0xff]  ;;  %v3277_v3 = vld [vmem:[#allocation5 + $0x338] sm:$0xff] }
 0x590   :  { %7026 = vmatprep.subr.bf16.mxu0 %v7025_v46  ;;  %7090 = vmatprep.subr.bf16.mxu1 %v7089_v47  ;;  %v7103_v46 = vpack.c.bf16 %v3268_v41, %v3260_v40  ;;  %v3274_v47 = vld [vmem:[#allocation5 + $0x320] sm:$0xff]  ;;  %v7041_v6 = vpack.c.bf16 %v3283_v31, %v3275_v29  ;;  %v7105_v49 = vpack.c.bf16 %v3285_v44, %v3277_v3  ;;  %v3324_v31 = vld [vmem:[#allocation5 + $0x4b0] sm:$0xff]  ;;  %v3339_v44 = vld [vmem:[#allocation5 + $0x528] sm:$0xff] }
 0x591   :  { %v7043_v1 = vpack.c.bf16 %v3282_v48, %v3274_v47  ;;  %v3330_v40 = vld [vmem:[#allocation5 + $0x4e0] sm:$0xff]  ;;  %v3332_v3 = vld [vmem:[#allocation5 + $0x4f0] sm:$0xff]  ;;  %v3349_v47 = vld [vmem:[#allocation5 + $0x578] sm:$0xff] }
 0x593   :  { %7028 = vmatpush1.bf16.msra.mxu0 %v7027_v60  ;;  %7092 = vmatpush1.bf16.msra.mxu1 %v7091_v0  ;;  %v3299_v60 = vld [vmem:[#allocation5 + $0x3e8] sm:$0xff]  ;;  %v3293_v0 = vld [vmem:[#allocation5 + $0x3b8] sm:$0xff] }
 0x594   :  { %7030 = vmatprep.subr.bf16.mxu0 %v7029_v2  ;;  %7094 = vmatprep.subr.bf16.mxu1 %v7093_v4  ;;  %v7107_v2 = vpack.c.bf16 %v3284_v58, %v3276_v50  ;;  %v3290_v4 = vld [vmem:[#allocation5 + $0x3a0] sm:$0xff]  ;;  %v7045_v8 = vpack.c.bf16 %v3299_v60, %v3291_v59  ;;  %v7109_v9 = vpack.c.bf16 %v3301_v12, %v3293_v0  ;;  %v3340_v60 = vld [vmem:[#allocation5 + $0x530] sm:$0xff]  ;;  %v3355_v12 = vld [vmem:[#allocation5 + $0x5a8] sm:$0xff] }
 0x595   :  { %v7047_v25 = vpack.c.bf16 %v3298_v7, %v3290_v4  ;;  %v3346_v50 = vld [vmem:[#allocation5 + $0x560] sm:$0xff]  ;;  %v3348_v0 = vld [vmem:[#allocation5 + $0x570] sm:$0xff]  ;;  %v3365_v4 = vld [vmem:[#allocation5 + $0x5f8] sm:$0xff] }
 0x597   :  { %7032 = vmatpush1.bf16.msra.mxu0 %v7031_v28  ;;  %7096 = vmatpush1.bf16.msra.mxu1 %v7095_v30  ;;  %v3315_v28 = vld [vmem:[#allocation5 + $0x468] sm:$0xff]  ;;  %v3309_v30 = vld [vmem:[#allocation5 + $0x438] sm:$0xff] }
 0x598   :  { %7034 = vmatprep.subr.bf16.mxu0 %v7033_v14  ;;  %7098 = vmatprep.subr.bf16.mxu1 %v7097_v20  ;;  %v7111_v14 = vpack.c.bf16 %v3300_v63, %v3292_v19  ;;  %v3306_v20 = vld [vmem:[#allocation5 + $0x420] sm:$0xff]  ;;  %v7049_v15 = vpack.c.bf16 %v3315_v28, %v3307_v10  ;;  %v7113_v17 = vpack.c.bf16 %v3317_v11, %v3309_v30  ;;  %v3356_v28 = vld [vmem:[#allocation5 + $0x5b0] sm:$0xff]  ;;  %v3371_v11 = vld [vmem:[#allocation5 + $0x628] sm:$0xff] }
 0x599   :  { %v7051_v36 = vpack.c.bf16 %v3314_v39, %v3306_v20  ;;  %v3362_v19 = vld [vmem:[#allocation5 + $0x5e0] sm:$0xff]  ;;  %v3364_v30 = vld [vmem:[#allocation5 + $0x5f0] sm:$0xff]  ;;  %v3381_v20 = vld [vmem:[#allocation5 + $0x678] sm:$0xff] }
 0x59b   :  { %7036 = vmatpush1.bf16.msra.mxu0 %v7035_v23  ;;  %7100 = vmatpush1.bf16.msra.mxu1 %v7099_v27  ;;  %v3331_v23 = vld [vmem:[#allocation5 + $0x4e8] sm:$0xff]  ;;  %v3325_v27 = vld [vmem:[#allocation5 + $0x4b8] sm:$0xff] }
 0x59c   :  { %7038 = vmatprep.subr.bf16.mxu0 %v7037_v37  ;;  %7102 = vmatprep.subr.bf16.mxu1 %v7101_v38  ;;  %v7115_v37 = vpack.c.bf16 %v3316_v22, %v3308_v21  ;;  %v3322_v38 = vld [vmem:[#allocation5 + $0x4a0] sm:$0xff]  ;;  %v7053_v41 = vpack.c.bf16 %v3331_v23, %v3323_v32  ;;  %v7117_v29 = vpack.c.bf16 %v3333_v35, %v3325_v27  ;;  %v3372_v23 = vld [vmem:[#allocation5 + $0x630] sm:$0xff]  ;;  %v3387_v35 = vld [vmem:[#allocation5 + $0x6a8] sm:$0xff] }
 0x59d   :  { %v7055_v48 = vpack.c.bf16 %v3330_v40, %v3322_v38  ;;  %v3378_v21 = vld [vmem:[#allocation5 + $0x660] sm:$0xff]  ;;  %v3380_v27 = vld [vmem:[#allocation5 + $0x670] sm:$0xff]  ;;  %v3397_v38 = vld [vmem:[#allocation5 + $0x6f8] sm:$0xff] }
 0x59f   :  { %7040 = vmatpush1.bf16.msra.mxu0 %v7039_v45  ;;  %7104 = vmatpush1.bf16.msra.mxu1 %v7103_v46  ;;  %v3347_v45 = vld [vmem:[#allocation5 + $0x568] sm:$0xff]  ;;  %v3341_v46 = vld [vmem:[#allocation5 + $0x538] sm:$0xff] }
 0x5a0   :  { %7042 = vmatprep.subr.bf16.mxu0 %v7041_v6  ;;  %7106 = vmatprep.subr.bf16.mxu1 %v7105_v49  ;;  %v7119_v6 = vpack.c.bf16 %v3332_v3, %v3324_v31  ;;  %v3338_v49 = vld [vmem:[#allocation5 + $0x520] sm:$0xff]  ;;  %v7057_v58 = vpack.c.bf16 %v3347_v45, %v3339_v44  ;;  %v7121_v59 = vpack.c.bf16 %v3349_v47, %v3341_v46  ;;  %v3388_v45 = vld [vmem:[#allocation5 + $0x6b0] sm:$0xff]  ;;  %v3403_v47 = vld [vmem:[#allocation5 + $0x728] sm:$0xff] }
 0x5a1   :  { %v7059_v7 = vpack.c.bf16 %v3346_v50, %v3338_v49  ;;  %v3394_v31 = vld [vmem:[#allocation5 + $0x6e0] sm:$0xff]  ;;  %v3396_v46 = vld [vmem:[#allocation5 + $0x6f0] sm:$0xff]  ;;  %v3413_v49 = vld [vmem:[#allocation5 + $0x778] sm:$0xff] }
 0x5a3   :  { %7044 = vmatpush1.bf16.msra.mxu0 %v7043_v1  ;;  %7108 = vmatpush1.bf16.msra.mxu1 %v7107_v2  ;;  %v3363_v1 = vld [vmem:[#allocation5 + $0x5e8] sm:$0xff]  ;;  %v3357_v2 = vld [vmem:[#allocation5 + $0x5b8] sm:$0xff] }
 0x5a4   :  { %7046 = vmatprep.subr.bf16.mxu0 %v7045_v8  ;;  %7110 = vmatprep.subr.bf16.mxu1 %v7109_v9  ;;  %v7123_v8 = vpack.c.bf16 %v3348_v0, %v3340_v60  ;;  %v3354_v9 = vld [vmem:[#allocation5 + $0x5a0] sm:$0xff]  ;;  %v7061_v63 = vpack.c.bf16 %v3363_v1, %v3355_v12  ;;  %v7125_v10 = vpack.c.bf16 %v3365_v4, %v3357_v2  ;;  %v3404_v1 = vld [vmem:[#allocation5 + $0x730] sm:$0xff]  ;;  %v3419_v4 = vld [vmem:[#allocation5 + $0x7a8] sm:$0xff] }
 0x5a5   :  { %v7063_v39 = vpack.c.bf16 %v3362_v19, %v3354_v9  ;;  %v3410_v60 = vld [vmem:[#allocation5 + $0x760] sm:$0xff]  ;;  %v3412_v2 = vld [vmem:[#allocation5 + $0x770] sm:$0xff]  ;;  %v3429_v9 = vld [vmem:[#allocation5 + $0x7f8] sm:$0xff] }
 0x5a7   :  { %7048 = vmatpush1.bf16.msra.mxu0 %v7047_v25  ;;  %7112 = vmatpush1.bf16.msra.mxu1 %v7111_v14  ;;  %v3379_v25 = vld [vmem:[#allocation5 + $0x668] sm:$0xff]  ;;  %v3373_v14 = vld [vmem:[#allocation5 + $0x638] sm:$0xff] }
 0x5a8   :  { %7050 = vmatprep.subr.bf16.mxu0 %v7049_v15  ;;  %7114 = vmatprep.subr.bf16.mxu1 %v7113_v17  ;;  %v7127_v15 = vpack.c.bf16 %v3364_v30, %v3356_v28  ;;  %v3370_v17 = vld [vmem:[#allocation5 + $0x620] sm:$0xff]  ;;  %v7065_v22 = vpack.c.bf16 %v3379_v25, %v3371_v11  ;;  %v7129_v32 = vpack.c.bf16 %v3381_v20, %v3373_v14  ;;  %v3420_v25 = vld [vmem:[#allocation5 + $0x7b0] sm:$0xff] }
 0x5a9   :  { %v7067_v40 = vpack.c.bf16 %v3378_v21, %v3370_v17  ;;  %v3426_v11 = vld [vmem:[#allocation5 + $0x7e0] sm:$0xff]  ;;  %v3428_v14 = vld [vmem:[#allocation5 + $0x7f0] sm:$0xff]  ;;  %v3796_v17 = vld [vmem:[#allocation5 + $0x48] sm:$0xff] }
 0x5aa   :  { %v3790_v21 = vld [vmem:[#allocation5 + $0x18] sm:$0xff] }
 0x5ab   :  { %7052 = vmatpush1.bf16.msra.mxu0 %v7051_v36  ;;  %7116 = vmatpush1.bf16.msra.mxu1 %v7115_v37  ;;  %v3395_v36 = vld [vmem:[#allocation5 + $0x6e8] sm:$0xff]  ;;  %v3389_v37 = vld [vmem:[#allocation5 + $0x6b8] sm:$0xff] }
 0x5ac   :  { %7054 = vmatprep.subr.bf16.mxu0 %v7053_v41  ;;  %7118 = vmatprep.subr.bf16.mxu1 %v7117_v29  ;;  %v7131_v41 = vpack.c.bf16 %v3380_v27, %v3372_v23  ;;  %v3386_v29 = vld [vmem:[#allocation5 + $0x6a0] sm:$0xff]  ;;  %v7069_v3 = vpack.c.bf16 %v3395_v36, %v3387_v35  ;;  %v7133_v44 = vpack.c.bf16 %v3397_v38, %v3389_v37  ;;  %v3789_v37 = vld [vmem:[#allocation5 + $0x10] sm:$0xff] }
 0x5ad   :  { %v7071_v50 = vpack.c.bf16 %v3394_v31, %v3386_v29  ;;  %v3787_v23 = vld [vmem:[#allocation5] sm:$0xff]  ;;  %v3797_v38 = vld [vmem:[#allocation5 + $0x50] sm:$0xff]  ;;  %v3812_v29 = vld [vmem:[#allocation5 + $0xc8] sm:$0xff] }
 0x5ae   :  { %v3795_v27 = vld [vmem:[#allocation5 + $0x40] sm:$0xff]  ;;  %v3806_v31 = vld [vmem:[#allocation5 + $0x98] sm:$0xff] }
 0x5af   :  { %7056 = vmatpush1.bf16.msra.mxu0 %v7055_v48  ;;  %7120 = vmatpush1.bf16.msra.mxu1 %v7119_v6  ;;  %v3411_v48 = vld [vmem:[#allocation5 + $0x768] sm:$0xff]  ;;  %v3405_v6 = vld [vmem:[#allocation5 + $0x738] sm:$0xff]  ;;  %v7147_v36 = vpack.c.bf16 %v3795_v27, %v3787_v23 }
 0x5b0   :  { %7058 = vmatprep.subr.bf16.mxu0 %v7057_v58  ;;  %7122 = vmatprep.subr.bf16.mxu1 %v7121_v59  ;;  %v7135_v58 = vpack.c.bf16 %v3396_v46, %v3388_v45  ;;  %v3402_v59 = vld [vmem:[#allocation5 + $0x720] sm:$0xff]  ;;  %v7073_v0 = vpack.c.bf16 %v3411_v48, %v3403_v47  ;;  %v7137_v12 = vpack.c.bf16 %v3413_v49, %v3405_v6  ;;  %v3805_v47 = vld [vmem:[#allocation5 + $0x90] sm:$0xff]  ;;  %v3820_v49 = vld [vmem:[#allocation5 + $0x108] sm:$0xff] }
 0x5b1   :  { %v7075_v19 = vpack.c.bf16 %v3410_v60, %v3402_v59  ;;  %v3803_v45 = vld [vmem:[#allocation5 + $0x80] sm:$0xff]  ;;  %v3813_v6 = vld [vmem:[#allocation5 + $0xd0] sm:$0xff]  ;;  %v3822_v60 = vld [vmem:[#allocation5 + $0x118] sm:$0xff] }
 0x5b2   :  { %v3811_v46 = vld [vmem:[#allocation5 + $0xc0] sm:$0xff] }
 0x5b3   :  { %7060 = vmatpush1.bf16.msra.mxu0 %v7059_v7  ;;  %7124 = vmatpush1.bf16.msra.mxu1 %v7123_v8  ;;  %v3427_v7 = vld [vmem:[#allocation5 + $0x7e8] sm:$0xff]  ;;  %v3421_v8 = vld [vmem:[#allocation5 + $0x7b8] sm:$0xff]  ;;  %v7151_v48 = vpack.c.bf16 %v3811_v46, %v3803_v45  ;;  %v3867_v46 = vld [vmem:[#allocation5 + $0x280] sm:$0xff] }
 0x5b4   :  { %7062 = vmatprep.subr.bf16.mxu0 %v7061_v63  ;;  %7126 = vmatprep.subr.bf16.mxu1 %v7125_v10  ;;  %v7139_v63 = vpack.c.bf16 %v3412_v2, %v3404_v1  ;;  %v3418_v10 = vld [vmem:[#allocation5 + $0x7a0] sm:$0xff]  ;;  %v7077_v28 = vpack.c.bf16 %v3427_v7, %v3419_v4  ;;  %v7141_v30 = vpack.c.bf16 %v3429_v9, %v3421_v8  ;;  %v3821_v4 = vld [vmem:[#allocation5 + $0x110] sm:$0xff]  ;;  %v3836_v9 = vld [vmem:[#allocation5 + $0x188] sm:$0xff] }
 0x5b5   :  { %v7079_v20 = vpack.c.bf16 %v3426_v11, %v3418_v10  ;;  %v3827_v2 = vld [vmem:[#allocation5 + $0x140] sm:$0xff]  ;;  %v3829_v7 = vld [vmem:[#allocation5 + $0x150] sm:$0xff]  ;;  %v3878_v45 = vld [vmem:[#allocation5 + $0x2d8] sm:$0xff] }
 0x5b6   :  { %v7219_v10 = vpack.c.bf16 %v3829_v7, %v3821_v4  ;;  %v3835_v11 = vld [vmem:[#allocation5 + $0x180] sm:$0xff] }
 0x5b7   :  { %7064 = vmatpush1.bf16.msra.mxu0 %v7063_v39  ;;  %7128 = vmatpush1.bf16.msra.mxu1 %v7127_v15  ;;  %v7143_v39 = vpack.c.bf16 %v3428_v14, %v3420_v25  ;;  %v3788_v15 = vld [vmem:[#allocation5 + $0x8] sm:$0xff]  ;;  %v3843_v25 = vld [vmem:[#allocation5 + $0x1c0] sm:$0xff] }
 0x5b8   :  { %7066 = vmatprep.subr.bf16.mxu0 %v7065_v22  ;;  %7130 = vmatprep.subr.bf16.mxu1 %v7129_v32  ;;  %v7145_v22 = vpack.c.bf16 %v3796_v17, %v3788_v15  ;;  %v3798_v32 = vld [vmem:[#allocation5 + $0x58] sm:$0xff]  ;;  %v3852_v15 = vld [vmem:[#allocation5 + $0x208] sm:$0xff]  ;;  %v3891_v4 = vld [vmem:[#allocation5 + $0x340] sm:$0xff] }
 0x5b9   :  { %v7209_v35 = vpack.c.bf16 %v3798_v32, %v3790_v21  ;;  %v3860_v17 = vld [vmem:[#allocation5 + $0x248] sm:$0xff]  ;;  %v3854_v21 = vld [vmem:[#allocation5 + $0x218] sm:$0xff]  ;;  %v7159_v32 = vpack.c.bf16 %v3843_v25, %v3835_v11 }
 0x5ba   :  { %v7161_v27 = vpack.c.bf16 %v3860_v17, %v3852_v15  ;;  %v3910_v25 = vld [vmem:[#allocation5 + $0x3d8] sm:$0xff]  ;;  %v3901_v17 = vld [vmem:[#allocation5 + $0x390] sm:$0xff] }
 0x5bb   :  { %7068 = vmatpush1.bf16.msra.mxu0 %v7067_v40  ;;  %7132 = vmatpush1.bf16.msra.mxu1 %v7131_v41  ;;  %v3804_v40 = vld [vmem:[#allocation5 + $0x88] sm:$0xff]  ;;  %v7211_v41 = vpack.c.bf16 %v3797_v38, %v3789_v37  ;;  %v3859_v37 = vld [vmem:[#allocation5 + $0x240] sm:$0xff]  ;;  %v3853_v38 = vld [vmem:[#allocation5 + $0x210] sm:$0xff] }
 0x5bc   :  { %7070 = vmatprep.subr.bf16.mxu0 %v7069_v3  ;;  %7134 = vmatprep.subr.bf16.mxu1 %v7133_v44  ;;  %v3814_v3 = vld [vmem:[#allocation5 + $0xd8] sm:$0xff] }
 0x5bd   :  { %v7213_v44 = vpack.c.bf16 %v3814_v3, %v3806_v31  ;;  %v3868_v31 = vld [vmem:[#allocation5 + $0x288] sm:$0xff] }
 0x5be   :  { %v3876_v3 = vld [vmem:[#allocation5 + $0x2c8] sm:$0xff] }
 0x5bf   :  { %7072 = vmatpush1.bf16.msra.mxu0 %v7071_v50  ;;  %7136 = vmatpush1.bf16.msra.mxu1 %v7135_v58  ;;  %v3828_v50 = vld [vmem:[#allocation5 + $0x148] sm:$0xff]  ;;  %v7215_v58 = vpack.c.bf16 %v3813_v6, %v3805_v47  ;;  %v3875_v47 = vld [vmem:[#allocation5 + $0x2c0] sm:$0xff] }
 0x5c0   :  { %7074 = vmatprep.subr.bf16.mxu0 %v7073_v0  ;;  %7138 = vmatprep.subr.bf16.mxu1 %v7137_v12  ;;  %v7153_v59 = vpack.c.bf16 %v3828_v50, %v3820_v49  ;;  %v3830_v0 = vld [vmem:[#allocation5 + $0x158] sm:$0xff]  ;;  %v3819_v12 = vld [vmem:[#allocation5 + $0x100] sm:$0xff]  ;;  %v7167_v6 = vpack.c.bf16 %v3875_v47, %v3867_v46  ;;  %v3869_v49 = vld [vmem:[#allocation5 + $0x290] sm:$0xff] }
 0x5c1   :  { %v7217_v1 = vpack.c.bf16 %v3830_v0, %v3822_v60  ;;  %v7155_v8 = vpack.c.bf16 %v3827_v2, %v3819_v12  ;;  %v3877_v50 = vld [vmem:[#allocation5 + $0x2d0] sm:$0xff]  ;;  %v3892_v60 = vld [vmem:[#allocation5 + $0x348] sm:$0xff]  ;;  %v3886_v0 = vld [vmem:[#allocation5 + $0x318] sm:$0xff] }
 0x5c2   :  { %v3883_v2 = vld [vmem:[#allocation5 + $0x300] sm:$0xff]  ;;  %v3942_v47 = vld [vmem:[#allocation5 + $0x4d8] sm:$0xff] }
 0x5c3   :  { %7076 = vmatpush1.bf16.msra.mxu0 %v7075_v19  ;;  %7140 = vmatpush1.bf16.msra.mxu1 %v7139_v63  ;;  %v3844_v19 = vld [vmem:[#allocation5 + $0x1c8] sm:$0xff]  ;;  %v3838_v63 = vld [vmem:[#allocation5 + $0x198] sm:$0xff] }
 0x5c4   :  { %7078 = vmatprep.subr.bf16.mxu0 %v7077_v28  ;;  %7142 = vmatprep.subr.bf16.mxu1 %v7141_v30  ;;  %v7157_v28 = vpack.c.bf16 %v3844_v19, %v3836_v9  ;;  %v3846_v30 = vld [vmem:[#allocation5 + $0x1d8] sm:$0xff]  ;;  %v3885_v9 = vld [vmem:[#allocation5 + $0x310] sm:$0xff] }
 0x5c5   :  { %v7221_v14 = vpack.c.bf16 %v3846_v30, %v3838_v63  ;;  %v3893_v19 = vld [vmem:[#allocation5 + $0x350] sm:$0xff]  ;;  %v3902_v30 = vld [vmem:[#allocation5 + $0x398] sm:$0xff] }
 0x5c6   :  { %v7235_v63 = vpack.c.bf16 %v3893_v19, %v3885_v9 }
 0x5c7   :  { %7080 = vmatpush1.bf16.msra.mxu0 %v7079_v20  ;;  %7144 = vmatpush1.bf16.msra.mxu1 %v7143_v39  ;;  %v3837_v20 = vld [vmem:[#allocation5 + $0x190] sm:$0xff] }
 0x5c8   :  { %7146 = vmatprep.subr.bf16.mxu0 %v7145_v22  ;;  %7210 = vmatprep.subr.bf16.mxu1 %v7209_v35  ;;  %v3845_v39 = vld [vmem:[#allocation5 + $0x1d0] sm:$0xff]  ;;  %v3862_v22 = vld [vmem:[#allocation5 + $0x258] sm:$0xff] }
 0x5c9   :  { %v7223_v23 = vpack.c.bf16 %v3845_v39, %v3837_v20  ;;  %v7225_v35 = vpack.c.bf16 %v3862_v22, %v3854_v21  ;;  %v3907_v20 = vld [vmem:[#allocation5 + $0x3c0] sm:$0xff]  ;;  %v7237_v39 = vpack.c.bf16 %v3910_v25, %v3902_v30  ;;  %v3909_v21 = vld [vmem:[#allocation5 + $0x3d0] sm:$0xff]  ;;  %v3964_v30 = vld [vmem:[#allocation5 + $0x588] sm:$0xff] }
 0x5ca   :  { %3637 = vmatmul.mubr.f32.vlgmr.msra.gmra.mrb[16].mxu0 %v8717_v24  ;;  %3708 = vmatmul.mubr.f32.vlgmr.msra.gmra.mrb[32].mxu1 %v8717_v24  ;;  %v7149_v24 = vpack.c.bf16 %v3812_v29, %v3804_v40  ;;  %v7239_v22 = vpack.c.bf16 %v3909_v21, %v3901_v17  ;;  %v3966_v25 = vld [vmem:[#allocation5 + $0x598] sm:$0xff] }
 0x5cb   :  { %7148 = vmatpush1.bf16.msra.mxu0 %v7147_v36  ;;  %7212 = vmatpush1.bf16.msra.mxu1 %v7211_v41  ;;  %v3851_v36 = vld [vmem:[#allocation5 + $0x200] sm:$0xff]  ;;  %v3861_v41 = vld [vmem:[#allocation5 + $0x250] sm:$0xff] }
 0x5cc   :  { %7150 = vmatprep.subr.bf16.mxu0 %v7149_v24  ;;  %7214 = vmatprep.subr.bf16.mxu1 %v7213_v44  ;;  %v7163_v40 = vpack.c.bf16 %v3859_v37, %v3851_v36  ;;  %v7227_v29 = vpack.c.bf16 %v3861_v41, %v3853_v38  ;;  %v3870_v24 = vld [vmem:[#allocation5 + $0x298] sm:$0xff]  ;;  %v7165_v44 = vpack.c.bf16 %v3876_v3, %v3868_v31  ;;  %v3915_v37 = vld [vmem:[#allocation5 + $0x400] sm:$0xff]  ;;  %v3925_v31 = vld [vmem:[#allocation5 + $0x450] sm:$0xff] }
 0x5cd   :  { %v3926_v36 = vld [vmem:[#allocation5 + $0x458] sm:$0xff]  ;;  %v3923_v38 = vld [vmem:[#allocation5 + $0x440] sm:$0xff] }
 0x5ce   :  { %v7179_v41 = vpack.c.bf16 %v3923_v38, %v3915_v37  ;;  %v3990_v38 = vld [vmem:[#allocation5 + $0x658] sm:$0xff] }
 0x5cf   :  { %7152 = vmatpush1.bf16.msra.mxu0 %v7151_v48  ;;  %7216 = vmatpush1.bf16.msra.mxu1 %v7215_v58  ;;  %v7229_v48 = vpack.c.bf16 %v3878_v45, %v3870_v24  ;;  %v7231_v58 = vpack.c.bf16 %v3877_v50, %v3869_v49  ;;  %v3932_v24 = vld [vmem:[#allocation5 + $0x488] sm:$0xff]  ;;  %v3934_v45 = vld [vmem:[#allocation5 + $0x498] sm:$0xff] }
 0x5d0   :  { %7154 = vmatprep.subr.bf16.mxu0 %v7153_v59  ;;  %7218 = vmatprep.subr.bf16.mxu1 %v7217_v1  ;;  %v3884_v59 = vld [vmem:[#allocation5 + $0x308] sm:$0xff]  ;;  %v3894_v1 = vld [vmem:[#allocation5 + $0x358] sm:$0xff]  ;;  %v7245_v49 = vpack.c.bf16 %v3942_v47, %v3934_v45 }
 0x5d1   :  { %v7169_v12 = vpack.c.bf16 %v3892_v60, %v3884_v59  ;;  %v7233_v7 = vpack.c.bf16 %v3894_v1, %v3886_v0  ;;  %v3941_v59 = vld [vmem:[#allocation5 + $0x4d0] sm:$0xff]  ;;  %v3948_v0 = vld [vmem:[#allocation5 + $0x508] sm:$0xff]  ;;  %v3950_v1 = vld [vmem:[#allocation5 + $0x518] sm:$0xff] }
 0x5d2   :  { %v3996_v45 = vld [vmem:[#allocation5 + $0x688] sm:$0xff]  ;;  %v3998_v47 = vld [vmem:[#allocation5 + $0x698] sm:$0xff] }
 0x5d3   :  { %7156 = vmatpush1.bf16.msra.mxu0 %v7155_v8  ;;  %7220 = vmatpush1.bf16.msra.mxu1 %v7219_v10  ;;  %v7171_v8 = vpack.c.bf16 %v3891_v4, %v3883_v2  ;;  %v3900_v10 = vld [vmem:[#allocation5 + $0x388] sm:$0xff]  ;;  %v3958_v4 = vld [vmem:[#allocation5 + $0x558] sm:$0xff] }
 0x5d4   :  { %7158 = vmatprep.subr.bf16.mxu0 %v7157_v28  ;;  %7222 = vmatprep.subr.bf16.mxu1 %v7221_v14  ;;  %v3908_v28 = vld [vmem:[#allocation5 + $0x3c8] sm:$0xff]  ;;  %v3899_v14 = vld [vmem:[#allocation5 + $0x380] sm:$0xff]  ;;  %v7249_v9 = vpack.c.bf16 %v3958_v4, %v3950_v1  ;;  %v4014_v4 = vld [vmem:[#allocation5 + $0x718] sm:$0xff] }
 0x5d5   :  { %v7173_v11 = vpack.c.bf16 %v3908_v28, %v3900_v10  ;;  %v7175_v15 = vpack.c.bf16 %v3907_v20, %v3899_v14  ;;  %v3957_v10 = vld [vmem:[#allocation5 + $0x550] sm:$0xff]  ;;  %v3974_v20 = vld [vmem:[#allocation5 + $0x5d8] sm:$0xff] }
 0x5d6   :  { %v7253_v17 = vpack.c.bf16 %v3974_v20, %v3966_v25  ;;  %v4036_v25 = vld [vmem:[#allocation5 + $0x7c8] sm:$0xff] }
 0x5d7   :  { %7160 = vmatpush1.bf16.msra.mxu0 %v7159_v32  ;;  %7224 = vmatpush1.bf16.msra.mxu1 %v7223_v23  ;;  %v3916_v32 = vld [vmem:[#allocation5 + $0x408] sm:$0xff] }
 0x5d8   :  { %7162 = vmatprep.subr.bf16.mxu0 %v7161_v27  ;;  %7226 = vmatprep.subr.bf16.mxu1 %v7225_v35  ;;  %v3924_v23 = vld [vmem:[#allocation5 + $0x448] sm:$0xff]  ;;  %v3918_v27 = vld [vmem:[#allocation5 + $0x418] sm:$0xff] }
 0x5d9   :  { %v7177_v35 = vpack.c.bf16 %v3924_v23, %v3916_v32  ;;  %v3973_v32 = vld [vmem:[#allocation5 + $0x5d0] sm:$0xff] }
 0x5db   :  { %7164 = vmatpush1.bf16.msra.mxu0 %v7163_v40  ;;  %7228 = vmatpush1.bf16.msra.mxu1 %v7227_v29  ;;  %v7241_v40 = vpack.c.bf16 %v3926_v36, %v3918_v27  ;;  %v3917_v29 = vld [vmem:[#allocation5 + $0x410] sm:$0xff]  ;;  %v3980_v27 = vld [vmem:[#allocation5 + $0x608] sm:$0xff]  ;;  %v3982_v36 = vld [vmem:[#allocation5 + $0x618] sm:$0xff] }
 0x5dc   :  { %7166 = vmatprep.subr.bf16.mxu0 %v7165_v44  ;;  %7230 = vmatprep.subr.bf16.mxu1 %v7229_v48  ;;  %v7243_v3 = vpack.c.bf16 %v3925_v31, %v3917_v29  ;;  %v3940_v44 = vld [vmem:[#allocation5 + $0x4c8] sm:$0xff]  ;;  %v3931_v48 = vld [vmem:[#allocation5 + $0x480] sm:$0xff]  ;;  %v7257_v29 = vpack.c.bf16 %v3990_v38, %v3982_v36  ;;  %v3794_v38 = vld [vmem:[#allocation5 + $0x38] sm:$0xff] }
 0x5dd   :  { %v7181_v46 = vpack.c.bf16 %v3940_v44, %v3932_v24  ;;  %v3989_v24 = vld [vmem:[#allocation5 + $0x650] sm:$0xff]  ;;  %v3792_v36 = vld [vmem:[#allocation5 + $0x28] sm:$0xff] }
 0x5df   :  { %7168 = vmatpush1.bf16.msra.mxu0 %v7167_v6  ;;  %7232 = vmatpush1.bf16.msra.mxu1 %v7231_v58  ;;  %v3939_v6 = vld [vmem:[#allocation5 + $0x4c0] sm:$0xff]  ;;  %v3933_v58 = vld [vmem:[#allocation5 + $0x490] sm:$0xff] }
 0x5e0   :  { %7170 = vmatprep.subr.bf16.mxu0 %v7169_v12  ;;  %7234 = vmatprep.subr.bf16.mxu1 %v7233_v7  ;;  %v7183_v50 = vpack.c.bf16 %v3939_v6, %v3931_v48  ;;  %v7247_v60 = vpack.c.bf16 %v3941_v59, %v3933_v58  ;;  %v3956_v12 = vld [vmem:[#allocation5 + $0x548] sm:$0xff]  ;;  %v3947_v7 = vld [vmem:[#allocation5 + $0x500] sm:$0xff]  ;;  %v4006_v6 = vld [vmem:[#allocation5 + $0x6d8] sm:$0xff] }
 0x5e1   :  { %v7185_v2 = vpack.c.bf16 %v3956_v12, %v3948_v0  ;;  %v7261_v58 = vpack.c.bf16 %v4006_v6, %v3998_v47  ;;  %v4005_v0 = vld [vmem:[#allocation5 + $0x6d0] sm:$0xff]  ;;  %v4012_v12 = vld [vmem:[#allocation5 + $0x708] sm:$0xff] }
 0x5e3   :  { %7172 = vmatpush1.bf16.msra.mxu0 %v7171_v8  ;;  %7236 = vmatpush1.bf16.msra.mxu1 %v7235_v63  ;;  %v3955_v8 = vld [vmem:[#allocation5 + $0x540] sm:$0xff]  ;;  %v3949_v63 = vld [vmem:[#allocation5 + $0x510] sm:$0xff] }
 0x5e4   :  { %7174 = vmatprep.subr.bf16.mxu0 %v7173_v11  ;;  %7238 = vmatprep.subr.bf16.mxu1 %v7237_v39  ;;  %v7187_v19 = vpack.c.bf16 %v3955_v8, %v3947_v7  ;;  %v7251_v28 = vpack.c.bf16 %v3957_v10, %v3949_v63  ;;  %v3972_v11 = vld [vmem:[#allocation5 + $0x5c8] sm:$0xff]  ;;  %v3963_v39 = vld [vmem:[#allocation5 + $0x580] sm:$0xff]  ;;  %v4022_v7 = vld [vmem:[#allocation5 + $0x758] sm:$0xff] }
 0x5e5   :  { %v7189_v14 = vpack.c.bf16 %v3972_v11, %v3964_v30  ;;  %v4019_v63 = vld [vmem:[#allocation5 + $0x740] sm:$0xff]  ;;  %v4013_v10 = vld [vmem:[#allocation5 + $0x710] sm:$0xff]  ;;  %v4028_v11 = vld [vmem:[#allocation5 + $0x788] sm:$0xff] }
 0x5e6   :  { %v4021_v30 = vld [vmem:[#allocation5 + $0x750] sm:$0xff]  ;;  %v7205_v20 = vpack.c.bf16 %v4036_v25, %v4028_v11 }
 0x5e7   :  { %7176 = vmatpush1.bf16.msra.mxu0 %v7175_v15  ;;  %7240 = vmatpush1.bf16.msra.mxu1 %v7239_v22  ;;  %v3971_v15 = vld [vmem:[#allocation5 + $0x5c0] sm:$0xff]  ;;  %v3965_v22 = vld [vmem:[#allocation5 + $0x590] sm:$0xff] }
 0x5e8   :  { %7178 = vmatprep.subr.bf16.mxu0 %v7177_v35  ;;  %7242 = vmatprep.subr.bf16.mxu1 %v7241_v40  ;;  %v7191_v21 = vpack.c.bf16 %v3971_v15, %v3963_v39  ;;  %v7255_v23 = vpack.c.bf16 %v3973_v32, %v3965_v22  ;;  %v3988_v35 = vld [vmem:[#allocation5 + $0x648] sm:$0xff]  ;;  %v3979_v40 = vld [vmem:[#allocation5 + $0x600] sm:$0xff]  ;;  %v4030_v39 = vld [vmem:[#allocation5 + $0x798] sm:$0xff] }
 0x5e9   :  { %v7193_v37 = vpack.c.bf16 %v3988_v35, %v3980_v27  ;;  %v4038_v15 = vld [vmem:[#allocation5 + $0x7d8] sm:$0xff]  ;;  %v4035_v22 = vld [vmem:[#allocation5 + $0x7c0] sm:$0xff]  ;;  %v4029_v32 = vld [vmem:[#allocation5 + $0x790] sm:$0xff] }
 0x5eb   :  { %7180 = vmatpush1.bf16.msra.mxu0 %v7179_v41  ;;  %7244 = vmatpush1.bf16.msra.mxu1 %v7243_v3  ;;  %v3987_v41 = vld [vmem:[#allocation5 + $0x640] sm:$0xff]  ;;  %v3981_v3 = vld [vmem:[#allocation5 + $0x610] sm:$0xff] }
 0x5ec   :  { %7182 = vmatprep.subr.bf16.mxu0 %v7181_v46  ;;  %7246 = vmatprep.subr.bf16.mxu1 %v7245_v49  ;;  %v7195_v31 = vpack.c.bf16 %v3987_v41, %v3979_v40  ;;  %v7259_v44 = vpack.c.bf16 %v3989_v24, %v3981_v3  ;;  %v4004_v46 = vld [vmem:[#allocation5 + $0x6c8] sm:$0xff]  ;;  %v3995_v49 = vld [vmem:[#allocation5 + $0x680] sm:$0xff]  ;;  %v3802_v41 = vld [vmem:[#allocation5 + $0x78] sm:$0xff]  ;;  %v613_v3 = vadd.f32 %v8629_v43, %v8604_v52 }
 0x5ed   :  { %v7197_v48 = vpack.c.bf16 %v4004_v46, %v3996_v45 }
 0x5ef   :  { %7184 = vmatpush1.bf16.msra.mxu0 %v7183_v50  ;;  %7248 = vmatpush1.bf16.msra.mxu1 %v7247_v60  ;;  %v4003_v50 = vld [vmem:[#allocation5 + $0x6c0] sm:$0xff]  ;;  %v3997_v60 = vld [vmem:[#allocation5 + $0x690] sm:$0xff] }
 0x5f0   :  { %7186 = vmatprep.subr.bf16.mxu0 %v7185_v2  ;;  %7250 = vmatprep.subr.bf16.mxu1 %v7249_v9  ;;  %v7199_v59 = vpack.c.bf16 %v4003_v50, %v3995_v49  ;;  %v7263_v1 = vpack.c.bf16 %v4005_v0, %v3997_v60  ;;  %v4020_v2 = vld [vmem:[#allocation5 + $0x748] sm:$0xff]  ;;  %v7265_v9 = vpack.c.bf16 %v4022_v7, %v4014_v4 }
 0x5f1   :  { %v7201_v8 = vpack.c.bf16 %v4020_v2, %v4012_v12 }
 0x5f3   :  { %7188 = vmatpush1.bf16.msra.mxu0 %v7187_v19  ;;  %7252 = vmatpush1.bf16.msra.mxu1 %v7251_v28  ;;  %v4011_v19 = vld [vmem:[#allocation5 + $0x700] sm:$0xff] }
 0x5f4   :  { %7190 = vmatprep.subr.bf16.mxu0 %v7189_v14  ;;  %7254 = vmatprep.subr.bf16.mxu1 %v7253_v17  ;;  %v7203_v28 = vpack.c.bf16 %v4019_v63, %v4011_v19  ;;  %v7267_v14 = vpack.c.bf16 %v4021_v30, %v4013_v10  ;;  %v4027_v17 = vld [vmem:[#allocation5 + $0x780] sm:$0xff] }
 0x5f5   :  { %v7207_v27 = vpack.c.bf16 %v4035_v22, %v4027_v17 }
 0x5f7   :  { %7192 = vmatpush1.bf16.msra.mxu0 %v7191_v21  ;;  %7256 = vmatpush1.bf16.msra.mxu1 %v7255_v23  ;;  %v7269_v21 = vpack.c.bf16 %v4038_v15, %v4030_v39  ;;  %v4037_v23 = vld [vmem:[#allocation5 + $0x7d0] sm:$0xff] }
 0x5f8   :  { %7194 = vmatprep.subr.bf16.mxu0 %v7193_v37  ;;  %7258 = vmatprep.subr.bf16.mxu1 %v7257_v29  ;;  %v7271_v35 = vpack.c.bf16 %v4037_v23, %v4029_v32  ;;  %v3800_v37 = vld [vmem:[#allocation5 + $0x68] sm:$0xff]  ;;  %v7337_v29 = vpack.c.bf16 %v3802_v41, %v3794_v38 }
 0x5f9   :  { %v7273_v40 = vpack.c.bf16 %v3800_v37, %v3792_v36 }
 0x5fb   :  { %7196 = vmatpush1.bf16.msra.mxu0 %v7195_v31  ;;  %7260 = vmatpush1.bf16.msra.mxu1 %v7259_v44  ;;  %v612_v31 = vadd.f32 %v8627_v42, %v8602_v51 }
 0x5fc   :  { %7198 = vmatprep.subr.bf16.mxu0 %v7197_v48  ;;  %7262 = vmatprep.subr.bf16.mxu1 %v7261_v58 }
 0x5ff   :  { %7200 = vmatpush1.bf16.msra.mxu0 %v7199_v59  ;;  %7264 = vmatpush1.bf16.msra.mxu1 %v7263_v1 }
 0x600   :  { %7202 = vmatprep.subr.bf16.mxu0 %v7201_v8  ;;  %7266 = vmatprep.subr.bf16.mxu1 %v7265_v9 }
 0x603   :  { %7204 = vmatpush1.bf16.msra.mxu0 %v7203_v28  ;;  %7268 = vmatpush1.bf16.msra.mxu1 %v7267_v14 }
 0x604   :  { %7206 = vmatprep.subr.bf16.mxu0 %v7205_v20  ;;  %7270 = vmatprep.subr.bf16.mxu1 %v7269_v21 }
 0x607   :  { %7208 = vmatpush1.bf16.msra.mxu0 %v7207_v27  ;;  %7272 = vmatpush1.bf16.msra.mxu1 %v7271_v35 }
 0x608   :  { %7274 = vmatprep.subr.bf16.mxu0 %v7273_v40  ;;  %7338 = vmatprep.subr.bf16.mxu1 %v7337_v29 }
 0x65d   :  { %v3496_v24 = vpop.f32.mrb[24].mxu0  ;;  %v3567_v44 = vpop.f32.mrb[16].mxu1 }
 0x65e   :  { %v3714_v45 = vadd.f32 %v3496_v24, %v612_v31  ;;  %v7979_v46 = vadd.f32 %v3567_v44, %v8621_v33  ;;  %v3498_v47 = vpop.f32.mrb[25].mxu0  ;;  %v3569_v48 = vpop.f32.mrb[17].mxu1  ;;  %v3791_v31 = vld [vmem:[#allocation5 + $0x20] sm:$0xff]  ;;  %v3793_v44 = vld [vmem:[#allocation5 + $0x30] sm:$0xff] }
 0x65f   :  { %v3715_v6 = vadd.f32 %v3498_v47, %v613_v3  ;;  %v7980_v49 = vadd.f32 %v3569_v48, %v8623_v34  ;;  %v3799_v24 = vld [vmem:[#allocation5 + $0x60] sm:$0xff]  ;;  %v3816_v48 = vld [vmem:[#allocation5 + $0xe8] sm:$0xff] }
 0x660   :  { %v5789_v50 = vmul.f32 -1.442695, %v7979_v46  ;;  %v3808_v46 = vld [vmem:[#allocation5 + $0xa8] sm:$0xff] }
 0x661   :  { %v5790_v58 = vmul.f32 -1.442695, %v7980_v49 }
 0x662   :  { %8207 = vpow2.f32 %v5789_v50 }
 0x663   :  { %8209 = vpow2.f32 %v5790_v58  ;;  %v7275_v58 = vpack.c.bf16 %v3799_v24, %v3791_v31  ;;  %v3858_v31 = vld [vmem:[#allocation5 + $0x238] sm:$0xff] }
 0x664   :  { %8211 = vtanh.f32 %v3714_v45 }
 0x665   :  { %8213 = vtanh.f32 %v3715_v6  ;;  %v3810_v6 = vld [vmem:[#allocation5 + $0xb8] sm:$0xff] }
 0x66c   :  { %v8208_v59 = vpop.eup %8207 }
 0x66d   :  { %v8210_v60 = vpop.eup %8209  ;;  %v3730_v51 = vadd.f32 1.0, %v8208_v59 }
 0x66e   :  { %v3731_v52 = vadd.f32 1.0, %v8210_v60  ;;  %v8212_v0 = vpop.eup %8211  ;;  %v3807_v60 = vld [vmem:[#allocation5 + $0xa0] sm:$0xff] }
 0x66f   :  { %8215 = vrcp.f32 %v3730_v51  ;;  %v8214_v12 = vpop.eup %8213  ;;  %v3815_v51 = vld [vmem:[#allocation5 + $0xe0] sm:$0xff] }
 0x670   :  { %8217 = vrcp.f32 %v3731_v52 }
 0x679   :  { %v8216_v1 = vpop.eup %8215 }
 0x67a   :  { %v8218_v2 = vpop.eup %8217  ;;  %v3764_v4 = vmul.f32 %v8216_v1, %v8212_v0  ;;  %v3809_v0 = vld [vmem:[#allocation5 + $0xb0] sm:$0xff]  ;;  %v3824_v1 = vld [vmem:[#allocation5 + $0x128] sm:$0xff] }
 0x67b   :  { %v3765_v7 = vmul.f32 %v8218_v2, %v8214_v12  ;;  %v3817_v12 = vld [vmem:[#allocation5 + $0xf0] sm:$0xff]  ;;  %v7277_v2 = vpack.c.bf16 %v3816_v48, %v3808_v46 }
 0x67c   :  { %v3857_v48 = vld [vmem:[#allocation5 + $0x230] sm:$0xff] }
 0x69d   :  { %v3638_v8 = vpop.f32.mrb[16].mxu0  ;;  %v3709_v9 = vpop.f32.mrb[32].mxu1 }
 0x69e   :  { %v7995_v19 = vadd.f32 %v3638_v8, %v8633_v62  ;;  %v3640_v63 = vpop.f32.mrb[17].mxu0  ;;  %v3711_v10 = vpop.f32.mrb[33].mxu1  ;;  %v8011_v14 = vadd.f32 %v3709_v9, %v8639_v16  ;;  %v3826_v8 = vld [vmem:[#allocation5 + $0x138] sm:$0xff] }
 0x69f   :  { %v7996_v28 = vadd.f32 %v3640_v63, %v8635_v26  ;;  %v8012_v25 = vadd.f32 %v3711_v10, %v8641_v18  ;;  %v3834_v9 = vld [vmem:[#allocation5 + $0x178] sm:$0xff]  ;;  %v7343_v63 = vpack.c.bf16 %v3817_v12, %v3809_v0  ;;  %v3823_v10 = vld [vmem:[#allocation5 + $0x120] sm:$0xff] }
 0x6a0   :  { %v5791_v30 = vmul.f32 -1.442695, %v7995_v19  ;;  %v5793_v15 = vmul.f32 -1.442695, %v8011_v14  ;;  %v7279_v19 = vpack.c.bf16 %v3815_v51, %v3807_v60  ;;  %v3833_v14 = vld [vmem:[#allocation5 + $0x170] sm:$0xff]  ;;  %v3871_v51 = vld [vmem:[#allocation5 + $0x2a0] sm:$0xff] }
 0x6a1   :  { %v5792_v11 = vmul.f32 -1.442695, %v7996_v28  ;;  %v5794_v20 = vmul.f32 -1.442695, %v8012_v25  ;;  %v3831_v28 = vld [vmem:[#allocation5 + $0x160] sm:$0xff]  ;;  %v3825_v25 = vld [vmem:[#allocation5 + $0x130] sm:$0xff] }
 0x6a2   :  { %8219 = vpow2.f32 %v5791_v30  ;;  %v3879_v0 = vld [vmem:[#allocation5 + $0x2e0] sm:$0xff] }
 0x6a3   :  { %8221 = vpow2.f32 %v5792_v11  ;;  %v7345_v11 = vpack.c.bf16 %v3834_v9, %v3826_v8  ;;  %v3896_v8 = vld [vmem:[#allocation5 + $0x368] sm:$0xff]  ;;  %v3890_v9 = vld [vmem:[#allocation5 + $0x338] sm:$0xff] }
 0x6a4   :  { %8223 = vpow2.f32 %v5794_v20  ;;  %v3840_v20 = vld [vmem:[#allocation5 + $0x1a8] sm:$0xff] }
 0x6ac   :  { %v8220_v39 = vpop.eup %8219 }
 0x6ad   :  { %v3742_v17 = vadd.f32 1.0, %v8220_v39  ;;  %v8222_v21 = vpop.eup %8221  ;;  %v3848_v39 = vld [vmem:[#allocation5 + $0x1e8] sm:$0xff] }
 0x6ae   :  { %v3743_v22 = vadd.f32 1.0, %v8222_v21  ;;  %v8224_v32 = vpop.eup %8223  ;;  %v7283_v21 = vpack.c.bf16 %v3831_v28, %v3823_v10  ;;  %v3887_v28 = vld [vmem:[#allocation5 + $0x320] sm:$0xff] }
 0x6af   :  { %8225 = vrcp.f32 %v3742_v17  ;;  %v3755_v36 = vadd.f32 1.0, %v8224_v32  ;;  %v3850_v17 = vld [vmem:[#allocation5 + $0x1f8] sm:$0xff]  ;;  %v3839_v32 = vld [vmem:[#allocation5 + $0x1a0] sm:$0xff] }
 0x6b0   :  { %8227 = vpow2.f32 %v5793_v15  ;;  %v3842_v15 = vld [vmem:[#allocation5 + $0x1b8] sm:$0xff] }
 0x6b1   :  { %8229 = vrcp.f32 %v3743_v22  ;;  %v7347_v22 = vpack.c.bf16 %v3833_v14, %v3825_v25  ;;  %v3889_v14 = vld [vmem:[#allocation5 + $0x330] sm:$0xff] }
 0x6b2   :  { %8231 = vrcp.f32 %v3755_v36  ;;  %v3841_v36 = vld [vmem:[#allocation5 + $0x1b0] sm:$0xff] }
 0x6b9   :  { %v8226_v23 = vpop.eup %8225 }
 0x6ba   :  { %v8228_v27 = vpop.eup %8227  ;;  %v3762_v35 = vmul.f32 %v8226_v23, %v8710_v5  ;;  %v3801_v5 = vld [vmem:[#allocation5 + $0x70] sm:$0xff]  ;;  %v3847_v23 = vld [vmem:[#allocation5 + $0x1e0] sm:$0xff] }
 0x6bb   :  { %v8230_v37 = vpop.eup %8229  ;;  %v3754_v41 = vadd.f32 1.0, %v8228_v27  ;;  %v7339_v59 = vpack.c.bf16 %v3801_v5, %v3793_v44  ;;  %v7285_v27 = vpack.c.bf16 %v3848_v39, %v3840_v20  ;;  %v7287_v24 = vpack.c.bf16 %v3847_v23, %v3839_v32  ;;  %v3855_v5 = vld [vmem:[#allocation5 + $0x220] sm:$0xff]  ;;  %v3897_v20 = vld [vmem:[#allocation5 + $0x370] sm:$0xff]  ;;  %v3904_v39 = vld [vmem:[#allocation5 + $0x3a8] sm:$0xff] }
 0x6bc   :  { %v8734_v38 = vadd.f32 %v3764_v4, %v3762_v35  ;;  %v3763_v40 = vmul.f32 %v8230_v37, %v8713_v61  ;;  %v8232_v3 = vpop.eup %8231  ;;  %v3818_v61 = vld [vmem:[#allocation5 + $0xf8] sm:$0xff]  ;;  %v7349_v35 = vpack.c.bf16 %v3850_v17, %v3842_v15  ;;  %v3849_v37 = vld [vmem:[#allocation5 + $0x1f0] sm:$0xff]  ;;  %v3912_v15 = vld [vmem:[#allocation5 + $0x3e8] sm:$0xff]  ;;  %v7363_v32 = vpack.c.bf16 %v3897_v20, %v3889_v14 }
 0x6bd   :  { %v7341_v4 = vpack.c.bf16 %v3818_v61, %v3810_v6  ;;  %v7351_v44 = vpack.c.bf16 %v3849_v37, %v3841_v36  ;;  %v3865_v6 = vld [vmem:[#allocation5 + $0x270] sm:$0xff]  ;;  %v3872_v61 = vld [vmem:[#allocation5 + $0x2a8] sm:$0xff]  ;;  %v3906_v17 = vld [vmem:[#allocation5 + $0x3b8] sm:$0xff] }
 0x6be   :  { %v8737_v29 = vadd.f32 %v3765_v7, %v3763_v40  ;;  %8233 = vtanh.f32 %v8734_v38  ;;  %v3832_v7 = vld [vmem:[#allocation5 + $0x168] sm:$0xff]  ;;  %v7355_v60 = vpack.c.bf16 %v3865_v6, %v3857_v48  ;;  %v3903_v23 = vld [vmem:[#allocation5 + $0x3a0] sm:$0xff]  ;;  %v3905_v37 = vld [vmem:[#allocation5 + $0x3b0] sm:$0xff] }
 0x6bf   :  { %v7281_v30 = vpack.c.bf16 %v3832_v7, %v3824_v1  ;;  %v3856_v40 = vld [vmem:[#allocation5 + $0x228] sm:$0xff]  ;;  %v3921_v6 = vld [vmem:[#allocation5 + $0x430] sm:$0xff] }
 0x6c0   :  { %8235 = vtanh.f32 %v8737_v29  ;;  %v3888_v7 = vld [vmem:[#allocation5 + $0x328] sm:$0xff]  ;;  %v3953_v20 = vld [vmem:[#allocation5 + $0x530] sm:$0xff] }
 0x6c1   :  { %8237 = vrcp.f32 %v3754_v41  ;;  %v3864_v41 = vld [vmem:[#allocation5 + $0x268] sm:$0xff] }
 0x6c2   :  { %v7289_v46 = vpack.c.bf16 %v3864_v41, %v3856_v40  ;;  %v3913_v40 = vld [vmem:[#allocation5 + $0x3f0] sm:$0xff]  ;;  %v3920_v41 = vld [vmem:[#allocation5 + $0x428] sm:$0xff] }
 0x6c8   :  { %v8234_v45 = vpop.eup %8233 }
 0x6ca   :  { %v8236_v47 = vpop.eup %8235 }
 0x6cb   :  { %v8238_v49 = vpop.eup %8237  ;;  %v3773_v50 = vmul.f32 %v8236_v47, %v8232_v3  ;;  %v3866_v3 = vld [vmem:[#allocation5 + $0x278] sm:$0xff] }
 0x6cc   :  { %v8741_v52 = vmul.f32 %v8238_v49, %v8234_v45  ;;  %v3863_v45 = vld [vmem:[#allocation5 + $0x260] sm:$0xff]  ;;  %v7353_v47 = vpack.c.bf16 %v3866_v3, %v3858_v31  ;;  %v3880_v49 = vld [vmem:[#allocation5 + $0x2e8] sm:$0xff]  ;;  %v3922_v3 = vld [vmem:[#allocation5 + $0x438] sm:$0xff] }
 0x6cd   :  { %4107 = vmatprep.mubr.f32.mxu0 %v3773_v50  ;;  %4178 = vmatprep.mubr.f32.mxu1 %v3773_v50  ;;  %v7293_v12 = vpack.c.bf16 %v3880_v49, %v3872_v61  ;;  %v3928_v31 = vld [vmem:[#allocation5 + $0x468] sm:$0xff]  ;;  %v3929_v61 = vld [vmem:[#allocation5 + $0x470] sm:$0xff] }
 0x6ce   :  { %4108 = vmatmul.mubr.f32.vlgmr.msra.gmra.mrb[26].mxu0 %v8741_v52  ;;  %4179 = vmatmul.mubr.f32.vlgmr.msra.gmra.mrb[18].mxu1 %v8741_v52  ;;  %v3936_v49 = vld [vmem:[#allocation5 + $0x4a8] sm:$0xff] }
 0x6cf   :  { %7276 = vmatpush1.bf16.msra.mxu0 %v7275_v58  ;;  %7340 = vmatpush1.bf16.msra.mxu1 %v7339_v59  ;;  %v3882_v58 = vld [vmem:[#allocation5 + $0x2f8] sm:$0xff]  ;;  %v7291_v59 = vpack.c.bf16 %v3863_v45, %v3855_v5  ;;  %v7367_v5 = vpack.c.bf16 %v3913_v40, %v3905_v37  ;;  %v3919_v45 = vld [vmem:[#allocation5 + $0x420] sm:$0xff]  ;;  %v3969_v40 = vld [vmem:[#allocation5 + $0x5b0] sm:$0xff] }
 0x6d0   :  { %4249 = vmatprep.mubr.f32.mxu0 %v3773_v50  ;;  %4320 = vmatprep.mubr.f32.mxu1 %v3773_v50  ;;  %v3874_v50 = vld [vmem:[#allocation5 + $0x2b8] sm:$0xff] }
 0x6d1   :  { %7278 = vmatprep.subr.bf16.mxu0 %v7277_v2  ;;  %7342 = vmatprep.subr.bf16.mxu1 %v7341_v4  ;;  %v7357_v1 = vpack.c.bf16 %v3882_v58, %v3874_v50  ;;  %v3873_v2 = vld [vmem:[#allocation5 + $0x2b0] sm:$0xff]  ;;  %v3944_v50 = vld [vmem:[#allocation5 + $0x4e8] sm:$0xff]  ;;  %v3938_v58 = vld [vmem:[#allocation5 + $0x4b8] sm:$0xff] }
 0x6d2   :  { %v3881_v4 = vld [vmem:[#allocation5 + $0x2f0] sm:$0xff] }
 0x6d3   :  { %7280 = vmatpush1.bf16.msra.mxu0 %v7279_v19  ;;  %7344 = vmatpush1.bf16.msra.mxu1 %v7343_v63  ;;  %v3898_v19 = vld [vmem:[#allocation5 + $0x378] sm:$0xff]  ;;  %v7295_v63 = vpack.c.bf16 %v3879_v0, %v3871_v51  ;;  %v7359_v10 = vpack.c.bf16 %v3881_v4, %v3873_v2  ;;  %v7371_v51 = vpack.c.bf16 %v3929_v61, %v3921_v6  ;;  %v3935_v0 = vld [vmem:[#allocation5 + $0x4a0] sm:$0xff]  ;;  %v3937_v4 = vld [vmem:[#allocation5 + $0x4b0] sm:$0xff] }
 0x6d4   :  { %7282 = vmatprep.subr.bf16.mxu0 %v7281_v30  ;;  %7346 = vmatprep.subr.bf16.mxu1 %v7345_v11  ;;  %v3895_v30 = vld [vmem:[#allocation5 + $0x360] sm:$0xff]  ;;  %v7297_v11 = vpack.c.bf16 %v3896_v8, %v3888_v7  ;;  %v7361_v25 = vpack.c.bf16 %v3898_v19, %v3890_v9  ;;  %v3945_v7 = vld [vmem:[#allocation5 + $0x4f0] sm:$0xff]  ;;  %v3952_v8 = vld [vmem:[#allocation5 + $0x528] sm:$0xff] }
 0x6d5   :  { %v3960_v9 = vld [vmem:[#allocation5 + $0x568] sm:$0xff]  ;;  %v3954_v19 = vld [vmem:[#allocation5 + $0x538] sm:$0xff]  ;;  %v3985_v61 = vld [vmem:[#allocation5 + $0x630] sm:$0xff] }
 0x6d7   :  { %7284 = vmatpush1.bf16.msra.mxu0 %v7283_v21  ;;  %7348 = vmatpush1.bf16.msra.mxu1 %v7347_v22  ;;  %v3914_v21 = vld [vmem:[#allocation5 + $0x3f8] sm:$0xff]  ;;  %v7299_v22 = vpack.c.bf16 %v3895_v30, %v3887_v28  ;;  %v7375_v28 = vpack.c.bf16 %v3945_v7, %v3937_v4  ;;  %v3951_v30 = vld [vmem:[#allocation5 + $0x520] sm:$0xff]  ;;  %v4001_v7 = vld [vmem:[#allocation5 + $0x6b0] sm:$0xff] }
 0x6d8   :  { %7286 = vmatprep.subr.bf16.mxu0 %v7285_v27  ;;  %7350 = vmatprep.subr.bf16.mxu1 %v7349_v35  ;;  %v3911_v27 = vld [vmem:[#allocation5 + $0x3e0] sm:$0xff]  ;;  %v7301_v35 = vpack.c.bf16 %v3912_v15, %v3904_v39  ;;  %v7365_v36 = vpack.c.bf16 %v3914_v21, %v3906_v17  ;;  %v3961_v39 = vld [vmem:[#allocation5 + $0x570] sm:$0xff]  ;;  %v3968_v15 = vld [vmem:[#allocation5 + $0x5a8] sm:$0xff] }
 0x6d9   :  { %v3976_v17 = vld [vmem:[#allocation5 + $0x5e8] sm:$0xff]  ;;  %v3970_v21 = vld [vmem:[#allocation5 + $0x5b8] sm:$0xff] }
 0x6db   :  { %7288 = vmatpush1.bf16.msra.mxu0 %v7287_v24  ;;  %7352 = vmatpush1.bf16.msra.mxu1 %v7351_v44  ;;  %v3930_v24 = vld [vmem:[#allocation5 + $0x478] sm:$0xff]  ;;  %v7303_v44 = vpack.c.bf16 %v3911_v27, %v3903_v23  ;;  %v7379_v23 = vpack.c.bf16 %v3961_v39, %v3953_v20  ;;  %v3967_v27 = vld [vmem:[#allocation5 + $0x5a0] sm:$0xff]  ;;  %v4017_v39 = vld [vmem:[#allocation5 + $0x730] sm:$0xff] }
 0x6dc   :  { %7290 = vmatprep.subr.bf16.mxu0 %v7289_v46  ;;  %7354 = vmatprep.subr.bf16.mxu1 %v7353_v47  ;;  %v3927_v46 = vld [vmem:[#allocation5 + $0x460] sm:$0xff]  ;;  %v7305_v47 = vpack.c.bf16 %v3928_v31, %v3920_v41  ;;  %v7369_v48 = vpack.c.bf16 %v3930_v24, %v3922_v3  ;;  %v3977_v41 = vld [vmem:[#allocation5 + $0x5f0] sm:$0xff]  ;;  %v3984_v31 = vld [vmem:[#allocation5 + $0x628] sm:$0xff] }
 0x6dd   :  { %v3992_v3 = vld [vmem:[#allocation5 + $0x668] sm:$0xff]  ;;  %v3986_v24 = vld [vmem:[#allocation5 + $0x638] sm:$0xff] }
 0x6df   :  { %7292 = vmatpush1.bf16.msra.mxu0 %v7291_v59  ;;  %7356 = vmatpush1.bf16.msra.mxu1 %v7355_v60  ;;  %v3946_v59 = vld [vmem:[#allocation5 + $0x4f8] sm:$0xff]  ;;  %v7307_v60 = vpack.c.bf16 %v3927_v46, %v3919_v45  ;;  %v7383_v45 = vpack.c.bf16 %v3977_v41, %v3969_v40  ;;  %v3983_v46 = vld [vmem:[#allocation5 + $0x620] sm:$0xff]  ;;  %v4033_v41 = vld [vmem:[#allocation5 + $0x7b0] sm:$0xff] }
 0x6e0   :  { %7294 = vmatprep.subr.bf16.mxu0 %v7293_v12  ;;  %7358 = vmatprep.subr.bf16.mxu1 %v7357_v1  ;;  %v3943_v12 = vld [vmem:[#allocation5 + $0x4e0] sm:$0xff]  ;;  %v7309_v1 = vpack.c.bf16 %v3944_v50, %v3936_v49  ;;  %v7373_v2 = vpack.c.bf16 %v3946_v59, %v3938_v58  ;;  %v3993_v49 = vld [vmem:[#allocation5 + $0x670] sm:$0xff]  ;;  %v4000_v50 = vld [vmem:[#allocation5 + $0x6a8] sm:$0xff] }
 0x6e1   :  { %v4008_v58 = vld [vmem:[#allocation5 + $0x6e8] sm:$0xff]  ;;  %v4002_v59 = vld [vmem:[#allocation5 + $0x6b8] sm:$0xff]  ;;  %v4039_v40 = vld [vmem:[#allocation5 + $0x7e0] sm:$0xff] }
 0x6e3   :  { %7296 = vmatpush1.bf16.msra.mxu0 %v7295_v63  ;;  %7360 = vmatpush1.bf16.msra.mxu1 %v7359_v10  ;;  %v3962_v63 = vld [vmem:[#allocation5 + $0x578] sm:$0xff]  ;;  %v7311_v10 = vpack.c.bf16 %v3943_v12, %v3935_v0  ;;  %v7387_v0 = vpack.c.bf16 %v3993_v49, %v3985_v61  ;;  %v3999_v12 = vld [vmem:[#allocation5 + $0x6a0] sm:$0xff] }
 0x6e4   :  { %7298 = vmatprep.subr.bf16.mxu0 %v7297_v11  ;;  %7362 = vmatprep.subr.bf16.mxu1 %v7361_v25  ;;  %v3959_v11 = vld [vmem:[#allocation5 + $0x560] sm:$0xff]  ;;  %v7313_v25 = vpack.c.bf16 %v3960_v9, %v3952_v8  ;;  %v7377_v14 = vpack.c.bf16 %v3962_v63, %v3954_v19  ;;  %v4009_v8 = vld [vmem:[#allocation5 + $0x6f0] sm:$0xff]  ;;  %v4016_v9 = vld [vmem:[#allocation5 + $0x728] sm:$0xff] }
 0x6e5   :  { %v4024_v19 = vld [vmem:[#allocation5 + $0x768] sm:$0xff]  ;;  %v4018_v63 = vld [vmem:[#allocation5 + $0x738] sm:$0xff] }
 0x6e7   :  { %7300 = vmatpush1.bf16.msra.mxu0 %v7299_v22  ;;  %7364 = vmatpush1.bf16.msra.mxu1 %v7363_v32  ;;  %v3978_v22 = vld [vmem:[#allocation5 + $0x5f8] sm:$0xff]  ;;  %v7315_v32 = vpack.c.bf16 %v3959_v11, %v3951_v30  ;;  %v7391_v30 = vpack.c.bf16 %v4009_v8, %v4001_v7  ;;  %v4015_v11 = vld [vmem:[#allocation5 + $0x720] sm:$0xff]  ;;  %v4418_v7 = vld [vmem:[#allocation5 + $0x90] sm:$0xff] }
 0x6e8   :  { %7302 = vmatprep.subr.bf16.mxu0 %v7301_v35  ;;  %7366 = vmatprep.subr.bf16.mxu1 %v7365_v36  ;;  %v3975_v35 = vld [vmem:[#allocation5 + $0x5e0] sm:$0xff]  ;;  %v7317_v36 = vpack.c.bf16 %v3976_v17, %v3968_v15  ;;  %v7381_v37 = vpack.c.bf16 %v3978_v22, %v3970_v21  ;;  %v4025_v15 = vld [vmem:[#allocation5 + $0x770] sm:$0xff]  ;;  %v4032_v17 = vld [vmem:[#allocation5 + $0x7a8] sm:$0xff] }
 0x6e9   :  { %v4040_v21 = vld [vmem:[#allocation5 + $0x7e8] sm:$0xff]  ;;  %v4034_v22 = vld [vmem:[#allocation5 + $0x7b8] sm:$0xff] }
 0x6eb   :  { %7304 = vmatpush1.bf16.msra.mxu0 %v7303_v44  ;;  %7368 = vmatpush1.bf16.msra.mxu1 %v7367_v5  ;;  %v3994_v44 = vld [vmem:[#allocation5 + $0x678] sm:$0xff]  ;;  %v7319_v5 = vpack.c.bf16 %v3975_v35, %v3967_v27  ;;  %v7395_v27 = vpack.c.bf16 %v4025_v15, %v4017_v39  ;;  %v4031_v35 = vld [vmem:[#allocation5 + $0x7a0] sm:$0xff]  ;;  %v4434_v39 = vld [vmem:[#allocation5 + $0x110] sm:$0xff] }
 0x6ec   :  { %7306 = vmatprep.subr.bf16.mxu0 %v7305_v47  ;;  %7370 = vmatprep.subr.bf16.mxu1 %v7369_v48  ;;  %v3991_v47 = vld [vmem:[#allocation5 + $0x660] sm:$0xff]  ;;  %v7321_v48 = vpack.c.bf16 %v3992_v3, %v3984_v31  ;;  %v7385_v6 = vpack.c.bf16 %v3994_v44, %v3986_v24  ;;  %v4041_v31 = vld [vmem:[#allocation5 + $0x7f0] sm:$0xff]  ;;  %v7335_v3 = vpack.c.bf16 %v4039_v40, %v4031_v35  ;;  %v4401_v44 = vld [vmem:[#allocation5 + $0x8] sm:$0xff] }
 0x6ed   :  { %v7399_v24 = vpack.c.bf16 %v4041_v31, %v4033_v41  ;;  %v4442_v15 = vld [vmem:[#allocation5 + $0x150] sm:$0xff]  ;;  %v4459_v35 = vld [vmem:[#allocation5 + $0x1d8] sm:$0xff] }
 0x6ee   :  { %v4450_v41 = vld [vmem:[#allocation5 + $0x190] sm:$0xff] }
 0x6ef   :  { %7308 = vmatpush1.bf16.msra.mxu0 %v7307_v60  ;;  %7372 = vmatpush1.bf16.msra.mxu1 %v7371_v51  ;;  %v4010_v60 = vld [vmem:[#allocation5 + $0x6f8] sm:$0xff]  ;;  %v7323_v51 = vpack.c.bf16 %v3991_v47, %v3983_v46  ;;  %v4458_v31 = vld [vmem:[#allocation5 + $0x1d0] sm:$0xff] }
 0x6f0   :  { %7310 = vmatprep.subr.bf16.mxu0 %v7309_v1  ;;  %7374 = vmatprep.subr.bf16.mxu1 %v7373_v2  ;;  %v4007_v1 = vld [vmem:[#allocation5 + $0x6e0] sm:$0xff]  ;;  %v7325_v2 = vpack.c.bf16 %v4008_v58, %v4000_v50  ;;  %v7389_v4 = vpack.c.bf16 %v4010_v60, %v4002_v59  ;;  %v4411_v47 = vld [vmem:[#allocation5 + $0x58] sm:$0xff]  ;;  %v4402_v50 = vld [vmem:[#allocation5 + $0x10] sm:$0xff] }
 0x6f1   :  { %v4410_v58 = vld [vmem:[#allocation5 + $0x50] sm:$0xff]  ;;  %v4417_v59 = vld [vmem:[#allocation5 + $0x88] sm:$0xff] }
 0x6f2   :  { %v7467_v60 = vpack.c.bf16 %v4410_v58, %v4402_v50  ;;  %v4474_v58 = vld [vmem:[#allocation5 + $0x250] sm:$0xff] }
 0x6f3   :  { %7312 = vmatpush1.bf16.msra.mxu0 %v7311_v10  ;;  %7376 = vmatpush1.bf16.msra.mxu1 %v7375_v28  ;;  %v4026_v10 = vld [vmem:[#allocation5 + $0x778] sm:$0xff]  ;;  %v7327_v28 = vpack.c.bf16 %v4007_v1, %v3999_v12 }
 0x6f4   :  { %7314 = vmatprep.subr.bf16.mxu0 %v7313_v25  ;;  %7378 = vmatprep.subr.bf16.mxu1 %v7377_v14  ;;  %v4023_v25 = vld [vmem:[#allocation5 + $0x760] sm:$0xff]  ;;  %v7329_v14 = vpack.c.bf16 %v4024_v19, %v4016_v9  ;;  %v7393_v20 = vpack.c.bf16 %v4026_v10, %v4018_v63  ;;  %v4427_v12 = vld [vmem:[#allocation5 + $0xd8] sm:$0xff]  ;;  %v4426_v9 = vld [vmem:[#allocation5 + $0xd0] sm:$0xff] }
 0x6f5   :  { %v4433_v19 = vld [vmem:[#allocation5 + $0x108] sm:$0xff]  ;;  %v7471_v10 = vpack.c.bf16 %v4426_v9, %v4418_v7  ;;  %v4490_v9 = vld [vmem:[#allocation5 + $0x2d0] sm:$0xff] }
 0x6f6   :  { %v4441_v63 = vld [vmem:[#allocation5 + $0x148] sm:$0xff] }
 0x6f7   :  { %7316 = vmatpush1.bf16.msra.mxu0 %v7315_v32  ;;  %7380 = vmatpush1.bf16.msra.mxu1 %v7379_v23  ;;  %v4042_v32 = vld [vmem:[#allocation5 + $0x7f8] sm:$0xff]  ;;  %v7331_v23 = vpack.c.bf16 %v4023_v25, %v4015_v11  ;;  %v4432_v25 = vld [vmem:[#allocation5 + $0x100] sm:$0xff] }
 0x6f8   :  { %7318 = vmatprep.subr.bf16.mxu0 %v7317_v36  ;;  %7382 = vmatprep.subr.bf16.mxu1 %v7381_v37  ;;  %v7333_v36 = vpack.c.bf16 %v4040_v21, %v4032_v17  ;;  %v7397_v37 = vpack.c.bf16 %v4042_v32, %v4034_v22  ;;  %v4443_v11 = vld [vmem:[#allocation5 + $0x158] sm:$0xff]  ;;  %v4449_v21 = vld [vmem:[#allocation5 + $0x188] sm:$0xff] }
 0x6f9   :  { %v4457_v22 = vld [vmem:[#allocation5 + $0x1c8] sm:$0xff]  ;;  %v4451_v32 = vld [vmem:[#allocation5 + $0x198] sm:$0xff] }
 0x6fa   :  { %v7477_v40 = vpack.c.bf16 %v4459_v35, %v4451_v32  ;;  %v4521_v32 = vld [vmem:[#allocation5 + $0x3c8] sm:$0xff]  ;;  %v4523_v35 = vld [vmem:[#allocation5 + $0x3d8] sm:$0xff] }
 0x6fb   :  { %7320 = vmatpush1.bf16.msra.mxu0 %v7319_v5  ;;  %7384 = vmatpush1.bf16.msra.mxu1 %v7383_v45  ;;  %v4409_v5 = vld [vmem:[#allocation5 + $0x48] sm:$0xff]  ;;  %v4403_v45 = vld [vmem:[#allocation5 + $0x18] sm:$0xff] }
 0x6fc   :  { %7322 = vmatprep.subr.bf16.mxu0 %v7321_v48  ;;  %7386 = vmatprep.subr.bf16.mxu1 %v7385_v6  ;;  %v7401_v46 = vpack.c.bf16 %v4409_v5, %v4401_v44  ;;  %v4400_v48 = vld [vmem:[#allocation5] sm:$0xff]  ;;  %v7465_v61 = vpack.c.bf16 %v4411_v47, %v4403_v45  ;;  %v4467_v44 = vld [vmem:[#allocation5 + $0x218] sm:$0xff] }
 0x6fd   :  { %v4408_v6 = vld [vmem:[#allocation5 + $0x40] sm:$0xff]  ;;  %v4475_v5 = vld [vmem:[#allocation5 + $0x258] sm:$0xff] }
 0x6fe   :  { %v7403_v49 = vpack.c.bf16 %v4408_v6, %v4400_v48  ;;  %v7481_v48 = vpack.c.bf16 %v4475_v5, %v4467_v44  ;;  %v4464_v6 = vld [vmem:[#allocation5 + $0x200] sm:$0xff]  ;;  %v4529_v44 = vld [vmem:[#allocation5 + $0x408] sm:$0xff] }
 0x6ff   :  { %7324 = vmatpush1.bf16.msra.mxu0 %v7323_v51  ;;  %7388 = vmatpush1.bf16.msra.mxu1 %v7387_v0  ;;  %v4425_v51 = vld [vmem:[#allocation5 + $0xc8] sm:$0xff]  ;;  %v4419_v0 = vld [vmem:[#allocation5 + $0x98] sm:$0xff] }
 0x700   :  { %7326 = vmatprep.subr.bf16.mxu0 %v7325_v2  ;;  %7390 = vmatprep.subr.bf16.mxu1 %v7389_v4  ;;  %v7469_v1 = vpack.c.bf16 %v4427_v12, %v4419_v0  ;;  %v4416_v2 = vld [vmem:[#allocation5 + $0x80] sm:$0xff]  ;;  %v4483_v0 = vld [vmem:[#allocation5 + $0x298] sm:$0xff]  ;;  %v4537_v5 = vld [vmem:[#allocation5 + $0x448] sm:$0xff] }
 0x701   :  { %v4424_v4 = vld [vmem:[#allocation5 + $0xc0] sm:$0xff] }
 0x702   :  { %v7407_v8 = vpack.c.bf16 %v4424_v4, %v4416_v2  ;;  %v4488_v2 = vld [vmem:[#allocation5 + $0x2c0] sm:$0xff] }
 0x703   :  { %7328 = vmatpush1.bf16.msra.mxu0 %v7327_v28  ;;  %7392 = vmatpush1.bf16.msra.mxu1 %v7391_v30  ;;  %v7409_v28 = vpack.c.bf16 %v4441_v63, %v4433_v19  ;;  %v4435_v30 = vld [vmem:[#allocation5 + $0x118] sm:$0xff]  ;;  %v4497_v63 = vld [vmem:[#allocation5 + $0x308] sm:$0xff] }
 0x704   :  { %7330 = vmatprep.subr.bf16.mxu0 %v7329_v14  ;;  %7394 = vmatprep.subr.bf16.mxu1 %v7393_v20  ;;  %v7473_v14 = vpack.c.bf16 %v4443_v11, %v4435_v30  ;;  %v4440_v20 = vld [vmem:[#allocation5 + $0x140] sm:$0xff]  ;;  %v4507_v11 = vld [vmem:[#allocation5 + $0x358] sm:$0xff] }
 0x705   :  { %v7411_v17 = vpack.c.bf16 %v4440_v20, %v4432_v25  ;;  %v4496_v25 = vld [vmem:[#allocation5 + $0x300] sm:$0xff] }
 0x707   :  { %7332 = vmatpush1.bf16.msra.mxu0 %v7331_v23  ;;  %7396 = vmatpush1.bf16.msra.mxu1 %v7395_v27  ;;  %v7475_v23 = vpack.c.bf16 %v4442_v15, %v4434_v39  ;;  %v7413_v27 = vpack.c.bf16 %v4457_v22, %v4449_v21  ;;  %v4498_v15 = vld [vmem:[#allocation5 + $0x310] sm:$0xff]  ;;  %v4513_v22 = vld [vmem:[#allocation5 + $0x388] sm:$0xff] }
 0x708   :  { %7334 = vmatprep.subr.bf16.mxu0 %v7333_v36  ;;  %7398 = vmatprep.subr.bf16.mxu1 %v7397_v37  ;;  %v4448_v36 = vld [vmem:[#allocation5 + $0x180] sm:$0xff] }
 0x709   :  { %v4456_v37 = vld [vmem:[#allocation5 + $0x1c0] sm:$0xff] }
 0x70a   :  { %v7415_v45 = vpack.c.bf16 %v4456_v37, %v4448_v36  ;;  %v4512_v36 = vld [vmem:[#allocation5 + $0x380] sm:$0xff] }
 0x70b   :  { %7336 = vmatpush1.bf16.msra.mxu0 %v7335_v3  ;;  %7400 = vmatpush1.bf16.msra.mxu1 %v7399_v24  ;;  %v4465_v3 = vld [vmem:[#allocation5 + $0x208] sm:$0xff]  ;;  %v4520_v37 = vld [vmem:[#allocation5 + $0x3c0] sm:$0xff] }
 0x70c   :  { %7402 = vmatprep.subr.bf16.mxu0 %v7401_v46  ;;  %7466 = vmatprep.subr.bf16.mxu1 %v7465_v61  ;;  %v4473_v24 = vld [vmem:[#allocation5 + $0x248] sm:$0xff]  ;;  %v7479_v46 = vpack.c.bf16 %v4458_v31, %v4450_v41  ;;  %v4472_v61 = vld [vmem:[#allocation5 + $0x240] sm:$0xff]  ;;  %v7431_v41 = vpack.c.bf16 %v4520_v37, %v4512_v36  ;;  %v4514_v31 = vld [vmem:[#allocation5 + $0x390] sm:$0xff] }
 0x70d   :  { %v7417_v47 = vpack.c.bf16 %v4473_v24, %v4465_v3  ;;  %v7419_v50 = vpack.c.bf16 %v4472_v61, %v4464_v6  ;;  %v4522_v3 = vld [vmem:[#allocation5 + $0x3d0] sm:$0xff]  ;;  %v4536_v6 = vld [vmem:[#allocation5 + $0x440] sm:$0xff] }
 0x70e   :  { %4250 = vmatmul.mubr.f32.vlgmr.msra.gmra.mrb[18].mxu0 %v8741_v52  ;;  %4321 = vmatmul.mubr.f32.vlgmr.msra.gmra.mrb[34].mxu1 %v8741_v52  ;;  %v7405_v52 = vpack.c.bf16 %v4425_v51, %v4417_v59  ;;  %v4489_v51 = vld [vmem:[#allocation5 + $0x2c8] sm:$0xff]  ;;  %v7495_v24 = vpack.c.bf16 %v4522_v3, %v4514_v31  ;;  %v4576_v36 = vld [vmem:[#allocation5 + $0x580] sm:$0xff]  ;;  %v4578_v31 = vld [vmem:[#allocation5 + $0x590] sm:$0xff] }
 0x70f   :  { %7404 = vmatpush1.bf16.msra.mxu0 %v7403_v49  ;;  %7468 = vmatpush1.bf16.msra.mxu1 %v7467_v60  ;;  %v4466_v49 = vld [vmem:[#allocation5 + $0x210] sm:$0xff]  ;;  %v4481_v60 = vld [vmem:[#allocation5 + $0x288] sm:$0xff]  ;;  %v4584_v37 = vld [vmem:[#allocation5 + $0x5c0] sm:$0xff] }
 0x710   :  { %7406 = vmatprep.subr.bf16.mxu0 %v7405_v52  ;;  %7470 = vmatprep.subr.bf16.mxu1 %v7469_v1  ;;  %v7483_v59 = vpack.c.bf16 %v4474_v58, %v4466_v49  ;;  %v7421_v12 = vpack.c.bf16 %v4489_v51, %v4481_v60  ;;  %v4491_v52 = vld [vmem:[#allocation5 + $0x2d8] sm:$0xff]  ;;  %v4480_v1 = vld [vmem:[#allocation5 + $0x280] sm:$0xff]  ;;  %v4538_v58 = vld [vmem:[#allocation5 + $0x450] sm:$0xff] }
 0x711   :  { %v7485_v4 = vpack.c.bf16 %v4491_v52, %v4483_v0  ;;  %v7423_v7 = vpack.c.bf16 %v4488_v2, %v4480_v1  ;;  %v4545_v60 = vld [vmem:[#allocation5 + $0x488] sm:$0xff]  ;;  %v4547_v0 = vld [vmem:[#allocation5 + $0x498] sm:$0xff]  ;;  %v4544_v1 = vld [vmem:[#allocation5 + $0x480] sm:$0xff] }
 0x712   :  { %v4553_v51 = vld [vmem:[#allocation5 + $0x4c8] sm:$0xff]  ;;  %v4555_v52 = vld [vmem:[#allocation5 + $0x4d8] sm:$0xff]  ;;  %v4552_v2 = vld [vmem:[#allocation5 + $0x4c0] sm:$0xff] }
 0x713   :  { %7408 = vmatpush1.bf16.msra.mxu0 %v7407_v8  ;;  %7472 = vmatpush1.bf16.msra.mxu1 %v7471_v10  ;;  %v4482_v8 = vld [vmem:[#allocation5 + $0x290] sm:$0xff]  ;;  %v4505_v10 = vld [vmem:[#allocation5 + $0x348] sm:$0xff] }
 0x714   :  { %7410 = vmatprep.subr.bf16.mxu0 %v7409_v28  ;;  %7474 = vmatprep.subr.bf16.mxu1 %v7473_v14  ;;  %v7487_v19 = vpack.c.bf16 %v4490_v9, %v4482_v8  ;;  %v4499_v28 = vld [vmem:[#allocation5 + $0x318] sm:$0xff]  ;;  %v7425_v30 = vpack.c.bf16 %v4505_v10, %v4497_v63  ;;  %v4504_v14 = vld [vmem:[#allocation5 + $0x340] sm:$0xff]  ;;  %v4546_v8 = vld [vmem:[#allocation5 + $0x490] sm:$0xff] }
 0x715   :  { %v7489_v20 = vpack.c.bf16 %v4507_v11, %v4499_v28  ;;  %v7427_v39 = vpack.c.bf16 %v4504_v14, %v4496_v25  ;;  %v4554_v9 = vld [vmem:[#allocation5 + $0x4d0] sm:$0xff]  ;;  %v4561_v63 = vld [vmem:[#allocation5 + $0x508] sm:$0xff]  ;;  %v4563_v28 = vld [vmem:[#allocation5 + $0x518] sm:$0xff] }
 0x716   :  { %v4569_v10 = vld [vmem:[#allocation5 + $0x548] sm:$0xff]  ;;  %v4571_v11 = vld [vmem:[#allocation5 + $0x558] sm:$0xff]  ;;  %v4560_v25 = vld [vmem:[#allocation5 + $0x500] sm:$0xff] }
 0x717   :  { %7412 = vmatpush1.bf16.msra.mxu0 %v7411_v17  ;;  %7476 = vmatpush1.bf16.msra.mxu1 %v7475_v23  ;;  %v4506_v17 = vld [vmem:[#allocation5 + $0x350] sm:$0xff]  ;;  %v4515_v23 = vld [vmem:[#allocation5 + $0x398] sm:$0xff]  ;;  %v4568_v14 = vld [vmem:[#allocation5 + $0x540] sm:$0xff] }
 0x718   :  { %7414 = vmatprep.subr.bf16.mxu0 %v7413_v27  ;;  %7478 = vmatprep.subr.bf16.mxu1 %v7477_v40  ;;  %v7491_v21 = vpack.c.bf16 %v4506_v17, %v4498_v15  ;;  %v7429_v27 = vpack.c.bf16 %v4521_v32, %v4513_v22  ;;  %v7493_v40 = vpack.c.bf16 %v4523_v35, %v4515_v23  ;;  %v4562_v15 = vld [vmem:[#allocation5 + $0x510] sm:$0xff]  ;;  %v4577_v22 = vld [vmem:[#allocation5 + $0x588] sm:$0xff]  ;;  %v4579_v23 = vld [vmem:[#allocation5 + $0x598] sm:$0xff] }
 0x719   :  { %v4570_v17 = vld [vmem:[#allocation5 + $0x550] sm:$0xff]  ;;  %v4585_v32 = vld [vmem:[#allocation5 + $0x5c8] sm:$0xff]  ;;  %v4587_v35 = vld [vmem:[#allocation5 + $0x5d8] sm:$0xff] }
 0x71a   :  { %v4586_v3 = vld [vmem:[#allocation5 + $0x5d0] sm:$0xff] }
 0x71b   :  { %7416 = vmatpush1.bf16.msra.mxu0 %v7415_v45  ;;  %7480 = vmatpush1.bf16.msra.mxu1 %v7479_v46  ;;  %v4531_v45 = vld [vmem:[#allocation5 + $0x418] sm:$0xff]  ;;  %v7433_v46 = vpack.c.bf16 %v4537_v5, %v4529_v44  ;;  %v4593_v44 = vld [vmem:[#allocation5 + $0x608] sm:$0xff] }
 0x71c   :  { %7418 = vmatprep.subr.bf16.mxu0 %v7417_v47  ;;  %7482 = vmatprep.subr.bf16.mxu1 %v7481_v48  ;;  %v4539_v47 = vld [vmem:[#allocation5 + $0x458] sm:$0xff]  ;;  %v4528_v48 = vld [vmem:[#allocation5 + $0x400] sm:$0xff]  ;;  %v4601_v5 = vld [vmem:[#allocation5 + $0x648] sm:$0xff] }
 0x71d   :  { %v7497_v61 = vpack.c.bf16 %v4539_v47, %v4531_v45  ;;  %v7435_v49 = vpack.c.bf16 %v4536_v6, %v4528_v48  ;;  %v4595_v45 = vld [vmem:[#allocation5 + $0x618] sm:$0xff]  ;;  %v4592_v48 = vld [vmem:[#allocation5 + $0x600] sm:$0xff] }
 0x71e   :  { %v4603_v47 = vld [vmem:[#allocation5 + $0x658] sm:$0xff]  ;;  %v4600_v6 = vld [vmem:[#allocation5 + $0x640] sm:$0xff] }
 0x71f   :  { %7420 = vmatpush1.bf16.msra.mxu0 %v7419_v50  ;;  %7484 = vmatpush1.bf16.msra.mxu1 %v7483_v59  ;;  %v4530_v50 = vld [vmem:[#allocation5 + $0x410] sm:$0xff] }
 0x720   :  { %7422 = vmatprep.subr.bf16.mxu0 %v7421_v12  ;;  %7486 = vmatprep.subr.bf16.mxu1 %v7485_v4  ;;  %v7499_v59 = vpack.c.bf16 %v4538_v58, %v4530_v50  ;;  %v7437_v12 = vpack.c.bf16 %v4553_v51, %v4545_v60  ;;  %v7501_v4 = vpack.c.bf16 %v4555_v52, %v4547_v0  ;;  %v4594_v50 = vld [vmem:[#allocation5 + $0x610] sm:$0xff]  ;;  %v4609_v60 = vld [vmem:[#allocation5 + $0x688] sm:$0xff]  ;;  %v4611_v0 = vld [vmem:[#allocation5 + $0x698] sm:$0xff] }
 0x721   :  { %v4602_v58 = vld [vmem:[#allocation5 + $0x650] sm:$0xff]  ;;  %v4617_v51 = vld [vmem:[#allocation5 + $0x6c8] sm:$0xff]  ;;  %v4619_v52 = vld [vmem:[#allocation5 + $0x6d8] sm:$0xff] }
 0x723   :  { %7424 = vmatpush1.bf16.msra.mxu0 %v7423_v7  ;;  %7488 = vmatpush1.bf16.msra.mxu1 %v7487_v19  ;;  %v7439_v7 = vpack.c.bf16 %v4552_v2, %v4544_v1  ;;  %v7503_v19 = vpack.c.bf16 %v4554_v9, %v4546_v8  ;;  %v4608_v1 = vld [vmem:[#allocation5 + $0x680] sm:$0xff]  ;;  %v4610_v8 = vld [vmem:[#allocation5 + $0x690] sm:$0xff] }
 0x724   :  { %7426 = vmatprep.subr.bf16.mxu0 %v7425_v30  ;;  %7490 = vmatprep.subr.bf16.mxu1 %v7489_v20  ;;  %v7441_v30 = vpack.c.bf16 %v4569_v10, %v4561_v63  ;;  %v7505_v20 = vpack.c.bf16 %v4571_v11, %v4563_v28  ;;  %v4616_v2 = vld [vmem:[#allocation5 + $0x6c0] sm:$0xff]  ;;  %v4618_v9 = vld [vmem:[#allocation5 + $0x6d0] sm:$0xff]  ;;  %v4633_v10 = vld [vmem:[#allocation5 + $0x748] sm:$0xff] }
 0x725   :  { %v7519_v63 = vpack.c.bf16 %v4618_v9, %v4610_v8  ;;  %v4627_v28 = vld [vmem:[#allocation5 + $0x718] sm:$0xff] }
 0x727   :  { %7428 = vmatpush1.bf16.msra.mxu0 %v7427_v39  ;;  %7492 = vmatpush1.bf16.msra.mxu1 %v7491_v21  ;;  %v7443_v39 = vpack.c.bf16 %v4568_v14, %v4560_v25  ;;  %v7507_v21 = vpack.c.bf16 %v4570_v17, %v4562_v15  ;;  %v4624_v14 = vld [vmem:[#allocation5 + $0x700] sm:$0xff]  ;;  %v4634_v17 = vld [vmem:[#allocation5 + $0x750] sm:$0xff] }
 0x728   :  { %7430 = vmatprep.subr.bf16.mxu0 %v7429_v27  ;;  %7494 = vmatprep.subr.bf16.mxu1 %v7493_v40  ;;  %v7445_v27 = vpack.c.bf16 %v4585_v32, %v4577_v22  ;;  %v7509_v40 = vpack.c.bf16 %v4587_v35, %v4579_v23  ;;  %v4649_v22 = vld [vmem:[#allocation5 + $0x7c8] sm:$0xff]  ;;  %v4651_v35 = vld [vmem:[#allocation5 + $0x7d8] sm:$0xff] }
 0x72b   :  { %7432 = vmatpush1.bf16.msra.mxu0 %v7431_v41  ;;  %7496 = vmatpush1.bf16.msra.mxu1 %v7495_v24  ;;  %v7447_v41 = vpack.c.bf16 %v4584_v37, %v4576_v36  ;;  %v7511_v24 = vpack.c.bf16 %v4586_v3, %v4578_v31  ;;  %v4640_v36 = vld [vmem:[#allocation5 + $0x780] sm:$0xff]  ;;  %v4650_v31 = vld [vmem:[#allocation5 + $0x7d0] sm:$0xff] }
 0x72c   :  { %7434 = vmatprep.subr.bf16.mxu0 %v7433_v46  ;;  %7498 = vmatprep.subr.bf16.mxu1 %v7497_v61  ;;  %v7449_v46 = vpack.c.bf16 %v4601_v5, %v4593_v44  ;;  %v7513_v61 = vpack.c.bf16 %v4603_v47, %v4595_v45  ;;  %v4405_v44 = vld [vmem:[#allocation5 + $0x28] sm:$0xff]  ;;  %v4407_v45 = vld [vmem:[#allocation5 + $0x38] sm:$0xff] }
 0x72d   :  { %v4413_v5 = vld [vmem:[#allocation5 + $0x68] sm:$0xff]  ;;  %v4415_v47 = vld [vmem:[#allocation5 + $0x78] sm:$0xff] }
 0x72f   :  { %7436 = vmatpush1.bf16.msra.mxu0 %v7435_v49  ;;  %7500 = vmatpush1.bf16.msra.mxu1 %v7499_v59  ;;  %v7451_v49 = vpack.c.bf16 %v4600_v6, %v4592_v48  ;;  %v7515_v59 = vpack.c.bf16 %v4602_v58, %v4594_v50  ;;  %v7593_v48 = vpack.c.bf16 %v4415_v47, %v4407_v45  ;;  %v4404_v47 = vld [vmem:[#allocation5 + $0x20] sm:$0xff] }
 0x730   :  { %7438 = vmatprep.subr.bf16.mxu0 %v7437_v12  ;;  %7502 = vmatprep.subr.bf16.mxu1 %v7501_v4  ;;  %v7453_v12 = vpack.c.bf16 %v4617_v51, %v4609_v60  ;;  %v7517_v4 = vpack.c.bf16 %v4619_v52, %v4611_v0  ;;  %v620_v6 = vadd.f32 %v8627_v42, %v8606_v13 }
 0x733   :  { %7440 = vmatpush1.bf16.msra.mxu0 %v7439_v7  ;;  %7504 = vmatpush1.bf16.msra.mxu1 %v7503_v19  ;;  %v7455_v7 = vpack.c.bf16 %v4616_v2, %v4608_v1  ;;  %v4625_v19 = vld [vmem:[#allocation5 + $0x708] sm:$0xff] }
 0x734   :  { %7442 = vmatprep.subr.bf16.mxu0 %v7441_v30  ;;  %7506 = vmatprep.subr.bf16.mxu1 %v7505_v20  ;;  %v4635_v30 = vld [vmem:[#allocation5 + $0x758] sm:$0xff]  ;;  %v7457_v11 = vpack.c.bf16 %v4633_v10, %v4625_v19  ;;  %v4632_v20 = vld [vmem:[#allocation5 + $0x740] sm:$0xff] }
 0x735   :  { %v7521_v25 = vpack.c.bf16 %v4635_v30, %v4627_v28  ;;  %v7459_v15 = vpack.c.bf16 %v4632_v20, %v4624_v14 }
 0x737   :  { %7444 = vmatpush1.bf16.msra.mxu0 %v7443_v39  ;;  %7508 = vmatpush1.bf16.msra.mxu1 %v7507_v21  ;;  %v4626_v39 = vld [vmem:[#allocation5 + $0x710] sm:$0xff]  ;;  %v4641_v21 = vld [vmem:[#allocation5 + $0x788] sm:$0xff] }
 0x738   :  { %7446 = vmatprep.subr.bf16.mxu0 %v7445_v27  ;;  %7510 = vmatprep.subr.bf16.mxu1 %v7509_v40  ;;  %v7523_v32 = vpack.c.bf16 %v4634_v17, %v4626_v39  ;;  %v7461_v23 = vpack.c.bf16 %v4649_v22, %v4641_v21  ;;  %v4643_v27 = vld [vmem:[#allocation5 + $0x798] sm:$0xff]  ;;  %v4648_v40 = vld [vmem:[#allocation5 + $0x7c0] sm:$0xff] }
 0x739   :  { %v7525_v37 = vpack.c.bf16 %v4651_v35, %v4643_v27  ;;  %v7463_v3 = vpack.c.bf16 %v4648_v40, %v4640_v36 }
 0x73b   :  { %7448 = vmatpush1.bf16.msra.mxu0 %v7447_v41  ;;  %7512 = vmatpush1.bf16.msra.mxu1 %v7511_v24  ;;  %v4642_v41 = vld [vmem:[#allocation5 + $0x790] sm:$0xff] }
 0x73c   :  { %7450 = vmatprep.subr.bf16.mxu0 %v7449_v46  ;;  %7514 = vmatprep.subr.bf16.mxu1 %v7513_v61  ;;  %v7527_v24 = vpack.c.bf16 %v4650_v31, %v4642_v41  ;;  %v7529_v46 = vpack.c.bf16 %v4413_v5, %v4405_v44  ;;  %v621_v61 = vadd.f32 %v8629_v43, %v8608_v53 }
 0x73f   :  { %7452 = vmatpush1.bf16.msra.mxu0 %v7451_v49  ;;  %7516 = vmatpush1.bf16.msra.mxu1 %v7515_v59 }
 0x740   :  { %7454 = vmatprep.subr.bf16.mxu0 %v7453_v12  ;;  %7518 = vmatprep.subr.bf16.mxu1 %v7517_v4 }
 0x743   :  { %7456 = vmatpush1.bf16.msra.mxu0 %v7455_v7  ;;  %7520 = vmatpush1.bf16.msra.mxu1 %v7519_v63 }
 0x744   :  { %7458 = vmatprep.subr.bf16.mxu0 %v7457_v11  ;;  %7522 = vmatprep.subr.bf16.mxu1 %v7521_v25 }
 0x747   :  { %7460 = vmatpush1.bf16.msra.mxu0 %v7459_v15  ;;  %7524 = vmatpush1.bf16.msra.mxu1 %v7523_v32 }
 0x748   :  { %7462 = vmatprep.subr.bf16.mxu0 %v7461_v23  ;;  %7526 = vmatprep.subr.bf16.mxu1 %v7525_v37 }
 0x74b   :  { %7464 = vmatpush1.bf16.msra.mxu0 %v7463_v3  ;;  %7528 = vmatpush1.bf16.msra.mxu1 %v7527_v24 }
 0x74c   :  { %7530 = vmatprep.subr.bf16.mxu0 %v7529_v46  ;;  %7594 = vmatprep.subr.bf16.mxu1 %v7593_v48 }
 0x7a1   :  { %v4109_v49 = vpop.f32.mrb[26].mxu0  ;;  %v4180_v50 = vpop.f32.mrb[18].mxu1 }
 0x7a2   :  { %v4327_v58 = vadd.f32 %v4109_v49, %v620_v6  ;;  %v7981_v59 = vadd.f32 %v4180_v50, %v8621_v33  ;;  %v4111_v60 = vpop.f32.mrb[27].mxu0  ;;  %v4182_v51 = vpop.f32.mrb[19].mxu1  ;;  %v4412_v6 = vld [vmem:[#allocation5 + $0x60] sm:$0xff]  ;;  %v4421_v50 = vld [vmem:[#allocation5 + $0xa8] sm:$0xff] }
 0x7a3   :  { %v4328_v0 = vadd.f32 %v4111_v60, %v621_v61  ;;  %v7982_v12 = vadd.f32 %v4182_v51, %v8623_v34  ;;  %v4406_v61 = vld [vmem:[#allocation5 + $0x30] sm:$0xff]  ;;  %v4423_v60 = vld [vmem:[#allocation5 + $0xb8] sm:$0xff] }
 0x7a4   :  { %v5795_v52 = vmul.f32 -1.442695, %v7981_v59  ;;  %v4429_v59 = vld [vmem:[#allocation5 + $0xe8] sm:$0xff] }
 0x7a5   :  { %v5796_v1 = vmul.f32 -1.442695, %v7982_v12  ;;  %v7531_v12 = vpack.c.bf16 %v4412_v6, %v4404_v47  ;;  %v4468_v6 = vld [vmem:[#allocation5 + $0x220] sm:$0xff] }
 0x7a6   :  { %8239 = vpow2.f32 %v5795_v52 }
 0x7a7   :  { %8241 = vpow2.f32 %v5796_v1  ;;  %v4420_v1 = vld [vmem:[#allocation5 + $0xa0] sm:$0xff] }
 0x7a8   :  { %8243 = vtanh.f32 %v4327_v58 }
 0x7a9   :  { %8245 = vtanh.f32 %v4328_v0 }
 0x7b0   :  { %v8240_v2 = vpop.eup %8239 }
 0x7b1   :  { %v8242_v4 = vpop.eup %8241  ;;  %v4343_v13 = vadd.f32 1.0, %v8240_v2  ;;  %v4428_v2 = vld [vmem:[#allocation5 + $0xe0] sm:$0xff] }
 0x7b2   :  { %v4344_v53 = vadd.f32 1.0, %v8242_v4  ;;  %v8244_v7 = vpop.eup %8243 }
 0x7b3   :  { %8247 = vrcp.f32 %v4343_v13  ;;  %v8246_v8 = vpop.eup %8245  ;;  %v4422_v13 = vld [vmem:[#allocation5 + $0xb0] sm:$0xff] }
 0x7b4   :  { %8249 = vrcp.f32 %v4344_v53  ;;  %v4430_v53 = vld [vmem:[#allocation5 + $0xf0] sm:$0xff] }
 0x7bd   :  { %v8248_v9 = vpop.eup %8247 }
 0x7be   :  { %v8250_v19 = vpop.eup %8249  ;;  %v4377_v63 = vmul.f32 %v8248_v9, %v8244_v7  ;;  %v4437_v7 = vld [vmem:[#allocation5 + $0x128] sm:$0xff] }
 0x7bf   :  { %v4378_v10 = vmul.f32 %v8250_v19, %v8246_v8  ;;  %v7533_v8 = vpack.c.bf16 %v4429_v59, %v4421_v50  ;;  %v4445_v19 = vld [vmem:[#allocation5 + $0x168] sm:$0xff]  ;;  %v4470_v50 = vld [vmem:[#allocation5 + $0x230] sm:$0xff] }
 0x7c0   :  { %v4485_v59 = vld [vmem:[#allocation5 + $0x2a8] sm:$0xff] }
 0x7e1   :  { %v4251_v28 = vpop.f32.mrb[18].mxu0  ;;  %v4322_v30 = vpop.f32.mrb[34].mxu1 }
 0x7e2   :  { %v7997_v11 = vadd.f32 %v4251_v28, %v8633_v62  ;;  %v4253_v25 = vpop.f32.mrb[19].mxu0  ;;  %v4324_v14 = vpop.f32.mrb[35].mxu1  ;;  %v8013_v21 = vadd.f32 %v4322_v30, %v8639_v16  ;;  %v7535_v28 = vpack.c.bf16 %v4428_v2, %v4420_v1  ;;  %v7599_v30 = vpack.c.bf16 %v4430_v53, %v4422_v13  ;;  %v4492_v1 = vld [vmem:[#allocation5 + $0x2e0] sm:$0xff]  ;;  %v4486_v53 = vld [vmem:[#allocation5 + $0x2b0] sm:$0xff] }
 0x7e3   :  { %v7998_v20 = vadd.f32 %v4253_v25, %v8635_v26  ;;  %v8014_v17 = vadd.f32 %v4324_v14, %v8641_v18  ;;  %v4444_v25 = vld [vmem:[#allocation5 + $0x160] sm:$0xff]  ;;  %v7537_v14 = vpack.c.bf16 %v4445_v19, %v4437_v7  ;;  %v4494_v7 = vld [vmem:[#allocation5 + $0x2f0] sm:$0xff]  ;;  %v4503_v19 = vld [vmem:[#allocation5 + $0x338] sm:$0xff] }
 0x7e4   :  { %v5797_v39 = vmul.f32 -1.442695, %v7997_v11  ;;  %v5799_v23 = vmul.f32 -1.442695, %v8013_v21  ;;  %v4436_v11 = vld [vmem:[#allocation5 + $0x120] sm:$0xff]  ;;  %v4461_v21 = vld [vmem:[#allocation5 + $0x1e8] sm:$0xff] }
 0x7e5   :  { %v5798_v15 = vmul.f32 -1.442695, %v7998_v20  ;;  %v5800_v22 = vmul.f32 -1.442695, %v8014_v17  ;;  %v4453_v17 = vld [vmem:[#allocation5 + $0x1a8] sm:$0xff] }
 0x7e6   :  { %8251 = vpow2.f32 %v5797_v39  ;;  %v4438_v39 = vld [vmem:[#allocation5 + $0x130] sm:$0xff] }
 0x7e7   :  { %8253 = vpow2.f32 %v5798_v15  ;;  %v4446_v15 = vld [vmem:[#allocation5 + $0x170] sm:$0xff] }
 0x7e8   :  { %8255 = vpow2.f32 %v5800_v22  ;;  %v4455_v22 = vld [vmem:[#allocation5 + $0x1b8] sm:$0xff] }
 0x7f0   :  { %v8252_v32 = vpop.eup %8251 }
 0x7f1   :  { %v4355_v27 = vadd.f32 1.0, %v8252_v32  ;;  %v8254_v35 = vpop.eup %8253  ;;  %v4463_v32 = vld [vmem:[#allocation5 + $0x1f8] sm:$0xff] }
 0x7f2   :  { %v4356_v36 = vadd.f32 1.0, %v8254_v35  ;;  %v8256_v37 = vpop.eup %8255  ;;  %v4452_v35 = vld [vmem:[#allocation5 + $0x1a0] sm:$0xff] }
 0x7f3   :  { %8257 = vrcp.f32 %v4355_v27  ;;  %v4368_v3 = vadd.f32 1.0, %v8256_v37  ;;  %v7603_v27 = vpack.c.bf16 %v4446_v15, %v4438_v39  ;;  %v7541_v37 = vpack.c.bf16 %v4461_v21, %v4453_v17  ;;  %v4510_v39 = vld [vmem:[#allocation5 + $0x370] sm:$0xff]  ;;  %v4517_v15 = vld [vmem:[#allocation5 + $0x3a8] sm:$0xff]  ;;  %v4519_v21 = vld [vmem:[#allocation5 + $0x3b8] sm:$0xff] }
 0x7f4   :  { %8259 = vpow2.f32 %v5799_v23  ;;  %v7539_v23 = vpack.c.bf16 %v4444_v25, %v4436_v11  ;;  %v4508_v11 = vld [vmem:[#allocation5 + $0x360] sm:$0xff]  ;;  %v4525_v17 = vld [vmem:[#allocation5 + $0x3e8] sm:$0xff] }
 0x7f5   :  { %8261 = vrcp.f32 %v4356_v36  ;;  %v4460_v36 = vld [vmem:[#allocation5 + $0x1e0] sm:$0xff] }
 0x7f6   :  { %8263 = vrcp.f32 %v4368_v3  ;;  %v4469_v3 = vld [vmem:[#allocation5 + $0x228] sm:$0xff]  ;;  %v7543_v47 = vpack.c.bf16 %v4460_v36, %v4452_v35  ;;  %v4524_v35 = vld [vmem:[#allocation5 + $0x3e0] sm:$0xff]  ;;  %v7557_v36 = vpack.c.bf16 %v4525_v17, %v4517_v15  ;;  %v4583_v17 = vld [vmem:[#allocation5 + $0x5b8] sm:$0xff] }
 0x7f7   :  { %v4589_v15 = vld [vmem:[#allocation5 + $0x5e8] sm:$0xff] }
 0x7fd   :  { %v8258_v40 = vpop.eup %8257 }
 0x7fe   :  { %v8260_v41 = vpop.eup %8259  ;;  %v4375_v31 = vmul.f32 %v8258_v40, %v8734_v38  ;;  %v4414_v38 = vld [vmem:[#allocation5 + $0x70] sm:$0xff]  ;;  %v7605_v40 = vpack.c.bf16 %v4463_v32, %v4455_v22  ;;  %v4527_v22 = vld [vmem:[#allocation5 + $0x3f8] sm:$0xff] }
 0x7ff   :  { %v8262_v24 = vpop.eup %8261  ;;  %v4367_v45 = vadd.f32 1.0, %v8260_v41  ;;  %v7595_v52 = vpack.c.bf16 %v4414_v38, %v4406_v61  ;;  %v4454_v41 = vld [vmem:[#allocation5 + $0x1b0] sm:$0xff]  ;;  %v4476_v61 = vld [vmem:[#allocation5 + $0x260] sm:$0xff] }
 0x800   :  { %v8758_v44 = vadd.f32 %v4377_v63, %v4375_v31  ;;  %v4376_v5 = vmul.f32 %v8262_v24, %v8737_v29  ;;  %v8264_v48 = vpop.eup %8263  ;;  %v4431_v29 = vld [vmem:[#allocation5 + $0xf8] sm:$0xff]  ;;  %v4462_v31 = vld [vmem:[#allocation5 + $0x1f0] sm:$0xff]  ;;  %v4477_v24 = vld [vmem:[#allocation5 + $0x268] sm:$0xff] }
 0x801   :  { %v7597_v9 = vpack.c.bf16 %v4431_v29, %v4423_v60  ;;  %v4439_v63 = vld [vmem:[#allocation5 + $0x138] sm:$0xff]  ;;  %v7545_v38 = vpack.c.bf16 %v4477_v24, %v4469_v3  ;;  %v4493_v60 = vld [vmem:[#allocation5 + $0x2e8] sm:$0xff] }
 0x802   :  { %v8761_v46 = vadd.f32 %v4378_v10, %v4376_v5  ;;  %8265 = vtanh.f32 %v8758_v44  ;;  %v4447_v10 = vld [vmem:[#allocation5 + $0x178] sm:$0xff]  ;;  %v7549_v2 = vpack.c.bf16 %v4493_v60, %v4485_v59  ;;  %v4541_v3 = vld [vmem:[#allocation5 + $0x468] sm:$0xff] }
 0x803   :  { %v7601_v20 = vpack.c.bf16 %v4447_v10, %v4439_v63  ;;  %v4471_v5 = vld [vmem:[#allocation5 + $0x238] sm:$0xff]  ;;  %v4557_v59 = vld [vmem:[#allocation5 + $0x4e8] sm:$0xff] }
 0x804   :  { %8267 = vtanh.f32 %v8761_v46  ;;  %v4487_v29 = vld [vmem:[#allocation5 + $0x2b8] sm:$0xff] }
 0x805   :  { %8269 = vrcp.f32 %v4367_v45  ;;  %v4479_v45 = vld [vmem:[#allocation5 + $0x278] sm:$0xff] }
 0x806   :  { %v4511_v63 = vld [vmem:[#allocation5 + $0x378] sm:$0xff] }
 0x807   :  { %v4535_v24 = vld [vmem:[#allocation5 + $0x438] sm:$0xff] }
 0x808   :  { %v4551_v60 = vld [vmem:[#allocation5 + $0x4b8] sm:$0xff] }
 0x80c   :  { %v8266_v49 = vpop.eup %8265 }
 0x80e   :  { %v8268_v58 = vpop.eup %8267 }
 0x80f   :  { %v8270_v51 = vpop.eup %8269  ;;  %v4386_v0 = vmul.f32 %v8268_v58, %v8264_v48  ;;  %v7607_v48 = vpack.c.bf16 %v4462_v31, %v4454_v41  ;;  %v4478_v58 = vld [vmem:[#allocation5 + $0x270] sm:$0xff]  ;;  %v4533_v31 = vld [vmem:[#allocation5 + $0x428] sm:$0xff] }
 0x810   :  { %v8765_v4 = vmul.f32 %v8270_v51, %v8266_v49  ;;  %v7609_v49 = vpack.c.bf16 %v4479_v45, %v4471_v5  ;;  %v4495_v51 = vld [vmem:[#allocation5 + $0x2f8] sm:$0xff]  ;;  %v4526_v41 = vld [vmem:[#allocation5 + $0x3f0] sm:$0xff] }
 0x811   :  { %4720 = vmatprep.mubr.f32.mxu0 %v4386_v0  ;;  %4791 = vmatprep.mubr.f32.mxu1 %v4386_v0  ;;  %v7613_v13 = vpack.c.bf16 %v4495_v51, %v4487_v29  ;;  %v4543_v5 = vld [vmem:[#allocation5 + $0x478] sm:$0xff] }
 0x812   :  { %4721 = vmatmul.mubr.f32.vlgmr.msra.gmra.mrb[28].mxu0 %v8765_v4  ;;  %4792 = vmatmul.mubr.f32.vlgmr.msra.gmra.mrb[20].mxu1 %v8765_v4  ;;  %v4559_v29 = vld [vmem:[#allocation5 + $0x4f8] sm:$0xff] }
 0x813   :  { %7532 = vmatpush1.bf16.msra.mxu0 %v7531_v12  ;;  %7596 = vmatpush1.bf16.msra.mxu1 %v7595_v52  ;;  %v7611_v12 = vpack.c.bf16 %v4478_v58, %v4470_v50  ;;  %v4484_v52 = vld [vmem:[#allocation5 + $0x2a0] sm:$0xff]  ;;  %v4542_v50 = vld [vmem:[#allocation5 + $0x470] sm:$0xff]  ;;  %v4549_v58 = vld [vmem:[#allocation5 + $0x4a8] sm:$0xff] }
 0x814   :  { %4862 = vmatprep.mubr.f32.mxu0 %v4386_v0  ;;  %4933 = vmatprep.mubr.f32.mxu1 %v4386_v0  ;;  %v7547_v0 = vpack.c.bf16 %v4476_v61, %v4468_v6  ;;  %v7551_v10 = vpack.c.bf16 %v4492_v1, %v4484_v52  ;;  %v4540_v6 = vld [vmem:[#allocation5 + $0x460] sm:$0xff]  ;;  %v7561_v61 = vpack.c.bf16 %v4541_v3, %v4533_v31  ;;  %v4605_v31 = vld [vmem:[#allocation5 + $0x668] sm:$0xff]  ;;  %v4599_v3 = vld [vmem:[#allocation5 + $0x638] sm:$0xff] }
 0x815   :  { %7534 = vmatprep.subr.bf16.mxu0 %v7533_v8  ;;  %7598 = vmatprep.subr.bf16.mxu1 %v7597_v9  ;;  %v4501_v8 = vld [vmem:[#allocation5 + $0x328] sm:$0xff]  ;;  %v4556_v52 = vld [vmem:[#allocation5 + $0x4e0] sm:$0xff]  ;;  %v7565_v1 = vpack.c.bf16 %v4557_v59, %v4549_v58  ;;  %v4615_v59 = vld [vmem:[#allocation5 + $0x6b8] sm:$0xff] }
 0x816   :  { %v4509_v9 = vld [vmem:[#allocation5 + $0x368] sm:$0xff] }
 0x817   :  { %7536 = vmatpush1.bf16.msra.mxu0 %v7535_v28  ;;  %7600 = vmatpush1.bf16.msra.mxu1 %v7599_v30  ;;  %v7615_v28 = vpack.c.bf16 %v4494_v7, %v4486_v53  ;;  %v4500_v30 = vld [vmem:[#allocation5 + $0x320] sm:$0xff]  ;;  %v7553_v25 = vpack.c.bf16 %v4509_v9, %v4501_v8  ;;  %v4558_v53 = vld [vmem:[#allocation5 + $0x4f0] sm:$0xff]  ;;  %v4565_v7 = vld [vmem:[#allocation5 + $0x528] sm:$0xff] }
 0x818   :  { %7538 = vmatprep.subr.bf16.mxu0 %v7537_v14  ;;  %7602 = vmatprep.subr.bf16.mxu1 %v7601_v20  ;;  %v7617_v14 = vpack.c.bf16 %v4511_v63, %v4503_v19  ;;  %v4502_v20 = vld [vmem:[#allocation5 + $0x330] sm:$0xff]  ;;  %v7555_v32 = vpack.c.bf16 %v4508_v11, %v4500_v30  ;;  %v4573_v8 = vld [vmem:[#allocation5 + $0x568] sm:$0xff]  ;;  %v4567_v9 = vld [vmem:[#allocation5 + $0x538] sm:$0xff] }
 0x819   :  { %v4575_v19 = vld [vmem:[#allocation5 + $0x578] sm:$0xff]  ;;  %v4572_v30 = vld [vmem:[#allocation5 + $0x560] sm:$0xff]  ;;  %v7569_v11 = vpack.c.bf16 %v4573_v8, %v4565_v7  ;;  %v4621_v58 = vld [vmem:[#allocation5 + $0x6e8] sm:$0xff] }
 0x81a   :  { %v4637_v7 = vld [vmem:[#allocation5 + $0x768] sm:$0xff]  ;;  %v4631_v8 = vld [vmem:[#allocation5 + $0x738] sm:$0xff] }
 0x81b   :  { %7540 = vmatpush1.bf16.msra.mxu0 %v7539_v23  ;;  %7604 = vmatpush1.bf16.msra.mxu1 %v7603_v27  ;;  %v7619_v23 = vpack.c.bf16 %v4510_v39, %v4502_v20  ;;  %v4516_v27 = vld [vmem:[#allocation5 + $0x3a0] sm:$0xff]  ;;  %v4574_v20 = vld [vmem:[#allocation5 + $0x570] sm:$0xff]  ;;  %v4581_v39 = vld [vmem:[#allocation5 + $0x5a8] sm:$0xff] }
 0x81c   :  { %7542 = vmatprep.subr.bf16.mxu0 %v7541_v37  ;;  %7606 = vmatprep.subr.bf16.mxu1 %v7605_v40  ;;  %v7621_v37 = vpack.c.bf16 %v4527_v22, %v4519_v21  ;;  %v4518_v40 = vld [vmem:[#allocation5 + $0x3b0] sm:$0xff]  ;;  %v7559_v45 = vpack.c.bf16 %v4524_v35, %v4516_v27  ;;  %v4591_v21 = vld [vmem:[#allocation5 + $0x5f8] sm:$0xff]  ;;  %v4588_v27 = vld [vmem:[#allocation5 + $0x5e0] sm:$0xff]  ;;  %v7573_v35 = vpack.c.bf16 %v4589_v15, %v4581_v39 }
 0x81d   :  { %v4653_v39 = vld [vmem:[#allocation5 + $0x7e8] sm:$0xff]  ;;  %v4647_v15 = vld [vmem:[#allocation5 + $0x7b8] sm:$0xff] }
 0x81f   :  { %7544 = vmatpush1.bf16.msra.mxu0 %v7543_v47  ;;  %7608 = vmatpush1.bf16.msra.mxu1 %v7607_v48  ;;  %v7623_v47 = vpack.c.bf16 %v4526_v41, %v4518_v40  ;;  %v4532_v48 = vld [vmem:[#allocation5 + $0x420] sm:$0xff]  ;;  %v4590_v40 = vld [vmem:[#allocation5 + $0x5f0] sm:$0xff]  ;;  %v4597_v41 = vld [vmem:[#allocation5 + $0x628] sm:$0xff] }
 0x820   :  { %7546 = vmatprep.subr.bf16.mxu0 %v7545_v38  ;;  %7610 = vmatprep.subr.bf16.mxu1 %v7609_v49  ;;  %v7625_v38 = vpack.c.bf16 %v4543_v5, %v4535_v24  ;;  %v4534_v49 = vld [vmem:[#allocation5 + $0x430] sm:$0xff]  ;;  %v7563_v51 = vpack.c.bf16 %v4540_v6, %v4532_v48  ;;  %v4607_v24 = vld [vmem:[#allocation5 + $0x678] sm:$0xff]  ;;  %v4604_v48 = vld [vmem:[#allocation5 + $0x660] sm:$0xff]  ;;  %v7577_v6 = vpack.c.bf16 %v4605_v31, %v4597_v41 }
 0x821   :  { %v5014_v31 = vld [vmem:[#allocation5 + $0x8] sm:$0xff] }
 0x823   :  { %7548 = vmatpush1.bf16.msra.mxu0 %v7547_v0  ;;  %7612 = vmatpush1.bf16.msra.mxu1 %v7611_v12  ;;  %v7627_v0 = vpack.c.bf16 %v4542_v50, %v4534_v49  ;;  %v4548_v12 = vld [vmem:[#allocation5 + $0x4a0] sm:$0xff]  ;;  %v4606_v49 = vld [vmem:[#allocation5 + $0x670] sm:$0xff]  ;;  %v4613_v50 = vld [vmem:[#allocation5 + $0x6a8] sm:$0xff] }
 0x824   :  { %7550 = vmatprep.subr.bf16.mxu0 %v7549_v2  ;;  %7614 = vmatprep.subr.bf16.mxu1 %v7613_v13  ;;  %v7629_v2 = vpack.c.bf16 %v4559_v29, %v4551_v60  ;;  %v4550_v13 = vld [vmem:[#allocation5 + $0x4b0] sm:$0xff]  ;;  %v7567_v63 = vpack.c.bf16 %v4556_v52, %v4548_v12  ;;  %v4623_v60 = vld [vmem:[#allocation5 + $0x6f8] sm:$0xff]  ;;  %v4620_v12 = vld [vmem:[#allocation5 + $0x6e0] sm:$0xff]  ;;  %v7581_v52 = vpack.c.bf16 %v4621_v58, %v4613_v50 }
 0x825   :  { %v5030_v50 = vld [vmem:[#allocation5 + $0x88] sm:$0xff] }
 0x827   :  { %7552 = vmatpush1.bf16.msra.mxu0 %v7551_v10  ;;  %7616 = vmatpush1.bf16.msra.mxu1 %v7615_v28  ;;  %v7631_v10 = vpack.c.bf16 %v4558_v53, %v4550_v13  ;;  %v4564_v28 = vld [vmem:[#allocation5 + $0x520] sm:$0xff]  ;;  %v4622_v13 = vld [vmem:[#allocation5 + $0x6f0] sm:$0xff]  ;;  %v4629_v53 = vld [vmem:[#allocation5 + $0x728] sm:$0xff] }
 0x828   :  { %7554 = vmatprep.subr.bf16.mxu0 %v7553_v25  ;;  %7618 = vmatprep.subr.bf16.mxu1 %v7617_v14  ;;  %v7633_v25 = vpack.c.bf16 %v4575_v19, %v4567_v9  ;;  %v4566_v14 = vld [vmem:[#allocation5 + $0x530] sm:$0xff]  ;;  %v7571_v22 = vpack.c.bf16 %v4572_v30, %v4564_v28  ;;  %v4639_v9 = vld [vmem:[#allocation5 + $0x778] sm:$0xff]  ;;  %v4636_v28 = vld [vmem:[#allocation5 + $0x760] sm:$0xff]  ;;  %v7585_v30 = vpack.c.bf16 %v4637_v7, %v4629_v53 }
 0x829   :  { %v5054_v53 = vld [vmem:[#allocation5 + $0x148] sm:$0xff] }
 0x82b   :  { %7556 = vmatpush1.bf16.msra.mxu0 %v7555_v32  ;;  %7620 = vmatpush1.bf16.msra.mxu1 %v7619_v23  ;;  %v7635_v32 = vpack.c.bf16 %v4574_v20, %v4566_v14  ;;  %v4580_v23 = vld [vmem:[#allocation5 + $0x5a0] sm:$0xff]  ;;  %v4638_v14 = vld [vmem:[#allocation5 + $0x770] sm:$0xff]  ;;  %v4645_v20 = vld [vmem:[#allocation5 + $0x7a8] sm:$0xff] }
 0x82c   :  { %7558 = vmatprep.subr.bf16.mxu0 %v7557_v36  ;;  %7622 = vmatprep.subr.bf16.mxu1 %v7621_v37  ;;  %v7637_v36 = vpack.c.bf16 %v4591_v21, %v4583_v17  ;;  %v4582_v37 = vld [vmem:[#allocation5 + $0x5b0] sm:$0xff]  ;;  %v7575_v5 = vpack.c.bf16 %v4588_v27, %v4580_v23  ;;  %v4655_v17 = vld [vmem:[#allocation5 + $0x7f8] sm:$0xff]  ;;  %v7589_v23 = vpack.c.bf16 %v4653_v39, %v4645_v20  ;;  %v5070_v20 = vld [vmem:[#allocation5 + $0x1c8] sm:$0xff] }
 0x82d   :  { %v7653_v27 = vpack.c.bf16 %v4655_v17, %v4647_v15  ;;  %v5064_v39 = vld [vmem:[#allocation5 + $0x198] sm:$0xff] }
 0x82f   :  { %7560 = vmatpush1.bf16.msra.mxu0 %v7559_v45  ;;  %7624 = vmatpush1.bf16.msra.mxu1 %v7623_v47  ;;  %v7639_v45 = vpack.c.bf16 %v4590_v40, %v4582_v37  ;;  %v4596_v47 = vld [vmem:[#allocation5 + $0x620] sm:$0xff]  ;;  %v4654_v37 = vld [vmem:[#allocation5 + $0x7f0] sm:$0xff] }
 0x830   :  { %7562 = vmatprep.subr.bf16.mxu0 %v7561_v61  ;;  %7626 = vmatprep.subr.bf16.mxu1 %v7625_v38  ;;  %v7641_v61 = vpack.c.bf16 %v4607_v24, %v4599_v3  ;;  %v4598_v38 = vld [vmem:[#allocation5 + $0x630] sm:$0xff]  ;;  %v7579_v29 = vpack.c.bf16 %v4604_v48, %v4596_v47  ;;  %v5022_v3 = vld [vmem:[#allocation5 + $0x48] sm:$0xff]  ;;  %v5016_v24 = vld [vmem:[#allocation5 + $0x18] sm:$0xff] }
 0x831   :  { %v5013_v47 = vld [vmem:[#allocation5] sm:$0xff] }
 0x832   :  { %v5021_v48 = vld [vmem:[#allocation5 + $0x40] sm:$0xff] }
 0x833   :  { %7564 = vmatpush1.bf16.msra.mxu0 %v7563_v51  ;;  %7628 = vmatpush1.bf16.msra.mxu1 %v7627_v0  ;;  %v7643_v51 = vpack.c.bf16 %v4606_v49, %v4598_v38  ;;  %v4612_v0 = vld [vmem:[#allocation5 + $0x6a0] sm:$0xff]  ;;  %v5015_v38 = vld [vmem:[#allocation5 + $0x10] sm:$0xff] }
 0x834   :  { %7566 = vmatprep.subr.bf16.mxu0 %v7565_v1  ;;  %7630 = vmatprep.subr.bf16.mxu1 %v7629_v2  ;;  %v7645_v1 = vpack.c.bf16 %v4623_v60, %v4615_v59  ;;  %v4614_v2 = vld [vmem:[#allocation5 + $0x6b0] sm:$0xff]  ;;  %v7583_v19 = vpack.c.bf16 %v4620_v12, %v4612_v0  ;;  %v5038_v59 = vld [vmem:[#allocation5 + $0xc8] sm:$0xff]  ;;  %v5032_v60 = vld [vmem:[#allocation5 + $0x98] sm:$0xff] }
 0x835   :  { %v5023_v49 = vld [vmem:[#allocation5 + $0x50] sm:$0xff]  ;;  %v5029_v0 = vld [vmem:[#allocation5 + $0x80] sm:$0xff] }
 0x836   :  { %v7723_v58 = vpack.c.bf16 %v5023_v49, %v5015_v38  ;;  %v5037_v12 = vld [vmem:[#allocation5 + $0xc0] sm:$0xff]  ;;  %v5094_v49 = vld [vmem:[#allocation5 + $0x288] sm:$0xff] }
 0x837   :  { %7568 = vmatpush1.bf16.msra.mxu0 %v7567_v63  ;;  %7632 = vmatpush1.bf16.msra.mxu1 %v7631_v10  ;;  %v7647_v63 = vpack.c.bf16 %v4622_v13, %v4614_v2  ;;  %v4628_v10 = vld [vmem:[#allocation5 + $0x720] sm:$0xff]  ;;  %v5039_v2 = vld [vmem:[#allocation5 + $0xd0] sm:$0xff]  ;;  %v5046_v13 = vld [vmem:[#allocation5 + $0x108] sm:$0xff] }
 0x838   :  { %7570 = vmatprep.subr.bf16.mxu0 %v7569_v11  ;;  %7634 = vmatprep.subr.bf16.mxu1 %v7633_v25  ;;  %v7649_v11 = vpack.c.bf16 %v4639_v9, %v4631_v8  ;;  %v4630_v25 = vld [vmem:[#allocation5 + $0x730] sm:$0xff]  ;;  %v7587_v21 = vpack.c.bf16 %v4636_v28, %v4628_v10  ;;  %v7665_v8 = vpack.c.bf16 %v5054_v53, %v5046_v13  ;;  %v5048_v9 = vld [vmem:[#allocation5 + $0x118] sm:$0xff]  ;;  %v5053_v28 = vld [vmem:[#allocation5 + $0x140] sm:$0xff] }
 0x839   :  { %v5118_v13 = vld [vmem:[#allocation5 + $0x348] sm:$0xff]  ;;  %v5112_v53 = vld [vmem:[#allocation5 + $0x318] sm:$0xff] }
 0x83b   :  { %7572 = vmatpush1.bf16.msra.mxu0 %v7571_v22  ;;  %7636 = vmatpush1.bf16.msra.mxu1 %v7635_v32  ;;  %v7651_v22 = vpack.c.bf16 %v4638_v14, %v4630_v25  ;;  %v4644_v32 = vld [vmem:[#allocation5 + $0x7a0] sm:$0xff]  ;;  %v5062_v14 = vld [vmem:[#allocation5 + $0x188] sm:$0xff] }
 0x83c   :  { %7574 = vmatprep.subr.bf16.mxu0 %v7573_v35  ;;  %7638 = vmatprep.subr.bf16.mxu1 %v7637_v36  ;;  %v4652_v35 = vld [vmem:[#allocation5 + $0x7e0] sm:$0xff]  ;;  %v4646_v36 = vld [vmem:[#allocation5 + $0x7b0] sm:$0xff]  ;;  %v7669_v17 = vpack.c.bf16 %v5070_v20, %v5062_v14  ;;  %v5134_v14 = vld [vmem:[#allocation5 + $0x3c8] sm:$0xff] }
 0x83d   :  { %v7591_v40 = vpack.c.bf16 %v4652_v35, %v4644_v32  ;;  %v7655_v41 = vpack.c.bf16 %v4654_v37, %v4646_v36  ;;  %v5069_v32 = vld [vmem:[#allocation5 + $0x1c0] sm:$0xff]  ;;  %v5071_v35 = vld [vmem:[#allocation5 + $0x1d0] sm:$0xff]  ;;  %v5078_v36 = vld [vmem:[#allocation5 + $0x208] sm:$0xff] }
 0x83e   :  { %v5086_v37 = vld [vmem:[#allocation5 + $0x248] sm:$0xff]  ;;  %v5128_v20 = vld [vmem:[#allocation5 + $0x398] sm:$0xff] }
 0x83f   :  { %7576 = vmatpush1.bf16.msra.mxu0 %v7575_v5  ;;  %7640 = vmatpush1.bf16.msra.mxu1 %v7639_v45  ;;  %v7657_v5 = vpack.c.bf16 %v5022_v3, %v5014_v31  ;;  %v5024_v45 = vld [vmem:[#allocation5 + $0x58] sm:$0xff] }
 0x840   :  { %7578 = vmatprep.subr.bf16.mxu0 %v7577_v6  ;;  %7642 = vmatprep.subr.bf16.mxu1 %v7641_v61  ;;  %v7721_v6 = vpack.c.bf16 %v5024_v45, %v5016_v24  ;;  %v7659_v61 = vpack.c.bf16 %v5021_v48, %v5013_v47  ;;  %v7673_v24 = vpack.c.bf16 %v5086_v37, %v5078_v36  ;;  %v5077_v45 = vld [vmem:[#allocation5 + $0x200] sm:$0xff]  ;;  %v5079_v48 = vld [vmem:[#allocation5 + $0x210] sm:$0xff]  ;;  %v5142_v36 = vld [vmem:[#allocation5 + $0x408] sm:$0xff] }
 0x841   :  { %v5085_v47 = vld [vmem:[#allocation5 + $0x240] sm:$0xff]  ;;  %v5150_v37 = vld [vmem:[#allocation5 + $0x448] sm:$0xff] }
 0x843   :  { %7580 = vmatpush1.bf16.msra.mxu0 %v7579_v29  ;;  %7644 = vmatpush1.bf16.msra.mxu1 %v7643_v51  ;;  %v5040_v29 = vld [vmem:[#allocation5 + $0xd8] sm:$0xff] }
 0x844   :  { %7582 = vmatprep.subr.bf16.mxu0 %v7581_v52  ;;  %7646 = vmatprep.subr.bf16.mxu1 %v7645_v1  ;;  %v7725_v51 = vpack.c.bf16 %v5040_v29, %v5032_v60  ;;  %v5031_v52 = vld [vmem:[#allocation5 + $0x90] sm:$0xff]  ;;  %v7663_v1 = vpack.c.bf16 %v5037_v12, %v5029_v0  ;;  %v5104_v60 = vld [vmem:[#allocation5 + $0x2d8] sm:$0xff]  ;;  %v5093_v29 = vld [vmem:[#allocation5 + $0x280] sm:$0xff] }
 0x845   :  { %v7727_v7 = vpack.c.bf16 %v5039_v2, %v5031_v52  ;;  %v5095_v12 = vld [vmem:[#allocation5 + $0x290] sm:$0xff]  ;;  %v5110_v2 = vld [vmem:[#allocation5 + $0x308] sm:$0xff] }
 0x846   :  { %v5103_v52 = vld [vmem:[#allocation5 + $0x2d0] sm:$0xff] }
 0x847   :  { %7584 = vmatpush1.bf16.msra.mxu0 %v7583_v19  ;;  %7648 = vmatpush1.bf16.msra.mxu1 %v7647_v63  ;;  %v5056_v19 = vld [vmem:[#allocation5 + $0x158] sm:$0xff]  ;;  %v5045_v63 = vld [vmem:[#allocation5 + $0x100] sm:$0xff] }
 0x848   :  { %7586 = vmatprep.subr.bf16.mxu0 %v7585_v30  ;;  %7650 = vmatprep.subr.bf16.mxu1 %v7649_v11  ;;  %v7729_v10 = vpack.c.bf16 %v5056_v19, %v5048_v9  ;;  %v5047_v30 = vld [vmem:[#allocation5 + $0x110] sm:$0xff]  ;;  %v7667_v25 = vpack.c.bf16 %v5053_v28, %v5045_v63  ;;  %v5109_v9 = vld [vmem:[#allocation5 + $0x300] sm:$0xff] }
 0x849   :  { %v5055_v11 = vld [vmem:[#allocation5 + $0x150] sm:$0xff]  ;;  %v5117_v19 = vld [vmem:[#allocation5 + $0x340] sm:$0xff] }
 0x84a   :  { %v7731_v15 = vpack.c.bf16 %v5055_v11, %v5047_v30  ;;  %v5111_v28 = vld [vmem:[#allocation5 + $0x310] sm:$0xff] }
 0x84b   :  { %7588 = vmatpush1.bf16.msra.mxu0 %v7587_v21  ;;  %7652 = vmatpush1.bf16.msra.mxu1 %v7651_v22  ;;  %v5072_v21 = vld [vmem:[#allocation5 + $0x1d8] sm:$0xff]  ;;  %v5061_v22 = vld [vmem:[#allocation5 + $0x180] sm:$0xff]  ;;  %v5119_v30 = vld [vmem:[#allocation5 + $0x350] sm:$0xff] }
 0x84c   :  { %7590 = vmatprep.subr.bf16.mxu0 %v7589_v23  ;;  %7654 = vmatprep.subr.bf16.mxu1 %v7653_v27  ;;  %v7733_v23 = vpack.c.bf16 %v5072_v21, %v5064_v39  ;;  %v5063_v27 = vld [vmem:[#allocation5 + $0x190] sm:$0xff]  ;;  %v7671_v31 = vpack.c.bf16 %v5069_v32, %v5061_v22  ;;  %v7747_v11 = vpack.c.bf16 %v5119_v30, %v5111_v28  ;;  %v5133_v21 = vld [vmem:[#allocation5 + $0x3c0] sm:$0xff]  ;;  %v5190_v30 = vld [vmem:[#allocation5 + $0x588] sm:$0xff] }
 0x84d   :  { %v7735_v3 = vpack.c.bf16 %v5071_v35, %v5063_v27  ;;  %v5135_v27 = vld [vmem:[#allocation5 + $0x3d0] sm:$0xff] }
 0x84f   :  { %7592 = vmatpush1.bf16.msra.mxu0 %v7591_v40  ;;  %7656 = vmatpush1.bf16.msra.mxu1 %v7655_v41  ;;  %v5080_v40 = vld [vmem:[#allocation5 + $0x218] sm:$0xff] }
 0x850   :  { %7658 = vmatprep.subr.bf16.mxu0 %v7657_v5  ;;  %7722 = vmatprep.subr.bf16.mxu1 %v7721_v6  ;;  %v5088_v41 = vld [vmem:[#allocation5 + $0x258] sm:$0xff]  ;;  %v7675_v6 = vpack.c.bf16 %v5085_v47, %v5077_v45  ;;  %v5143_v47 = vld [vmem:[#allocation5 + $0x410] sm:$0xff] }
 0x851   :  { %v7737_v5 = vpack.c.bf16 %v5088_v41, %v5080_v40  ;;  %v5144_v40 = vld [vmem:[#allocation5 + $0x418] sm:$0xff]  ;;  %v7689_v41 = vpack.c.bf16 %v5150_v37, %v5142_v36 }
 0x852   :  { %4863 = vmatmul.mubr.f32.vlgmr.msra.gmra.mrb[20].mxu0 %v8765_v4  ;;  %4934 = vmatmul.mubr.f32.vlgmr.msra.gmra.mrb[36].mxu1 %v8765_v4  ;;  %v7661_v4 = vpack.c.bf16 %v5038_v59, %v5030_v50  ;;  %v5102_v50 = vld [vmem:[#allocation5 + $0x2c8] sm:$0xff]  ;;  %v5208_v36 = vld [vmem:[#allocation5 + $0x618] sm:$0xff] }
 0x853   :  { %7660 = vmatpush1.bf16.msra.mxu0 %v7659_v61  ;;  %7724 = vmatpush1.bf16.msra.mxu1 %v7723_v58  ;;  %v5087_v61 = vld [vmem:[#allocation5 + $0x250] sm:$0xff]  ;;  %v5096_v58 = vld [vmem:[#allocation5 + $0x298] sm:$0xff]  ;;  %v7677_v59 = vpack.c.bf16 %v5102_v50, %v5094_v49 }
 0x854   :  { %7662 = vmatprep.subr.bf16.mxu0 %v7661_v4  ;;  %7726 = vmatprep.subr.bf16.mxu1 %v7725_v51  ;;  %v7739_v38 = vpack.c.bf16 %v5087_v61, %v5079_v48  ;;  %v5101_v4 = vld [vmem:[#allocation5 + $0x2c0] sm:$0xff]  ;;  %v7741_v51 = vpack.c.bf16 %v5104_v60, %v5096_v58  ;;  %v5151_v48 = vld [vmem:[#allocation5 + $0x450] sm:$0xff]  ;;  %v5158_v61 = vld [vmem:[#allocation5 + $0x488] sm:$0xff] }
 0x855   :  { %v7679_v0 = vpack.c.bf16 %v5101_v4, %v5093_v29  ;;  %v5160_v49 = vld [vmem:[#allocation5 + $0x498] sm:$0xff]  ;;  %v5165_v60 = vld [vmem:[#allocation5 + $0x4c0] sm:$0xff] }
 0x856   :  { %v5168_v58 = vld [vmem:[#allocation5 + $0x4d8] sm:$0xff] }
 0x857   :  { %7664 = vmatpush1.bf16.msra.mxu0 %v7663_v1  ;;  %7728 = vmatpush1.bf16.msra.mxu1 %v7727_v7  ;;  %v7743_v1 = vpack.c.bf16 %v5103_v52, %v5095_v12  ;;  %v7681_v7 = vpack.c.bf16 %v5118_v13, %v5110_v2  ;;  %v7757_v29 = vpack.c.bf16 %v5168_v58, %v5160_v49  ;;  %v5174_v52 = vld [vmem:[#allocation5 + $0x508] sm:$0xff]  ;;  %v5176_v2 = vld [vmem:[#allocation5 + $0x518] sm:$0xff]  ;;  %v5229_v58 = vld [vmem:[#allocation5 + $0x6c0] sm:$0xff] }
 0x858   :  { %7666 = vmatprep.subr.bf16.mxu0 %v7665_v8  ;;  %7730 = vmatprep.subr.bf16.mxu1 %v7729_v10  ;;  %v5120_v8 = vld [vmem:[#allocation5 + $0x358] sm:$0xff]  ;;  %v7683_v10 = vpack.c.bf16 %v5117_v19, %v5109_v9 }
 0x859   :  { %v7745_v63 = vpack.c.bf16 %v5120_v8, %v5112_v53  ;;  %v5184_v53 = vld [vmem:[#allocation5 + $0x558] sm:$0xff]  ;;  %v5181_v8 = vld [vmem:[#allocation5 + $0x540] sm:$0xff] }
 0x85a   :  { %v7761_v9 = vpack.c.bf16 %v5184_v53, %v5176_v2  ;;  %v5232_v49 = vld [vmem:[#allocation5 + $0x6d8] sm:$0xff]  ;;  %v5237_v53 = vld [vmem:[#allocation5 + $0x700] sm:$0xff] }
 0x85b   :  { %7668 = vmatpush1.bf16.msra.mxu0 %v7667_v25  ;;  %7732 = vmatpush1.bf16.msra.mxu1 %v7731_v15  ;;  %v5126_v25 = vld [vmem:[#allocation5 + $0x388] sm:$0xff]  ;;  %v5136_v15 = vld [vmem:[#allocation5 + $0x3d8] sm:$0xff] }
 0x85c   :  { %7670 = vmatprep.subr.bf16.mxu0 %v7669_v17  ;;  %7734 = vmatprep.subr.bf16.mxu1 %v7733_v23  ;;  %v7685_v39 = vpack.c.bf16 %v5134_v14, %v5126_v25  ;;  %v5125_v17 = vld [vmem:[#allocation5 + $0x380] sm:$0xff]  ;;  %v7749_v22 = vpack.c.bf16 %v5136_v15, %v5128_v20  ;;  %v5127_v23 = vld [vmem:[#allocation5 + $0x390] sm:$0xff]  ;;  %v5192_v25 = vld [vmem:[#allocation5 + $0x598] sm:$0xff] }
 0x85d   :  { %v7687_v32 = vpack.c.bf16 %v5133_v21, %v5125_v17  ;;  %v7751_v35 = vpack.c.bf16 %v5135_v27, %v5127_v23  ;;  %v5200_v20 = vld [vmem:[#allocation5 + $0x5d8] sm:$0xff]  ;;  %v5197_v15 = vld [vmem:[#allocation5 + $0x5c0] sm:$0xff]  ;;  %v5206_v27 = vld [vmem:[#allocation5 + $0x608] sm:$0xff] }
 0x85e   :  { %v7765_v17 = vpack.c.bf16 %v5200_v20, %v5192_v25  ;;  %v5264_v25 = vld [vmem:[#allocation5 + $0x7d8] sm:$0xff] }
 0x85f   :  { %7672 = vmatpush1.bf16.msra.mxu0 %v7671_v31  ;;  %7736 = vmatpush1.bf16.msra.mxu1 %v7735_v3  ;;  %v5152_v31 = vld [vmem:[#allocation5 + $0x458] sm:$0xff]  ;;  %v5141_v3 = vld [vmem:[#allocation5 + $0x400] sm:$0xff] }
 0x860   :  { %7674 = vmatprep.subr.bf16.mxu0 %v7673_v24  ;;  %7738 = vmatprep.subr.bf16.mxu1 %v7737_v5  ;;  %v5149_v24 = vld [vmem:[#allocation5 + $0x440] sm:$0xff]  ;;  %v7753_v5 = vpack.c.bf16 %v5152_v31, %v5144_v40  ;;  %v5216_v40 = vld [vmem:[#allocation5 + $0x658] sm:$0xff] }
 0x861   :  { %v7691_v45 = vpack.c.bf16 %v5149_v24, %v5141_v3  ;;  %v5213_v31 = vld [vmem:[#allocation5 + $0x640] sm:$0xff]  ;;  %v7769_v3 = vpack.c.bf16 %v5216_v40, %v5208_v36  ;;  %v5028_v36 = vld [vmem:[#allocation5 + $0x78] sm:$0xff]  ;;  %v628_v40 = vadd.f32 %v8627_v42, %v8610_v54 }
 0x863   :  { %7676 = vmatpush1.bf16.msra.mxu0 %v7675_v6  ;;  %7740 = vmatpush1.bf16.msra.mxu1 %v7739_v38  ;;  %v7755_v6 = vpack.c.bf16 %v5151_v48, %v5143_v47  ;;  %v5166_v38 = vld [vmem:[#allocation5 + $0x4c8] sm:$0xff] }
 0x864   :  { %7678 = vmatprep.subr.bf16.mxu0 %v7677_v59  ;;  %7742 = vmatprep.subr.bf16.mxu1 %v7741_v51  ;;  %v7693_v50 = vpack.c.bf16 %v5166_v38, %v5158_v61  ;;  %v5157_v59 = vld [vmem:[#allocation5 + $0x480] sm:$0xff]  ;;  %v5159_v51 = vld [vmem:[#allocation5 + $0x490] sm:$0xff]  ;;  %v5222_v48 = vld [vmem:[#allocation5 + $0x688] sm:$0xff] }
 0x865   :  { %v7695_v4 = vpack.c.bf16 %v5165_v60, %v5157_v59  ;;  %v5224_v61 = vld [vmem:[#allocation5 + $0x698] sm:$0xff] }
 0x866   :  { %v7773_v59 = vpack.c.bf16 %v5232_v49, %v5224_v61 }
 0x867   :  { %7680 = vmatpush1.bf16.msra.mxu0 %v7679_v0  ;;  %7744 = vmatpush1.bf16.msra.mxu1 %v7743_v1  ;;  %v5167_v0 = vld [vmem:[#allocation5 + $0x4d0] sm:$0xff]  ;;  %v5182_v1 = vld [vmem:[#allocation5 + $0x548] sm:$0xff] }
 0x868   :  { %7682 = vmatprep.subr.bf16.mxu0 %v7681_v7  ;;  %7746 = vmatprep.subr.bf16.mxu1 %v7745_v63  ;;  %v7759_v12 = vpack.c.bf16 %v5167_v0, %v5159_v51  ;;  %v7697_v13 = vpack.c.bf16 %v5182_v1, %v5174_v52  ;;  %v5173_v7 = vld [vmem:[#allocation5 + $0x500] sm:$0xff]  ;;  %v5175_v63 = vld [vmem:[#allocation5 + $0x510] sm:$0xff]  ;;  %v5238_v51 = vld [vmem:[#allocation5 + $0x708] sm:$0xff] }
 0x869   :  { %v7699_v19 = vpack.c.bf16 %v5181_v8, %v5173_v7  ;;  %v5240_v52 = vld [vmem:[#allocation5 + $0x718] sm:$0xff]  ;;  %v5245_v7 = vld [vmem:[#allocation5 + $0x740] sm:$0xff]  ;;  %v5239_v8 = vld [vmem:[#allocation5 + $0x710] sm:$0xff] }
 0x86a   :  { %v5248_v1 = vld [vmem:[#allocation5 + $0x758] sm:$0xff] }
 0x86b   :  { %7684 = vmatpush1.bf16.msra.mxu0 %v7683_v10  ;;  %7748 = vmatpush1.bf16.msra.mxu1 %v7747_v11  ;;  %v5183_v10 = vld [vmem:[#allocation5 + $0x550] sm:$0xff]  ;;  %v5198_v11 = vld [vmem:[#allocation5 + $0x5c8] sm:$0xff] }
 0x86c   :  { %7686 = vmatprep.subr.bf16.mxu0 %v7685_v39  ;;  %7750 = vmatprep.subr.bf16.mxu1 %v7749_v22  ;;  %v7763_v28 = vpack.c.bf16 %v5183_v10, %v5175_v63  ;;  %v7701_v14 = vpack.c.bf16 %v5198_v11, %v5190_v30  ;;  %v5189_v39 = vld [vmem:[#allocation5 + $0x580] sm:$0xff]  ;;  %v5191_v22 = vld [vmem:[#allocation5 + $0x590] sm:$0xff]  ;;  %v5254_v63 = vld [vmem:[#allocation5 + $0x788] sm:$0xff] }
 0x86d   :  { %v7703_v21 = vpack.c.bf16 %v5197_v15, %v5189_v39  ;;  %v5262_v10 = vld [vmem:[#allocation5 + $0x7c8] sm:$0xff]  ;;  %v5256_v11 = vld [vmem:[#allocation5 + $0x798] sm:$0xff]  ;;  %v5261_v39 = vld [vmem:[#allocation5 + $0x7c0] sm:$0xff] }
 0x86e   :  { %v7717_v30 = vpack.c.bf16 %v5262_v10, %v5254_v63  ;;  %v7781_v20 = vpack.c.bf16 %v5264_v25, %v5256_v11  ;;  %v5255_v15 = vld [vmem:[#allocation5 + $0x790] sm:$0xff] }
 0x86f   :  { %7688 = vmatpush1.bf16.msra.mxu0 %v7687_v32  ;;  %7752 = vmatpush1.bf16.msra.mxu1 %v7751_v35  ;;  %v5199_v32 = vld [vmem:[#allocation5 + $0x5d0] sm:$0xff]  ;;  %v5214_v35 = vld [vmem:[#allocation5 + $0x648] sm:$0xff] }
 0x870   :  { %7690 = vmatprep.subr.bf16.mxu0 %v7689_v41  ;;  %7754 = vmatprep.subr.bf16.mxu1 %v7753_v5  ;;  %v7767_v23 = vpack.c.bf16 %v5199_v32, %v5191_v22  ;;  %v7705_v37 = vpack.c.bf16 %v5214_v35, %v5206_v27  ;;  %v5205_v41 = vld [vmem:[#allocation5 + $0x600] sm:$0xff]  ;;  %v5207_v5 = vld [vmem:[#allocation5 + $0x610] sm:$0xff]  ;;  %v5018_v32 = vld [vmem:[#allocation5 + $0x28] sm:$0xff] }
 0x871   :  { %v7707_v24 = vpack.c.bf16 %v5213_v31, %v5205_v41  ;;  %v5020_v27 = vld [vmem:[#allocation5 + $0x38] sm:$0xff]  ;;  %v629_v41 = vadd.f32 %v8629_v43, %v8612_v55 }
 0x873   :  { %7692 = vmatpush1.bf16.msra.mxu0 %v7691_v45  ;;  %7756 = vmatpush1.bf16.msra.mxu1 %v7755_v6  ;;  %v5215_v45 = vld [vmem:[#allocation5 + $0x650] sm:$0xff]  ;;  %v5230_v6 = vld [vmem:[#allocation5 + $0x6c8] sm:$0xff] }
 0x874   :  { %7694 = vmatprep.subr.bf16.mxu0 %v7693_v50  ;;  %7758 = vmatprep.subr.bf16.mxu1 %v7757_v29  ;;  %v7771_v47 = vpack.c.bf16 %v5215_v45, %v5207_v5  ;;  %v7709_v38 = vpack.c.bf16 %v5230_v6, %v5222_v48  ;;  %v5221_v50 = vld [vmem:[#allocation5 + $0x680] sm:$0xff]  ;;  %v5223_v29 = vld [vmem:[#allocation5 + $0x690] sm:$0xff] }
 0x875   :  { %v7711_v60 = vpack.c.bf16 %v5229_v58, %v5221_v50 }
 0x877   :  { %7696 = vmatpush1.bf16.msra.mxu0 %v7695_v4  ;;  %7760 = vmatpush1.bf16.msra.mxu1 %v7759_v12  ;;  %v5231_v4 = vld [vmem:[#allocation5 + $0x6d0] sm:$0xff]  ;;  %v5246_v12 = vld [vmem:[#allocation5 + $0x748] sm:$0xff] }
 0x878   :  { %7698 = vmatprep.subr.bf16.mxu0 %v7697_v13  ;;  %7762 = vmatprep.subr.bf16.mxu1 %v7761_v9  ;;  %v7775_v0 = vpack.c.bf16 %v5231_v4, %v5223_v29  ;;  %v7713_v2 = vpack.c.bf16 %v5246_v12, %v5238_v51  ;;  %v7777_v13 = vpack.c.bf16 %v5248_v1, %v5240_v52 }
 0x879   :  { %v7715_v9 = vpack.c.bf16 %v5245_v7, %v5237_v53 }
 0x87b   :  { %7700 = vmatpush1.bf16.msra.mxu0 %v7699_v19  ;;  %7764 = vmatpush1.bf16.msra.mxu1 %v7763_v28  ;;  %v5247_v19 = vld [vmem:[#allocation5 + $0x750] sm:$0xff] }
 0x87c   :  { %7702 = vmatprep.subr.bf16.mxu0 %v7701_v14  ;;  %7766 = vmatprep.subr.bf16.mxu1 %v7765_v17  ;;  %v7779_v28 = vpack.c.bf16 %v5247_v19, %v5239_v8  ;;  %v5253_v14 = vld [vmem:[#allocation5 + $0x780] sm:$0xff]  ;;  %v5263_v17 = vld [vmem:[#allocation5 + $0x7d0] sm:$0xff] }
 0x87d   :  { %v7783_v22 = vpack.c.bf16 %v5263_v17, %v5255_v15 }
 0x87f   :  { %7704 = vmatpush1.bf16.msra.mxu0 %v7703_v21  ;;  %7768 = vmatpush1.bf16.msra.mxu1 %v7767_v23  ;;  %v7719_v21 = vpack.c.bf16 %v5261_v39, %v5253_v14  ;;  %v5026_v23 = vld [vmem:[#allocation5 + $0x68] sm:$0xff] }
 0x880   :  { %7706 = vmatprep.subr.bf16.mxu0 %v7705_v37  ;;  %7770 = vmatprep.subr.bf16.mxu1 %v7769_v3  ;;  %v7785_v35 = vpack.c.bf16 %v5026_v23, %v5018_v32  ;;  %v7849_v37 = vpack.c.bf16 %v5028_v36, %v5020_v27  ;;  %v5017_v27 = vld [vmem:[#allocation5 + $0x20] sm:$0xff] }
 0x881   :  { %v5025_v36 = vld [vmem:[#allocation5 + $0x60] sm:$0xff] }
 0x883   :  { %7708 = vmatpush1.bf16.msra.mxu0 %v7707_v24  ;;  %7772 = vmatpush1.bf16.msra.mxu1 %v7771_v47 }
 0x884   :  { %7710 = vmatprep.subr.bf16.mxu0 %v7709_v38  ;;  %7774 = vmatprep.subr.bf16.mxu1 %v7773_v59 }
 0x887   :  { %7712 = vmatpush1.bf16.msra.mxu0 %v7711_v60  ;;  %7776 = vmatpush1.bf16.msra.mxu1 %v7775_v0 }
 0x888   :  { %7714 = vmatprep.subr.bf16.mxu0 %v7713_v2  ;;  %7778 = vmatprep.subr.bf16.mxu1 %v7777_v13 }
 0x88b   :  { %7716 = vmatpush1.bf16.msra.mxu0 %v7715_v9  ;;  %7780 = vmatpush1.bf16.msra.mxu1 %v7779_v28 }
 0x88c   :  { %7718 = vmatprep.subr.bf16.mxu0 %v7717_v30  ;;  %7782 = vmatprep.subr.bf16.mxu1 %v7781_v20 }
 0x88f   :  { %7720 = vmatpush1.bf16.msra.mxu0 %v7719_v21  ;;  %7784 = vmatpush1.bf16.msra.mxu1 %v7783_v22 }
 0x890   :  { %7786 = vmatprep.subr.bf16.mxu0 %v7785_v35  ;;  %7850 = vmatprep.subr.bf16.mxu1 %v7849_v37  ;;  %v5019_v37 = vld [vmem:[#allocation5 + $0x30] sm:$0xff] }
 0x8e5   :  { %v4722_v31 = vpop.f32.mrb[28].mxu0  ;;  %v4793_v3 = vpop.f32.mrb[20].mxu1 }
 0x8e6   :  { %v4940_v24 = vadd.f32 %v4722_v31, %v628_v40  ;;  %v7983_v5 = vadd.f32 %v4793_v3, %v8621_v33  ;;  %v4724_v45 = vpop.f32.mrb[29].mxu0  ;;  %v4795_v47 = vpop.f32.mrb[21].mxu1  ;;  %v5042_v3 = vld [vmem:[#allocation5 + $0xe8] sm:$0xff] }
 0x8e7   :  { %v4941_v48 = vadd.f32 %v4724_v45, %v629_v41  ;;  %v7984_v6 = vadd.f32 %v4795_v47, %v8623_v34  ;;  %v5034_v41 = vld [vmem:[#allocation5 + $0xa8] sm:$0xff]  ;;  %v7787_v47 = vpack.c.bf16 %v5025_v36, %v5017_v27  ;;  %v5081_v27 = vld [vmem:[#allocation5 + $0x220] sm:$0xff] }
 0x8e8   :  { %v5801_v61 = vmul.f32 -1.442695, %v7983_v5 }
 0x8e9   :  { %v5802_v38 = vmul.f32 -1.442695, %v7984_v6  ;;  %v5033_v6 = vld [vmem:[#allocation5 + $0xa0] sm:$0xff] }
 0x8ea   :  { %8271 = vpow2.f32 %v5801_v61  ;;  %v5041_v61 = vld [vmem:[#allocation5 + $0xe0] sm:$0xff] }
 0x8eb   :  { %8273 = vpow2.f32 %v5802_v38 }
 0x8ec   :  { %8275 = vtanh.f32 %v4940_v24  ;;  %v5036_v24 = vld [vmem:[#allocation5 + $0xb8] sm:$0xff] }
 0x8ed   :  { %8277 = vtanh.f32 %v4941_v48 }
 0x8f4   :  { %v8272_v49 = vpop.eup %8271 }
 0x8f5   :  { %v8274_v50 = vpop.eup %8273  ;;  %v4956_v54 = vadd.f32 1.0, %v8272_v49  ;;  %v5035_v49 = vld [vmem:[#allocation5 + $0xb0] sm:$0xff] }
 0x8f6   :  { %v4957_v55 = vadd.f32 1.0, %v8274_v50  ;;  %v8276_v58 = vpop.eup %8275  ;;  %v5043_v50 = vld [vmem:[#allocation5 + $0xf0] sm:$0xff] }
 0x8f7   :  { %8279 = vrcp.f32 %v4956_v54  ;;  %v8278_v59 = vpop.eup %8277  ;;  %v5050_v54 = vld [vmem:[#allocation5 + $0x128] sm:$0xff] }
 0x8f8   :  { %8281 = vrcp.f32 %v4957_v55  ;;  %v7789_v55 = vpack.c.bf16 %v5042_v3, %v5034_v41  ;;  %v5098_v41 = vld [vmem:[#allocation5 + $0x2a8] sm:$0xff]  ;;  %v5100_v3 = vld [vmem:[#allocation5 + $0x2b8] sm:$0xff] }
 0x901   :  { %v8280_v60 = vpop.eup %8279 }
 0x902   :  { %v8282_v29 = vpop.eup %8281  ;;  %v4990_v4 = vmul.f32 %v8280_v60, %v8276_v58  ;;  %v5052_v60 = vld [vmem:[#allocation5 + $0x138] sm:$0xff] }
 0x903   :  { %v4991_v51 = vmul.f32 %v8282_v29, %v8278_v59  ;;  %v5058_v59 = vld [vmem:[#allocation5 + $0x168] sm:$0xff]  ;;  %v5060_v29 = vld [vmem:[#allocation5 + $0x178] sm:$0xff] }
 0x925   :  { %v4864_v0 = vpop.f32.mrb[20].mxu0  ;;  %v4935_v12 = vpop.f32.mrb[36].mxu1 }
 0x926   :  { %v7999_v52 = vadd.f32 %v4864_v0, %v8633_v62  ;;  %v4866_v1 = vpop.f32.mrb[21].mxu0  ;;  %v4937_v2 = vpop.f32.mrb[37].mxu1  ;;  %v8015_v9 = vadd.f32 %v4935_v12, %v8639_v16  ;;  %v5049_v0 = vld [vmem:[#allocation5 + $0x120] sm:$0xff] }
 0x927   :  { %v8000_v13 = vadd.f32 %v4866_v1, %v8635_v26  ;;  %v8016_v8 = vadd.f32 %v4937_v2, %v8641_v18  ;;  %v5057_v12 = vld [vmem:[#allocation5 + $0x160] sm:$0xff]  ;;  %v7857_v1 = vpack.c.bf16 %v5060_v29, %v5052_v60  ;;  %v5051_v2 = vld [vmem:[#allocation5 + $0x130] sm:$0xff] }
 0x928   :  { %v5803_v53 = vmul.f32 -1.442695, %v7999_v52  ;;  %v5805_v10 = vmul.f32 -1.442695, %v8015_v9  ;;  %v7793_v52 = vpack.c.bf16 %v5058_v59, %v5050_v54  ;;  %v5076_v9 = vld [vmem:[#allocation5 + $0x1f8] sm:$0xff]  ;;  %v5122_v54 = vld [vmem:[#allocation5 + $0x368] sm:$0xff] }
 0x929   :  { %v5804_v7 = vmul.f32 -1.442695, %v8000_v13  ;;  %v5806_v19 = vmul.f32 -1.442695, %v8016_v8  ;;  %v5059_v13 = vld [vmem:[#allocation5 + $0x170] sm:$0xff]  ;;  %v5068_v8 = vld [vmem:[#allocation5 + $0x1b8] sm:$0xff] }
 0x92a   :  { %8283 = vpow2.f32 %v5803_v53  ;;  %v5066_v53 = vld [vmem:[#allocation5 + $0x1a8] sm:$0xff]  ;;  %v5113_v29 = vld [vmem:[#allocation5 + $0x320] sm:$0xff] }
 0x92b   :  { %8285 = vpow2.f32 %v5804_v7  ;;  %v5074_v7 = vld [vmem:[#allocation5 + $0x1e8] sm:$0xff] }
 0x92c   :  { %8287 = vpow2.f32 %v5806_v19  ;;  %v7795_v19 = vpack.c.bf16 %v5057_v12, %v5049_v0  ;;  %v5115_v12 = vld [vmem:[#allocation5 + $0x330] sm:$0xff] }
 0x934   :  { %v8284_v63 = vpop.eup %8283 }
 0x935   :  { %v4968_v28 = vadd.f32 1.0, %v8284_v63  ;;  %v8286_v30 = vpop.eup %8285  ;;  %v7859_v63 = vpack.c.bf16 %v5059_v13, %v5051_v2  ;;  %v5138_v2 = vld [vmem:[#allocation5 + $0x3e8] sm:$0xff]  ;;  %v5132_v13 = vld [vmem:[#allocation5 + $0x3b8] sm:$0xff] }
 0x936   :  { %v4969_v11 = vadd.f32 1.0, %v8286_v30  ;;  %v8288_v25 = vpop.eup %8287  ;;  %v7797_v30 = vpack.c.bf16 %v5074_v7, %v5066_v53  ;;  %v5140_v53 = vld [vmem:[#allocation5 + $0x3f8] sm:$0xff] }
 0x937   :  { %8289 = vrcp.f32 %v4968_v28  ;;  %v4981_v15 = vadd.f32 1.0, %v8288_v25  ;;  %v5073_v28 = vld [vmem:[#allocation5 + $0x1e0] sm:$0xff]  ;;  %v5067_v25 = vld [vmem:[#allocation5 + $0x1b0] sm:$0xff] }
 0x938   :  { %8291 = vpow2.f32 %v5805_v10  ;;  %v5065_v10 = vld [vmem:[#allocation5 + $0x1a0] sm:$0xff] }
 0x939   :  { %8293 = vrcp.f32 %v4969_v11  ;;  %v7861_v11 = vpack.c.bf16 %v5076_v9, %v5068_v8  ;;  %v5129_v9 = vld [vmem:[#allocation5 + $0x3a0] sm:$0xff] }
 0x93a   :  { %8295 = vrcp.f32 %v4981_v15  ;;  %v5084_v15 = vld [vmem:[#allocation5 + $0x238] sm:$0xff] }
 0x941   :  { %v8290_v14 = vpop.eup %8289 }
 0x942   :  { %v8292_v20 = vpop.eup %8291  ;;  %v4988_v39 = vmul.f32 %v8290_v14, %v8758_v44  ;;  %v5027_v44 = vld [vmem:[#allocation5 + $0x70] sm:$0xff] }
 0x943   :  { %v8294_v17 = vpop.eup %8293  ;;  %v4980_v32 = vadd.f32 1.0, %v8292_v20  ;;  %v7851_v48 = vpack.c.bf16 %v5027_v44, %v5019_v37  ;;  %v5075_v14 = vld [vmem:[#allocation5 + $0x1f0] sm:$0xff]  ;;  %v5082_v20 = vld [vmem:[#allocation5 + $0x228] sm:$0xff] }
 0x944   :  { %v8782_v21 = vadd.f32 %v4990_v4, %v4988_v39  ;;  %v4989_v22 = vmul.f32 %v8294_v17, %v8761_v46  ;;  %v8296_v35 = vpop.eup %8295  ;;  %v5044_v46 = vld [vmem:[#allocation5 + $0xf8] sm:$0xff]  ;;  %v7791_v4 = vpack.c.bf16 %v5041_v61, %v5033_v6  ;;  %v5090_v39 = vld [vmem:[#allocation5 + $0x268] sm:$0xff]  ;;  %v5083_v44 = vld [vmem:[#allocation5 + $0x230] sm:$0xff] }
 0x945   :  { %v7853_v58 = vpack.c.bf16 %v5044_v46, %v5036_v24  ;;  %v5092_v17 = vld [vmem:[#allocation5 + $0x278] sm:$0xff]  ;;  %v7801_v36 = vpack.c.bf16 %v5090_v39, %v5082_v20  ;;  %v5099_v61 = vld [vmem:[#allocation5 + $0x2b0] sm:$0xff] }
 0x946   :  { %v8785_v23 = vadd.f32 %v4991_v51, %v4989_v22  ;;  %8297 = vtanh.f32 %v8782_v21  ;;  %v7855_v51 = vpack.c.bf16 %v5043_v50, %v5035_v49  ;;  %v7799_v22 = vpack.c.bf16 %v5073_v28, %v5065_v10  ;;  %v5108_v24 = vld [vmem:[#allocation5 + $0x2f8] sm:$0xff]  ;;  %v5107_v49 = vld [vmem:[#allocation5 + $0x2f0] sm:$0xff]  ;;  %v5114_v50 = vld [vmem:[#allocation5 + $0x328] sm:$0xff] }
 0x947   :  { %v7865_v37 = vpack.c.bf16 %v5092_v17, %v5084_v15  ;;  %v7869_v6 = vpack.c.bf16 %v5108_v24, %v5100_v3  ;;  %v7871_v60 = vpack.c.bf16 %v5107_v49, %v5099_v61  ;;  %v7877_v10 = vpack.c.bf16 %v5140_v53, %v5132_v13  ;;  %v5131_v28 = vld [vmem:[#allocation5 + $0x3b0] sm:$0xff]  ;;  %v5156_v20 = vld [vmem:[#allocation5 + $0x478] sm:$0xff]  ;;  %v5145_v17 = vld [vmem:[#allocation5 + $0x420] sm:$0xff] }
 0x948   :  { %8299 = vtanh.f32 %v8785_v23  ;;  %v5161_v24 = vld [vmem:[#allocation5 + $0x4a0] sm:$0xff]  ;;  %v5186_v61 = vld [vmem:[#allocation5 + $0x568] sm:$0xff]  ;;  %v5180_v49 = vld [vmem:[#allocation5 + $0x538] sm:$0xff] }
 0x949   :  { %8301 = vrcp.f32 %v4980_v32  ;;  %v7863_v32 = vpack.c.bf16 %v5075_v14, %v5067_v25  ;;  %v5154_v25 = vld [vmem:[#allocation5 + $0x468] sm:$0xff]  ;;  %v5148_v14 = vld [vmem:[#allocation5 + $0x438] sm:$0xff]  ;;  %v5193_v53 = vld [vmem:[#allocation5 + $0x5a0] sm:$0xff] }
 0x950   :  { %v8298_v40 = vpop.eup %8297 }
 0x952   :  { %v8300_v31 = vpop.eup %8299 }
 0x953   :  { %v8302_v5 = vpop.eup %8301  ;;  %v4999_v45 = vmul.f32 %v8300_v31, %v8296_v35  ;;  %v5089_v35 = vld [vmem:[#allocation5 + $0x260] sm:$0xff]  ;;  %v5106_v31 = vld [vmem:[#allocation5 + $0x2e8] sm:$0xff] }
 0x954   :  { %v8789_v38 = vmul.f32 %v8302_v5, %v8298_v40  ;;  %v5091_v40 = vld [vmem:[#allocation5 + $0x270] sm:$0xff]  ;;  %v7803_v46 = vpack.c.bf16 %v5089_v35, %v5081_v27  ;;  %v7881_v27 = vpack.c.bf16 %v5156_v20, %v5148_v14  ;;  %v5209_v20 = vld [vmem:[#allocation5 + $0x620] sm:$0xff] }
 0x955   :  { %5333 = vmatprep.mubr.f32.mxu0 %v4999_v45  ;;  %5404 = vmatprep.mubr.f32.mxu1 %v4999_v45  ;;  %v7867_v5 = vpack.c.bf16 %v5091_v40, %v5083_v44  ;;  %v5147_v35 = vld [vmem:[#allocation5 + $0x430] sm:$0xff]  ;;  %v5170_v44 = vld [vmem:[#allocation5 + $0x4e8] sm:$0xff]  ;;  %v5164_v40 = vld [vmem:[#allocation5 + $0x4b8] sm:$0xff] }
 0x956   :  { %5334 = vmatmul.mubr.f32.vlgmr.msra.gmra.mrb[30].mxu0 %v8789_v38  ;;  %5405 = vmatmul.mubr.f32.vlgmr.msra.gmra.mrb[22].mxu1 %v8789_v38 }
 0x957   :  { %7788 = vmatpush1.bf16.msra.mxu0 %v7787_v47  ;;  %7852 = vmatpush1.bf16.msra.mxu1 %v7851_v48  ;;  %v5105_v47 = vld [vmem:[#allocation5 + $0x2e0] sm:$0xff]  ;;  %v7805_v48 = vpack.c.bf16 %v5106_v31, %v5098_v41  ;;  %v5172_v41 = vld [vmem:[#allocation5 + $0x4f8] sm:$0xff] }
 0x958   :  { %5475 = vmatprep.mubr.f32.mxu0 %v4999_v45  ;;  %5546 = vmatprep.mubr.f32.mxu1 %v4999_v45  ;;  %v5097_v45 = vld [vmem:[#allocation5 + $0x2a0] sm:$0xff] }
 0x959   :  { %7790 = vmatprep.subr.bf16.mxu0 %v7789_v55  ;;  %7854 = vmatprep.subr.bf16.mxu1 %v7853_v58  ;;  %v5116_v55 = vld [vmem:[#allocation5 + $0x338] sm:$0xff]  ;;  %v7807_v59 = vpack.c.bf16 %v5105_v47, %v5097_v45  ;;  %v7885_v45 = vpack.c.bf16 %v5172_v41, %v5164_v40  ;;  %v5163_v47 = vld [vmem:[#allocation5 + $0x4b0] sm:$0xff]  ;;  %v5225_v41 = vld [vmem:[#allocation5 + $0x6a0] sm:$0xff] }
 0x95a   :  { %v5124_v58 = vld [vmem:[#allocation5 + $0x378] sm:$0xff] }
 0x95b   :  { %7792 = vmatpush1.bf16.msra.mxu0 %v7791_v4  ;;  %7856 = vmatpush1.bf16.msra.mxu1 %v7855_v51  ;;  %v5121_v4 = vld [vmem:[#allocation5 + $0x360] sm:$0xff]  ;;  %v7809_v51 = vpack.c.bf16 %v5122_v54, %v5114_v50  ;;  %v7873_v0 = vpack.c.bf16 %v5124_v58, %v5116_v55  ;;  %v5188_v50 = vld [vmem:[#allocation5 + $0x578] sm:$0xff] }
 0x95c   :  { %7794 = vmatprep.subr.bf16.mxu0 %v7793_v52  ;;  %7858 = vmatprep.subr.bf16.mxu1 %v7857_v1  ;;  %v5123_v52 = vld [vmem:[#allocation5 + $0x370] sm:$0xff]  ;;  %v5130_v1 = vld [vmem:[#allocation5 + $0x3a8] sm:$0xff]  ;;  %v7811_v7 = vpack.c.bf16 %v5121_v4, %v5113_v29  ;;  %v5177_v58 = vld [vmem:[#allocation5 + $0x520] sm:$0xff]  ;;  %v7889_v29 = vpack.c.bf16 %v5188_v50, %v5180_v49 }
 0x95d   :  { %v7875_v8 = vpack.c.bf16 %v5123_v52, %v5115_v12  ;;  %v5179_v4 = vld [vmem:[#allocation5 + $0x530] sm:$0xff]  ;;  %v5202_v12 = vld [vmem:[#allocation5 + $0x5e8] sm:$0xff]  ;;  %v5196_v52 = vld [vmem:[#allocation5 + $0x5b8] sm:$0xff] }
 0x95e   :  { %v5241_v50 = vld [vmem:[#allocation5 + $0x720] sm:$0xff] }
 0x95f   :  { %7796 = vmatpush1.bf16.msra.mxu0 %v7795_v19  ;;  %7860 = vmatpush1.bf16.msra.mxu1 %v7859_v63  ;;  %v5137_v19 = vld [vmem:[#allocation5 + $0x3e0] sm:$0xff]  ;;  %v7813_v63 = vpack.c.bf16 %v5138_v2, %v5130_v1  ;;  %v5204_v1 = vld [vmem:[#allocation5 + $0x5f8] sm:$0xff] }
 0x960   :  { %7798 = vmatprep.subr.bf16.mxu0 %v7797_v30  ;;  %7862 = vmatprep.subr.bf16.mxu1 %v7861_v11  ;;  %v5139_v30 = vld [vmem:[#allocation5 + $0x3f0] sm:$0xff]  ;;  %v5146_v11 = vld [vmem:[#allocation5 + $0x428] sm:$0xff]  ;;  %v7815_v39 = vpack.c.bf16 %v5137_v19, %v5129_v9  ;;  %v7893_v9 = vpack.c.bf16 %v5204_v1, %v5196_v52  ;;  %v5257_v1 = vld [vmem:[#allocation5 + $0x7a0] sm:$0xff] }
 0x961   :  { %v7879_v15 = vpack.c.bf16 %v5139_v30, %v5131_v28  ;;  %v5195_v19 = vld [vmem:[#allocation5 + $0x5b0] sm:$0xff]  ;;  %v5218_v28 = vld [vmem:[#allocation5 + $0x668] sm:$0xff]  ;;  %v5212_v30 = vld [vmem:[#allocation5 + $0x638] sm:$0xff] }
 0x963   :  { %7800 = vmatpush1.bf16.msra.mxu0 %v7799_v22  ;;  %7864 = vmatpush1.bf16.msra.mxu1 %v7863_v32  ;;  %v5153_v22 = vld [vmem:[#allocation5 + $0x460] sm:$0xff]  ;;  %v7817_v32 = vpack.c.bf16 %v5154_v25, %v5146_v11  ;;  %v5220_v11 = vld [vmem:[#allocation5 + $0x678] sm:$0xff] }
 0x964   :  { %7802 = vmatprep.subr.bf16.mxu0 %v7801_v36  ;;  %7866 = vmatprep.subr.bf16.mxu1 %v7865_v37  ;;  %v5155_v36 = vld [vmem:[#allocation5 + $0x470] sm:$0xff]  ;;  %v5162_v37 = vld [vmem:[#allocation5 + $0x4a8] sm:$0xff]  ;;  %v7819_v31 = vpack.c.bf16 %v5153_v22, %v5145_v17  ;;  %v7897_v17 = vpack.c.bf16 %v5220_v11, %v5212_v30  ;;  %v5617_v30 = vld [vmem:[%s8913_s4] sm:$0xff] }
 0x965   :  { %v7883_v3 = vpack.c.bf16 %v5155_v36, %v5147_v35  ;;  %v5211_v22 = vld [vmem:[#allocation5 + $0x630] sm:$0xff]  ;;  %v5234_v35 = vld [vmem:[#allocation5 + $0x6e8] sm:$0xff]  ;;  %v5228_v36 = vld [vmem:[#allocation5 + $0x6b8] sm:$0xff] }
 0x966   :  { %v5618_v11 = vld [vmem:[%s8913_s4 + $0x8] sm:$0xff] }
 0x967   :  { %7804 = vmatpush1.bf16.msra.mxu0 %v7803_v46  ;;  %7868 = vmatpush1.bf16.msra.mxu1 %v7867_v5  ;;  %v5169_v46 = vld [vmem:[#allocation5 + $0x4e0] sm:$0xff]  ;;  %v7821_v5 = vpack.c.bf16 %v5170_v44, %v5162_v37  ;;  %v5236_v37 = vld [vmem:[#allocation5 + $0x6f8] sm:$0xff] }
 0x968   :  { %7806 = vmatprep.subr.bf16.mxu0 %v7805_v48  ;;  %7870 = vmatprep.subr.bf16.mxu1 %v7869_v6  ;;  %v5171_v48 = vld [vmem:[#allocation5 + $0x4f0] sm:$0xff]  ;;  %v5178_v6 = vld [vmem:[#allocation5 + $0x528] sm:$0xff]  ;;  %v7823_v54 = vpack.c.bf16 %v5169_v46, %v5161_v24  ;;  %v7901_v24 = vpack.c.bf16 %v5236_v37, %v5228_v36 }
 0x969   :  { %v7887_v55 = vpack.c.bf16 %v5171_v48, %v5163_v47  ;;  %v5227_v46 = vld [vmem:[#allocation5 + $0x6b0] sm:$0xff]  ;;  %v5250_v47 = vld [vmem:[#allocation5 + $0x768] sm:$0xff]  ;;  %v5244_v48 = vld [vmem:[#allocation5 + $0x738] sm:$0xff] }
 0x96a   :  { %v5622_v36 = vld [vmem:[%s8913_s4 + $0x28] sm:$0xff] }
 0x96b   :  { %7808 = vmatpush1.bf16.msra.mxu0 %v7807_v59  ;;  %7872 = vmatpush1.bf16.msra.mxu1 %v7871_v60  ;;  %v5185_v59 = vld [vmem:[#allocation5 + $0x560] sm:$0xff]  ;;  %v7825_v60 = vpack.c.bf16 %v5186_v61, %v5178_v6  ;;  %v5252_v6 = vld [vmem:[#allocation5 + $0x778] sm:$0xff] }
 0x96c   :  { %7810 = vmatprep.subr.bf16.mxu0 %v7809_v51  ;;  %7874 = vmatprep.subr.bf16.mxu1 %v7873_v0  ;;  %v5187_v51 = vld [vmem:[#allocation5 + $0x570] sm:$0xff]  ;;  %v5194_v0 = vld [vmem:[#allocation5 + $0x5a8] sm:$0xff]  ;;  %v7827_v2 = vpack.c.bf16 %v5185_v59, %v5177_v58  ;;  %v7905_v58 = vpack.c.bf16 %v5252_v6, %v5244_v48 }
 0x96d   :  { %v7891_v13 = vpack.c.bf16 %v5187_v51, %v5179_v4  ;;  %v5243_v59 = vld [vmem:[#allocation5 + $0x730] sm:$0xff]  ;;  %v5266_v4 = vld [vmem:[#allocation5 + $0x7e8] sm:$0xff]  ;;  %v5260_v51 = vld [vmem:[#allocation5 + $0x7b8] sm:$0xff] }
 0x96e   :  { %v5626_v48 = vld [vmem:[%s8913_s4 + $0x48] sm:$0xff] }
 0x96f   :  { %7812 = vmatpush1.bf16.msra.mxu0 %v7811_v7  ;;  %7876 = vmatpush1.bf16.msra.mxu1 %v7875_v8  ;;  %v5201_v7 = vld [vmem:[#allocation5 + $0x5e0] sm:$0xff]  ;;  %v7829_v8 = vpack.c.bf16 %v5202_v12, %v5194_v0  ;;  %v5268_v0 = vld [vmem:[#allocation5 + $0x7f8] sm:$0xff] }
 0x970   :  { %7814 = vmatprep.subr.bf16.mxu0 %v7813_v63  ;;  %7878 = vmatprep.subr.bf16.mxu1 %v7877_v10  ;;  %v5203_v63 = vld [vmem:[#allocation5 + $0x5f0] sm:$0xff]  ;;  %v5210_v10 = vld [vmem:[#allocation5 + $0x628] sm:$0xff]  ;;  %v7831_v25 = vpack.c.bf16 %v5201_v7, %v5193_v53  ;;  %v5265_v53 = vld [vmem:[#allocation5 + $0x7e0] sm:$0xff] }
 0x971   :  { %v7895_v14 = vpack.c.bf16 %v5203_v63, %v5195_v19  ;;  %v5259_v7 = vld [vmem:[#allocation5 + $0x7b0] sm:$0xff]  ;;  %v5633_v63 = vld [vmem:[%s8913_s4 + $0x80] sm:$0xff] }
 0x973   :  { %7816 = vmatpush1.bf16.msra.mxu0 %v7815_v39  ;;  %7880 = vmatpush1.bf16.msra.mxu1 %v7879_v15  ;;  %v5217_v39 = vld [vmem:[#allocation5 + $0x660] sm:$0xff]  ;;  %v7833_v15 = vpack.c.bf16 %v5218_v28, %v5210_v10  ;;  %v5634_v10 = vld [vmem:[%s8913_s4 + $0x88] sm:$0xff] }
 0x974   :  { %7818 = vmatprep.subr.bf16.mxu0 %v7817_v32  ;;  %7882 = vmatprep.subr.bf16.mxu1 %v7881_v27  ;;  %v5219_v32 = vld [vmem:[#allocation5 + $0x670] sm:$0xff]  ;;  %v5226_v27 = vld [vmem:[#allocation5 + $0x6a8] sm:$0xff]  ;;  %v7835_v44 = vpack.c.bf16 %v5217_v39, %v5209_v20  ;;  %v7913_v28 = vpack.c.bf16 %v5634_v10, %v5633_v63 }
 0x975   :  { %v7899_v40 = vpack.c.bf16 %v5219_v32, %v5211_v22  ;;  %v5619_v39 = vld [vmem:[%s8913_s4 + $0x10] sm:$0xff]  ;;  %v5637_v22 = vld [vmem:[%s8913_s4 + $0xa0] sm:$0xff]  ;;  %v5638_v32 = vld [vmem:[%s8913_s4 + $0xa8] sm:$0xff] }
 0x977   :  { %7820 = vmatpush1.bf16.msra.mxu0 %v7819_v31  ;;  %7884 = vmatpush1.bf16.msra.mxu1 %v7883_v3  ;;  %v5233_v31 = vld [vmem:[#allocation5 + $0x6e0] sm:$0xff]  ;;  %v7837_v3 = vpack.c.bf16 %v5234_v35, %v5226_v27  ;;  %v7921_v27 = vpack.c.bf16 %v5638_v32, %v5637_v22 }
 0x978   :  { %7822 = vmatprep.subr.bf16.mxu0 %v7821_v5  ;;  %7886 = vmatprep.subr.bf16.mxu1 %v7885_v45  ;;  %v5235_v5 = vld [vmem:[#allocation5 + $0x6f0] sm:$0xff]  ;;  %v5242_v45 = vld [vmem:[#allocation5 + $0x728] sm:$0xff]  ;;  %v7839_v61 = vpack.c.bf16 %v5233_v31, %v5225_v41  ;;  %v5621_v35 = vld [vmem:[%s8913_s4 + $0x20] sm:$0xff] }
 0x979   :  { %v7903_v49 = vpack.c.bf16 %v5235_v5, %v5227_v46  ;;  %v7923_v37 = vpack.c.bf16 %v5622_v36, %v5621_v35  ;;  %v5623_v31 = vld [vmem:[%s8913_s4 + $0x30] sm:$0xff]  ;;  %v5641_v46 = vld [vmem:[%s8913_s4 + $0xc0] sm:$0xff]  ;;  %v5642_v5 = vld [vmem:[%s8913_s4 + $0xc8] sm:$0xff] }
 0x97b   :  { %7824 = vmatpush1.bf16.msra.mxu0 %v7823_v54  ;;  %7888 = vmatpush1.bf16.msra.mxu1 %v7887_v55  ;;  %v5249_v54 = vld [vmem:[#allocation5 + $0x760] sm:$0xff]  ;;  %v7841_v55 = vpack.c.bf16 %v5250_v47, %v5242_v45  ;;  %v7929_v45 = vpack.c.bf16 %v5642_v5, %v5641_v46 }
 0x97c   :  { %7826 = vmatprep.subr.bf16.mxu0 %v7825_v60  ;;  %7890 = vmatprep.subr.bf16.mxu1 %v7889_v29  ;;  %v5251_v60 = vld [vmem:[#allocation5 + $0x770] sm:$0xff]  ;;  %v5258_v29 = vld [vmem:[#allocation5 + $0x7a8] sm:$0xff]  ;;  %v7843_v12 = vpack.c.bf16 %v5249_v54, %v5241_v50  ;;  %v5625_v47 = vld [vmem:[%s8913_s4 + $0x40] sm:$0xff] }
 0x97d   :  { %v7907_v52 = vpack.c.bf16 %v5251_v60, %v5243_v59  ;;  %v7931_v6 = vpack.c.bf16 %v5626_v48, %v5625_v47  ;;  %v5627_v50 = vld [vmem:[%s8913_s4 + $0x50] sm:$0xff]  ;;  %v5646_v59 = vld [vmem:[%s8913_s4 + $0xe8] sm:$0xff] }
 0x97f   :  { %7828 = vmatpush1.bf16.msra.mxu0 %v7827_v2  ;;  %7892 = vmatpush1.bf16.msra.mxu1 %v7891_v13  ;;  %v7845_v2 = vpack.c.bf16 %v5266_v4, %v5258_v29  ;;  %v7909_v13 = vpack.c.bf16 %v5268_v0, %v5260_v51  ;;  %v5629_v4 = vld [vmem:[%s8913_s4 + $0x60] sm:$0xff]  ;;  %v5630_v51 = vld [vmem:[%s8913_s4 + $0x68] sm:$0xff]  ;;  %v5647_v0 = vld [vmem:[%s8913_s4 + $0xf0] sm:$0xff] }
 0x980   :  { %7830 = vmatprep.subr.bf16.mxu0 %v7829_v8  ;;  %7894 = vmatprep.subr.bf16.mxu1 %v7893_v9  ;;  %v5267_v8 = vld [vmem:[#allocation5 + $0x7f0] sm:$0xff]  ;;  %v7847_v9 = vpack.c.bf16 %v5265_v53, %v5257_v1 }
 0x981   :  { %v7911_v19 = vpack.c.bf16 %v5267_v8, %v5259_v7  ;;  %v636_v7 = vadd.f32 %v8627_v42, %v8614_v56  ;;  %v637_v8 = vadd.f32 %v8629_v43, %v8616_v57 }
 0x983   :  { %7832 = vmatpush1.bf16.msra.mxu0 %v7831_v25  ;;  %7896 = vmatpush1.bf16.msra.mxu1 %v7895_v14  ;;  %v7915_v25 = vpack.c.bf16 %v5618_v11, %v5617_v30  ;;  %v5636_v14 = vld [vmem:[%s8913_s4 + $0x98] sm:$0xff] }
 0x984   :  { %7834 = vmatprep.subr.bf16.mxu0 %v7833_v15  ;;  %7898 = vmatprep.subr.bf16.mxu1 %v7897_v17  ;;  %v5620_v15 = vld [vmem:[%s8913_s4 + $0x18] sm:$0xff] }
 0x985   :  { %v7919_v17 = vpack.c.bf16 %v5620_v15, %v5619_v39 }
 0x987   :  { %7836 = vmatpush1.bf16.msra.mxu0 %v7835_v44  ;;  %7900 = vmatpush1.bf16.msra.mxu1 %v7899_v40  ;;  %v5639_v44 = vld [vmem:[%s8913_s4 + $0xb0] sm:$0xff]  ;;  %v5640_v40 = vld [vmem:[%s8913_s4 + $0xb8] sm:$0xff] }
 0x988   :  { %7838 = vmatprep.subr.bf16.mxu0 %v7837_v3  ;;  %7902 = vmatprep.subr.bf16.mxu1 %v7901_v24  ;;  %v7925_v41 = vpack.c.bf16 %v5640_v40, %v5639_v44  ;;  %v5624_v3 = vld [vmem:[%s8913_s4 + $0x38] sm:$0xff] }
 0x989   :  { %v7927_v24 = vpack.c.bf16 %v5624_v3, %v5623_v31 }
 0x98b   :  { %7840 = vmatpush1.bf16.msra.mxu0 %v7839_v61  ;;  %7904 = vmatpush1.bf16.msra.mxu1 %v7903_v49  ;;  %v5643_v61 = vld [vmem:[%s8913_s4 + $0xd0] sm:$0xff]  ;;  %v5644_v49 = vld [vmem:[%s8913_s4 + $0xd8] sm:$0xff] }
 0x98c   :  { %7842 = vmatprep.subr.bf16.mxu0 %v7841_v55  ;;  %7906 = vmatprep.subr.bf16.mxu1 %v7905_v58  ;;  %v7933_v54 = vpack.c.bf16 %v5644_v49, %v5643_v61  ;;  %v5628_v55 = vld [vmem:[%s8913_s4 + $0x58] sm:$0xff]  ;;  %v5645_v58 = vld [vmem:[%s8913_s4 + $0xe0] sm:$0xff] }
 0x98d   :  { %v7935_v60 = vpack.c.bf16 %v5628_v55, %v5627_v50  ;;  %v7937_v29 = vpack.c.bf16 %v5646_v59, %v5645_v58 }
 0x98f   :  { %7844 = vmatpush1.bf16.msra.mxu0 %v7843_v12  ;;  %7908 = vmatpush1.bf16.msra.mxu1 %v7907_v52  ;;  %v5648_v12 = vld [vmem:[%s8913_s4 + $0xf8] sm:$0xff]  ;;  %v7939_v52 = vpack.c.bf16 %v5630_v51, %v5629_v4 }
 0x990   :  { %7846 = vmatprep.subr.bf16.mxu0 %v7845_v2  ;;  %7910 = vmatprep.subr.bf16.mxu1 %v7909_v13  ;;  %v7941_v1 = vpack.c.bf16 %v5648_v12, %v5647_v0  ;;  %v5631_v2 = vld [vmem:[%s8913_s4 + $0x70] sm:$0xff]  ;;  %v5632_v13 = vld [vmem:[%s8913_s4 + $0x78] sm:$0xff] }
 0x991   :  { %v7943_v53 = vpack.c.bf16 %v5632_v13, %v5631_v2 }
 0x993   :  { %7848 = vmatpush1.bf16.msra.mxu0 %v7847_v9  ;;  %7912 = vmatpush1.bf16.msra.mxu1 %v7911_v19 }
 0x994   :  { %7914 = vmatprep.subr.bf16.mxu0 %v7913_v28 }
 0x996   :  { %5476 = vmatmul.mubr.f32.vlgmr.msra.gmra.mrb[22].mxu0 %v8789_v38  ;;  %5547 = vmatmul.mubr.f32.vlgmr.msra.gmra.mrb[38].mxu1 %v8789_v38  ;;  %v5635_v38 = vld [vmem:[%s8913_s4 + $0x90] sm:$0xff] }
 0x997   :  { %7916 = vmatpush3.bf16.msra.mxu0 %v7915_v25  ;;  %v7917_v20 = vpack.c.bf16 %v5636_v14, %v5635_v38 }
 0x999   :  { %7918 = vmatprep.subr.bf16.mxu0 %v7917_v20 }
 0x99b   :  { %7920 = vmatpush3.bf16.msra.mxu0 %v7919_v17 }
 0x99c   :  { %7922 = vmatprep.subr.bf16.mxu0 %v7921_v27 }
 0x99f   :  { %7924 = vmatpush3.bf16.msra.mxu0 %v7923_v37 }
 0x9a0   :  { %7926 = vmatprep.subr.bf16.mxu0 %v7925_v41 }
 0x9a3   :  { %7928 = vmatpush3.bf16.msra.mxu0 %v7927_v24 }
 0x9a4   :  { %7930 = vmatprep.subr.bf16.mxu0 %v7929_v45 }
 0x9a7   :  { %7932 = vmatpush3.bf16.msra.mxu0 %v7931_v6 }
 0x9a8   :  { %7934 = vmatprep.subr.bf16.mxu0 %v7933_v54 }
 0x9ab   :  { %7936 = vmatpush3.bf16.msra.mxu0 %v7935_v60 }
 0x9ac   :  { %7938 = vmatprep.subr.bf16.mxu0 %v7937_v29 }
 0x9af   :  { %7940 = vmatpush3.bf16.msra.mxu0 %v7939_v52 }
 0x9b0   :  { %7942 = vmatprep.subr.bf16.mxu0 %v7941_v1 }
 0x9b3   :  { %7944 = vmatpush3.bf16.msra.mxu0 %v7943_v53 }
 0xa29   :  { %v5335_v9 = vpop.f32.mrb[30].mxu0  ;;  %v5406_v19 = vpop.f32.mrb[22].mxu1 }
 0xa2a   :  { %v5553_v63 = vadd.f32 %v5335_v9, %v636_v7  ;;  %v7985_v10 = vadd.f32 %v5406_v19, %v8621_v33  ;;  %v5337_v28 = vpop.f32.mrb[31].mxu0  ;;  %v5408_v30 = vpop.f32.mrb[23].mxu1 }
 0xa2b   :  { %v5554_v11 = vadd.f32 %v5337_v28, %v637_v8  ;;  %v7986_v25 = vadd.f32 %v5408_v30, %v8623_v34 }
 0xa2c   :  { %v5807_v38 = vmul.f32 -1.442695, %v7985_v10 }
 0xa2d   :  { %v5808_v14 = vmul.f32 -1.442695, %v7986_v25 }
 0xa2e   :  { %8303 = vpow2.f32 %v5807_v38 }
 0xa2f   :  { %8305 = vpow2.f32 %v5808_v14 }
 0xa30   :  { %8307 = vtanh.f32 %v5553_v63 }
 0xa31   :  { %8309 = vtanh.f32 %v5554_v11 }
 0xa38   :  { %v8304_v20 = vpop.eup %8303 }
 0xa39   :  { %v8306_v39 = vpop.eup %8305  ;;  %v5569_v56 = vadd.f32 1.0, %v8304_v20 }
 0xa3a   :  { %v5570_v57 = vadd.f32 1.0, %v8306_v39  ;;  %v8308_v42 = vpop.eup %8307 }
 0xa3b   :  { %8311 = vrcp.f32 %v5569_v56  ;;  %v8310_v43 = vpop.eup %8309 }
 0xa3c   :  { %8313 = vrcp.f32 %v5570_v57 }
 0xa45   :  { %v8312_v33 = vpop.eup %8311 }
 0xa46   :  { %v8314_v15 = vpop.eup %8313  ;;  %v5603_v17 = vmul.f32 %v8312_v33, %v8308_v42 }
 0xa47   :  { %v5604_v22 = vmul.f32 %v8314_v15, %v8310_v43 }
 0xa69   :  { %v5477_v32 = vpop.f32.mrb[22].mxu0  ;;  %v5548_v34 = vpop.f32.mrb[38].mxu1 }
 0xa6a   :  { %v8001_v27 = vadd.f32 %v5477_v32, %v8633_v62  ;;  %v5479_v35 = vpop.f32.mrb[23].mxu0  ;;  %v5550_v36 = vpop.f32.mrb[39].mxu1  ;;  %v8017_v41 = vadd.f32 %v5548_v34, %v8639_v16 }
 0xa6b   :  { %v8002_v37 = vadd.f32 %v5479_v35, %v8635_v26  ;;  %v8018_v31 = vadd.f32 %v5550_v36, %v8641_v18 }
 0xa6c   :  { %v5809_v44 = vmul.f32 -1.442695, %v8001_v27  ;;  %v5811_v3 = vmul.f32 -1.442695, %v8017_v41 }
 0xa6d   :  { %v5810_v40 = vmul.f32 -1.442695, %v8002_v37  ;;  %v5812_v24 = vmul.f32 -1.442695, %v8018_v31 }
 0xa6e   :  { %8315 = vpow2.f32 %v5809_v44 }
 0xa6f   :  { %8317 = vpow2.f32 %v5810_v40 }
 0xa70   :  { %8319 = vpow2.f32 %v5811_v3 }
 0xa71   :  { %8321 = vpow2.f32 %v5812_v24 }
 0xa78   :  { %v8316_v46 = vpop.eup %8315 }
 0xa79   :  { %v5581_v5 = vadd.f32 1.0, %v8316_v46  ;;  %v8318_v45 = vpop.eup %8317 }
 0xa7a   :  { %v5582_v62 = vadd.f32 1.0, %v8318_v45  ;;  %v8320_v47 = vpop.eup %8319 }
 0xa7b   :  { %8323 = vrcp.f32 %v5581_v5  ;;  %v8322_v26 = vpop.eup %8321  ;;  %v5593_v6 = vadd.f32 1.0, %v8320_v47 }
 0xa7c   :  { %8325 = vrcp.f32 %v5582_v62  ;;  %v5594_v49 = vadd.f32 1.0, %v8322_v26 }
 0xa7d   :  { %8327 = vrcp.f32 %v5593_v6 }
 0xa85   :  { %v8324_v48 = vpop.eup %8323 }
 0xa86   :  { %v5601_v61 = vmul.f32 %v8324_v48, %v8782_v21  ;;  %v8326_v16 = vpop.eup %8325  ;;  %v5813_v21 = vld [vmem:[%s8914_s5] ss:$0 sm:$0xff] }
 0xa87   :  { %v5602_v18 = vmul.f32 %v8326_v16, %v8785_v23  ;;  %v8328_v55 = vpop.eup %8327 }
 0xa88   :  { %v5605_v50 = vadd.f32 %v5603_v17, %v5601_v61 }
 0xa89   :  { %v5606_v54 = vadd.f32 %v5604_v22, %v5602_v18 }
 0xa8a   :  { %8329 = vtanh.f32 %v5605_v50 }
 0xa8b   :  { %8331 = vrcp.f32 %v5594_v49 }
 0xa8c   :  { %8333 = vtanh.f32 %v5606_v54 }
 0xa94   :  { %v8330_v58 = vpop.eup %8329 }
 0xa95   :  { %v8332_v59 = vpop.eup %8331  ;;  %v5611_v60 = vmul.f32 %v8330_v58, %v8328_v55 }
 0xa96   :  { %v8334_v29 = vpop.eup %8333 }
 0xa97   :  { %v5612_v4 = vmul.f32 %v8334_v29, %v8332_v59 }
 0xa99   :  { %5720 = vmatprep.mubr.f32.mxu0 %v5612_v4 }
 0xa9a   :  { %5721 = vmatmul.mubr.f32.vlgmr.msra.gmra.mrb[32].mxu0 %v5611_v60 }
 0xb6d   :  { %v5846_v51 = vpop.f32.mrb[32].mxu0 }
 0xb6e   :  { %v5847_v0 = vpop.f32.mrb[33].mxu0 }
 0xb6f   :  { %v5848_v23 = vadd.f32 %v5847_v0, %v5846_v51 }
 0xb71   :  { %v5723_v12 = vadd.f32 %v5848_v23, %v5813_v21 }
 0xb73   :  { %5727 = vst.msk [vmem:[%s8915_s6] sm:$0xff] %vm5726_vm1, %v5723_v12 }
 0xb74   :  { %5732 = vsyncpa [#allocation6], 1 }

</bundles_post_ra>
